<compile_context>
chip_gen: v6e
topology: v6e:2x2x1
jax: 0.10.0
libtpu: 0.0.40
codegen_flags: <defaults>
</compile_context>

<pallas_src>
import functools

import jax
import jax.numpy as jnp
from jax.experimental import pallas as pl
from jax.experimental.pallas import tpu as pltpu


K_TAPS = 7            # (1,7) / (7,1) kernel size
PAD = 3               # 'same' padding for the 7-tap convs
PADL = 8              # left margin of the W-pad scratch (keeps the big store aligned)
C_IN = 1152
C_B1C1 = 128          # branch1 conv1 out channels
C_B1C2 = 160          # branch1 conv2 out channels (real)
C_B1C2P = 256         # ... zero-padded to a lane multiple (keeps slices lane-aligned)
C_B1C3 = 192          # branch1 conv3 out channels
C_B2 = 192            # branch2 out channels
C_ENTRY = C_B1C1 + C_B2   # merged entry matmul output channels (320)


# ----------------------------------------------------------------------------
# Fused kernel: one grid step == Nb images (all intermediates stay in VMEM)
# ----------------------------------------------------------------------------
def _two_way_b_kernel(x_ref,
                      w_entry_ref, s_entry_ref, b_entry_ref,
                      w_wconv_ref, s_wconv_ref, b_wconv_ref,
                      w_hconv_ref, s_hconv_ref, b_hconv_ref,
                      w_fin1_ref, w_fin2_ref, s_fin_ref, b_fin_ref,
                      o_ref,
                      padw_ref, padh_ref,
                      *, nb, H, W):
    HW = H * W
    M = nb * HW
    bf16 = jnp.bfloat16
    f32 = jnp.float32

    x2 = x_ref[...].reshape(M, C_IN)                               # (M,1152) bf16

    # ---- merged entry 1x1 convs: branch1-c1 (128 ch) ++ branch2 (192 ch) ----
    t = jnp.dot(x2, w_entry_ref[...], preferred_element_type=f32)
    t = jnp.maximum(t * s_entry_ref[...] + b_entry_ref[...], 0.0)  # (M,320)
    b1 = t[:, :C_B1C1]                                             # (M,128) f32
    br2 = t[:, C_B1C1:].astype(bf16)                               # (M,192) bf16, long-lived

    # ---- branch1 (1,7) conv along W (pad 3): 7 accumulated per-tap matmuls --
    # Zero only the 3-column halos every step (interior is fully overwritten;
    # re-zeroing each step is safe for any parallel/core assignment).
    zw = jnp.zeros((nb, H, PAD, C_B1C1), f32)
    padw_ref[:, :, PADL - PAD:PADL, :] = zw
    padw_ref[:, :, PADL + W:PADL + W + PAD, :] = zw
    padw_ref[:, :, PADL:PADL + W, :] = b1.reshape(nb, H, W, C_B1C1)
    u = None
    for k in range(K_TAPS):                                        # static unroll
        off = PADL - PAD + k
        lhs = padw_ref[:, :, off:off + W, :].reshape(M, C_B1C1).astype(bf16)
        p = jnp.dot(lhs, w_wconv_ref[k], preferred_element_type=f32)
        u = p if u is None else u + p
    u = jnp.maximum(u * s_wconv_ref[...] + b_wconv_ref[...], 0.0)  # (M,256)

    # ---- branch1 (7,1) conv along H (pad 3): 7 accumulated per-tap matmuls --
    # One full bf16 store (zero halo concatenated along the untiled H axis).
    zh = jnp.zeros((nb, PAD, W, C_B1C2P), bf16)
    padh_ref[...] = jnp.concatenate(
        [zh, u.astype(bf16).reshape(nb, H, W, C_B1C2P), zh], axis=1)
    v = None
    for k in range(K_TAPS):                                        # static unroll
        lhs = padh_ref[:, k:k + H, :, :].reshape(M, C_B1C2P)
        p = jnp.dot(lhs, w_hconv_ref[k], preferred_element_type=f32)
        v = p if v is None else v + p
    v = jnp.maximum(v * s_hconv_ref[...] + b_hconv_ref[...], 0.0)  # (M,192)

    # ---- concat folded into split final weights; final 1x1 + BN (no ReLU) ---
    acc = jnp.dot(v.astype(bf16), w_fin1_ref[...], preferred_element_type=f32)
    acc = acc + jnp.dot(br2, w_fin2_ref[...], preferred_element_type=f32)
    y = acc * s_fin_ref[...] + b_fin_ref[...]                      # (M,1152)
    o_ref[...] = y.reshape(nb, HW, C_IN).astype(o_ref.dtype)


# ----------------------------------------------------------------------------
# VMEM budgeting and batch-tile selection
# ----------------------------------------------------------------------------
def _round_up(x, m):
    return (x + m - 1) // m * m


def _vmem_estimate_bytes(nb, H, W):
    """Rough per-core VMEM footprint (bytes) for a batch tile of nb images."""
    HW = H * W
    # Constant weights / BN vectors.  The pipeline allocates two buffers even
    # though the constant index_map only fetches them once; they are budgeted
    # at 2x here.
    # TODO(synk): single-buffer them via pipeline_mode=pl.Buffered(1) to
    # reclaim ~2.8 MB once that path is exercised on this toolchain.
    w_bytes = (C_IN * C_ENTRY + K_TAPS * C_B1C1 * C_B1C2P
               + K_TAPS * C_B1C2P * C_B1C3 + (C_B1C3 + C_B2) * C_IN) * 2
    sb_bytes = 2 * (C_ENTRY + C_B1C2P + C_B1C3 + C_IN) * 4
    const_bytes = 2 * (w_bytes + sb_bytes)
    # Double-buffered activation I/O blocks (bf16 in, f32 out).
    io_bytes = 2 * nb * HW * C_IN * (2 + 4)
    # Persistent pad scratch (last two dims tile-rounded); padw f32, padh bf16.
    scratch = (nb * H * _round_up(PADL + W + PAD, 8) * C_B1C1 * 4
               + nb * (H + 2 * PAD) * _round_up(W, 8) * C_B1C2P * 2)
    # Live f32 temporaries (entry out, u, v, acc) + bf16 br2.
    temps = nb * HW * (C_ENTRY + C_B1C2P + C_B1C3 + C_IN) * 4 + nb * HW * C_B2 * 2
    return const_bytes + io_bytes + scratch + temps


def _pick_batch_tile(N, H, W, budget_bytes):
    """Images per grid step: fill >=256 MXU rows, stay inside the VMEM budget,
    and keep >=2 grid steps (megacore) when the batch allows it."""
    HW = H * W
    nb = 1
    for cand in range(2, N + 1):
        if N % cand:
            continue
        if N >= 4 and cand > N // 2:
            break
        if _vmem_estimate_bytes(cand, H, W) > budget_bytes:
            break
        if nb * HW >= 256:
            break
        nb = cand
    return nb


# ----------------------------------------------------------------------------
# Public wrapper: NCHW in / NCHW out
# ----------------------------------------------------------------------------
def two_way_b_block(x_nchw, fused, *, out_dtype=jnp.float32):
    N, C, H, W = x_nchw.shape
    assert C == C_IN
    HW = H * W

    # TODO(synk): in a full channels-last network these two transposes (a full
    # HBM read+write of the activations each) should be dropped entirely.
    x = jnp.transpose(x_nchw, (0, 2, 3, 1)).reshape(N, HW, C).astype(jnp.bfloat16)

    nb = _pick_batch_tile(N, H, W, budget_bytes=30 << 20)
    est = _vmem_estimate_bytes(nb, H, W)
    vmem_limit = int(min(max(est + (8 << 20), 32 << 20), 56 << 20))

    kernel = functools.partial(_two_way_b_kernel, nb=nb, H=H, W=W)
    c2 = lambda b: (0, 0)      # noqa: E731  grid-invariant params
    c3 = lambda b: (0, 0, 0)   # noqa: E731

    out = pl.pallas_call(
        kernel,
        out_shape=jax.ShapeDtypeStruct((N, HW, C_IN), out_dtype),
        grid_spec=pltpu.PrefetchScalarGridSpec(
            num_scalar_prefetch=0,
            grid=(N // nb,),
            in_specs=[
                pl.BlockSpec((nb, HW, C_IN), lambda b: (b, 0, 0)),
                pl.BlockSpec((C_IN, C_ENTRY), c2),
                pl.BlockSpec((1, C_ENTRY), c2),
                pl.BlockSpec((1, C_ENTRY), c2),
                pl.BlockSpec((K_TAPS, C_B1C1, C_B1C2P), c3),
                pl.BlockSpec((1, C_B1C2P), c2),
                pl.BlockSpec((1, C_B1C2P), c2),
                pl.BlockSpec((K_TAPS, C_B1C2P, C_B1C3), c3),
                pl.BlockSpec((1, C_B1C3), c2),
                pl.BlockSpec((1, C_B1C3), c2),
                pl.BlockSpec((C_B1C3, C_IN), c2),
                pl.BlockSpec((C_B2, C_IN), c2),
                pl.BlockSpec((1, C_IN), c2),
                pl.BlockSpec((1, C_IN), c2),
            ],
            out_specs=pl.BlockSpec((nb, HW, C_IN), lambda b: (b, 0, 0)),
            scratch_shapes=[
                pltpu.VMEM((nb, H, PADL + W + PAD, C_B1C1), jnp.float32),   # W-pad
                pltpu.VMEM((nb, H + 2 * PAD, W, C_B1C2P), jnp.bfloat16),    # H-pad
            ],
        ),
        compiler_params=pltpu.CompilerParams(
            dimension_semantics=("parallel",),
            vmem_limit_bytes=vmem_limit,
        ),
    )(x,
      fused["w_entry"], fused["s_entry"], fused["b_entry"],
      fused["w_wconv"], fused["s_wconv"], fused["b_wconv"],
      fused["w_hconv"], fused["s_hconv"], fused["b_hconv"],
      fused["w_fin1"], fused["w_fin2"], fused["s_fin"], fused["b_fin"])

    return jnp.transpose(out.reshape(N, H, W, C_IN), (0, 3, 1, 2))


# ----------------------------------------------------------------------------
# Parameter construction (deterministic, synthetic — folded conv+BN params)
# ----------------------------------------------------------------------------
def _make_conv_bn(key, cin, cout, k=None, eps=1e-5):
    k1, k2, k3, k4, k5 = jax.random.split(key, 5)
    if k is None:
        w = 0.02 * jax.random.normal(k1, (cin, cout), jnp.float32)
    else:
        w = 0.02 * jax.random.normal(k1, (k, cin, cout), jnp.float32)
    gamma = 1.0 + 0.1 * jax.random.normal(k2, (cout,), jnp.float32)
    beta = 0.1 * jax.random.normal(k3, (cout,), jnp.float32)
    mean = 0.1 * jax.random.normal(k4, (cout,), jnp.float32)
    var = jnp.abs(jax.random.normal(k5, (cout,), jnp.float32)) + 0.5
    scale = gamma / jnp.sqrt(var + eps)
    bias = beta - mean * scale
    return w, scale.reshape(1, cout), bias.reshape(1, cout)


def init_two_way_b_params(key):
    ks = jax.random.split(key, 5)
    return {
        # branch1: 1152 -1x1-> 128 -(1,7)-> 160 -(7,1)-> 192   (conv+BN+ReLU)
        "b1c1": _make_conv_bn(ks[0], C_IN, C_B1C1),
        "b1c2": _make_conv_bn(ks[1], C_B1C1, C_B1C2, k=K_TAPS),
        "b1c3": _make_conv_bn(ks[2], C_B1C2, C_B1C3, k=K_TAPS),
        # branch2: 1152 -1x1-> 192                              (conv+BN+ReLU)
        "b2": _make_conv_bn(ks[3], C_IN, C_B2),
        # fuse conv: 384 -1x1-> 1152                            (conv+BN, no act)
        "final": _make_conv_bn(ks[4], C_B1C3 + C_B2, C_IN),
    }


def pack_params(raw):
    """Fold / pad / merge the per-layer params into the fused-kernel layout."""
    w11, s11, b11 = raw["b1c1"]          # (1152,128), (1,128), (1,128)
    w17, s17, b17 = raw["b1c2"]          # (7,128,160), (1,160), (1,160)
    w71, s71, b71 = raw["b1c3"]          # (7,160,192), (1,192), (1,192)
    w2b, s2b, b2b = raw["b2"]            # (1152,192), (1,192), (1,192)
    wfn, sfn, bfn = raw["final"]         # (384,1152), (1,1152), (1,1152)

    # merged entry matmul: branch1-c1 ++ branch2
    w_entry = jnp.concatenate([w11, w2b], axis=1)              # (1152, 320)
    s_entry = jnp.concatenate([s11, s2b], axis=1)
    b_entry = jnp.concatenate([b11, b2b], axis=1)

    # (1,7) conv: per-tap (128,256) weights; zero-padded out channels stay 0
    # because their scale/bias are padded with zeros (ReLU keeps them 0).
    cpad = C_B1C2P - C_B1C2
    w_wconv = jnp.pad(w17, ((0, 0), (0, 0), (0, cpad)))        # (7, 128, 256)
    s_wconv = jnp.pad(s17, ((0, 0), (0, cpad)))
    b_wconv = jnp.pad(b17, ((0, 0), (0, cpad)))

    # (7,1) conv: per-tap (256,192) weights; zero rows for the padded inputs.
    w_hconv = jnp.pad(w71, ((0, 0), (0, cpad), (0, 0)))        # (7, 256, 192)

    # final conv: split for the folded concat (branch1 first, then branch2)
    w_fin1 = wfn[:C_B1C3]                                      # (192, 1152)
    w_fin2 = wfn[C_B1C3:]                                      # (192, 1152)

    bf16 = jnp.bfloat16
    return {
        "w_entry": w_entry.astype(bf16), "s_entry": s_entry, "b_entry": b_entry,
        "w_wconv": w_wconv.astype(bf16), "s_wconv": s_wconv, "b_wconv": b_wconv,
        "w_hconv": w_hconv.astype(bf16), "s_hconv": s71, "b_hconv": b71,
        "w_fin1": w_fin1.astype(bf16), "w_fin2": w_fin2.astype(bf16),
        "s_fin": sfn, "b_fin": bfn,
    }


# ----------------------------------------------------------------------------
# Pure-XLA f32 reference of the original module graph (for a sanity check)
# ----------------------------------------------------------------------------
def _reference(x_nchw, raw):
    x = jnp.transpose(x_nchw, (0, 2, 3, 1)).astype(jnp.float32)   # NHWC
    dn = ("NHWC", "HWIO", "NHWC")

    def conv1x1(h, w):
        return jnp.einsum("nhwc,cd->nhwd", h, w)

    def conv1d(h, w, axis):
        if axis == "w":
            kern = w[jnp.newaxis]                 # (1,7,cin,cout)
            pad = [(0, 0), (PAD, PAD)]
        else:
            kern = w[:, jnp.newaxis]              # (7,1,cin,cout)
            pad = [(PAD, PAD), (0, 0)]
        return jax.lax.conv_general_dilated(h, kern, (1, 1), pad,
                                            dimension_numbers=dn)

    def bn(h, s, b, relu=True):
        y = h * s.reshape(1, 1, 1, -1) + b.reshape(1, 1, 1, -1)
        return jnp.maximum(y, 0.0) if relu else y

    w11, s11, b11 = raw["b1c1"]
    w17, s17, b17 = raw["b1c2"]
    w71, s71, b71 = raw["b1c3"]
    w2b, s2b, b2b = raw["b2"]
    wfn, sfn, bfn = raw["final"]

    t1 = bn(conv1x1(x, w11), s11, b11)
    t1 = bn(conv1d(t1, w17, "w"), s17, b17)
    t1 = bn(conv1d(t1, w71, "h"), s71, b71)
    t2 = bn(conv1x1(x, w2b), s2b, b2b)
    cat = jnp.concatenate([t1, t2], axis=-1)
    y = bn(conv1x1(cat, wfn), sfn, bfn, relu=False)
    return jnp.transpose(y, (0, 3, 1, 2))


if __name__ == "__main__":
    key = jax.random.PRNGKey(0)
    k_x, k_p = jax.random.split(key)

    # channels (1152) are fixed by the module; keep spatial / batch small.
    N, C, H, W = 2, 1152, 8, 8
    x = jax.random.normal(k_x, (N, C, H, W), jnp.float32)
    raw = init_two_way_b_params(k_p)
    fused = pack_params(raw)

    out = jax.jit(two_way_b_block)(x, fused)
    out = jax.block_until_ready(out)
    assert out.shape == (N, C_IN, H, W), out.shape
    assert bool(jnp.all(jnp.isfinite(out)))

    # loose-tolerance check against an f32 XLA reference (kernel uses bf16 MXU)
    ref = jax.block_until_ready(jax.jit(_reference)(x, raw))
    max_ref = float(jnp.max(jnp.abs(ref)))
    err = float(jnp.max(jnp.abs(out.astype(jnp.float32) - ref)))
    assert err <= 5e-2 * max(1.0, max_ref), (err, max_ref)

    print("KERNEL_OK")
</pallas_src>

<mosaic_0001>
module attributes {stable_mosaic.version = 11 : i64} {
  func.func @_two_way_b_kernel(%arg0: i32, %arg1: memref<2x64x1152xbf16, #tpu.memory_space<vmem>>, %arg2: memref<1152x320xbf16, #tpu.memory_space<vmem>>, %arg3: memref<1x320xf32, #tpu.memory_space<vmem>>, %arg4: memref<1x320xf32, #tpu.memory_space<vmem>>, %arg5: memref<7x128x256xbf16, #tpu.memory_space<vmem>>, %arg6: memref<1x256xf32, #tpu.memory_space<vmem>>, %arg7: memref<1x256xf32, #tpu.memory_space<vmem>>, %arg8: memref<7x256x192xbf16, #tpu.memory_space<vmem>>, %arg9: memref<1x192xf32, #tpu.memory_space<vmem>>, %arg10: memref<1x192xf32, #tpu.memory_space<vmem>>, %arg11: memref<192x1152xbf16, #tpu.memory_space<vmem>>, %arg12: memref<192x1152xbf16, #tpu.memory_space<vmem>>, %arg13: memref<1x1152xf32, #tpu.memory_space<vmem>>, %arg14: memref<1x1152xf32, #tpu.memory_space<vmem>>, %arg15: memref<2x64x1152xf32, #tpu.memory_space<vmem>>, %arg16: memref<2x8x19x128xf32, #tpu.memory_space<vmem>>, %arg17: memref<2x14x8x256xbf16, #tpu.memory_space<vmem>>) attributes {dimension_semantics = [#tpu.dimension_semantics<parallel>], iteration_bounds = array<i64: 1>, scalar_prefetch = 0 : i64, scratch_operands = 2 : i64, tpu.core_type = #tpu.core_type<tc>, window_params = [{transform_indices = @transform_0, window_bounds = array<i64: 2, 64, 1152>}, {pipeline_mode = #tpu.pipeline_mode<synchronous>, transform_indices = @transform_1, window_bounds = array<i64: 1152, 320>}, {pipeline_mode = #tpu.pipeline_mode<synchronous>, transform_indices = @transform_2, window_bounds = array<i64: 1, 320>}, {pipeline_mode = #tpu.pipeline_mode<synchronous>, transform_indices = @transform_3, window_bounds = array<i64: 1, 320>}, {pipeline_mode = #tpu.pipeline_mode<synchronous>, transform_indices = @transform_4, window_bounds = array<i64: 7, 128, 256>}, {pipeline_mode = #tpu.pipeline_mode<synchronous>, transform_indices = @transform_5, window_bounds = array<i64: 1, 256>}, {pipeline_mode = #tpu.pipeline_mode<synchronous>, transform_indices = @transform_6, window_bounds = array<i64: 1, 256>}, {pipeline_mode = #tpu.pipeline_mode<synchronous>, transform_indices = @transform_7, window_bounds = array<i64: 7, 256, 192>}, {pipeline_mode = #tpu.pipeline_mode<synchronous>, transform_indices = @transform_8, window_bounds = array<i64: 1, 192>}, {pipeline_mode = #tpu.pipeline_mode<synchronous>, transform_indices = @transform_9, window_bounds = array<i64: 1, 192>}, {pipeline_mode = #tpu.pipeline_mode<synchronous>, transform_indices = @transform_10, window_bounds = array<i64: 192, 1152>}, {pipeline_mode = #tpu.pipeline_mode<synchronous>, transform_indices = @transform_11, window_bounds = array<i64: 192, 1152>}, {pipeline_mode = #tpu.pipeline_mode<synchronous>, transform_indices = @transform_12, window_bounds = array<i64: 1, 1152>}, {pipeline_mode = #tpu.pipeline_mode<synchronous>, transform_indices = @transform_13, window_bounds = array<i64: 1, 1152>}, {transform_indices = @transform_14, window_bounds = array<i64: 2, 64, 1152>}]} {
    %c0 = arith.constant 0 : index
    %c0_0 = arith.constant 0 : index
    %c0_1 = arith.constant 0 : index
    %0 = vector.load %arg1[%c0, %c0_0, %c0_1] : memref<2x64x1152xbf16, #tpu.memory_space<vmem>>, vector<2x64x1152xbf16>
    %1 = vector.shape_cast %0 : vector<2x64x1152xbf16> to vector<128x1152xbf16>
    %c0_2 = arith.constant 0 : index
    %c0_3 = arith.constant 0 : index
    %2 = vector.load %arg2[%c0_2, %c0_3] : memref<1152x320xbf16, #tpu.memory_space<vmem>>, vector<1152x320xbf16>
    %cst = arith.constant dense<0.000000e+00> : vector<128x320xf32>
    %3 = tpu.matmul %1, %2, %cst {dimension_numbers = #tpu.dot_dimension_numbers<[1], [0], [0], [1], [0, 0, 1, 1], [], []>} : vector<128x1152xbf16>, vector<1152x320xbf16>, vector<128x320xf32> -> vector<128x320xf32>
    %c0_4 = arith.constant 0 : index
    %c0_5 = arith.constant 0 : index
    %4 = vector.load %arg3[%c0_4, %c0_5] : memref<1x320xf32, #tpu.memory_space<vmem>>, vector<1x320xf32>
    %5 = vector.broadcast %4 : vector<1x320xf32> to vector<128x320xf32>
    %6 = arith.mulf %3, %5 : vector<128x320xf32>
    %c0_6 = arith.constant 0 : index
    %c0_7 = arith.constant 0 : index
    %7 = vector.load %arg4[%c0_6, %c0_7] : memref<1x320xf32, #tpu.memory_space<vmem>>, vector<1x320xf32>
    %8 = vector.broadcast %7 : vector<1x320xf32> to vector<128x320xf32>
    %9 = arith.addf %6, %8 : vector<128x320xf32>
    %cst_8 = arith.constant 0.000000e+00 : f32
    %10 = vector.broadcast %cst_8 : f32 to vector<128x320xf32>
    %11 = arith.maximumf %9, %10 : vector<128x320xf32>
    %12 = vector.extract_strided_slice %11 {offsets = [0, 0], sizes = [128, 128], strides = [1, 1]} : vector<128x320xf32> to vector<128x128xf32>
    %13 = vector.extract_strided_slice %11 {offsets = [0, 128], sizes = [128, 192], strides = [1, 1]} : vector<128x320xf32> to vector<128x192xf32>
    %14 = arith.truncf %13 : vector<128x192xf32> to vector<128x192xbf16>
    %cst_9 = arith.constant 0.000000e+00 : f32
    %15 = vector.broadcast %cst_9 : f32 to vector<2x8x3x128xf32>
    %c0_10 = arith.constant 0 : index
    %c0_11 = arith.constant 0 : index
    %c5 = arith.constant 5 : index
    %c0_12 = arith.constant 0 : index
    %16 = vector.load %arg16[%c0_10, %c0_11, %c5, %c0_12] : memref<2x8x19x128xf32, #tpu.memory_space<vmem>>, vector<2x8x3x128xf32>
    tpu.vector_store %arg16[%c0_10, %c0_11, %c5, %c0_12], %15 {strides = array<i32>} : memref<2x8x19x128xf32, #tpu.memory_space<vmem>>, vector<2x8x3x128xf32>,
    %c0_13 = arith.constant 0 : index
    %c0_14 = arith.constant 0 : index
    %c16 = arith.constant 16 : index
    %c0_15 = arith.constant 0 : index
    %17 = vector.load %arg16[%c0_13, %c0_14, %c16, %c0_15] : memref<2x8x19x128xf32, #tpu.memory_space<vmem>>, vector<2x8x3x128xf32>
    tpu.vector_store %arg16[%c0_13, %c0_14, %c16, %c0_15], %15 {strides = array<i32>} : memref<2x8x19x128xf32, #tpu.memory_space<vmem>>, vector<2x8x3x128xf32>,
    %18 = vector.shape_cast %12 : vector<128x128xf32> to vector<2x8x8x128xf32>
    %c0_16 = arith.constant 0 : index
    %c0_17 = arith.constant 0 : index
    %c8 = arith.constant 8 : index
    %c0_18 = arith.constant 0 : index
    %19 = vector.load %arg16[%c0_16, %c0_17, %c8, %c0_18] : memref<2x8x19x128xf32, #tpu.memory_space<vmem>>, vector<2x8x8x128xf32>
    tpu.vector_store %arg16[%c0_16, %c0_17, %c8, %c0_18], %18 {strides = array<i32>} : memref<2x8x19x128xf32, #tpu.memory_space<vmem>>, vector<2x8x8x128xf32>,
    %c0_19 = arith.constant 0 : index
    %c0_20 = arith.constant 0 : index
    %c5_21 = arith.constant 5 : index
    %c0_22 = arith.constant 0 : index
    %20 = vector.load %arg16[%c0_19, %c0_20, %c5_21, %c0_22] : memref<2x8x19x128xf32, #tpu.memory_space<vmem>>, vector<2x8x8x128xf32>
    %21 = vector.shape_cast %20 : vector<2x8x8x128xf32> to vector<128x128xf32>
    %22 = arith.truncf %21 : vector<128x128xf32> to vector<128x128xbf16>
    %c0_23 = arith.constant 0 : index
    %c0_24 = arith.constant 0 : index
    %c0_25 = arith.constant 0 : index
    %23 = vector.load %arg5[%c0_23, %c0_24, %c0_25] : memref<7x128x256xbf16, #tpu.memory_space<vmem>>, vector<1x128x256xbf16>
    %24 = vector.shape_cast %23 : vector<1x128x256xbf16> to vector<128x256xbf16>
    %cst_26 = arith.constant dense<0.000000e+00> : vector<128x256xf32>
    %25 = tpu.matmul %22, %24, %cst_26 {dimension_numbers = #tpu.dot_dimension_numbers<[1], [0], [0], [1], [0, 0, 1, 1], [], []>} : vector<128x128xbf16>, vector<128x256xbf16>, vector<128x256xf32> -> vector<128x256xf32>
    %c0_27 = arith.constant 0 : index
    %c0_28 = arith.constant 0 : index
    %c6 = arith.constant 6 : index
    %c0_29 = arith.constant 0 : index
    %26 = vector.load %arg16[%c0_27, %c0_28, %c6, %c0_29] : memref<2x8x19x128xf32, #tpu.memory_space<vmem>>, vector<2x8x8x128xf32>
    %27 = vector.shape_cast %26 : vector<2x8x8x128xf32> to vector<128x128xf32>
    %28 = arith.truncf %27 : vector<128x128xf32> to vector<128x128xbf16>
    %c1 = arith.constant 1 : index
    %c0_30 = arith.constant 0 : index
    %c0_31 = arith.constant 0 : index
    %29 = vector.load %arg5[%c1, %c0_30, %c0_31] : memref<7x128x256xbf16, #tpu.memory_space<vmem>>, vector<1x128x256xbf16>
    %30 = vector.shape_cast %29 : vector<1x128x256xbf16> to vector<128x256xbf16>
    %cst_32 = arith.constant dense<0.000000e+00> : vector<128x256xf32>
    %31 = tpu.matmul %28, %30, %cst_32 {dimension_numbers = #tpu.dot_dimension_numbers<[1], [0], [0], [1], [0, 0, 1, 1], [], []>} : vector<128x128xbf16>, vector<128x256xbf16>, vector<128x256xf32> -> vector<128x256xf32>
    %32 = arith.addf %25, %31 : vector<128x256xf32>
    %c0_33 = arith.constant 0 : index
    %c0_34 = arith.constant 0 : index
    %c7 = arith.constant 7 : index
    %c0_35 = arith.constant 0 : index
    %33 = vector.load %arg16[%c0_33, %c0_34, %c7, %c0_35] : memref<2x8x19x128xf32, #tpu.memory_space<vmem>>, vector<2x8x8x128xf32>
    %34 = vector.shape_cast %33 : vector<2x8x8x128xf32> to vector<128x128xf32>
    %35 = arith.truncf %34 : vector<128x128xf32> to vector<128x128xbf16>
    %c2 = arith.constant 2 : index
    %c0_36 = arith.constant 0 : index
    %c0_37 = arith.constant 0 : index
    %36 = vector.load %arg5[%c2, %c0_36, %c0_37] : memref<7x128x256xbf16, #tpu.memory_space<vmem>>, vector<1x128x256xbf16>
    %37 = vector.shape_cast %36 : vector<1x128x256xbf16> to vector<128x256xbf16>
    %cst_38 = arith.constant dense<0.000000e+00> : vector<128x256xf32>
    %38 = tpu.matmul %35, %37, %cst_38 {dimension_numbers = #tpu.dot_dimension_numbers<[1], [0], [0], [1], [0, 0, 1, 1], [], []>} : vector<128x128xbf16>, vector<128x256xbf16>, vector<128x256xf32> -> vector<128x256xf32>
    %39 = arith.addf %32, %38 : vector<128x256xf32>
    %c0_39 = arith.constant 0 : index
    %c0_40 = arith.constant 0 : index
    %c8_41 = arith.constant 8 : index
    %c0_42 = arith.constant 0 : index
    %40 = vector.load %arg16[%c0_39, %c0_40, %c8_41, %c0_42] : memref<2x8x19x128xf32, #tpu.memory_space<vmem>>, vector<2x8x8x128xf32>
    %41 = vector.shape_cast %40 : vector<2x8x8x128xf32> to vector<128x128xf32>
    %42 = arith.truncf %41 : vector<128x128xf32> to vector<128x128xbf16>
    %c3 = arith.constant 3 : index
    %c0_43 = arith.constant 0 : index
    %c0_44 = arith.constant 0 : index
    %43 = vector.load %arg5[%c3, %c0_43, %c0_44] : memref<7x128x256xbf16, #tpu.memory_space<vmem>>, vector<1x128x256xbf16>
    %44 = vector.shape_cast %43 : vector<1x128x256xbf16> to vector<128x256xbf16>
    %cst_45 = arith.constant dense<0.000000e+00> : vector<128x256xf32>
    %45 = tpu.matmul %42, %44, %cst_45 {dimension_numbers = #tpu.dot_dimension_numbers<[1], [0], [0], [1], [0, 0, 1, 1], [], []>} : vector<128x128xbf16>, vector<128x256xbf16>, vector<128x256xf32> -> vector<128x256xf32>
    %46 = arith.addf %39, %45 : vector<128x256xf32>
    %c0_46 = arith.constant 0 : index
    %c0_47 = arith.constant 0 : index
    %c9 = arith.constant 9 : index
    %c0_48 = arith.constant 0 : index
    %47 = vector.load %arg16[%c0_46, %c0_47, %c9, %c0_48] : memref<2x8x19x128xf32, #tpu.memory_space<vmem>>, vector<2x8x8x128xf32>
    %48 = vector.shape_cast %47 : vector<2x8x8x128xf32> to vector<128x128xf32>
    %49 = arith.truncf %48 : vector<128x128xf32> to vector<128x128xbf16>
    %c4 = arith.constant 4 : index
    %c0_49 = arith.constant 0 : index
    %c0_50 = arith.constant 0 : index
    %50 = vector.load %arg5[%c4, %c0_49, %c0_50] : memref<7x128x256xbf16, #tpu.memory_space<vmem>>, vector<1x128x256xbf16>
    %51 = vector.shape_cast %50 : vector<1x128x256xbf16> to vector<128x256xbf16>
    %cst_51 = arith.constant dense<0.000000e+00> : vector<128x256xf32>
    %52 = tpu.matmul %49, %51, %cst_51 {dimension_numbers = #tpu.dot_dimension_numbers<[1], [0], [0], [1], [0, 0, 1, 1], [], []>} : vector<128x128xbf16>, vector<128x256xbf16>, vector<128x256xf32> -> vector<128x256xf32>
    %53 = arith.addf %46, %52 : vector<128x256xf32>
    %c0_52 = arith.constant 0 : index
    %c0_53 = arith.constant 0 : index
    %c10 = arith.constant 10 : index
    %c0_54 = arith.constant 0 : index
    %54 = vector.load %arg16[%c0_52, %c0_53, %c10, %c0_54] : memref<2x8x19x128xf32, #tpu.memory_space<vmem>>, vector<2x8x8x128xf32>
    %55 = vector.shape_cast %54 : vector<2x8x8x128xf32> to vector<128x128xf32>
    %56 = arith.truncf %55 : vector<128x128xf32> to vector<128x128xbf16>
    %c5_55 = arith.constant 5 : index
    %c0_56 = arith.constant 0 : index
    %c0_57 = arith.constant 0 : index
    %57 = vector.load %arg5[%c5_55, %c0_56, %c0_57] : memref<7x128x256xbf16, #tpu.memory_space<vmem>>, vector<1x128x256xbf16>
    %58 = vector.shape_cast %57 : vector<1x128x256xbf16> to vector<128x256xbf16>
    %cst_58 = arith.constant dense<0.000000e+00> : vector<128x256xf32>
    %59 = tpu.matmul %56, %58, %cst_58 {dimension_numbers = #tpu.dot_dimension_numbers<[1], [0], [0], [1], [0, 0, 1, 1], [], []>} : vector<128x128xbf16>, vector<128x256xbf16>, vector<128x256xf32> -> vector<128x256xf32>
    %60 = arith.addf %53, %59 : vector<128x256xf32>
    %c0_59 = arith.constant 0 : index
    %c0_60 = arith.constant 0 : index
    %c11 = arith.constant 11 : index
    %c0_61 = arith.constant 0 : index
    %61 = vector.load %arg16[%c0_59, %c0_60, %c11, %c0_61] : memref<2x8x19x128xf32, #tpu.memory_space<vmem>>, vector<2x8x8x128xf32>
    %62 = vector.shape_cast %61 : vector<2x8x8x128xf32> to vector<128x128xf32>
    %63 = arith.truncf %62 : vector<128x128xf32> to vector<128x128xbf16>
    %c6_62 = arith.constant 6 : index
    %c0_63 = arith.constant 0 : index
    %c0_64 = arith.constant 0 : index
    %64 = vector.load %arg5[%c6_62, %c0_63, %c0_64] : memref<7x128x256xbf16, #tpu.memory_space<vmem>>, vector<1x128x256xbf16>
    %65 = vector.shape_cast %64 : vector<1x128x256xbf16> to vector<128x256xbf16>
    %cst_65 = arith.constant dense<0.000000e+00> : vector<128x256xf32>
    %66 = tpu.matmul %63, %65, %cst_65 {dimension_numbers = #tpu.dot_dimension_numbers<[1], [0], [0], [1], [0, 0, 1, 1], [], []>} : vector<128x128xbf16>, vector<128x256xbf16>, vector<128x256xf32> -> vector<128x256xf32>
    %67 = arith.addf %60, %66 : vector<128x256xf32>
    %c0_66 = arith.constant 0 : index
    %c0_67 = arith.constant 0 : index
    %68 = vector.load %arg6[%c0_66, %c0_67] : memref<1x256xf32, #tpu.memory_space<vmem>>, vector<1x256xf32>
    %69 = vector.broadcast %68 : vector<1x256xf32> to vector<128x256xf32>
    %70 = arith.mulf %67, %69 : vector<128x256xf32>
    %c0_68 = arith.constant 0 : index
    %c0_69 = arith.constant 0 : index
    %71 = vector.load %arg7[%c0_68, %c0_69] : memref<1x256xf32, #tpu.memory_space<vmem>>, vector<1x256xf32>
    %72 = vector.broadcast %71 : vector<1x256xf32> to vector<128x256xf32>
    %73 = arith.addf %70, %72 : vector<128x256xf32>
    %cst_70 = arith.constant 0.000000e+00 : f32
    %74 = vector.broadcast %cst_70 : f32 to vector<128x256xf32>
    %75 = arith.maximumf %73, %74 : vector<128x256xf32>
    %cst_71 = arith.constant 0.000000e+00 : bf16
    %76 = vector.broadcast %cst_71 : bf16 to vector<2x3x8x256xbf16>
    %77 = arith.truncf %75 : vector<128x256xf32> to vector<128x256xbf16>
    %78 = vector.shape_cast %77 : vector<128x256xbf16> to vector<2x8x8x256xbf16>
    %79 = tpu.concatenate %76, %78, %76 in 1 : vector<2x3x8x256xbf16>, vector<2x8x8x256xbf16>, vector<2x3x8x256xbf16> -> vector<2x14x8x256xbf16>
    %c0_72 = arith.constant 0 : index
    %c0_73 = arith.constant 0 : index
    %c0_74 = arith.constant 0 : index
    %c0_75 = arith.constant 0 : index
    %80 = vector.load %arg17[%c0_72, %c0_73, %c0_74, %c0_75] : memref<2x14x8x256xbf16, #tpu.memory_space<vmem>>, vector<2x14x8x256xbf16>
    tpu.vector_store %arg17[%c0_72, %c0_73, %c0_74, %c0_75], %79 {strides = array<i32>} : memref<2x14x8x256xbf16, #tpu.memory_space<vmem>>, vector<2x14x8x256xbf16>,
    %c0_76 = arith.constant 0 : index
    %c0_77 = arith.constant 0 : index
    %c0_78 = arith.constant 0 : index
    %c0_79 = arith.constant 0 : index
    %81 = vector.load %arg17[%c0_76, %c0_77, %c0_78, %c0_79] : memref<2x14x8x256xbf16, #tpu.memory_space<vmem>>, vector<2x8x8x256xbf16>
    %82 = vector.shape_cast %81 : vector<2x8x8x256xbf16> to vector<128x256xbf16>
    %c0_80 = arith.constant 0 : index
    %c0_81 = arith.constant 0 : index
    %c0_82 = arith.constant 0 : index
    %83 = vector.load %arg8[%c0_80, %c0_81, %c0_82] : memref<7x256x192xbf16, #tpu.memory_space<vmem>>, vector<1x256x192xbf16>
    %84 = vector.shape_cast %83 : vector<1x256x192xbf16> to vector<256x192xbf16>
    %cst_83 = arith.constant dense<0.000000e+00> : vector<128x192xf32>
    %85 = tpu.matmul %82, %84, %cst_83 {dimension_numbers = #tpu.dot_dimension_numbers<[1], [0], [0], [1], [0, 0, 1, 1], [], []>} : vector<128x256xbf16>, vector<256x192xbf16>, vector<128x192xf32> -> vector<128x192xf32>
    %c0_84 = arith.constant 0 : index
    %c1_85 = arith.constant 1 : index
    %c0_86 = arith.constant 0 : index
    %c0_87 = arith.constant 0 : index
    %86 = vector.load %arg17[%c0_84, %c1_85, %c0_86, %c0_87] : memref<2x14x8x256xbf16, #tpu.memory_space<vmem>>, vector<2x8x8x256xbf16>
    %87 = vector.shape_cast %86 : vector<2x8x8x256xbf16> to vector<128x256xbf16>
    %c1_88 = arith.constant 1 : index
    %c0_89 = arith.constant 0 : index
    %c0_90 = arith.constant 0 : index
    %88 = vector.load %arg8[%c1_88, %c0_89, %c0_90] : memref<7x256x192xbf16, #tpu.memory_space<vmem>>, vector<1x256x192xbf16>
    %89 = vector.shape_cast %88 : vector<1x256x192xbf16> to vector<256x192xbf16>
    %cst_91 = arith.constant dense<0.000000e+00> : vector<128x192xf32>
    %90 = tpu.matmul %87, %89, %cst_91 {dimension_numbers = #tpu.dot_dimension_numbers<[1], [0], [0], [1], [0, 0, 1, 1], [], []>} : vector<128x256xbf16>, vector<256x192xbf16>, vector<128x192xf32> -> vector<128x192xf32>
    %91 = arith.addf %85, %90 : vector<128x192xf32>
    %c0_92 = arith.constant 0 : index
    %c2_93 = arith.constant 2 : index
    %c0_94 = arith.constant 0 : index
    %c0_95 = arith.constant 0 : index
    %92 = vector.load %arg17[%c0_92, %c2_93, %c0_94, %c0_95] : memref<2x14x8x256xbf16, #tpu.memory_space<vmem>>, vector<2x8x8x256xbf16>
    %93 = vector.shape_cast %92 : vector<2x8x8x256xbf16> to vector<128x256xbf16>
    %c2_96 = arith.constant 2 : index
    %c0_97 = arith.constant 0 : index
    %c0_98 = arith.constant 0 : index
    %94 = vector.load %arg8[%c2_96, %c0_97, %c0_98] : memref<7x256x192xbf16, #tpu.memory_space<vmem>>, vector<1x256x192xbf16>
    %95 = vector.shape_cast %94 : vector<1x256x192xbf16> to vector<256x192xbf16>
    %cst_99 = arith.constant dense<0.000000e+00> : vector<128x192xf32>
    %96 = tpu.matmul %93, %95, %cst_99 {dimension_numbers = #tpu.dot_dimension_numbers<[1], [0], [0], [1], [0, 0, 1, 1], [], []>} : vector<128x256xbf16>, vector<256x192xbf16>, vector<128x192xf32> -> vector<128x192xf32>
    %97 = arith.addf %91, %96 : vector<128x192xf32>
    %c0_100 = arith.constant 0 : index
    %c3_101 = arith.constant 3 : index
    %c0_102 = arith.constant 0 : index
    %c0_103 = arith.constant 0 : index
    %98 = vector.load %arg17[%c0_100, %c3_101, %c0_102, %c0_103] : memref<2x14x8x256xbf16, #tpu.memory_space<vmem>>, vector<2x8x8x256xbf16>
    %99 = vector.shape_cast %98 : vector<2x8x8x256xbf16> to vector<128x256xbf16>
    %c3_104 = arith.constant 3 : index
    %c0_105 = arith.constant 0 : index
    %c0_106 = arith.constant 0 : index
    %100 = vector.load %arg8[%c3_104, %c0_105, %c0_106] : memref<7x256x192xbf16, #tpu.memory_space<vmem>>, vector<1x256x192xbf16>
    %101 = vector.shape_cast %100 : vector<1x256x192xbf16> to vector<256x192xbf16>
    %cst_107 = arith.constant dense<0.000000e+00> : vector<128x192xf32>
    %102 = tpu.matmul %99, %101, %cst_107 {dimension_numbers = #tpu.dot_dimension_numbers<[1], [0], [0], [1], [0, 0, 1, 1], [], []>} : vector<128x256xbf16>, vector<256x192xbf16>, vector<128x192xf32> -> vector<128x192xf32>
    %103 = arith.addf %97, %102 : vector<128x192xf32>
    %c0_108 = arith.constant 0 : index
    %c4_109 = arith.constant 4 : index
    %c0_110 = arith.constant 0 : index
    %c0_111 = arith.constant 0 : index
    %104 = vector.load %arg17[%c0_108, %c4_109, %c0_110, %c0_111] : memref<2x14x8x256xbf16, #tpu.memory_space<vmem>>, vector<2x8x8x256xbf16>
    %105 = vector.shape_cast %104 : vector<2x8x8x256xbf16> to vector<128x256xbf16>
    %c4_112 = arith.constant 4 : index
    %c0_113 = arith.constant 0 : index
    %c0_114 = arith.constant 0 : index
    %106 = vector.load %arg8[%c4_112, %c0_113, %c0_114] : memref<7x256x192xbf16, #tpu.memory_space<vmem>>, vector<1x256x192xbf16>
    %107 = vector.shape_cast %106 : vector<1x256x192xbf16> to vector<256x192xbf16>
    %cst_115 = arith.constant dense<0.000000e+00> : vector<128x192xf32>
    %108 = tpu.matmul %105, %107, %cst_115 {dimension_numbers = #tpu.dot_dimension_numbers<[1], [0], [0], [1], [0, 0, 1, 1], [], []>} : vector<128x256xbf16>, vector<256x192xbf16>, vector<128x192xf32> -> vector<128x192xf32>
    %109 = arith.addf %103, %108 : vector<128x192xf32>
    %c0_116 = arith.constant 0 : index
    %c5_117 = arith.constant 5 : index
    %c0_118 = arith.constant 0 : index
    %c0_119 = arith.constant 0 : index
    %110 = vector.load %arg17[%c0_116, %c5_117, %c0_118, %c0_119] : memref<2x14x8x256xbf16, #tpu.memory_space<vmem>>, vector<2x8x8x256xbf16>
    %111 = vector.shape_cast %110 : vector<2x8x8x256xbf16> to vector<128x256xbf16>
    %c5_120 = arith.constant 5 : index
    %c0_121 = arith.constant 0 : index
    %c0_122 = arith.constant 0 : index
    %112 = vector.load %arg8[%c5_120, %c0_121, %c0_122] : memref<7x256x192xbf16, #tpu.memory_space<vmem>>, vector<1x256x192xbf16>
    %113 = vector.shape_cast %112 : vector<1x256x192xbf16> to vector<256x192xbf16>
    %cst_123 = arith.constant dense<0.000000e+00> : vector<128x192xf32>
    %114 = tpu.matmul %111, %113, %cst_123 {dimension_numbers = #tpu.dot_dimension_numbers<[1], [0], [0], [1], [0, 0, 1, 1], [], []>} : vector<128x256xbf16>, vector<256x192xbf16>, vector<128x192xf32> -> vector<128x192xf32>
    %115 = arith.addf %109, %114 : vector<128x192xf32>
    %c0_124 = arith.constant 0 : index
    %c6_125 = arith.constant 6 : index
    %c0_126 = arith.constant 0 : index
    %c0_127 = arith.constant 0 : index
    %116 = vector.load %arg17[%c0_124, %c6_125, %c0_126, %c0_127] : memref<2x14x8x256xbf16, #tpu.memory_space<vmem>>, vector<2x8x8x256xbf16>
    %117 = vector.shape_cast %116 : vector<2x8x8x256xbf16> to vector<128x256xbf16>
    %c6_128 = arith.constant 6 : index
    %c0_129 = arith.constant 0 : index
    %c0_130 = arith.constant 0 : index
    %118 = vector.load %arg8[%c6_128, %c0_129, %c0_130] : memref<7x256x192xbf16, #tpu.memory_space<vmem>>, vector<1x256x192xbf16>
    %119 = vector.shape_cast %118 : vector<1x256x192xbf16> to vector<256x192xbf16>
    %cst_131 = arith.constant dense<0.000000e+00> : vector<128x192xf32>
    %120 = tpu.matmul %117, %119, %cst_131 {dimension_numbers = #tpu.dot_dimension_numbers<[1], [0], [0], [1], [0, 0, 1, 1], [], []>} : vector<128x256xbf16>, vector<256x192xbf16>, vector<128x192xf32> -> vector<128x192xf32>
    %121 = arith.addf %115, %120 : vector<128x192xf32>
    %c0_132 = arith.constant 0 : index
    %c0_133 = arith.constant 0 : index
    %122 = vector.load %arg9[%c0_132, %c0_133] : memref<1x192xf32, #tpu.memory_space<vmem>>, vector<1x192xf32>
    %123 = vector.broadcast %122 : vector<1x192xf32> to vector<128x192xf32>
    %124 = arith.mulf %121, %123 : vector<128x192xf32>
    %c0_134 = arith.constant 0 : index
    %c0_135 = arith.constant 0 : index
    %125 = vector.load %arg10[%c0_134, %c0_135] : memref<1x192xf32, #tpu.memory_space<vmem>>, vector<1x192xf32>
    %126 = vector.broadcast %125 : vector<1x192xf32> to vector<128x192xf32>
    %127 = arith.addf %124, %126 : vector<128x192xf32>
    %cst_136 = arith.constant 0.000000e+00 : f32
    %128 = vector.broadcast %cst_136 : f32 to vector<128x192xf32>
    %129 = arith.maximumf %127, %128 : vector<128x192xf32>
    %130 = arith.truncf %129 : vector<128x192xf32> to vector<128x192xbf16>
    %c0_137 = arith.constant 0 : index
    %c0_138 = arith.constant 0 : index
    %131 = vector.load %arg11[%c0_137, %c0_138] : memref<192x1152xbf16, #tpu.memory_space<vmem>>, vector<192x1152xbf16>
    %cst_139 = arith.constant dense<0.000000e+00> : vector<128x1152xf32>
    %132 = tpu.matmul %130, %131, %cst_139 {dimension_numbers = #tpu.dot_dimension_numbers<[1], [0], [0], [1], [0, 0, 1, 1], [], []>} : vector<128x192xbf16>, vector<192x1152xbf16>, vector<128x1152xf32> -> vector<128x1152xf32>
    %c0_140 = arith.constant 0 : index
    %c0_141 = arith.constant 0 : index
    %133 = vector.load %arg12[%c0_140, %c0_141] : memref<192x1152xbf16, #tpu.memory_space<vmem>>, vector<192x1152xbf16>
    %cst_142 = arith.constant dense<0.000000e+00> : vector<128x1152xf32>
    %134 = tpu.matmul %14, %133, %cst_142 {dimension_numbers = #tpu.dot_dimension_numbers<[1], [0], [0], [1], [0, 0, 1, 1], [], []>} : vector<128x192xbf16>, vector<192x1152xbf16>, vector<128x1152xf32> -> vector<128x1152xf32>
    %135 = arith.addf %132, %134 : vector<128x1152xf32>
    %c0_143 = arith.constant 0 : index
    %c0_144 = arith.constant 0 : index
    %136 = vector.load %arg13[%c0_143, %c0_144] : memref<1x1152xf32, #tpu.memory_space<vmem>>, vector<1x1152xf32>
    %137 = vector.broadcast %136 : vector<1x1152xf32> to vector<128x1152xf32>
    %138 = arith.mulf %135, %137 : vector<128x1152xf32>
    %c0_145 = arith.constant 0 : index
    %c0_146 = arith.constant 0 : index
    %139 = vector.load %arg14[%c0_145, %c0_146] : memref<1x1152xf32, #tpu.memory_space<vmem>>, vector<1x1152xf32>
    %140 = vector.broadcast %139 : vector<1x1152xf32> to vector<128x1152xf32>
    %141 = arith.addf %138, %140 : vector<128x1152xf32>
    %142 = vector.shape_cast %141 : vector<128x1152xf32> to vector<2x64x1152xf32>
    %c0_147 = arith.constant 0 : index
    %c0_148 = arith.constant 0 : index
    %c0_149 = arith.constant 0 : index
    %143 = vector.load %arg15[%c0_147, %c0_148, %c0_149] : memref<2x64x1152xf32, #tpu.memory_space<vmem>>, vector<2x64x1152xf32>
    tpu.vector_store %arg15[%c0_147, %c0_148, %c0_149], %142 {strides = array<i32>} : memref<2x64x1152xf32, #tpu.memory_space<vmem>>, vector<2x64x1152xf32>,
    return
  }
  func.func @transform_0(%arg0: i32) -> (i32, i32, i32) {
    %c0_i32 = arith.constant 0 : i32
    %c0_i32_0 = arith.constant 0 : i32
    %c0_i32_1 = arith.constant 0 : i32
    return %arg0, %c0_i32, %c0_i32_0 : i32, i32, i32
  }
  func.func @transform_1(%arg0: i32) -> (i32, i32) {
    %c0_i32 = arith.constant 0 : i32
    %c0_i32_0 = arith.constant 0 : i32
    %c0_i32_1 = arith.constant 0 : i32
    return %c0_i32, %c0_i32_0 : i32, i32
  }
  func.func @transform_2(%arg0: i32) -> (i32, i32) {
    %c0_i32 = arith.constant 0 : i32
    %c0_i32_0 = arith.constant 0 : i32
    %c0_i32_1 = arith.constant 0 : i32
    return %c0_i32, %c0_i32_0 : i32, i32
  }
  func.func @transform_3(%arg0: i32) -> (i32, i32) {
    %c0_i32 = arith.constant 0 : i32
    %c0_i32_0 = arith.constant 0 : i32
    %c0_i32_1 = arith.constant 0 : i32
    return %c0_i32, %c0_i32_0 : i32, i32
  }
  func.func @transform_4(%arg0: i32) -> (i32, i32, i32) {
    %c0_i32 = arith.constant 0 : i32
    %c0_i32_0 = arith.constant 0 : i32
    %c0_i32_1 = arith.constant 0 : i32
    %c0_i32_2 = arith.constant 0 : i32
    return %c0_i32, %c0_i32_0, %c0_i32_1 : i32, i32, i32
  }
  func.func @transform_5(%arg0: i32) -> (i32, i32) {
    %c0_i32 = arith.constant 0 : i32
    %c0_i32_0 = arith.constant 0 : i32
    %c0_i32_1 = arith.constant 0 : i32
    return %c0_i32, %c0_i32_0 : i32, i32
  }
  func.func @transform_6(%arg0: i32) -> (i32, i32) {
    %c0_i32 = arith.constant 0 : i32
    %c0_i32_0 = arith.constant 0 : i32
    %c0_i32_1 = arith.constant 0 : i32
    return %c0_i32, %c0_i32_0 : i32, i32
  }
  func.func @transform_7(%arg0: i32) -> (i32, i32, i32) {
    %c0_i32 = arith.constant 0 : i32
    %c0_i32_0 = arith.constant 0 : i32
    %c0_i32_1 = arith.constant 0 : i32
    %c0_i32_2 = arith.constant 0 : i32
    return %c0_i32, %c0_i32_0, %c0_i32_1 : i32, i32, i32
  }
  func.func @transform_8(%arg0: i32) -> (i32, i32) {
    %c0_i32 = arith.constant 0 : i32
    %c0_i32_0 = arith.constant 0 : i32
    %c0_i32_1 = arith.constant 0 : i32
    return %c0_i32, %c0_i32_0 : i32, i32
  }
  func.func @transform_9(%arg0: i32) -> (i32, i32) {
    %c0_i32 = arith.constant 0 : i32
    %c0_i32_0 = arith.constant 0 : i32
    %c0_i32_1 = arith.constant 0 : i32
    return %c0_i32, %c0_i32_0 : i32, i32
  }
  func.func @transform_10(%arg0: i32) -> (i32, i32) {
    %c0_i32 = arith.constant 0 : i32
    %c0_i32_0 = arith.constant 0 : i32
    %c0_i32_1 = arith.constant 0 : i32
    return %c0_i32, %c0_i32_0 : i32, i32
  }
  func.func @transform_11(%arg0: i32) -> (i32, i32) {
    %c0_i32 = arith.constant 0 : i32
    %c0_i32_0 = arith.constant 0 : i32
    %c0_i32_1 = arith.constant 0 : i32
    return %c0_i32, %c0_i32_0 : i32, i32
  }
  func.func @transform_12(%arg0: i32) -> (i32, i32) {
    %c0_i32 = arith.constant 0 : i32
    %c0_i32_0 = arith.constant 0 : i32
    %c0_i32_1 = arith.constant 0 : i32
    return %c0_i32, %c0_i32_0 : i32, i32
  }
  func.func @transform_13(%arg0: i32) -> (i32, i32) {
    %c0_i32 = arith.constant 0 : i32
    %c0_i32_0 = arith.constant 0 : i32
    %c0_i32_1 = arith.constant 0 : i32
    return %c0_i32, %c0_i32_0 : i32, i32
  }
  func.func @transform_14(%arg0: i32) -> (i32, i32, i32) {
    %c0_i32 = arith.constant 0 : i32
    %c0_i32_0 = arith.constant 0 : i32
    %c0_i32_1 = arith.constant 0 : i32
    return %arg0, %c0_i32, %c0_i32_0 : i32, i32, i32
  }
}

</mosaic_0001>

<bundles_post_ra>
// kernel: two_way_b_block.1
= control target key start
LH: loop header
LB: loop body
LE: loop exit
PB: predicated region body
PF: predicated region fallthrough
CT: control target
= control target key end

     0   :  { %s20164_s0 = inlined_call_operand.vmem [shape: bf16[2,64,1152], index: 0, kind: input, shape index: {}]   ;;  %s20165_s1 = inlined_call_operand.vmem [shape: bf16[1152,320], index: 1, kind: input, shape index: {}]   ;;  %s20166_s2 = inlined_call_operand.vmem [shape: f32[1,320], index: 2, kind: input, shape index: {}]   ;;  %s20167_s3 = inlined_call_operand.vmem [shape: f32[1,320], index: 3, kind: input, shape index: {}]   ;;  %s20168_s4 = inlined_call_operand.vmem [shape: bf16[7,128,256], index: 4, kind: input, shape index: {}]   ;;  %s20169_s5 = inlined_call_operand.vmem [shape: f32[1,256], index: 5, kind: input, shape index: {}]   ;;  %s20170_s6 = inlined_call_operand.vmem [shape: f32[1,256], index: 6, kind: input, shape index: {}]   ;;  %s20171_s7 = inlined_call_operand.vmem [shape: bf16[7,256,192], index: 7, kind: input, shape index: {}]   ;;  %s20172_s8 = inlined_call_operand.vmem [shape: f32[1,192], index: 8, kind: input, shape index: {}]   ;;  %s20173_s9 = inlined_call_operand.vmem [shape: f32[1,192], index: 9, kind: input, shape index: {}]   ;;  %s20174_s10 = inlined_call_operand.vmem [shape: bf16[192,1152], index: 10, kind: input, shape index: {}]   ;;  %s20175_s11 = inlined_call_operand.vmem [shape: bf16[192,1152], index: 11, kind: input, shape index: {}]   ;;  %s20176_s12 = inlined_call_operand.vmem [shape: f32[1,1152], index: 12, kind: input, shape index: {}]   ;;  %s20177_s13 = inlined_call_operand.vmem [shape: f32[1,1152], index: 13, kind: input, shape index: {}]   ;;  %s20178_s14 = inlined_call_operand.hbm [shape: f32[2,64,1152], index: 14, kind: output, shape index: {}]  }
   0x1   :  { %v13148_v0 = vld [vmem:[%s20165_s1 + $0xac] ss:$12 sps:$4 sm:$0xff]   ;;  %v13152_v2 = vld [vmem:[%s20165_s1 + $0xa8] ss:$12 sps:$4 sm:$0xff]   ;;  %v13158_v6 = vld [vmem:[%s20165_s1 + $0x90] ss:$12 sps:$4 sm:$0xff]  }
   0x2   :  { %v13150_v1 = vld [vmem:[%s20165_s1 + $0x22c] ss:$12 sps:$4 sm:$0xff]   ;;  %1937 = vmatprep.subr.bf16.mxu0 %v13148_v0  ;;  %v13153_v3 = vld [vmem:[%s20165_s1 + $0x228] ss:$12 sps:$4 sm:$0xff]   ;;  %v13159_v7 = vld [vmem:[%s20165_s1 + $0x210] ss:$12 sps:$4 sm:$0xff]  }
   0x3   :  { %2050 = vmatprep.subr.bf16.mxu1 %v13150_v1  ;;  %v13154_v4 = vld [vmem:[%s20165_s1 + $0x94] ss:$12 sps:$4 sm:$0xff]   ;;  %1938 = vmatpush1.bf16.msra.mxu0 %v13152_v2  ;;  %v13160_v8 = vld [vmem:[%s20165_s1 + $0x7c] ss:$12 sps:$4 sm:$0xff]   ;;  %v13164_v10 = vld [vmem:[%s20165_s1 + $0x78] ss:$12 sps:$4 sm:$0xff]  }
   0x4   :  { %2051 = vmatpush1.bf16.msra.mxu1 %v13153_v3  ;;  %v13156_v5 = vld [vmem:[%s20165_s1 + $0x214] ss:$12 sps:$4 sm:$0xff]   ;;  %1939 = vmatprep.subr.bf16.mxu0 %v13154_v4  ;;  %v13162_v9 = vld [vmem:[%s20165_s1 + $0x1fc] ss:$12 sps:$4 sm:$0xff]   ;;  %v13165_v11 = vld [vmem:[%s20165_s1 + $0x1f8] ss:$12 sps:$4 sm:$0xff]  }
   0x5   :  { %2052 = vmatprep.subr.bf16.mxu1 %v13156_v5  ;;  %v13166_v12 = vld [vmem:[%s20165_s1 + $0x64] ss:$12 sps:$4 sm:$0xff]   ;;  %v13170_v14 = vld [vmem:[%s20165_s1 + $0x60] ss:$12 sps:$4 sm:$0xff]   ;;  %v13176_v18 = vld [vmem:[%s20165_s1 + $0x48] ss:$12 sps:$4 sm:$0xff]  }
   0x6   :  { %v13168_v13 = vld [vmem:[%s20165_s1 + $0x1e4] ss:$12 sps:$4 sm:$0xff]   ;;  %v13171_v15 = vld [vmem:[%s20165_s1 + $0x1e0] ss:$12 sps:$4 sm:$0xff]   ;;  %v13177_v19 = vld [vmem:[%s20165_s1 + $0x1c8] ss:$12 sps:$4 sm:$0xff]  }
   0x7   :  { %1940 = vmatpush1.bf16.msra.mxu0 %v13158_v6  ;;  %v13172_v16 = vld [vmem:[%s20165_s1 + $0x4c] ss:$12 sps:$4 sm:$0xff]   ;;  %v13178_v20 = vld [vmem:[%s20165_s1 + $0x34] ss:$12 sps:$4 sm:$0xff]   ;;  %v13182_v22 = vld [vmem:[%s20165_s1 + $0x30] ss:$12 sps:$4 sm:$0xff]  }
   0x8   :  { %2053 = vmatpush1.bf16.msra.mxu1 %v13159_v7  ;;  %1941 = vmatprep.subr.bf16.mxu0 %v13160_v8  ;;  %v13174_v17 = vld [vmem:[%s20165_s1 + $0x1cc] ss:$12 sps:$4 sm:$0xff]   ;;  %v13180_v21 = vld [vmem:[%s20165_s1 + $0x1b4] ss:$12 sps:$4 sm:$0xff]   ;;  %v13183_v23 = vld [vmem:[%s20165_s1 + $0x1b0] ss:$12 sps:$4 sm:$0xff]  }
   0x9   :  { %2054 = vmatprep.subr.bf16.mxu1 %v13162_v9  ;;  %v13184_v24 = vld [vmem:[%s20165_s1 + $0x1c] ss:$12 sps:$4 sm:$0xff]   ;;  %v13188_v26 = vld [vmem:[%s20165_s1 + $0x18] ss:$12 sps:$4 sm:$0xff]   ;;  %v13194_v30 = vld [vmem:[%s20165_s1] ss:$12 sps:$4 sm:$0xff]  }
   0xa   :  { %v13186_v25 = vld [vmem:[%s20165_s1 + $0x19c] ss:$12 sps:$4 sm:$0xff]   ;;  %v13189_v27 = vld [vmem:[%s20165_s1 + $0x198] ss:$12 sps:$4 sm:$0xff]   ;;  %v13195_v31 = vld [vmem:[%s20165_s1 + $0x180] ss:$12 sps:$4 sm:$0xff]  }
   0xb   :  { %1942 = vmatpush1.bf16.msra.mxu0 %v13164_v10  ;;  %v13190_v28 = vld [vmem:[%s20165_s1 + $0x4] ss:$12 sps:$4 sm:$0xff]   ;;  %v13196_v32 = vld [vmem:[%s20165_s1 + $0x16c] ss:$12 sps:$4 sm:$0xff]   ;;  %v13200_v34 = vld [vmem:[%s20165_s1 + $0x168] ss:$12 sps:$4 sm:$0xff]  }
   0xc   :  { %2055 = vmatpush1.bf16.msra.mxu1 %v13165_v11  ;;  %1943 = vmatprep.subr.bf16.mxu0 %v13166_v12  ;;  %v13192_v29 = vld [vmem:[%s20165_s1 + $0x184] ss:$12 sps:$4 sm:$0xff]   ;;  %v13198_v33 = vld [vmem:[%s20165_s1 + $0x2ec] ss:$12 sps:$4 sm:$0xff]   ;;  %v13201_v35 = vld [vmem:[%s20165_s1 + $0x2e8] ss:$12 sps:$4 sm:$0xff]  }
   0xd   :  { %2056 = vmatprep.subr.bf16.mxu1 %v13168_v13  ;;  %v13202_v36 = vld [vmem:[%s20165_s1 + $0x154] ss:$12 sps:$4 sm:$0xff]   ;;  %v13206_v38 = vld [vmem:[%s20165_s1 + $0x150] ss:$12 sps:$4 sm:$0xff]   ;;  %v13212_v42 = vld [vmem:[%s20165_s1 + $0x138] ss:$12 sps:$4 sm:$0xff]  }
   0xe   :  { %v13204_v37 = vld [vmem:[%s20165_s1 + $0x2d4] ss:$12 sps:$4 sm:$0xff]   ;;  %v13207_v39 = vld [vmem:[%s20165_s1 + $0x2d0] ss:$12 sps:$4 sm:$0xff]   ;;  %v13213_v43 = vld [vmem:[%s20165_s1 + $0x2b8] ss:$12 sps:$4 sm:$0xff]  }
   0xf   :  { %1944 = vmatpush1.bf16.msra.mxu0 %v13170_v14  ;;  %v13208_v40 = vld [vmem:[%s20165_s1 + $0x13c] ss:$12 sps:$4 sm:$0xff]   ;;  %v13214_v44 = vld [vmem:[%s20165_s1 + $0x124] ss:$12 sps:$4 sm:$0xff]   ;;  %v13218_v46 = vld [vmem:[%s20165_s1 + $0x120] ss:$12 sps:$4 sm:$0xff]  }
  0x10   :  { %2057 = vmatpush1.bf16.msra.mxu1 %v13171_v15  ;;  %1945 = vmatprep.subr.bf16.mxu0 %v13172_v16  ;;  %v13210_v41 = vld [vmem:[%s20165_s1 + $0x2bc] ss:$12 sps:$4 sm:$0xff]   ;;  %v13216_v45 = vld [vmem:[%s20165_s1 + $0x2a4] ss:$12 sps:$4 sm:$0xff]   ;;  %v13219_v47 = vld [vmem:[%s20165_s1 + $0x2a0] ss:$12 sps:$4 sm:$0xff]  }
  0x11   :  { %2058 = vmatprep.subr.bf16.mxu1 %v13174_v17  ;;  %v13220_v48 = vld [vmem:[%s20165_s1 + $0x10c] ss:$12 sps:$4 sm:$0xff]   ;;  %v13246_v49 = vld [vmem:[%s20164_s0 + $0x4] ss:$36 sps:$4 sm:$0xff]   ;;  %v13226_v54 = vld [vmem:[%s20165_s1 + $0xf4] ss:$12 sps:$4 sm:$0xff]  }
  0x12   :  { %v13222_v50 = vld [vmem:[%s20165_s1 + $0x28c] ss:$12 sps:$4 sm:$0xff]   ;;  %1969 = vmatprep.mubr.bf16.mxu0 %v13246_v49  ;;  %v13224_v52 = vld [vmem:[%s20165_s1 + $0x108] ss:$12 sps:$4 sm:$0xff]   ;;  %v13230_v56 = vld [vmem:[%s20165_s1 + $0xf0] ss:$12 sps:$4 sm:$0xff]  }
  0x13   :  { %1946 = vmatpush1.bf16.msra.mxu0 %v13176_v18  ;;  %v13249_v51 = vld [vmem:[%s20164_s0 + $0xc] ss:$36 sps:$4 sm:$0xff]   ;;  %v13225_v53 = vld [vmem:[%s20165_s1 + $0x288] ss:$12 sps:$4 sm:$0xff]   ;;  %v13236_v60 = vld [vmem:[%s20165_s1 + $0xd8] ss:$12 sps:$4 sm:$0xff]  }
  0x14   :  { %2059 = vmatpush1.bf16.msra.mxu1 %v13177_v19  ;;  %1947 = vmatprep.subr.bf16.mxu0 %v13178_v20  ;;  %v13228_v55 = vld [vmem:[%s20165_s1 + $0x274] ss:$12 sps:$4 sm:$0xff]   ;;  %v13231_v57 = vld [vmem:[%s20165_s1 + $0x270] ss:$12 sps:$4 sm:$0xff]   ;;  %v13237_v61 = vld [vmem:[%s20165_s1 + $0x258] ss:$12 sps:$4 sm:$0xff]  }
  0x15   :  { %2060 = vmatprep.subr.bf16.mxu1 %v13180_v21  ;;  %2082 = vmatprep.mubr.bf16.mxu1 %v13249_v51  ;;  %v13232_v58 = vld [vmem:[%s20165_s1 + $0xdc] ss:$12 sps:$4 sm:$0xff]   ;;  %v13238_v62 = vld [vmem:[%s20165_s1 + $0xc4] ss:$12 sps:$4 sm:$0xff]   ;;  %v13242_v0 = vld [vmem:[%s20165_s1 + $0xc0] ss:$12 sps:$4 sm:$0xff]  }
  0x16   :  { %v13234_v59 = vld [vmem:[%s20165_s1 + $0x25c] ss:$12 sps:$4 sm:$0xff]   ;;  %v13240_v63 = vld [vmem:[%s20165_s1 + $0x244] ss:$12 sps:$4 sm:$0xff]   ;;  %v13243_v1 = vld [vmem:[%s20165_s1 + $0x240] ss:$12 sps:$4 sm:$0xff]  }
  0x17   :  { %1948 = vmatpush1.bf16.msra.mxu0 %v13182_v22  ;;  %v13252_v2 = vld [vmem:[%s20165_s1 + $0x3ac] ss:$12 sps:$4 sm:$0xff]   ;;  %v13244_v4 = vld [vmem:[%s20164_s0] ss:$36 sps:$4 sm:$0xff]   ;;  %v13250_v6 = vld [vmem:[%s20165_s1 + $0x3a8] ss:$12 sps:$4 sm:$0xff]  }
  0x18   :  { %2061 = vmatpush1.bf16.msra.mxu1 %v13183_v23  ;;  %1949 = vmatprep.subr.bf16.mxu0 %v13184_v24  ;;  %v13255_v3 = vld [vmem:[%s20165_s1 + $0x52c] ss:$12 sps:$4 sm:$0xff]   ;;  %v13253_v7 = vld [vmem:[%s20165_s1 + $0x528] ss:$12 sps:$4 sm:$0xff]   ;;  %v13256_v12 = vld [vmem:[%s20165_s1 + $0x390] ss:$12 sps:$4 sm:$0xff]  }
  0x19   :  { %2062 = vmatprep.subr.bf16.mxu1 %v13186_v25  ;;  %v13247_v5 = vld [vmem:[%s20164_s0 + $0x8] ss:$36 sps:$4 sm:$0xff]   ;;  %v13258_v8 = vld [vmem:[%s20165_s1 + $0x394] ss:$12 sps:$4 sm:$0xff]   ;;  %v13259_v13 = vld [vmem:[%s20165_s1 + $0x510] ss:$12 sps:$4 sm:$0xff]  }
  0x1a   :  { %v13261_v9 = vld [vmem:[%s20165_s1 + $0x514] ss:$12 sps:$4 sm:$0xff]   ;;  %v13262_v10 = vld [vmem:[%s20164_s0 + $0x4c] ss:$36 sps:$4 sm:$0xff]   ;;  %v13270_v14 = vld [vmem:[%s20165_s1 + $0x37c] ss:$12 sps:$4 sm:$0xff]  }
  0x1b   :  { %1950 = vmatpush1.bf16.msra.mxu0 %v13188_v26  ;;  %v13264_v11 = vld [vmem:[%s20164_s0 + $0x54] ss:$36 sps:$4 sm:$0xff]   ;;  %v13273_v15 = vld [vmem:[%s20165_s1 + $0x4fc] ss:$12 sps:$4 sm:$0xff]   ;;  %v13276_v20 = vld [vmem:[%s20165_s1 + $0x364] ss:$12 sps:$4 sm:$0xff]  }
  0x1c   :  { %2063 = vmatpush1.bf16.msra.mxu1 %v13189_v27  ;;  %1951 = vmatprep.subr.bf16.mxu0 %v13190_v28  ;;  %v13266_v16 = vld [vmem:[%s20164_s0 + $0x48] ss:$36 sps:$4 sm:$0xff]   ;;  %v13267_v17 = vld [vmem:[%s20164_s0 + $0x50] ss:$36 sps:$4 sm:$0xff]   ;;  %v13268_v18 = vld [vmem:[%s20165_s1 + $0x378] ss:$12 sps:$4 sm:$0xff]  }
  0x1d   :  { %2064 = vmatprep.subr.bf16.mxu1 %v13192_v29  ;;  %v13271_v19 = vld [vmem:[%s20165_s1 + $0x4f8] ss:$12 sps:$4 sm:$0xff]   ;;  %v13282_v23 = vld [vmem:[%s20164_s0 + $0x9c] ss:$36 sps:$4 sm:$0xff]   ;;  %v13284_v28 = vld [vmem:[%s20164_s0 + $0x90] ss:$36 sps:$4 sm:$0xff]  }
  0x1e   :  { %v13279_v21 = vld [vmem:[%s20165_s1 + $0x4e4] ss:$12 sps:$4 sm:$0xff]   ;;  %v13280_v22 = vld [vmem:[%s20164_s0 + $0x94] ss:$36 sps:$4 sm:$0xff]   ;;  %v13274_v24 = vld [vmem:[%s20165_s1 + $0x360] ss:$12 sps:$4 sm:$0xff]  }
  0x1f   :  { %1952 = vmatpush1.bf16.msra.mxu0 %v13194_v30  ;;  %v13277_v25 = vld [vmem:[%s20165_s1 + $0x4e0] ss:$12 sps:$4 sm:$0xff]   ;;  %v13285_v29 = vld [vmem:[%s20164_s0 + $0x98] ss:$36 sps:$4 sm:$0xff]   ;;  %v13286_v30 = vld [vmem:[%s20165_s1 + $0x348] ss:$12 sps:$4 sm:$0xff]  }
  0x20   :  { %2065 = vmatpush1.bf16.msra.mxu1 %v13195_v31  ;;  %1953 = vmatprep.subr.bf16.mxu0 %v13196_v32  ;;  %v13288_v26 = vld [vmem:[%s20165_s1 + $0x34c] ss:$12 sps:$4 sm:$0xff]   ;;  %v13289_v31 = vld [vmem:[%s20165_s1 + $0x4c8] ss:$12 sps:$4 sm:$0xff]  }
  0x21   :  { %2066 = vmatprep.subr.bf16.mxu1 %v13198_v33  ;;  %v13291_v27 = vld [vmem:[%s20165_s1 + $0x4cc] ss:$12 sps:$4 sm:$0xff]   ;;  %v13294_v32 = vld [vmem:[%s20165_s1 + $0x334] ss:$12 sps:$4 sm:$0xff]  }
  0x22   :  { %v13297_v33 = vld [vmem:[%s20165_s1 + $0x4b4] ss:$12 sps:$4 sm:$0xff]   ;;  %v13327_v51 = vld [vmem:[%s20165_s1 + $0x5ec] ss:$12 sps:$4 sm:$0xff]  }
  0x23   :  { %1954 = vmatpush2.bf16.msra.mxu0 %v13200_v34  ;;  %v13298_v34 = vld [vmem:[%s20164_s0 + $0xdc] ss:$36 sps:$4 sm:$0xff]  }
  0x24   :  { %2067 = vmatpush2.bf16.msra.mxu1 %v13201_v35  ;;  %1955 = vmatprep.subr.bf16.mxu0 %v13202_v36  ;;  %v13300_v35 = vld [vmem:[%s20164_s0 + $0xe4] ss:$36 sps:$4 sm:$0xff]   ;;  %v13292_v36 = vld [vmem:[%s20165_s1 + $0x330] ss:$12 sps:$4 sm:$0xff]   ;;  %v13313_v49 = vld [vmem:[%s20165_s1 + $0x480] ss:$12 sps:$4 sm:$0xff]  }
  0x25   :  { %2068 = vmatprep.subr.bf16.mxu1 %v13204_v37  ;;  %v13295_v37 = vld [vmem:[%s20165_s1 + $0x4b0] ss:$12 sps:$4 sm:$0xff]  }
  0x27   :  { %1956 = vmatpush2.bf16.msra.mxu0 %v13206_v38  ;;  %v13306_v38 = vld [vmem:[%s20165_s1 + $0x31c] ss:$12 sps:$4 sm:$0xff]  }
  0x28   :  { %2069 = vmatpush2.bf16.msra.mxu1 %v13207_v39  ;;  %1957 = vmatprep.subr.bf16.mxu0 %v13208_v40  ;;  %v13309_v39 = vld [vmem:[%s20165_s1 + $0x49c] ss:$12 sps:$4 sm:$0xff]  }
  0x29   :  { %2070 = vmatprep.subr.bf16.mxu1 %v13210_v41  ;;  %v13302_v40 = vld [vmem:[%s20164_s0 + $0xd8] ss:$36 sps:$4 sm:$0xff]   ;;  %v13303_v41 = vld [vmem:[%s20164_s0 + $0xe0] ss:$36 sps:$4 sm:$0xff]  }
  0x2b   :  { %1958 = vmatpush2.bf16.msra.mxu0 %v13212_v42  ;;  %v13304_v42 = vld [vmem:[%s20165_s1 + $0x318] ss:$12 sps:$4 sm:$0xff]  }
  0x2c   :  { %2071 = vmatpush2.bf16.msra.mxu1 %v13213_v43  ;;  %1959 = vmatprep.subr.bf16.mxu0 %v13214_v44  ;;  %v13307_v43 = vld [vmem:[%s20165_s1 + $0x498] ss:$12 sps:$4 sm:$0xff]  }
  0x2d   :  { %2072 = vmatprep.subr.bf16.mxu1 %v13216_v45  ;;  %v13312_v44 = vld [vmem:[%s20165_s1 + $0x304] ss:$12 sps:$4 sm:$0xff]  }
  0x2e   :  { %v13315_v45 = vld [vmem:[%s20165_s1 + $0x484] ss:$12 sps:$4 sm:$0xff]  }
  0x2f   :  { %1960 = vmatpush2.bf16.msra.mxu0 %v13218_v46  ;;  %v13316_v46 = vld [vmem:[%s20164_s0 + $0x124] ss:$36 sps:$4 sm:$0xff]  }
  0x30   :  { %2073 = vmatpush2.bf16.msra.mxu1 %v13219_v47  ;;  %1961 = vmatprep.subr.bf16.mxu0 %v13220_v48  ;;  %v13318_v47 = vld [vmem:[%s20164_s0 + $0x12c] ss:$36 sps:$4 sm:$0xff]  }
  0x31   :  { %2074 = vmatprep.subr.bf16.mxu1 %v13222_v50  ;;  %v13310_v48 = vld [vmem:[%s20165_s1 + $0x300] ss:$12 sps:$4 sm:$0xff]  }
  0x32   :  { %v13324_v50 = vld [vmem:[%s20165_s1 + $0x46c] ss:$12 sps:$4 sm:$0xff]  }
  0x33   :  { %1962 = vmatpush2.bf16.msra.mxu0 %v13224_v52  ;;  %v13320_v52 = vld [vmem:[%s20164_s0 + $0x120] ss:$36 sps:$4 sm:$0xff]  }
  0x34   :  { %2075 = vmatpush2.bf16.msra.mxu1 %v13225_v53  ;;  %1963 = vmatprep.subr.bf16.mxu0 %v13226_v54  ;;  %v13321_v53 = vld [vmem:[%s20164_s0 + $0x128] ss:$36 sps:$4 sm:$0xff]  }
  0x35   :  { %2076 = vmatprep.subr.bf16.mxu1 %v13228_v55  ;;  %v13322_v54 = vld [vmem:[%s20165_s1 + $0x468] ss:$12 sps:$4 sm:$0xff]  }
  0x36   :  { %v13325_v55 = vld [vmem:[%s20165_s1 + $0x5e8] ss:$12 sps:$4 sm:$0xff]  }
  0x37   :  { %1964 = vmatpush2.bf16.msra.mxu0 %v13230_v56  ;;  %v13330_v56 = vld [vmem:[%s20165_s1 + $0x454] ss:$12 sps:$4 sm:$0xff]  }
  0x38   :  { %2077 = vmatpush2.bf16.msra.mxu1 %v13231_v57  ;;  %1965 = vmatprep.subr.bf16.mxu0 %v13232_v58  ;;  %v13333_v57 = vld [vmem:[%s20165_s1 + $0x5d4] ss:$12 sps:$4 sm:$0xff]   ;;  %v13334_v58 = vld [vmem:[%s20164_s0 + $0x16c] ss:$36 sps:$4 sm:$0xff]  }
  0x39   :  { %2078 = vmatprep.subr.bf16.mxu1 %v13234_v59  ;;  %v13336_v59 = vld [vmem:[%s20164_s0 + $0x174] ss:$36 sps:$4 sm:$0xff]  }
  0x3b   :  { %1966 = vmatpush2.bf16.msra.mxu0 %v13236_v60  ;;  %v13328_v60 = vld [vmem:[%s20165_s1 + $0x450] ss:$12 sps:$4 sm:$0xff]  }
  0x3c   :  { %2079 = vmatpush2.bf16.msra.mxu1 %v13237_v61  ;;  %1967 = vmatprep.subr.bf16.mxu0 %v13238_v62  ;;  %v13331_v61 = vld [vmem:[%s20165_s1 + $0x5d0] ss:$12 sps:$4 sm:$0xff]  }
  0x3d   :  { %2080 = vmatprep.subr.bf16.mxu1 %v13240_v63  ;;  %v13342_v62 = vld [vmem:[%s20165_s1 + $0x43c] ss:$12 sps:$4 sm:$0xff]  }
  0x3e   :  { %v13345_v63 = vld [vmem:[%s20165_s1 + $0x5bc] ss:$12 sps:$4 sm:$0xff]  }
  0x3f   :  { %1968 = vmatpush2.bf16.msra.mxu0 %v13242_v0  ;;  %v13338_v0 = vld [vmem:[%s20164_s0 + $0x168] ss:$36 sps:$4 sm:$0xff]  }
  0x40   :  { %2081 = vmatpush2.bf16.msra.mxu1 %v13243_v1  ;;  %2163 = vmatprep.subr.bf16.mxu0 %v13252_v2  ;;  %v13339_v1 = vld [vmem:[%s20164_s0 + $0x170] ss:$36 sps:$4 sm:$0xff]   ;;  %v13340_v2 = vld [vmem:[%s20165_s1 + $0x438] ss:$12 sps:$4 sm:$0xff]  }
  0x41   :  { %2276 = vmatprep.subr.bf16.mxu1 %v13255_v3  ;;  %v13343_v3 = vld [vmem:[%s20165_s1 + $0x5b8] ss:$12 sps:$4 sm:$0xff]  }
  0x42   :  { %1970 = vmatmul.mubr.bf16.vlgmr.msra.gmra.mxu0 %v13244_v4  ;;  %v13348_v4 = vld [vmem:[%s20165_s1 + $0x424] ss:$12 sps:$4 sm:$0xff]  }
  0x43   :  { %2083 = vmatmul.mubr.bf16.vlgmr.msra.gmra.mxu1 %v13247_v5  ;;  %2164 = vmatpush1.bf16.msra.mxu0 %v13250_v6  ;;  %v13351_v5 = vld [vmem:[%s20165_s1 + $0x5a4] ss:$12 sps:$4 sm:$0xff]   ;;  %v13352_v6 = vld [vmem:[%s20164_s0 + $0x1b4] ss:$36 sps:$4 sm:$0xff]  }
  0x44   :  { %2277 = vmatpush1.bf16.msra.mxu1 %v13253_v7  ;;  %2165 = vmatprep.subr.bf16.mxu0 %v13258_v8  ;;  %v13354_v7 = vld [vmem:[%s20164_s0 + $0x1bc] ss:$36 sps:$4 sm:$0xff]  }
  0x45   :  { %2278 = vmatprep.subr.bf16.mxu1 %v13261_v9  ;;  %1979 = vmatprep.mubr.bf16.mxu0 %v13262_v10  ;;  %v13346_v8 = vld [vmem:[%s20165_s1 + $0x420] ss:$12 sps:$4 sm:$0xff]  }
  0x46   :  { %2092 = vmatprep.mubr.bf16.mxu1 %v13264_v11  ;;  %v13349_v9 = vld [vmem:[%s20165_s1 + $0x5a0] ss:$12 sps:$4 sm:$0xff]  }
  0x47   :  { %2166 = vmatpush1.bf16.msra.mxu0 %v13256_v12  ;;  %v13360_v10 = vld [vmem:[%s20165_s1 + $0x40c] ss:$12 sps:$4 sm:$0xff]   ;;  %v13356_v12 = vld [vmem:[%s20164_s0 + $0x1b0] ss:$36 sps:$4 sm:$0xff]  }
  0x48   :  { %2279 = vmatpush1.bf16.msra.mxu1 %v13259_v13  ;;  %2167 = vmatprep.subr.bf16.mxu0 %v13270_v14  ;;  %v13363_v11 = vld [vmem:[%s20165_s1 + $0x58c] ss:$12 sps:$4 sm:$0xff]   ;;  %v13358_v14 = vld [vmem:[%s20165_s1 + $0x408] ss:$12 sps:$4 sm:$0xff]  }
  0x49   :  { %2280 = vmatprep.subr.bf16.mxu1 %v13273_v15  ;;  %v13357_v13 = vld [vmem:[%s20164_s0 + $0x1b8] ss:$36 sps:$4 sm:$0xff]   ;;  %v13361_v15 = vld [vmem:[%s20165_s1 + $0x588] ss:$12 sps:$4 sm:$0xff]  }
  0x4a   :  { %1980 = vmatmul.mubr.bf16.gmra.mxu0 %v13266_v16  ;;  %v13366_v16 = vld [vmem:[%s20165_s1 + $0x3f4] ss:$12 sps:$4 sm:$0xff]  }
  0x4b   :  { %2093 = vmatmul.mubr.bf16.gmra.mxu1 %v13267_v17  ;;  %2168 = vmatpush1.bf16.msra.mxu0 %v13268_v18  ;;  %v13369_v17 = vld [vmem:[%s20165_s1 + $0x574] ss:$12 sps:$4 sm:$0xff]  }
  0x4c   :  { %2281 = vmatpush1.bf16.msra.mxu1 %v13271_v19  ;;  %2169 = vmatprep.subr.bf16.mxu0 %v13276_v20  ;;  %v13370_v18 = vld [vmem:[%s20164_s0 + $0x1fc] ss:$36 sps:$4 sm:$0xff]   ;;  %v13372_v19 = vld [vmem:[%s20164_s0 + $0x204] ss:$36 sps:$4 sm:$0xff]  }
  0x4d   :  { %2282 = vmatprep.subr.bf16.mxu1 %v13279_v21  ;;  %1989 = vmatprep.mubr.bf16.mxu0 %v13280_v22  ;;  %v13364_v20 = vld [vmem:[%s20165_s1 + $0x3f0] ss:$12 sps:$4 sm:$0xff]  }
  0x4e   :  { %2102 = vmatprep.mubr.bf16.mxu1 %v13282_v23  ;;  %v13367_v21 = vld [vmem:[%s20165_s1 + $0x570] ss:$12 sps:$4 sm:$0xff]  }
  0x4f   :  { %2170 = vmatpush1.bf16.msra.mxu0 %v13274_v24  ;;  %v13378_v22 = vld [vmem:[%s20165_s1 + $0x3dc] ss:$12 sps:$4 sm:$0xff]  }
  0x50   :  { %2283 = vmatpush1.bf16.msra.mxu1 %v13277_v25  ;;  %2171 = vmatprep.subr.bf16.mxu0 %v13288_v26  ;;  %v13381_v23 = vld [vmem:[%s20165_s1 + $0x55c] ss:$12 sps:$4 sm:$0xff]   ;;  %v13375_v25 = vld [vmem:[%s20164_s0 + $0x200] ss:$36 sps:$4 sm:$0xff]  }
  0x51   :  { %2284 = vmatprep.subr.bf16.mxu1 %v13291_v27  ;;  %v13374_v24 = vld [vmem:[%s20164_s0 + $0x1f8] ss:$36 sps:$4 sm:$0xff]  }
  0x52   :  { %1990 = vmatmul.mubr.bf16.gmra.mxu0 %v13284_v28  ;;  %v13376_v26 = vld [vmem:[%s20165_s1 + $0x3d8] ss:$12 sps:$4 sm:$0xff]  }
  0x53   :  { %2103 = vmatmul.mubr.bf16.gmra.mxu1 %v13285_v29  ;;  %2172 = vmatpush1.bf16.msra.mxu0 %v13286_v30  ;;  %v13379_v27 = vld [vmem:[%s20165_s1 + $0x558] ss:$12 sps:$4 sm:$0xff]  }
  0x54   :  { %2285 = vmatpush1.bf16.msra.mxu1 %v13289_v31  ;;  %2173 = vmatprep.subr.bf16.mxu0 %v13294_v32  ;;  %v13384_v28 = vld [vmem:[%s20165_s1 + $0x3c4] ss:$12 sps:$4 sm:$0xff]   ;;  %v13390_v30 = vld [vmem:[%s20164_s0 + $0x14] ss:$36 sps:$4 sm:$0xff]   ;;  %v13396_v31 = vld [vmem:[%s20164_s0 + $0x1c] ss:$36 sps:$4 sm:$0xff]  }
  0x55   :  { %2286 = vmatprep.subr.bf16.mxu1 %v13297_v33  ;;  %1999 = vmatprep.mubr.bf16.mxu0 %v13298_v34  ;;  %v13387_v29 = vld [vmem:[%s20165_s1 + $0x544] ss:$12 sps:$4 sm:$0xff]   ;;  %v13382_v32 = vld [vmem:[%s20165_s1 + $0x3c0] ss:$12 sps:$4 sm:$0xff]  }
  0x56   :  { %2112 = vmatprep.mubr.bf16.mxu1 %v13300_v35  ;;  %v13385_v33 = vld [vmem:[%s20165_s1 + $0x540] ss:$12 sps:$4 sm:$0xff]   ;;  %v13388_v34 = vld [vmem:[%s20164_s0 + $0x10] ss:$36 sps:$4 sm:$0xff]  }
  0x57   :  { %2174 = vmatpush1.bf16.msra.mxu0 %v13292_v36  ;;  %v13393_v35 = vld [vmem:[%s20165_s1 + $0x6ac] ss:$12 sps:$4 sm:$0xff]   ;;  %v13391_v36 = vld [vmem:[%s20165_s1 + $0x6a8] ss:$12 sps:$4 sm:$0xff]  }
  0x58   :  { %2287 = vmatpush1.bf16.msra.mxu1 %v13295_v37  ;;  %2175 = vmatprep.subr.bf16.mxu0 %v13306_v38  ;;  %v13394_v37 = vld [vmem:[%s20164_s0 + $0x18] ss:$36 sps:$4 sm:$0xff]  }
  0x59   :  { %2288 = vmatprep.subr.bf16.mxu1 %v13309_v39  ;;  %v13397_v38 = vld [vmem:[%s20164_s0 + $0x5c] ss:$36 sps:$4 sm:$0xff]  }
  0x5a   :  { %2000 = vmatmul.mubr.bf16.gmra.mxu0 %v13302_v40  ;;  %v13433_v39 = vld [vmem:[%s20165_s1 + $0x170] ss:$12 sps:$4 sm:$0xff]   ;;  %v13402_v40 = vld [vmem:[%s20165_s1 + $0x694] ss:$12 sps:$4 sm:$0xff]  }
  0x5b   :  { %2113 = vmatmul.mubr.bf16.gmra.mxu1 %v13303_v41  ;;  %2176 = vmatpush1.bf16.msra.mxu0 %v13304_v42  ;;  %v13403_v41 = vld [vmem:[%s20164_s0 + $0x64] ss:$36 sps:$4 sm:$0xff]   ;;  %v13434_v42 = vld [vmem:[%s20165_s1 + $0xb0] ss:$12 sps:$4 sm:$0xff]  }
  0x5c   :  { %2289 = vmatpush1.bf16.msra.mxu1 %v13307_v43  ;;  %2177 = vmatprep.subr.bf16.mxu0 %v13312_v44  ;;  %v13435_v43 = vld [vmem:[%s20165_s1 + $0x158] ss:$12 sps:$4 sm:$0xff]   ;;  %v13400_v44 = vld [vmem:[%s20165_s1 + $0x690] ss:$12 sps:$4 sm:$0xff]  }
  0x5d   :  { %2290 = vmatprep.subr.bf16.mxu1 %v13315_v45  ;;  %2009 = vmatprep.mubr.bf16.mxu0 %v13316_v46  ;;  %v13399_v45 = vld [vmem:[%s20164_s0 + $0x58] ss:$36 sps:$4 sm:$0xff]   ;;  %v13405_v46 = vld [vmem:[%s20164_s0 + $0x60] ss:$36 sps:$4 sm:$0xff]  }
  0x5e   :  { %2122 = vmatprep.mubr.bf16.mxu1 %v13318_v47  ;;  %v13411_v47 = vld [vmem:[%s20165_s1 + $0x67c] ss:$12 sps:$4 sm:$0xff]  }
  0x5f   :  { %2178 = vmatpush1.bf16.msra.mxu0 %v13310_v48  ;;  %v13406_v48 = vld [vmem:[%s20164_s0 + $0xa4] ss:$36 sps:$4 sm:$0xff]  }
  0x60   :  { %2291 = vmatpush1.bf16.msra.mxu1 %v13313_v49  ;;  %2179 = vmatprep.subr.bf16.mxu0 %v13324_v50  ;;  %v13438_v49 = vld [vmem:[%s20165_s1 + $0x98] ss:$12 sps:$4 sm:$0xff]  }
  0x61   :  { %2292 = vmatprep.subr.bf16.mxu1 %v13327_v51  ;;  %v13409_v50 = vld [vmem:[%s20165_s1 + $0x678] ss:$12 sps:$4 sm:$0xff]   ;;  %v13412_v51 = vld [vmem:[%s20164_s0 + $0xac] ss:$36 sps:$4 sm:$0xff]  }
  0x62   :  { %2010 = vmatmul.mubr.bf16.gmra.mxu0 %v13320_v52  ;;  %v13420_v52 = vld [vmem:[%s20165_s1 + $0x664] ss:$12 sps:$4 sm:$0xff]  }
  0x63   :  { %2123 = vmatmul.mubr.bf16.gmra.mxu1 %v13321_v53  ;;  %2180 = vmatpush2.bf16.msra.mxu0 %v13322_v54  ;;  %v13446_v53 = vld [vmem:[%s20165_s1 + $0x140] ss:$12 sps:$4 sm:$0xff]  }
  0x64   :  { %2293 = vmatpush2.bf16.msra.mxu1 %v13325_v55  ;;  %2181 = vmatprep.subr.bf16.mxu0 %v13330_v56  ;;  %v13447_v54 = vld [vmem:[%s20165_s1 + $0x80] ss:$12 sps:$4 sm:$0xff]   ;;  %v13448_v55 = vld [vmem:[%s20165_s1 + $0x128] ss:$12 sps:$4 sm:$0xff]  }
  0x65   :  { %2294 = vmatprep.subr.bf16.mxu1 %v13333_v57  ;;  %2019 = vmatprep.mubr.bf16.mxu0 %v13334_v58  ;;  %v13408_v56 = vld [vmem:[%s20164_s0 + $0xa0] ss:$36 sps:$4 sm:$0xff]   ;;  %v13414_v57 = vld [vmem:[%s20164_s0 + $0xa8] ss:$36 sps:$4 sm:$0xff]  }
  0x66   :  { %2132 = vmatprep.mubr.bf16.mxu1 %v13336_v59  ;;  %v13418_v58 = vld [vmem:[%s20165_s1 + $0x660] ss:$12 sps:$4 sm:$0xff]  }
  0x67   :  { %2182 = vmatpush2.bf16.msra.mxu0 %v13328_v60  ;;  %v13415_v59 = vld [vmem:[%s20164_s0 + $0xec] ss:$36 sps:$4 sm:$0xff]   ;;  %v13421_v60 = vld [vmem:[%s20164_s0 + $0xf4] ss:$36 sps:$4 sm:$0xff]  }
  0x68   :  { %2295 = vmatpush2.bf16.msra.mxu1 %v13331_v61  ;;  %2183 = vmatprep.subr.bf16.mxu0 %v13342_v62  ;;  %v13429_v61 = vld [vmem:[%s20165_s1 + $0x64c] ss:$12 sps:$4 sm:$0xff]   ;;  %v13451_v62 = vld [vmem:[%s20165_s1 + $0x68] ss:$12 sps:$4 sm:$0xff]  }
  0x69   :  { %2296 = vmatprep.subr.bf16.mxu1 %v13345_v63  ;;  %v13427_v63 = vld [vmem:[%s20165_s1 + $0x648] ss:$12 sps:$4 sm:$0xff]  }
  0x6a   :  { %2020 = vmatmul.mubr.bf16.gmra.mxu0 %v13338_v0  ;;  %v13442_v0 = vld [vmem:[%s20165_s1 + $0x634] ss:$12 sps:$4 sm:$0xff]  }
  0x6b   :  { %2133 = vmatmul.mubr.bf16.gmra.mxu1 %v13339_v1  ;;  %2184 = vmatpush2.bf16.msra.mxu0 %v13340_v2  ;;  %v13459_v1 = vld [vmem:[%s20165_s1 + $0x110] ss:$12 sps:$4 sm:$0xff]  }
  0x6c   :  { %2297 = vmatpush2.bf16.msra.mxu1 %v13343_v3  ;;  %2185 = vmatprep.subr.bf16.mxu0 %v13348_v4  ;;  %v13460_v2 = vld [vmem:[%s20165_s1 + $0x50] ss:$12 sps:$4 sm:$0xff]   ;;  %v13461_v3 = vld [vmem:[%s20165_s1 + $0xf8] ss:$12 sps:$4 sm:$0xff]   ;;  %v13417_v4 = vld [vmem:[%s20164_s0 + $0xe8] ss:$36 sps:$4 sm:$0xff]  }
  0x6d   :  { %2298 = vmatprep.subr.bf16.mxu1 %v13351_v5  ;;  %2029 = vmatprep.mubr.bf16.mxu0 %v13352_v6  ;;  %v13423_v5 = vld [vmem:[%s20164_s0 + $0xf0] ss:$36 sps:$4 sm:$0xff]  }
  0x6e   :  { %2142 = vmatprep.mubr.bf16.mxu1 %v13354_v7  ;;  %v13440_v6 = vld [vmem:[%s20165_s1 + $0x630] ss:$12 sps:$4 sm:$0xff]   ;;  %v13424_v7 = vld [vmem:[%s20164_s0 + $0x134] ss:$36 sps:$4 sm:$0xff]  }
  0x6f   :  { %2186 = vmatpush2.bf16.msra.mxu0 %v13346_v8  ;;  %v13430_v8 = vld [vmem:[%s20164_s0 + $0x13c] ss:$36 sps:$4 sm:$0xff]  }
  0x70   :  { %2299 = vmatpush2.bf16.msra.mxu1 %v13349_v9  ;;  %2187 = vmatprep.subr.bf16.mxu0 %v13360_v10  ;;  %v13455_v9 = vld [vmem:[%s20165_s1 + $0x61c] ss:$12 sps:$4 sm:$0xff]   ;;  %v13464_v10 = vld [vmem:[%s20165_s1 + $0x38] ss:$12 sps:$4 sm:$0xff]  }
  0x71   :  { %2300 = vmatprep.subr.bf16.mxu1 %v13363_v11  ;;  %v13453_v11 = vld [vmem:[%s20165_s1 + $0x618] ss:$12 sps:$4 sm:$0xff]  }
  0x72   :  { %2030 = vmatmul.mubr.bf16.gmra.mxu0 %v13356_v12  ;;  %v13468_v12 = vld [vmem:[%s20165_s1 + $0x604] ss:$12 sps:$4 sm:$0xff]  }
  0x73   :  { %2143 = vmatmul.mubr.bf16.gmra.mxu1 %v13357_v13  ;;  %2188 = vmatpush2.bf16.msra.mxu0 %v13358_v14  ;;  %v13472_v13 = vld [vmem:[%s20165_s1 + $0xe0] ss:$12 sps:$4 sm:$0xff]  }
  0x74   :  { %2301 = vmatpush2.bf16.msra.mxu1 %v13361_v15  ;;  %2189 = vmatprep.subr.bf16.mxu0 %v13366_v16  ;;  %v13473_v14 = vld [vmem:[%s20165_s1 + $0x20] ss:$12 sps:$4 sm:$0xff]   ;;  %v13474_v15 = vld [vmem:[%s20165_s1 + $0xc8] ss:$12 sps:$4 sm:$0xff]  }
  0x75   :  { %2302 = vmatprep.subr.bf16.mxu1 %v13369_v17  ;;  %2039 = vmatprep.mubr.bf16.mxu0 %v13370_v18  ;;  %v13426_v16 = vld [vmem:[%s20164_s0 + $0x130] ss:$36 sps:$4 sm:$0xff]   ;;  %v13432_v17 = vld [vmem:[%s20164_s0 + $0x138] ss:$36 sps:$4 sm:$0xff]   ;;  %v13466_v18 = vld [vmem:[%s20165_s1 + $0x600] ss:$12 sps:$4 sm:$0xff]  }
  0x76   :  { %2152 = vmatprep.mubr.bf16.mxu1 %v13372_v19  ;;  %v13436_v19 = vld [vmem:[%s20164_s0 + $0x17c] ss:$36 sps:$4 sm:$0xff]  }
  0x77   :  { %2190 = vmatpush2.bf16.msra.mxu0 %v13364_v20  ;;  %v13475_v20 = vld [vmem:[%s20165_s1 + $0x8] ss:$12 sps:$4 sm:$0xff]  }
  0x78   :  { %2303 = vmatpush2.bf16.msra.mxu1 %v13367_v21  ;;  %2191 = vmatprep.subr.bf16.mxu0 %v13378_v22  ;;  %v13443_v21 = vld [vmem:[%s20164_s0 + $0x184] ss:$36 sps:$4 sm:$0xff]   ;;  %v13481_v22 = vld [vmem:[%s20165_s1 + $0x2f0] ss:$12 sps:$4 sm:$0xff]  }
  0x79   :  { %2304 = vmatprep.subr.bf16.mxu1 %v13381_v23  ;;  %v13483_v23 = vld [vmem:[%s20165_s1 + $0x470] ss:$12 sps:$4 sm:$0xff]  }
  0x7a   :  { %2040 = vmatmul.mubr.bf16.gmra.mxu0 %v13374_v24  ;;  %v13439_v24 = vld [vmem:[%s20164_s0 + $0x178] ss:$36 sps:$4 sm:$0xff]  }
  0x7b   :  { %2153 = vmatmul.mubr.bf16.gmra.mxu1 %v13375_v25  ;;  %2192 = vmatpush2.bf16.msra.mxu0 %v13376_v26  ;;  %v13445_v25 = vld [vmem:[%s20164_s0 + $0x180] ss:$36 sps:$4 sm:$0xff]  }
  0x7c   :  { %2305 = vmatpush2.bf16.msra.mxu1 %v13379_v27  ;;  %2193 = vmatprep.subr.bf16.mxu0 %v13384_v28  ;;  %v13449_v26 = vld [vmem:[%s20164_s0 + $0x1c4] ss:$36 sps:$4 sm:$0xff]   ;;  %v13456_v27 = vld [vmem:[%s20164_s0 + $0x1cc] ss:$36 sps:$4 sm:$0xff]  }
  0x7d   :  { %2306 = vmatprep.subr.bf16.mxu1 %v13387_v29  ;;  %2195 = vmatprep.mubr.bf16.mxu0 %v13390_v30  ;;  %v13452_v28 = vld [vmem:[%s20164_s0 + $0x1c0] ss:$36 sps:$4 sm:$0xff]   ;;  %v13458_v29 = vld [vmem:[%s20164_s0 + $0x1c8] ss:$36 sps:$4 sm:$0xff]  }
  0x7e   :  { %2308 = vmatprep.mubr.bf16.mxu1 %v13396_v31  ;;  %v13462_v30 = vld [vmem:[%s20164_s0 + $0x20c] ss:$36 sps:$4 sm:$0xff]   ;;  %v13469_v31 = vld [vmem:[%s20164_s0 + $0x214] ss:$36 sps:$4 sm:$0xff]  }
  0x7f   :  { %2194 = vmatpush2.bf16.msra.mxu0 %v13382_v32  ;;  %v13465_v32 = vld [vmem:[%s20164_s0 + $0x208] ss:$36 sps:$4 sm:$0xff]  }
  0x80   :  { %2307 = vmatpush2.bf16.msra.mxu1 %v13385_v33  ;;  %2389 = vmatprep.subr.bf16.mxu0 %v13393_v35  ;;  %v13471_v33 = vld [vmem:[%s20164_s0 + $0x210] ss:$36 sps:$4 sm:$0xff]   ;;  %v14356_v35 = vld [vmem:[%s20164_s0 + $0x4] ss:$36 sps:$4 sm:$0xff]  }
  0x81   :  { %12815 = vmatprep.subr.bf16.mxu1 %v13433_v39  ;;  %v13485_v39 = vld [vmem:[%s20165_s1 + $0x2d8] ss:$12 sps:$4 sm:$0xff]  }
  0x82   :  { %2196 = vmatmul.mubr.bf16.vlgmr.msra.gmra.mxu0 %v13388_v34  ;;  %v20179_v34 = vmov 0  }
  0x83   :  { %2309 = vmatmul.mubr.bf16.vlgmr.msra.gmra.mxu1 %v13394_v37  ;;  %2390 = vmatpush1.bf16.msra.mxu0 %v13391_v36  ;;  %v13476_v36 = vld [vmem:[%s20164_s0 + $0x20] ss:$36 sps:$4 sm:$0xff]   ;;  %v13482_v37 = vld [vmem:[%s20165_s1 + $0x230] ss:$12 sps:$4 sm:$0xff]  }
  0x84   :  { %2205 = vmatprep.mubr.bf16.mxu0 %v13397_v38  ;;  %2391 = vmatprep.subr.bf16.mxu0 %v13402_v40  ;;  %v13484_v38 = vld [vmem:[%s20165_s1 + $0x3b0] ss:$12 sps:$4 sm:$0xff]   ;;  %v13487_v40 = vld [vmem:[%s20165_s1 + $0x458] ss:$12 sps:$4 sm:$0xff]  }
  0x85   :  { %2318 = vmatprep.mubr.bf16.mxu1 %v13403_v41  ;;  %12816 = vmatpush3.bf16.msra.mxu1 %v13434_v42  ;;  %v14357_v41 = vld [vmem:[%s20164_s0] ss:$36 sps:$4 sm:$0xff]  }
  0x86   :  { %12817 = vmatprep.subr.bf16.mxu1 %v13435_v43  ;;  %v13486_v42 = vld [vmem:[%s20165_s1 + $0x218] ss:$12 sps:$4 sm:$0xff]   ;;  %v14358_v43 = vld [vmem:[%s20164_s0 + $0x4c] ss:$36 sps:$4 sm:$0xff]  }
  0x87   :  { %2392 = vmatpush1.bf16.msra.mxu0 %v13400_v44  ;;  %v13488_v44 = vld [vmem:[%s20165_s1 + $0x398] ss:$12 sps:$4 sm:$0xff]  }
  0x88   :  { %2393 = vmatprep.subr.bf16.mxu0 %v13411_v47  ;;  %v13492_v47 = vld [vmem:[%s20165_s1 + $0x440] ss:$12 sps:$4 sm:$0xff]  }
  0x89   :  { %12818 = vmatpush3.bf16.msra.mxu1 %v13438_v49  ;;  %v13493_v49 = vld [vmem:[%s20165_s1 + $0x380] ss:$12 sps:$4 sm:$0xff]  }
  0x8a   :  { %2206 = vmatmul.mubr.bf16.gmra.mxu0 %v13399_v45  ;;  %12819 = vmatprep.subr.bf16.mxu1 %v13446_v53  ;;  %v13477_v45 = vld [vmem:[%s20164_s0 + $0x68] ss:$36 sps:$4 sm:$0xff]  }
  0x8b   :  { %2319 = vmatmul.mubr.bf16.gmra.mxu1 %v13405_v46  ;;  %2215 = vmatprep.mubr.bf16.mxu0 %v13406_v48  ;;  %v13490_v46 = vld [vmem:[%s20165_s1 + $0x2c0] ss:$12 sps:$4 sm:$0xff]   ;;  %v13495_v53 = vld [vmem:[%s20165_s1 + $0x1e8] ss:$12 sps:$4 sm:$0xff]  }
  0x8c   :  { %2328 = vmatprep.mubr.bf16.mxu1 %v13412_v51  ;;  %2394 = vmatpush1.bf16.msra.mxu0 %v13409_v50  ;;  %v13491_v48 = vld [vmem:[%s20165_s1 + $0x200] ss:$12 sps:$4 sm:$0xff]   ;;  %v13494_v50 = vld [vmem:[%s20165_s1 + $0x2a8] ss:$12 sps:$4 sm:$0xff]  }
  0x8d   :  { %2395 = vmatprep.subr.bf16.mxu0 %v13420_v52  ;;  %12820 = vmatpush3.bf16.msra.mxu1 %v13447_v54  ;;  %v13496_v51 = vld [vmem:[%s20165_s1 + $0x428] ss:$12 sps:$4 sm:$0xff]  }
  0x8e   :  { %12821 = vmatprep.subr.bf16.mxu1 %v13448_v55  ;;  %v14359_v52 = vld [vmem:[%s20164_s0 + $0x48] ss:$36 sps:$4 sm:$0xff]   ;;  %v14360_v54 = vld [vmem:[%s20164_s0 + $0x94] ss:$36 sps:$4 sm:$0xff]  }
  0x8f   :  { %v13497_v55 = vld [vmem:[%s20165_s1 + $0x368] ss:$12 sps:$4 sm:$0xff]  }
  0x90   :  { %2396 = vmatpush1.bf16.msra.mxu0 %v13418_v58  ;;  %v13501_v58 = vld [vmem:[%s20165_s1 + $0x410] ss:$12 sps:$4 sm:$0xff]  }
  0x91   :  { %2397 = vmatprep.subr.bf16.mxu0 %v13429_v61  ;;  %12822 = vmatpush3.bf16.msra.mxu1 %v13451_v62  ;;  %v13503_v61 = vld [vmem:[%s20165_s1 + $0x278] ss:$12 sps:$4 sm:$0xff]  }
  0x92   :  { %2216 = vmatmul.mubr.bf16.gmra.mxu0 %v13408_v56  ;;  %12823 = vmatprep.subr.bf16.mxu1 %v13459_v1  ;;  %v13478_v56 = vld [vmem:[%s20164_s0 + $0xb0] ss:$36 sps:$4 sm:$0xff]   ;;  %v13505_v62 = vld [vmem:[%s20165_s1 + $0x3f8] ss:$12 sps:$4 sm:$0xff]   ;;  %v14362_v1 = vld [vmem:[%s20164_s0 + $0xdc] ss:$36 sps:$4 sm:$0xff]  }
  0x93   :  { %2329 = vmatmul.mubr.bf16.gmra.mxu1 %v13414_v57  ;;  %2225 = vmatprep.mubr.bf16.mxu0 %v13415_v59  ;;  %v13499_v57 = vld [vmem:[%s20165_s1 + $0x290] ss:$12 sps:$4 sm:$0xff]  }
  0x94   :  { %2338 = vmatprep.mubr.bf16.mxu1 %v13421_v60  ;;  %2398 = vmatpush1.bf16.msra.mxu0 %v13427_v63  ;;  %v13500_v59 = vld [vmem:[%s20165_s1 + $0x1d0] ss:$12 sps:$4 sm:$0xff]  }
  0x95   :  { %2399 = vmatprep.subr.bf16.mxu0 %v13442_v0  ;;  %12824 = vmatpush3.bf16.msra.mxu1 %v13460_v2  ;;  %v13502_v60 = vld [vmem:[%s20165_s1 + $0x350] ss:$12 sps:$4 sm:$0xff]   ;;  %v13504_v0 = vld [vmem:[%s20165_s1 + $0x1b8] ss:$12 sps:$4 sm:$0xff]  }
  0x96   :  { %12825 = vmatprep.subr.bf16.mxu1 %v13461_v3  ;;  %v14361_v63 = vld [vmem:[%s20164_s0 + $0x90] ss:$36 sps:$4 sm:$0xff]   ;;  %v13506_v2 = vld [vmem:[%s20165_s1 + $0x338] ss:$12 sps:$4 sm:$0xff]  }
  0x97   :  { %v13479_v3 = vld [vmem:[%s20164_s0 + $0xf8] ss:$36 sps:$4 sm:$0xff]  }
  0x98   :  { %2400 = vmatpush1.bf16.msra.mxu0 %v13440_v6  ;;  %v13509_v6 = vld [vmem:[%s20165_s1 + $0x1a0] ss:$12 sps:$4 sm:$0xff]  }
  0x99   :  { %2401 = vmatprep.subr.bf16.mxu0 %v13455_v9  ;;  %12826 = vmatpush3.bf16.msra.mxu1 %v13464_v10  ;;  %v13514_v9 = vld [vmem:[%s20165_s1 + $0x3c8] ss:$12 sps:$4 sm:$0xff]   ;;  %v14363_v10 = vld [vmem:[%s20164_s0 + $0xd8] ss:$36 sps:$4 sm:$0xff]  }
  0x9a   :  { %2226 = vmatmul.mubr.bf16.gmra.mxu0 %v13417_v4  ;;  %12827 = vmatprep.subr.bf16.mxu1 %v13472_v13  ;;  %v13508_v4 = vld [vmem:[%s20165_s1 + $0x260] ss:$12 sps:$4 sm:$0xff]   ;;  %v14364_v13 = vld [vmem:[%s20164_s0 + $0x124] ss:$36 sps:$4 sm:$0xff]  }
  0x9b   :  { %2339 = vmatmul.mubr.bf16.gmra.mxu1 %v13423_v5  ;;  %2235 = vmatprep.mubr.bf16.mxu0 %v13424_v7  ;;  %v13510_v5 = vld [vmem:[%s20165_s1 + $0x3e0] ss:$12 sps:$4 sm:$0xff]  }
  0x9c   :  { %2348 = vmatprep.mubr.bf16.mxu1 %v13430_v8  ;;  %2402 = vmatpush1.bf16.msra.mxu0 %v13453_v11  ;;  %v13511_v7 = vld [vmem:[%s20165_s1 + $0x320] ss:$12 sps:$4 sm:$0xff]   ;;  %v13512_v8 = vld [vmem:[%s20165_s1 + $0x248] ss:$12 sps:$4 sm:$0xff]  }
  0x9d   :  { %2403 = vmatprep.subr.bf16.mxu0 %v13468_v12  ;;  %12828 = vmatpush3.bf16.msra.mxu1 %v13473_v14  ;;  %v13513_v11 = vld [vmem:[%s20165_s1 + $0x188] ss:$12 sps:$4 sm:$0xff]   ;;  %v13516_v14 = vld [vmem:[%s20165_s1 + $0x5f0] ss:$12 sps:$4 sm:$0xff]  }
  0x9e   :  { %12829 = vmatprep.subr.bf16.mxu1 %v13474_v15  ;;  %v13515_v12 = vld [vmem:[%s20165_s1 + $0x308] ss:$12 sps:$4 sm:$0xff]   ;;  %v13519_v15 = vld [vmem:[%s20165_s1 + $0x6b0] ss:$12 sps:$4 sm:$0xff]  }
  0xa0   :  { %2404 = vmatpush1.bf16.msra.mxu0 %v13466_v18  ;;  %v14366_v18 = vld [vmem:[%s20164_s0 + $0x16c] ss:$36 sps:$4 sm:$0xff]  }
  0xa1   :  { %12830 = vmatpush3.bf16.msra.mxu1 %v13475_v20  ;;  %12879 = vmatprep.subr.bf16.mxu0 %v13481_v22  ;;  %v14367_v20 = vld [vmem:[%s20164_s0 + $0x168] ss:$36 sps:$4 sm:$0xff]   ;;  %v13498_v22 = vld [vmem:[%s20164_s0 + $0x1d0] ss:$36 sps:$4 sm:$0xff]  }
  0xa2   :  { %2236 = vmatmul.mubr.bf16.gmra.mxu0 %v13426_v16  ;;  %12943 = vmatprep.subr.bf16.mxu1 %v13483_v23  ;;  %v13480_v16 = vld [vmem:[%s20164_s0 + $0x140] ss:$36 sps:$4 sm:$0xff]   ;;  %v14369_v23 = vld [vmem:[%s20164_s0 + $0x1b0] ss:$36 sps:$4 sm:$0xff]  }
  0xa3   :  { %2349 = vmatmul.mubr.bf16.gmra.mxu1 %v13432_v17  ;;  %2245 = vmatprep.mubr.bf16.mxu0 %v13436_v19  ;;  %v14365_v17 = vld [vmem:[%s20164_s0 + $0x120] ss:$36 sps:$4 sm:$0xff]   ;;  %v13489_v19 = vld [vmem:[%s20164_s0 + $0x188] ss:$36 sps:$4 sm:$0xff]  }
  0xa4   :  { %2358 = vmatprep.mubr.bf16.mxu1 %v13443_v21  ;;  %v14368_v21 = vld [vmem:[%s20164_s0 + $0x1b4] ss:$36 sps:$4 sm:$0xff]  }
  0xaa   :  { %2246 = vmatmul.mubr.bf16.gmra.mxu0 %v13439_v24  ;;  %v14370_v24 = vld [vmem:[%s20164_s0 + $0x1fc] ss:$36 sps:$4 sm:$0xff]  }
  0xab   :  { %2359 = vmatmul.mubr.bf16.gmra.mxu1 %v13445_v25  ;;  %2255 = vmatprep.mubr.bf16.mxu0 %v13449_v26  ;;  %v13507_v25 = vld [vmem:[%s20164_s0 + $0x218] ss:$36 sps:$4 sm:$0xff]  }
  0xac   :  { %2368 = vmatprep.mubr.bf16.mxu1 %v13456_v27  ;;  %v14371_v26 = vld [vmem:[%s20164_s0 + $0x1f8] ss:$36 sps:$4 sm:$0xff]   ;;  %v14372_v27 = vld [vmem:[%s20164_s0 + $0xc] ss:$36 sps:$4 sm:$0xff]  }
  0xb2   :  { %2256 = vmatmul.mubr.bf16.gmra.mxu0 %v13452_v28  ;;  %v14373_v28 = vld [vmem:[%s20164_s0 + $0x14] ss:$36 sps:$4 sm:$0xff]  }
  0xb3   :  { %2369 = vmatmul.mubr.bf16.gmra.mxu1 %v13458_v29  ;;  %2265 = vmatprep.mubr.bf16.mxu0 %v13462_v30  ;;  %v13517_v29 = vld [vmem:[%s20165_s1 + $0x530] ss:$12 sps:$4 sm:$0xff]   ;;  %v13518_v30 = vld [vmem:[%s20165_s1 + $0x5d8] ss:$12 sps:$4 sm:$0xff]  }
  0xb4   :  { %2378 = vmatprep.mubr.bf16.mxu1 %v13469_v31  ;;  %v13522_v31 = vld [vmem:[%s20165_s1 + $0x698] ss:$12 sps:$4 sm:$0xff]  }
  0xba   :  { %2266 = vmatmul.mubr.bf16.gmra.mxu0 %v13465_v32 }
  0xbb   :  { %2379 = vmatmul.mubr.bf16.gmra.mxu1 %v13471_v33  ;;  %2421 = vmatprep.mubr.bf16.mxu0 %v20179_v34 }
  0xbc   :  { %2534 = vmatprep.mubr.bf16.mxu1 %v14356_v35  ;;  %v14374_v35 = vld [vmem:[%s20164_s0 + $0x8] ss:$36 sps:$4 sm:$0xff]  }
  0xc2   :  { %2422 = vmatmul.mubr.bf16.vlgmr.msra.gmra.mxu0 %v13476_v36  ;;  %v14375_v36 = vld [vmem:[%s20164_s0 + $0x10] ss:$36 sps:$4 sm:$0xff]  }
  0xc3   :  { %2535 = vmatmul.mubr.bf16.vlgmr.msra.gmra.mxu1 %v14357_v41  ;;  %2431 = vmatprep.mubr.bf16.mxu0 %v20179_v34 }
  0xc4   :  { %2542 = vmatprep.mubr.bf16.mxu1 %v14358_v43  ;;  %12880 = vmatpush3.bf16.msra.mxu0 %v13482_v37  ;;  %v13521_v43 = vld [vmem:[%s20165_s1 + $0x5c0] ss:$12 sps:$4 sm:$0xff]  }
  0xc5   :  { %12944 = vmatpush3.bf16.msra.mxu1 %v13484_v38  ;;  %12881 = vmatprep.subr.bf16.mxu0 %v13485_v39  ;;  %v14376_v38 = vld [vmem:[%s20164_s0 + $0x54] ss:$36 sps:$4 sm:$0xff]   ;;  %v14377_v39 = vld [vmem:[%s20164_s0 + $0x5c] ss:$36 sps:$4 sm:$0xff]  }
  0xc6   :  { %12945 = vmatprep.subr.bf16.mxu1 %v13487_v40 }
  0xc8   :  { %12882 = vmatpush3.bf16.msra.mxu0 %v13486_v42  ;;  %v13520_v42 = vld [vmem:[%s20165_s1 + $0x518] ss:$12 sps:$4 sm:$0xff]  }
  0xc9   :  { %12946 = vmatpush3.bf16.msra.mxu1 %v13488_v44  ;;  %12883 = vmatprep.subr.bf16.mxu0 %v13490_v46  ;;  %v13525_v44 = vld [vmem:[%s20165_s1 + $0x680] ss:$12 sps:$4 sm:$0xff]  }
  0xca   :  { %12947 = vmatprep.subr.bf16.mxu1 %v13492_v47  ;;  %2432 = vmatmul.mubr.bf16.gmra.mxu0 %v13477_v45 }
  0xcb   :  { %2543 = vmatmul.mubr.bf16.gmra.mxu1 %v14359_v52  ;;  %2441 = vmatprep.mubr.bf16.mxu0 %v20179_v34  ;;  %v13524_v52 = vld [vmem:[%s20165_s1 + $0x5a8] ss:$12 sps:$4 sm:$0xff]  }
  0xcc   :  { %2550 = vmatprep.mubr.bf16.mxu1 %v14360_v54  ;;  %12884 = vmatpush3.bf16.msra.mxu0 %v13491_v48 }
  0xcd   :  { %12948 = vmatpush3.bf16.msra.mxu1 %v13493_v49  ;;  %12885 = vmatprep.subr.bf16.mxu0 %v13494_v50  ;;  %v13523_v49 = vld [vmem:[%s20165_s1 + $0x500] ss:$12 sps:$4 sm:$0xff]  }
  0xce   :  { %12949 = vmatprep.subr.bf16.mxu1 %v13496_v51 }
  0xd0   :  { %12886 = vmatpush3.bf16.msra.mxu0 %v13495_v53  ;;  %v15438_v53 = vld [vmem:[%s20165_s1 + $0x668] ss:$12 sps:$4 sm:$0xff]  }
  0xd1   :  { %12950 = vmatpush3.bf16.msra.mxu1 %v13497_v55  ;;  %12887 = vmatprep.subr.bf16.mxu0 %v13499_v57  ;;  %v14378_v57 = vld [vmem:[%s20164_s0 + $0x50] ss:$36 sps:$4 sm:$0xff]  }
  0xd2   :  { %12951 = vmatprep.subr.bf16.mxu1 %v13501_v58  ;;  %2442 = vmatmul.mubr.bf16.gmra.mxu0 %v13478_v56  ;;  %v14379_v58 = vld [vmem:[%s20164_s0 + $0x58] ss:$36 sps:$4 sm:$0xff]  }
  0xd3   :  { %2551 = vmatmul.mubr.bf16.gmra.mxu1 %v14361_v63  ;;  %2451 = vmatprep.mubr.bf16.mxu0 %v20179_v34 }
  0xd4   :  { %2558 = vmatprep.mubr.bf16.mxu1 %v14362_v1  ;;  %12888 = vmatpush3.bf16.msra.mxu0 %v13500_v59  ;;  %v13527_v1 = vld [vmem:[%s20165_s1 + $0x590] ss:$12 sps:$4 sm:$0xff]  }
  0xd5   :  { %12952 = vmatpush3.bf16.msra.mxu1 %v13502_v60  ;;  %12889 = vmatprep.subr.bf16.mxu0 %v13503_v61  ;;  %v14380_v60 = vld [vmem:[%s20164_s0 + $0x9c] ss:$36 sps:$4 sm:$0xff]   ;;  %v14381_v61 = vld [vmem:[%s20164_s0 + $0xa4] ss:$36 sps:$4 sm:$0xff]  }
  0xd6   :  { %12953 = vmatprep.subr.bf16.mxu1 %v13505_v62  ;;  %v13526_v62 = vld [vmem:[%s20165_s1 + $0x4e8] ss:$12 sps:$4 sm:$0xff]  }
  0xd8   :  { %12890 = vmatpush3.bf16.msra.mxu0 %v13504_v0 }
  0xd9   :  { %12954 = vmatpush3.bf16.msra.mxu1 %v13506_v2  ;;  %12891 = vmatprep.subr.bf16.mxu0 %v13508_v4  ;;  %v15465_v2 = vld [vmem:[%s20165_s1 + $0x650] ss:$12 sps:$4 sm:$0xff]  }
  0xda   :  { %12955 = vmatprep.subr.bf16.mxu1 %v13510_v5  ;;  %2452 = vmatmul.mubr.bf16.gmra.mxu0 %v13479_v3  ;;  %v14454_v3 = vmov 0.0  }
  0xdb   :  { %2559 = vmatmul.mubr.bf16.gmra.mxu1 %v14363_v10  ;;  %2461 = vmatprep.mubr.bf16.mxu0 %v20179_v34  ;;  %3181 = vst [vmem:[#allocation2 + $0x5] sm:$0x7] %v14454_v3  ;;  %3182 = vst [vmem:[#allocation2 + $0x1d] sm:$0x7] %v14454_v3  ;;  %v13529_v10 = vld [vmem:[%s20165_s1 + $0x4d0] ss:$12 sps:$4 sm:$0xff]  }
  0xdc   :  { %2566 = vmatprep.mubr.bf16.mxu1 %v14364_v13  ;;  %12892 = vmatpush3.bf16.msra.mxu0 %v13509_v6  ;;  %3183 = vst [vmem:[#allocation2 + $0x35] sm:$0x7] %v14454_v3  ;;  %3184 = vst [vmem:[#allocation2 + $0x4d] sm:$0x7] %v14454_v3  ;;  %v13534_v13 = vld [vmem:[%s20165_s1 + $0x638] ss:$12 sps:$4 sm:$0xff]  }
  0xdd   :  { %12956 = vmatpush3.bf16.msra.mxu1 %v13511_v7  ;;  %12893 = vmatprep.subr.bf16.mxu0 %v13512_v8  ;;  %3185 = vst [vmem:[#allocation2 + $0x65] sm:$0x7] %v14454_v3  ;;  %3186 = vst [vmem:[#allocation2 + $0x7d] sm:$0x7] %v14454_v3 }
  0xde   :  { %12957 = vmatprep.subr.bf16.mxu1 %v13514_v9  ;;  %3187 = vst [vmem:[#allocation2 + $0x95] sm:$0x7] %v14454_v3  ;;  %3188 = vst [vmem:[#allocation2 + $0xad] sm:$0x7] %v14454_v3 }
  0xdf   :  { %3189 = vst [vmem:[#allocation2 + $0xc5] sm:$0x7] %v14454_v3  ;;  %3190 = vst [vmem:[#allocation2 + $0xdd] sm:$0x7] %v14454_v3 }
  0xe0   :  { %12894 = vmatpush3.bf16.msra.mxu0 %v13513_v11  ;;  %3191 = vst [vmem:[#allocation2 + $0xf5] sm:$0x7] %v14454_v3  ;;  %3192 = vst [vmem:[#allocation2 + $0x10d] sm:$0x7] %v14454_v3 }
  0xe1   :  { %12958 = vmatpush3.bf16.msra.mxu1 %v13515_v12  ;;  %13007 = vmatprep.subr.bf16.mxu0 %v13516_v14  ;;  %3193 = vst [vmem:[#allocation2 + $0x125] sm:$0x7] %v14454_v3  ;;  %3194 = vst [vmem:[#allocation2 + $0x13d] sm:$0x7] %v14454_v3  ;;  %v13530_v12 = vld [vmem:[%s20165_s1 + $0x578] ss:$12 sps:$4 sm:$0xff]  }
  0xe2   :  { %13087 = vmatprep.subr.bf16.mxu1 %v13519_v15  ;;  %2462 = vmatmul.mubr.bf16.gmra.mxu0 %v13480_v16  ;;  %3195 = vst [vmem:[#allocation2 + $0x155] sm:$0x7] %v14454_v3  ;;  %3196 = vst [vmem:[#allocation2 + $0x16d] sm:$0x7] %v14454_v3  ;;  %v14382_v16 = vld [vmem:[%s20164_s0 + $0x98] ss:$36 sps:$4 sm:$0xff]  }
  0xe3   :  { %2567 = vmatmul.mubr.bf16.gmra.mxu1 %v14365_v17  ;;  %2471 = vmatprep.mubr.bf16.mxu0 %v20179_v34  ;;  %3197 = vst [vmem:[#allocation2 + $0x10] sm:$0x7] %v14454_v3  ;;  %3198 = vst [vmem:[#allocation2 + $0x28] sm:$0x7] %v14454_v3  ;;  %v14383_v17 = vld [vmem:[%s20164_s0 + $0xa0] ss:$36 sps:$4 sm:$0xff]  }
  0xe4   :  { %2574 = vmatprep.mubr.bf16.mxu1 %v14366_v18  ;;  %3199 = vst [vmem:[#allocation2 + $0x40] sm:$0x7] %v14454_v3  ;;  %3200 = vst [vmem:[#allocation2 + $0x58] sm:$0x7] %v14454_v3 }
  0xe5   :  { %3201 = vst [vmem:[#allocation2 + $0x70] sm:$0x7] %v14454_v3  ;;  %3202 = vst [vmem:[#allocation2 + $0x88] sm:$0x7] %v14454_v3 }
  0xe6   :  { %3203 = vst [vmem:[#allocation2 + $0xa0] sm:$0x7] %v14454_v3  ;;  %3204 = vst [vmem:[#allocation2 + $0xb8] sm:$0x7] %v14454_v3 }
  0xe7   :  { %3205 = vst [vmem:[#allocation2 + $0xd0] sm:$0x7] %v14454_v3  ;;  %3206 = vst [vmem:[#allocation2 + $0xe8] sm:$0x7] %v14454_v3 }
  0xe8   :  { %3207 = vst [vmem:[#allocation2 + $0x100] sm:$0x7] %v14454_v3  ;;  %3208 = vst [vmem:[#allocation2 + $0x118] sm:$0x7] %v14454_v3 }
  0xe9   :  { %3209 = vst [vmem:[#allocation2 + $0x130] sm:$0x7] %v14454_v3  ;;  %3210 = vst [vmem:[#allocation2 + $0x148] sm:$0x7] %v14454_v3 }
  0xea   :  { %2472 = vmatmul.mubr.bf16.gmra.mxu0 %v13489_v19  ;;  %3211 = vst [vmem:[#allocation2 + $0x160] sm:$0x7] %v14454_v3  ;;  %3212 = vst [vmem:[#allocation2 + $0x178] sm:$0x7] %v14454_v3  ;;  %v14384_v19 = vld [vmem:[%s20164_s0 + $0xe4] ss:$36 sps:$4 sm:$0xff]  }
  0xeb   :  { %2575 = vmatmul.mubr.bf16.gmra.mxu1 %v14367_v20  ;;  %2481 = vmatprep.mubr.bf16.mxu0 %v20179_v34  ;;  %v14385_v20 = vld [vmem:[%s20164_s0 + $0xec] ss:$36 sps:$4 sm:$0xff]   ;;  %v14393_v3 = vld [vmem:[%s20164_s0 + $0x17c] ss:$36 sps:$4 sm:$0xff]  }
  0xec   :  { %2582 = vmatprep.mubr.bf16.mxu1 %v14368_v21 }
  0xf2   :  { %2482 = vmatmul.mubr.bf16.gmra.mxu0 %v13498_v22 }
  0xf3   :  { %2583 = vmatmul.mubr.bf16.gmra.mxu1 %v14369_v23  ;;  %2491 = vmatprep.mubr.bf16.mxu0 %v20179_v34  ;;  %v13532_v23 = vld [vmem:[%s20165_s1 + $0x4b8] ss:$12 sps:$4 sm:$0xff]  }
  0xf4   :  { %2590 = vmatprep.mubr.bf16.mxu1 %v14370_v24 }
  0xfa   :  { %2492 = vmatmul.mubr.bf16.gmra.mxu0 %v13507_v25  ;;  %v13533_v25 = vld [vmem:[%s20165_s1 + $0x560] ss:$12 sps:$4 sm:$0xff]  }
  0xfb   :  { %2591 = vmatmul.mubr.bf16.gmra.mxu1 %v14371_v26  ;;  %2631 = vmatprep.mubr.bf16.mxu0 %v14372_v27  ;;  %v13537_v26 = vld [vmem:[%s20165_s1 + $0x620] ss:$12 sps:$4 sm:$0xff]  }
  0xfc   :  { %2728 = vmatprep.mubr.bf16.mxu1 %v14373_v28 }
 0x102   :  { %v1971_v32 = vpop.f32.mrf.mxu0  ;;  %2632 = vmatmul.mubr.bf16.vlgmr.msra.gmra.mxu0 %v14374_v35 }
 0x103   :  { %v2084_v33 = vpop.f32.mrf.mxu1  ;;  %2729 = vmatmul.mubr.bf16.vlgmr.msra.gmra.mxu1 %v14375_v36  ;;  %2639 = vmatprep.mubr.bf16.mxu0 %v14376_v38 }
 0x104   :  { %v15408_v37 = vadd.f32 %v2084_v33, %v1971_v32  ;;  %2736 = vmatprep.mubr.bf16.mxu1 %v14377_v39  ;;  %v1973_v40 = vpop.f32.mrf.mxu0  ;;  %13008 = vmatpush3.bf16.msra.mxu0 %v13517_v29  ;;  %v13535_v29 = vld [vmem:[%s20165_s1 + $0x4a0] ss:$12 sps:$4 sm:$0xff]   ;;  %v13539_v32 = vld [vmem:[%s20165_s1 + $0x608] ss:$12 sps:$4 sm:$0xff]  }
 0x105   :  { %v2086_v41 = vpop.f32.mrf.mxu1  ;;  %13088 = vmatpush3.bf16.msra.mxu1 %v13519_v15  ;;  %13009 = vmatprep.subr.bf16.mxu0 %v13518_v30 }
 0x106   :  { %v15425_v45 = vadd.f32 %v2086_v41, %v1973_v40  ;;  %13089 = vmatprep.subr.bf16.mxu1 %v13522_v31  ;;  %v1975_v46 = vpop.f32.mrf.mxu0  ;;  %v14386_v40 = vld [vmem:[%s20164_s0 + $0xe0] ss:$36 sps:$4 sm:$0xff]   ;;  %v14387_v41 = vld [vmem:[%s20164_s0 + $0xe8] ss:$36 sps:$4 sm:$0xff]  }
 0x107   :  { %v2088_v47 = vpop.f32.mrf.mxu1 }
 0x108   :  { %v15427_v48 = vadd.f32 %v2088_v47, %v1975_v46  ;;  %v1977_v50 = vpop.f32.mrf.mxu0  ;;  %13010 = vmatpush3.bf16.msra.mxu0 %v13520_v42  ;;  %v13538_v42 = vld [vmem:[%s20165_s1 + $0x488] ss:$12 sps:$4 sm:$0xff]  }
 0x109   :  { %v2090_v51 = vpop.f32.mrf.mxu1  ;;  %13090 = vmatpush3.bf16.msra.mxu1 %v13522_v31  ;;  %13011 = vmatprep.subr.bf16.mxu0 %v13521_v43  ;;  %v13536_v31 = vld [vmem:[%s20165_s1 + $0x548] ss:$12 sps:$4 sm:$0xff]  }
 0x10a   :  { %v15440_v54 = vadd.f32 %v2090_v51, %v1977_v50  ;;  %13091 = vmatprep.subr.bf16.mxu1 %v13525_v44  ;;  %v1981_v55 = vpop.f32.mrf.mxu0  ;;  %2640 = vmatmul.mubr.bf16.gmra.mxu0 %v14378_v57  ;;  %v14389_v46 = vld [vmem:[%s20164_s0 + $0x134] ss:$36 sps:$4 sm:$0xff]  }
 0x10b   :  { %v2094_v56 = vpop.f32.mrf.mxu1  ;;  %2737 = vmatmul.mubr.bf16.gmra.mxu1 %v14379_v58  ;;  %2647 = vmatprep.mubr.bf16.mxu0 %v14380_v60  ;;  %v13542_v47 = vld [vmem:[%s20168_s4 + $0xf4] ss:$8 sps:$4 sm:$0xff]  }
 0x10c   :  { %v15448_v59 = vadd.f32 %v2094_v56, %v1981_v55  ;;  %2744 = vmatprep.mubr.bf16.mxu1 %v14381_v61  ;;  %v1983_v63 = vpop.f32.mrf.mxu0  ;;  %13012 = vmatpush3.bf16.msra.mxu0 %v13523_v49  ;;  %v13545_v49 = vld [vmem:[%s20168_s4 + $0x74] ss:$8 sps:$4 sm:$0xff]  }
 0x10d   :  { %v2096_v0 = vpop.f32.mrf.mxu1  ;;  %13092 = vmatpush3.bf16.msra.mxu1 %v13525_v44  ;;  %13013 = vmatprep.subr.bf16.mxu0 %v13524_v52  ;;  %v14388_v44 = vld [vmem:[%s20164_s0 + $0x12c] ss:$36 sps:$4 sm:$0xff]  }
 0x10e   :  { %v15467_v4 = vadd.f32 %v2096_v0, %v1983_v63  ;;  %13093 = vmatprep.subr.bf16.mxu1 %v15438_v53  ;;  %v1985_v5 = vpop.f32.mrf.mxu0  ;;  %v14390_v63 = vld [vmem:[%s20164_s0 + $0x128] ss:$36 sps:$4 sm:$0xff]   ;;  %v14391_v0 = vld [vmem:[%s20164_s0 + $0x130] ss:$36 sps:$4 sm:$0xff]  }
 0x10f   :  { %v2098_v6 = vpop.f32.mrf.mxu1 }
 0x110   :  { %v15470_v7 = vadd.f32 %v2098_v6, %v1985_v5  ;;  %v1987_v8 = vpop.f32.mrf.mxu0  ;;  %13014 = vmatpush3.bf16.msra.mxu0 %v13526_v62 }
 0x111   :  { %v2100_v9 = vpop.f32.mrf.mxu1  ;;  %13094 = vmatpush3.bf16.msra.mxu1 %v15438_v53  ;;  %13015 = vmatprep.subr.bf16.mxu0 %v13527_v1 }
 0x112   :  { %v15476_v11 = vadd.f32 %v2100_v9, %v1987_v8  ;;  %13095 = vmatprep.subr.bf16.mxu1 %v15465_v2  ;;  %v1991_v14 = vpop.f32.mrf.mxu0  ;;  %2648 = vmatmul.mubr.bf16.gmra.mxu0 %v14382_v16 }
 0x113   :  { %v2104_v15 = vpop.f32.mrf.mxu1  ;;  %2745 = vmatmul.mubr.bf16.gmra.mxu1 %v14383_v17  ;;  %2655 = vmatprep.mubr.bf16.mxu0 %v14384_v19  ;;  %v14394_v19 = vld [vmem:[%s20164_s0 + $0x170] ss:$36 sps:$4 sm:$0xff]  }
 0x114   :  { %v15491_v18 = vadd.f32 %v2104_v15, %v1991_v14  ;;  %2752 = vmatprep.mubr.bf16.mxu1 %v14385_v20  ;;  %v1993_v21 = vpop.f32.mrf.mxu0  ;;  %13016 = vmatpush3.bf16.msra.mxu0 %v13529_v10  ;;  %v14395_v20 = vld [vmem:[%s20164_s0 + $0x178] ss:$36 sps:$4 sm:$0xff]  }
 0x115   :  { %v2106_v22 = vpop.f32.mrf.mxu1  ;;  %13096 = vmatpush3.bf16.msra.mxu1 %v15465_v2  ;;  %13017 = vmatprep.subr.bf16.mxu0 %v13530_v12  ;;  %v14392_v2 = vld [vmem:[%s20164_s0 + $0x174] ss:$36 sps:$4 sm:$0xff]  }
 0x116   :  { %v15503_v24 = vadd.f32 %v2106_v22, %v1993_v21  ;;  %13097 = vmatprep.subr.bf16.mxu1 %v13534_v13  ;;  %v1995_v27 = vpop.f32.mrf.mxu0  ;;  %v14396_v22 = vld [vmem:[%s20164_s0 + $0x1bc] ss:$36 sps:$4 sm:$0xff]  }
 0x117   :  { %v2108_v28 = vpop.f32.mrf.mxu1 }
 0x118   :  { %v15514_v30 = vadd.f32 %v2108_v28, %v1995_v27  ;;  %v1997_v33 = vpop.f32.mrf.mxu0  ;;  %13018 = vmatpush3.bf16.msra.mxu0 %v13532_v23  ;;  %v14397_v23 = vld [vmem:[%s20164_s0 + $0x1c4] ss:$36 sps:$4 sm:$0xff]  }
 0x119   :  { %v2110_v35 = vpop.f32.mrf.mxu1  ;;  %13098 = vmatpush3.bf16.msra.mxu1 %v13534_v13  ;;  %13019 = vmatprep.subr.bf16.mxu0 %v13533_v25 }
 0x11a   :  { %v15522_v36 = vadd.f32 %v2110_v35, %v1997_v33  ;;  %13099 = vmatprep.subr.bf16.mxu1 %v13537_v26  ;;  %v2001_v38 = vpop.f32.mrf.mxu0  ;;  %2656 = vmatmul.mubr.bf16.gmra.mxu0 %v14386_v40  ;;  %v14398_v40 = vld [vmem:[%s20164_s0 + $0x1b8] ss:$36 sps:$4 sm:$0xff]  }
 0x11b   :  { %v2114_v39 = vpop.f32.mrf.mxu1  ;;  %2753 = vmatmul.mubr.bf16.gmra.mxu1 %v14387_v41  ;;  %2663 = vmatprep.mubr.bf16.mxu0 %v14388_v44  ;;  %v14399_v41 = vld [vmem:[%s20164_s0 + $0x1c0] ss:$36 sps:$4 sm:$0xff]  }
 0x11c   :  { %v15533_v43 = vadd.f32 %v2114_v39, %v2001_v38  ;;  %2760 = vmatprep.mubr.bf16.mxu1 %v14389_v46  ;;  %v2003_v50 = vpop.f32.mrf.mxu0  ;;  %13020 = vmatpush3.bf16.msra.mxu0 %v13535_v29  ;;  %v14400_v44 = vld [vmem:[%s20164_s0 + $0x204] ss:$36 sps:$4 sm:$0xff]   ;;  %v14401_v46 = vld [vmem:[%s20164_s0 + $0x20c] ss:$36 sps:$4 sm:$0xff]  }
 0x11d   :  { %v2116_v51 = vpop.f32.mrf.mxu1  ;;  %13100 = vmatpush3.bf16.msra.mxu1 %v13537_v26  ;;  %13021 = vmatprep.subr.bf16.mxu0 %v13536_v31 }
 0x11e   :  { %v15547_v52 = vadd.f32 %v2116_v51, %v2003_v50  ;;  %13101 = vmatprep.subr.bf16.mxu1 %v13539_v32  ;;  %v2005_v53 = vpop.f32.mrf.mxu0 }
 0x11f   :  { %v2118_v55 = vpop.f32.mrf.mxu1 }
 0x120   :  { %v15549_v56 = vadd.f32 %v2118_v55, %v2005_v53  ;;  %v2007_v57 = vpop.f32.mrf.mxu0  ;;  %13022 = vmatpush3.bf16.msra.mxu0 %v13538_v42 }
 0x121   :  { %v2120_v58 = vpop.f32.mrf.mxu1  ;;  %13102 = vmatpush3.bf16.msra.mxu1 %v13539_v32  ;;  %3583 = vmatprep.subr.bf16.mxu0 %v13545_v49 }
 0x122   :  { %v15551_v60 = vadd.f32 %v2120_v58, %v2007_v57  ;;  %3390 = vmatprep.subr.bf16.mxu1 %v13542_v47  ;;  %v2011_v61 = vpop.f32.mrf.mxu0  ;;  %2664 = vmatmul.mubr.bf16.gmra.mxu0 %v14390_v63 }
 0x123   :  { %v2124_v62 = vpop.f32.mrf.mxu1  ;;  %2761 = vmatmul.mubr.bf16.gmra.mxu1 %v14391_v0  ;;  %2671 = vmatprep.mubr.bf16.mxu0 %v14392_v2  ;;  %v14402_v0 = vld [vmem:[%s20164_s0 + $0x200] ss:$36 sps:$4 sm:$0xff]   ;;  %v14403_v2 = vld [vmem:[%s20164_s0 + $0x208] ss:$36 sps:$4 sm:$0xff]  }
 0x124   :  { %v15559_v1 = vadd.f32 %v2124_v62, %v2011_v61  ;;  %2768 = vmatprep.mubr.bf16.mxu1 %v14393_v3  ;;  %v2013_v5 = vpop.f32.mrf.mxu0 }
 0x125   :  { %v2126_v6 = vpop.f32.mrf.mxu1 }
 0x126   :  { %v15567_v8 = vadd.f32 %v2126_v6, %v2013_v5  ;;  %v2015_v9 = vpop.f32.mrf.mxu0  ;;  %v14404_v5 = vld [vmem:[%s20164_s0 + $0x1c] ss:$36 sps:$4 sm:$0xff]  }
 0x127   :  { %v2128_v10 = vpop.f32.mrf.mxu1  ;;  %v14405_v6 = vld [vmem:[%s20164_s0 + $0x20] ss:$36 sps:$4 sm:$0xff]  }
 0x128   :  { %v15569_v12 = vadd.f32 %v2128_v10, %v2015_v9  ;;  %v2017_v13 = vpop.f32.mrf.mxu0 }
 0x129   :  { %v2130_v14 = vpop.f32.mrf.mxu1 }
 0x12a   :  { %v15571_v15 = vadd.f32 %v2130_v14, %v2017_v13  ;;  %v2021_v16 = vpop.f32.mrf.mxu0  ;;  %2672 = vmatmul.mubr.bf16.gmra.mxu0 %v14394_v19 }
 0x12b   :  { %v2134_v17 = vpop.f32.mrf.mxu1  ;;  %2769 = vmatmul.mubr.bf16.gmra.mxu1 %v14395_v20  ;;  %2679 = vmatprep.mubr.bf16.mxu0 %v14396_v22 }
 0x12c   :  { %v15579_v21 = vadd.f32 %v2134_v17, %v2021_v16  ;;  %2776 = vmatprep.mubr.bf16.mxu1 %v14397_v23  ;;  %v2023_v25 = vpop.f32.mrf.mxu0  ;;  %v13540_v17 = vld [vmem:[%s20168_s4 + $0xf0] ss:$8 sps:$4 sm:$0xff]  }
 0x12d   :  { %v2136_v26 = vpop.f32.mrf.mxu1  ;;  %v13543_v23 = vld [vmem:[%s20168_s4 + $0x70] ss:$8 sps:$4 sm:$0xff]  }
 0x12e   :  { %v15587_v27 = vadd.f32 %v2136_v26, %v2023_v25  ;;  %v2025_v28 = vpop.f32.mrf.mxu0  ;;  %v13548_v26 = vld [vmem:[%s20168_s4 + $0xe4] ss:$8 sps:$4 sm:$0xff]  }
 0x12f   :  { %v2138_v29 = vpop.f32.mrf.mxu1 }
 0x130   :  { %v15589_v31 = vadd.f32 %v2138_v29, %v2025_v28  ;;  %v2027_v32 = vpop.f32.mrf.mxu0  ;;  %v13551_v28 = vld [vmem:[%s20168_s4 + $0x64] ss:$8 sps:$4 sm:$0xff]  }
 0x131   :  { %v2140_v33 = vpop.f32.mrf.mxu1 }
 0x132   :  { %20209 = vst [vmem:[#allocation7_spill] sm:$0xff] %v15589_v31  ;;  %v15591_v35 = vadd.f32 %v2140_v33, %v2027_v32  ;;  %v2031_v38 = vpop.f32.mrf.mxu0  ;;  %2680 = vmatmul.mubr.bf16.gmra.mxu0 %v14398_v40  ;;  %v14406_v32 = vld [vmem:[%s20164_s0 + $0x18] ss:$36 sps:$4 sm:$0xff]   ;;  %v13549_v40 = vld [vmem:[%s20168_s4 + $0x60] ss:$8 sps:$4 sm:$0xff]  }
 0x133   :  { %v2144_v39 = vpop.f32.mrf.mxu1  ;;  %2777 = vmatmul.mubr.bf16.gmra.mxu1 %v14399_v41  ;;  %2687 = vmatprep.mubr.bf16.mxu0 %v14400_v44  ;;  %v14408_v41 = vld [vmem:[%s20164_s0 + $0x64] ss:$36 sps:$4 sm:$0xff]   ;;  %v14409_v44 = vld [vmem:[%s20164_s0 + $0xb0] ss:$36 sps:$4 sm:$0xff]  }
 0x134   :  { %v15599_v42 = vadd.f32 %v2144_v39, %v2031_v38  ;;  %2784 = vmatprep.mubr.bf16.mxu1 %v14401_v46  ;;  %v2033_v47 = vpop.f32.mrf.mxu0  ;;  %v14407_v38 = vld [vmem:[%s20164_s0 + $0x68] ss:$36 sps:$4 sm:$0xff]  }
 0x135   :  { %v2146_v49 = vpop.f32.mrf.mxu1  ;;  %v13546_v39 = vld [vmem:[%s20168_s4 + $0xe0] ss:$8 sps:$4 sm:$0xff]  }
 0x136   :  { %20210 = vst [vmem:[#allocation8_spill] sm:$0xff] %v15599_v42  ;;  %v15607_v50 = vadd.f32 %v2146_v49, %v2033_v47  ;;  %v2035_v51 = vpop.f32.mrf.mxu0  ;;  %v13554_v49 = vld [vmem:[%s20168_s4 + $0xd4] ss:$8 sps:$4 sm:$0xff]  }
 0x137   :  { %v2148_v53 = vpop.f32.mrf.mxu1 }
 0x138   :  { %v15609_v55 = vadd.f32 %v2148_v53, %v2035_v51  ;;  %v2037_v57 = vpop.f32.mrf.mxu0  ;;  %v13557_v53 = vld [vmem:[%s20168_s4 + $0x54] ss:$8 sps:$4 sm:$0xff]  }
 0x139   :  { %v2150_v58 = vpop.f32.mrf.mxu1 }
 0x13a   :  { %20211 = vst [vmem:[#allocation9_spill] sm:$0xff] %v15609_v55  ;;  %v15611_v61 = vadd.f32 %v2150_v58, %v2037_v57  ;;  %v2041_v62 = vpop.f32.mrf.mxu0  ;;  %2688 = vmatmul.mubr.bf16.gmra.mxu0 %v14402_v0 }
 0x13b   :  { %v2154_v63 = vpop.f32.mrf.mxu1  ;;  %2785 = vmatmul.mubr.bf16.gmra.mxu1 %v14403_v2  ;;  %2825 = vmatprep.mubr.bf16.mxu0 %v14404_v5  ;;  %v13560_v5 = vld [vmem:[%s20168_s4 + $0xc4] ss:$8 sps:$4 sm:$0xff]  }
 0x13c   :  { %v15619_v3 = vadd.f32 %v2154_v63, %v2041_v62  ;;  %13103 = vmatprep.mubr.bf16.mxu1 %v14405_v6  ;;  %v2043_v9 = vpop.f32.mrf.mxu0  ;;  %v13552_v62 = vld [vmem:[%s20168_s4 + $0xd0] ss:$8 sps:$4 sm:$0xff]  }
 0x13d   :  { %v2156_v10 = vpop.f32.mrf.mxu1  ;;  %v13555_v63 = vld [vmem:[%s20168_s4 + $0x50] ss:$8 sps:$4 sm:$0xff]  }
 0x13e   :  { %20212 = vst [vmem:[#allocation10_spill] sm:$0xff] %v15619_v3  ;;  %v15627_v13 = vadd.f32 %v2156_v10, %v2043_v9  ;;  %v2045_v14 = vpop.f32.mrf.mxu0  ;;  %v13563_v9 = vld [vmem:[%s20168_s4 + $0x44] ss:$8 sps:$4 sm:$0xff]  }
 0x13f   :  { %v2158_v16 = vpop.f32.mrf.mxu1 }
 0x140   :  { %v15632_v19 = vadd.f32 %v2158_v16, %v2045_v14  ;;  %v2047_v20 = vpop.f32.mrf.mxu0  ;;  %v14410_v14 = vld [vmem:[%s20164_s0 + $0x60] ss:$36 sps:$4 sm:$0xff]  }
 0x141   :  { %v2160_v22 = vpop.f32.mrf.mxu1 }
 0x142   :  { %20213 = vst [vmem:[#allocation11_spill] sm:$0xff] %v15632_v19  ;;  %v15637_v25 = vadd.f32 %v2160_v22, %v2047_v20  ;;  %v15645_v29 = vpop.f32.mrf.mxu0  ;;  %2826 = vmatmul.mubr.bf16.vlgmr.msra.gmra.mxu0 %v14406_v32  ;;  %v14413_v20 = vld [vmem:[%s20164_s0 + $0x140] ss:$36 sps:$4 sm:$0xff]   ;;  %v13566_v32 = vld [vmem:[%s20168_s4 + $0xb4] ss:$8 sps:$4 sm:$0xff]  }
 0x143   :  { %v15650_v33 = vpop.f32.mrf.mxu1  ;;  %13104 = vmatmul.mubr.bf16.vlgmr.msra.gmra.mxu1 %v14407_v38  ;;  %2833 = vmatprep.mubr.bf16.mxu0 %v14408_v41  ;;  %v13558_v22 = vld [vmem:[%s20168_s4 + $0xc0] ss:$8 sps:$4 sm:$0xff]  }
 0x144   :  { %13107 = vmatprep.mubr.bf16.mxu1 %v14409_v44  ;;  %v2199_v46 = vpop.f32.mrf.mxu0  ;;  %3391 = vmatpush1.bf16.msra.mxu1 %v13540_v17  ;;  %v14412_v17 = vld [vmem:[%s20164_s0 + $0xac] ss:$36 sps:$4 sm:$0xff]  }
 0x145   :  { %v2312_v47 = vpop.f32.mrf.mxu1  ;;  %3584 = vmatpush1.bf16.msra.mxu0 %v13543_v23  ;;  %v2200_v51 = vadd.f32 %v2199_v46, %v15425_v45  ;;  %3392 = vmatprep.subr.bf16.mxu1 %v13548_v26  ;;  %v13561_v23 = vld [vmem:[%s20168_s4 + $0x40] ss:$8 sps:$4 sm:$0xff]   ;;  %v13564_v44 = vld [vmem:[%s20168_s4 + $0xb0] ss:$8 sps:$4 sm:$0xff]  }
 0x146   :  { %3585 = vmatprep.subr.bf16.mxu0 %v13551_v28  ;;  %v15674_v57 = vpop.f32.mrf.mxu0  ;;  %v13567_v46 = vld [vmem:[%s20168_s4 + $0x30] ss:$8 sps:$4 sm:$0xff]  }
 0x147   :  { %v15676_v58 = vpop.f32.mrf.mxu1  ;;  %v15684_v0 = vadd.f32 %v2312_v47, %v2200_v51  ;;  %v13572_v51 = vld [vmem:[%s20168_s4 + $0xa4] ss:$8 sps:$4 sm:$0xff]  }
 0x148   :  { %v2203_v45 = vpop.f32.mrf.mxu0  ;;  %3393 = vmatpush1.bf16.msra.mxu1 %v13546_v39  ;;  %v13569_v39 = vld [vmem:[%s20168_s4 + $0x34] ss:$8 sps:$4 sm:$0xff]  }
 0x149   :  { %v15686_v2 = vpop.f32.mrf.mxu1  ;;  %3586 = vmatpush1.bf16.msra.mxu0 %v13549_v40  ;;  %v15692_v6 = vadd.f32 %v2203_v45, %v15440_v54  ;;  %3394 = vmatprep.subr.bf16.mxu1 %v13554_v49  ;;  %v14411_v54 = vld [vmem:[%s20164_s0 + $0xf8] ss:$36 sps:$4 sm:$0xff]   ;;  %v14414_v45 = vld [vmem:[%s20164_s0 + $0xa8] ss:$36 sps:$4 sm:$0xff]  }
 0x14a   :  { %3587 = vmatprep.subr.bf16.mxu0 %v13557_v53  ;;  %v15697_v10 = vpop.f32.mrf.mxu0  ;;  %2834 = vmatmul.mubr.bf16.gmra.mxu0 %v14410_v14  ;;  %v14417_v14 = vld [vmem:[%s20164_s0 + $0x1d0] ss:$36 sps:$4 sm:$0xff]  }
 0x14b   :  { %v15702_v16 = vpop.f32.mrf.mxu1  ;;  %13108 = vmatmul.mubr.bf16.gmra.mxu1 %v14411_v54  ;;  %2841 = vmatprep.mubr.bf16.mxu0 %v14412_v17  ;;  %v13570_v54 = vld [vmem:[%s20168_s4 + $0xa0] ss:$8 sps:$4 sm:$0xff]  }
 0x14c   :  { %13111 = vmatprep.mubr.bf16.mxu1 %v14413_v20  ;;  %v2209_v26 = vpop.f32.mrf.mxu0  ;;  %3395 = vmatpush1.bf16.msra.mxu1 %v13552_v62  ;;  %v13575_v62 = vld [vmem:[%s20168_s4 + $0x24] ss:$8 sps:$4 sm:$0xff]   ;;  %v13573_v17 = vld [vmem:[%s20168_s4 + $0x20] ss:$8 sps:$4 sm:$0xff]  }
 0x14d   :  { %v2322_v28 = vpop.f32.mrf.mxu1  ;;  %3588 = vmatpush1.bf16.msra.mxu0 %v13555_v63  ;;  %v2210_v38 = vadd.f32 %v2209_v26, %v15467_v4  ;;  %3396 = vmatprep.subr.bf16.mxu1 %v13560_v5 }
 0x14e   :  { %3589 = vmatprep.subr.bf16.mxu0 %v13563_v9  ;;  %v15726_v40 = vpop.f32.mrf.mxu0  ;;  %v14416_v9 = vld [vmem:[%s20164_s0 + $0xf4] ss:$36 sps:$4 sm:$0xff]  }
 0x14f   :  { %v15728_v41 = vpop.f32.mrf.mxu1  ;;  %v15736_v47 = vadd.f32 %v2322_v28, %v2210_v38  ;;  %v13581_v28 = vld [vmem:[%s20168_s4 + $0x14] ss:$8 sps:$4 sm:$0xff]  }
 0x150   :  { %v2213_v4 = vpop.f32.mrf.mxu0  ;;  %3397 = vmatpush1.bf16.msra.mxu1 %v13558_v22 }
 0x151   :  { %v15738_v49 = vpop.f32.mrf.mxu1  ;;  %3590 = vmatpush1.bf16.msra.mxu0 %v13561_v23  ;;  %v15744_v53 = vadd.f32 %v2213_v4, %v15476_v11  ;;  %3398 = vmatprep.subr.bf16.mxu1 %v13566_v32  ;;  %v14415_v11 = vld [vmem:[%s20164_s0 + $0x188] ss:$36 sps:$4 sm:$0xff]   ;;  %v13578_v23 = vld [vmem:[%s20168_s4 + $0x94] ss:$8 sps:$4 sm:$0xff]  }
 0x152   :  { %3591 = vmatprep.subr.bf16.mxu0 %v13569_v39  ;;  %v15749_v63 = vpop.f32.mrf.mxu0  ;;  %2842 = vmatmul.mubr.bf16.gmra.mxu0 %v14414_v45  ;;  %v13576_v39 = vld [vmem:[%s20168_s4 + $0x90] ss:$8 sps:$4 sm:$0xff]   ;;  %v13587_v4 = vld [vmem:[%s20168_s4 + $0x4] ss:$8 sps:$4 sm:$0xff]  }
 0x153   :  { %v15754_v5 = vpop.f32.mrf.mxu1  ;;  %13112 = vmatmul.mubr.bf16.gmra.mxu1 %v14415_v11  ;;  %2849 = vmatprep.mubr.bf16.mxu0 %v14416_v9  ;;  %v14418_v9 = vld [vmem:[%s20164_s0 + $0xf0] ss:$36 sps:$4 sm:$0xff]  }
 0x154   :  { %13115 = vmatprep.mubr.bf16.mxu1 %v14417_v14  ;;  %v2219_v20 = vpop.f32.mrf.mxu0  ;;  %3399 = vmatpush1.bf16.msra.mxu1 %v13564_v44  ;;  %v13579_v44 = vld [vmem:[%s20168_s4 + $0x10] ss:$8 sps:$4 sm:$0xff]  }
 0x155   :  { %v2332_v22 = vpop.f32.mrf.mxu1  ;;  %3592 = vmatpush1.bf16.msra.mxu0 %v13567_v46  ;;  %v2220_v26 = vadd.f32 %v2219_v20, %v15503_v24  ;;  %3400 = vmatprep.subr.bf16.mxu1 %v13572_v51  ;;  %v13584_v24 = vld [vmem:[%s20168_s4 + $0x84] ss:$8 sps:$4 sm:$0xff]   ;;  %v14419_v20 = vld [vmem:[%s20164_s0 + $0x218] ss:$36 sps:$4 sm:$0xff]  }
 0x156   :  { %3593 = vmatprep.subr.bf16.mxu0 %v13575_v62  ;;  %v15778_v32 = vpop.f32.mrf.mxu0 }
 0x157   :  { %v15780_v38 = vpop.f32.mrf.mxu1  ;;  %v15788_v46 = vadd.f32 %v2332_v22, %v2220_v26  ;;  %v13590_v22 = vld [vmem:[%s20168_s4 + $0x174] ss:$8 sps:$4 sm:$0xff]  }
 0x158   :  { %v2223_v51 = vpop.f32.mrf.mxu0  ;;  %3401 = vmatpush1.bf16.msra.mxu1 %v13570_v54  ;;  %v13585_v54 = vld [vmem:[%s20168_s4] ss:$8 sps:$4 sm:$0xff]  }
 0x159   :  { %v15796_v62 = vpop.f32.mrf.mxu1  ;;  %3594 = vmatpush1.bf16.msra.mxu0 %v13573_v17  ;;  %v15799_v45 = vadd.f32 %v2223_v51, %v15522_v36  ;;  %3402 = vmatprep.subr.bf16.mxu1 %v13578_v23  ;;  %v13582_v36 = vld [vmem:[%s20168_s4 + $0x80] ss:$8 sps:$4 sm:$0xff]   ;;  %v13605_v23 = vld [vmem:[%s20168_s4 + $0x1f4] ss:$8 sps:$4 sm:$0xff]  }
 0x15a   :  { %3595 = vmatprep.subr.bf16.mxu0 %v13581_v28  ;;  %v15801_v11 = vpop.f32.mrf.mxu0  ;;  %2850 = vmatmul.mubr.bf16.gmra.mxu0 %v14418_v9  ;;  %v14420_v17 = vld [vmem:[%s20164_s0 + $0x13c] ss:$36 sps:$4 sm:$0xff]  }
 0x15b   :  { %v15806_v14 = vpop.f32.mrf.mxu1  ;;  %13116 = vmatmul.mubr.bf16.gmra.mxu1 %v14419_v20  ;;  %2857 = vmatprep.mubr.bf16.mxu0 %v14420_v17 }
 0x15c   :  { %3422 = vmatprep.mubr.bf16.mxu1 %v20179_v34  ;;  %v2229_v26 = vpop.f32.mrf.mxu0  ;;  %3403 = vmatpush1.bf16.msra.mxu1 %v13576_v39 }
 0x15d   :  { %v2342_v28 = vpop.f32.mrf.mxu1  ;;  %3596 = vmatpush1.bf16.msra.mxu0 %v13579_v44  ;;  %v2230_v51 = vadd.f32 %v2229_v26, %v15547_v52  ;;  %3404 = vmatprep.subr.bf16.mxu1 %v13584_v24  ;;  %v14421_v52 = vld [vmem:[%s20164_s0 + $0x138] ss:$36 sps:$4 sm:$0xff]   ;;  %v14422_v24 = vld [vmem:[%s20164_s0 + $0x184] ss:$36 sps:$4 sm:$0xff]  }
 0x15e   :  { %3597 = vmatprep.subr.bf16.mxu0 %v13587_v4  ;;  %v15828_v9 = vpop.f32.mrf.mxu0 }
 0x15f   :  { %v15830_v20 = vpop.f32.mrf.mxu1  ;;  %v15832_v17 = vadd.f32 %v2342_v28, %v2230_v51 }
 0x160   :  { %v2233_v34 = vpop.f32.mrf.mxu0  ;;  %3405 = vmatpush1.bf16.msra.mxu1 %v13582_v36 }
 0x161   :  { %v15834_v19 = vpop.f32.mrf.mxu1  ;;  %3598 = vmatpush1.bf16.msra.mxu0 %v13585_v54  ;;  %v15837_v3 = vadd.f32 %v2233_v34, %v15551_v60  ;;  %3817 = vmatprep.subr.bf16.mxu1 %v13590_v22 }
 0x162   :  { %4083 = vmatprep.subr.bf16.mxu0 %v13605_v23  ;;  %v15839_v39 = vpop.f32.mrf.mxu0  ;;  %2858 = vmatmul.mubr.bf16.gmra.mxu0 %v14421_v52  ;;  %v14423_v52 = vld [vmem:[%s20164_s0 + $0x180] ss:$36 sps:$4 sm:$0xff]  }
 0x163   :  { %v15844_v44 = vpop.f32.mrf.mxu1  ;;  %2865 = vmatprep.mubr.bf16.mxu0 %v14422_v24  ;;  %v14424_v24 = vld [vmem:[%s20164_s0 + $0x1cc] ss:$36 sps:$4 sm:$0xff]  }
 0x164   :  { %v2239_v4 = vpop.f32.mrf.mxu0 }
 0x165   :  { %v2352_v36 = vpop.f32.mrf.mxu1  ;;  %v2240_v34 = vadd.f32 %v2239_v4, %v15567_v8 }
 0x166   :  { %v15850_v60 = vpop.f32.mrf.mxu0 }
 0x167   :  { %v15852_v54 = vpop.f32.mrf.mxu1  ;;  %v15854_v22 = vadd.f32 %v2352_v36, %v2240_v34 }
 0x168   :  { %v2243_v23 = vpop.f32.mrf.mxu0 }
 0x169   :  { %v15856_v26 = vpop.f32.mrf.mxu1  ;;  %v15859_v28 = vadd.f32 %v2243_v23, %v15571_v15 }
 0x16a   :  { %v15861_v51 = vpop.f32.mrf.mxu0  ;;  %2866 = vmatmul.mubr.bf16.gmra.mxu0 %v14423_v52 }
 0x16b   :  { %v15866_v8 = vpop.f32.mrf.mxu1  ;;  %2873 = vmatprep.mubr.bf16.mxu0 %v14424_v24  ;;  %v14425_v24 = vld [vmem:[%s20164_s0 + $0x1c8] ss:$36 sps:$4 sm:$0xff]  }
 0x16c   :  { %20214 = vst [vmem:[#allocation12_spill] sm:$0xff] %v15866_v8  ;;  %v2249_v4 = vpop.f32.mrf.mxu0 }
 0x16d   :  { %v2362_v36 = vpop.f32.mrf.mxu1  ;;  %v2250_v34 = vadd.f32 %v2249_v4, %v15587_v27  ;;  %v14426_v4 = vld [vmem:[%s20164_s0 + $0x214] ss:$36 sps:$4 sm:$0xff]  }
 0x16e   :  { %v15872_v15 = vpop.f32.mrf.mxu0 }
 0x16f   :  { %v15874_v23 = vpop.f32.mrf.mxu1  ;;  %v15876_v55 = vadd.f32 %v2362_v36, %v2250_v34 }
 0x170   :  { %20215 = vst [vmem:[#allocation13_spill] sm:$0xff] %v15874_v23  ;;  %v2253_v42 = vpop.f32.mrf.mxu0 }
 0x171   :  { %20216 = vst [vmem:[#allocation14_spill] sm:$0xff] %v15876_v55  ;;  %v15878_v31 = vpop.f32.mrf.mxu1  ;;  %v15881_v52 = vadd.f32 %v2253_v42, %v15591_v35  ;;  %v2989_v35 = vlaneseq }
 0x172   :  { %20217 = vst [vmem:[#allocation15_spill] sm:$0xff] %v15878_v31  ;;  %v15883_v8 = vpop.f32.mrf.mxu0  ;;  %2874 = vmatmul.mubr.bf16.gmra.mxu0 %v14425_v24 }
 0x173   :  { %20218 = vst [vmem:[#allocation16_spill] sm:$0xff] %v15881_v52  ;;  %20219 = vst [vmem:[#allocation17_spill] sm:$0xff] %v15883_v8  ;;  %v15888_v27 = vpop.f32.mrf.mxu1  ;;  %2881 = vmatprep.mubr.bf16.mxu0 %v14426_v4  ;;  %v15905_v23 = vshrl.u32 %v2989_v35, 7 }
 0x174   :  { %20220 = vst [vmem:[#allocation18_spill] sm:$0xff] %v15888_v27  ;;  %v2259_v36 = vpop.f32.mrf.mxu0 }
 0x175   :  { %v2372_v34 = vpop.f32.mrf.mxu1  ;;  %v2260_v31 = vadd.f32 %v2259_v36, %v15607_v50  ;;  %20226 = vst [vmem:[#allocation24_spill] sm:$0xff] %v15905_v23  ;;  %v14427_v50 = vld [vmem:[%s20164_s0 + $0x210] ss:$36 sps:$4 sm:$0xff]  }
 0x176   :  { %v15894_v42 = vpop.f32.mrf.mxu0 }
 0x177   :  { %20221 = vst [vmem:[#allocation19_spill] sm:$0xff] %v15894_v42  ;;  %v15896_v52 = vpop.f32.mrf.mxu1  ;;  %v15898_v55 = vadd.f32 %v2372_v34, %v2260_v31 }
 0x178   :  { %20222 = vst [vmem:[#allocation20_spill] sm:$0xff] %v15896_v52  ;;  %v2263_v8 = vpop.f32.mrf.mxu0  ;;  %v20229_v52 = vmov 0  }
 0x179   :  { %20223 = vst [vmem:[#allocation21_spill] sm:$0xff] %v15898_v55  ;;  %v15900_v24 = vpop.f32.mrf.mxu1  ;;  %v15903_v27 = vadd.f32 %v2263_v8, %v15611_v61  ;;  %v15919_v8 = vsub.s32 0, %v15905_v23  ;;  %v3052_v55 = vld [vmem:[%s20167_s3] sm:$0x7] }
 0x17a   :  { %20224 = vst [vmem:[#allocation22_spill] sm:$0xff] %v15900_v24  ;;  %v15907_v4 = vpop.f32.mrf.mxu0  ;;  %2882 = vmatmul.mubr.bf16.gmra.mxu0 %v14427_v50  ;;  %v2198_v24 = vadd.f32 %v15645_v29, %v15408_v37  ;;  %v2987_v50 = vld [vmem:[%s20166_s2] sm:$0x7]  ;;  %v15934_v37 = vsub.s32 1, %v15905_v23 }
 0x17b   :  { %20225 = vst [vmem:[#allocation23_spill] sm:$0xff] %v15903_v27  ;;  %20227 = vst [vmem:[#allocation25_spill] sm:$0xff] %v15907_v4  ;;  %v15912_v36 = vpop.f32.mrf.mxu1  ;;  %3615 = vmatprep.mubr.bf16.mxu0 %v20229_v52  ;;  %v15948_v23 = vrot.slane %v3052_v55, %v15919_v8 }
 0x17c   :  { %20228 = vst [vmem:[#allocation26_spill] sm:$0xff] %v15912_v36  ;;  %v2269_v31 = vpop.f32.mrf.mxu0  ;;  %20230 = vst [vmem:[#allocation27_spill] sm:$0xff] %v15919_v8  ;;  %v15951_v42 = vrot.slane %v2987_v50, %v15934_v37 }
 0x17d   :  { %v2382_v34 = vpop.f32.mrf.mxu1  ;;  %v2270_v61 = vadd.f32 %v2269_v31, %v15627_v13  ;;  %20234 = vst [vmem:[#allocation31_spill] sm:$0xff] %v15934_v37  ;;  %v2202_v13 = vadd.f32 %v15674_v57, %v15427_v48 }
 0x17e   :  { %v15921_v35 = vpop.f32.mrf.mxu0 }
 0x17f   :  { %20231 = vst [vmem:[#allocation28_spill] sm:$0xff] %v15921_v35  ;;  %v15923_v27 = vpop.f32.mrf.mxu1  ;;  %v15928_v36 = vadd.f32 %v2382_v34, %v2270_v61  ;;  %v15945_v34 = vrot.slane %v2987_v50, %v15919_v8  ;;  %v2315_v48 = vadd.f32 %v15676_v58, %v2202_v13  ;;  %v2317_v58 = vadd.f32 %v15686_v2, %v15692_v6 }
 0x180   :  { %20232 = vst [vmem:[#allocation29_spill] sm:$0xff] %v15923_v27  ;;  %v2273_v29 = vpop.f32.mrf.mxu0  ;;  %v2311_v27 = vadd.f32 %v15650_v33, %v2198_v24 }
 0x181   :  { %20233 = vst [vmem:[#allocation30_spill] sm:$0xff] %v15928_v36  ;;  %v15938_v31 = vpop.f32.mrf.mxu1  ;;  %v15942_v35 = vadd.f32 %v2273_v29, %v15637_v25  ;;  %v2208_v25 = vadd.f32 %v15697_v10, %v15448_v59  ;;  %v2212_v10 = vadd.f32 %v15726_v40, %v15470_v7  ;;  %v2218_v40 = vadd.f32 %v15749_v63, %v15491_v18 }
 0x182   :  { %20235 = vst [vmem:[#allocation32_spill] sm:$0xff] %v15938_v31  ;;  %v2423_v61 = vpop.f32.mrf.mxu0  ;;  %v2327_v63 = vadd.f32 %v15738_v49, %v15744_v53 }
 0x183   :  { %v12831_v36 = vpop.f32.mrf.mxu1  ;;  %v2424_v4 = vadd.f32 %v2423_v61, %v2311_v27  ;;  %v15961_v27 = vrot.slane %v3052_v55, %v15934_v37  ;;  %v2321_v55 = vadd.f32 %v15702_v16, %v2208_v25  ;;  %v2325_v7 = vadd.f32 %v15728_v41, %v2212_v10 }
 0x184   :  { %v2425_v57 = vpop.f32.mrf.mxu0 }
 0x185   :  { %v12832_v31 = vpop.f32.mrf.mxu1  ;;  %v3004_v33 = vmul.f32 %v15945_v34, %v2424_v4  ;;  %v2426_v24 = vadd.f32 %v2425_v57, %v15684_v0 }
 0x186   :  { %v15958_v29 = vadd.f32 %v12832_v31, %v12831_v36  ;;  %v2427_v61 = vpop.f32.mrf.mxu0 }
 0x187   :  { %v15963_v8 = vpop.f32.mrf.mxu1  ;;  %v3069_v50 = vadd.f32 %v15948_v23, %v3004_v33  ;;  %v3005_v13 = vmul.f32 %v15951_v42, %v2426_v24  ;;  %v2428_v59 = vadd.f32 %v2427_v61, %v2315_v48 }
 0x188   :  { %20236 = vst [vmem:[#allocation33_spill] sm:$0xff] %v15963_v8  ;;  %v2429_v0 = vpop.f32.mrf.mxu0 }
 0x189   :  { %v15971_v4 = vpop.f32.mrf.mxu1  ;;  %v3117_v36 = vmax.f32 %v3069_v50, 0.0  ;;  %v3007_v31 = vmul.f32 %v15945_v34, %v2428_v59  ;;  %v2430_v57 = vadd.f32 %v2429_v0, %v2317_v58  ;;  %v3070_v2 = vadd.f32 %v15961_v27, %v3005_v13 }
 0x18a   :  { %v2433_v37 = vpop.f32.mrf.mxu0 }
 0x18b   :  { %v12837_v8 = vpop.f32.mrf.mxu1  ;;  %3213 = vst [vmem:[#allocation2 + $0x8] sm:$0xff] %v3117_v36  ;;  %v3072_v6 = vadd.f32 %v15948_v23, %v3007_v31  ;;  %v3008_v48 = vmul.f32 %v15951_v42, %v2430_v57  ;;  %v2434_v33 = vadd.f32 %v2433_v37, %v2321_v55  ;;  %v3118_v37 = vmax.f32 %v3070_v2, 0.0 }
 0x18c   :  { %v2435_v16 = vpop.f32.mrf.mxu0  ;;  %v2222_v55 = vadd.f32 %v15778_v32, %v15514_v30  ;;  %v2228_v32 = vadd.f32 %v15801_v11, %v15533_v43  ;;  %v2337_v43 = vadd.f32 %v15796_v62, %v15799_v45  ;;  %v2232_v62 = vadd.f32 %v15828_v9, %v15549_v56 }
 0x18d   :  { %v12838_v25 = vpop.f32.mrf.mxu1  ;;  %v3120_v24 = vmax.f32 %v3072_v6, 0.0  ;;  %v3073_v61 = vadd.f32 %v15961_v27, %v3008_v48  ;;  %v3010_v58 = vmul.f32 %v15945_v34, %v2434_v33  ;;  %v2436_v50 = vadd.f32 %v2435_v16, %v15736_v47 }
 0x18e   :  { %v2437_v13 = vpop.f32.mrf.mxu0  ;;  %v15984_v59 = vadd.f32 %v12838_v25, %v12837_v8  ;;  %v2331_v8 = vadd.f32 %v15754_v5, %v2218_v40  ;;  %v2335_v30 = vadd.f32 %v15780_v38, %v2222_v55 }
 0x18f   :  { %v15986_v0 = vpop.f32.mrf.mxu1  ;;  %3214 = vst [vmem:[#allocation2 + $0x20] sm:$0xff] %v3120_v24  ;;  %v3121_v41 = vmax.f32 %v3073_v61, 0.0  ;;  %v3075_v10 = vadd.f32 %v15948_v23, %v3010_v58  ;;  %v2438_v18 = vadd.f32 %v2437_v13, %v2325_v7  ;;  %v3011_v36 = vmul.f32 %v15951_v42, %v2436_v50  ;;  %v13588_v24 = vld [vmem:[%s20168_s4 + $0x170] ss:$8 sps:$4 sm:$0xff]  }
 0x190   :  { %v2439_v47 = vpop.f32.mrf.mxu0 }
 0x191   :  { %v15994_v31 = vpop.f32.mrf.mxu1  ;;  %v15997_v57 = vpack.c.bf16 %v3121_v41, %v3118_v37  ;;  %v3123_v2 = vmax.f32 %v3075_v10, 0.0  ;;  %v3013_v6 = vmul.f32 %v15945_v34, %v2438_v18  ;;  %v2440_v48 = vadd.f32 %v2439_v47, %v2327_v63 }
 0x192   :  { %v2443_v33 = vpop.f32.mrf.mxu0  ;;  %v3076_v16 = vadd.f32 %v15961_v27, %v3011_v36  ;;  %v3269_v41 = vld [vmem:[#allocation2 + $0x6] sm:$0xff] }
 0x193   :  { %20237 = vst [vmem:[#allocation34_spill] sm:$0xff] %v15997_v57  ;;  %v12843_v7 = vpop.f32.mrf.mxu1  ;;  %3215 = vst [vmem:[#allocation2 + $0x38] sm:$0xff] %v3123_v2  ;;  %v3078_v49 = vadd.f32 %v15948_v23, %v3013_v6  ;;  %v2444_v53 = vadd.f32 %v2443_v33, %v2331_v8  ;;  %v3014_v5 = vmul.f32 %v15951_v42, %v2440_v48  ;;  %v3229_v47 = vld [vmem:[#allocation2 + $0x5] sm:$0xff] }
 0x194   :  { %v2445_v40 = vpop.f32.mrf.mxu0  ;;  %v3124_v45 = vmax.f32 %v3076_v16, 0.0  ;;  %v13593_v33 = vld [vmem:[%s20168_s4 + $0x164] ss:$8 sps:$4 sm:$0xff]  }
 0x195   :  { %v12844_v25 = vpop.f32.mrf.mxu1  ;;  %v3126_v61 = vmax.f32 %v3078_v49, 0.0  ;;  %v3016_v58 = vmul.f32 %v15945_v34, %v2444_v53  ;;  %v2446_v50 = vadd.f32 %v2445_v40, %v15788_v46  ;;  %v3079_v38 = vadd.f32 %v15961_v27, %v3014_v5 }
 0x196   :  { %v16011_v13 = vadd.f32 %v12844_v25, %v12843_v7  ;;  %v2447_v11 = vpop.f32.mrf.mxu0  ;;  %v3270_v10 = vld [vmem:[#allocation2 + $0x1e] sm:$0xff]  ;;  %v13603_v7 = vld [vmem:[%s20168_s4 + $0x1f0] ss:$8 sps:$4 sm:$0xff]   ;;  %v2341_v49 = vadd.f32 %v15806_v14, %v2228_v32 }
 0x197   :  { %v16016_v37 = vpop.f32.mrf.mxu1  ;;  %v3230_v18 = vld [vmem:[#allocation2 + $0x1d] sm:$0xff]  ;;  %3216 = vst [vmem:[#allocation2 + $0x50] sm:$0xff] %v3126_v61  ;;  %v16019_v63 = vadd.f32 %v15948_v23, %v3016_v58  ;;  %v3017_v55 = vmul.f32 %v15951_v42, %v2446_v50  ;;  %v2448_v46 = vadd.f32 %v2447_v11, %v2335_v30  ;;  %v3285_v36 = vpack.c.bf16 %v3270_v10, %v3269_v41 }
 0x198   :  { %v3127_v8 = vmax.f32 %v3079_v38, 0.0  ;;  %v2449_v2 = vpop.f32.mrf.mxu0  ;;  %v3245_v6 = vpack.c.bf16 %v3230_v18, %v3229_v47  ;;  %v13608_v30 = vld [vmem:[%s20168_s4 + $0x1e4] ss:$8 sps:$4 sm:$0xff]   ;;  %v13591_v14 = vld [vmem:[%s20168_s4 + $0x160] ss:$8 sps:$4 sm:$0xff]   ;;  %v2238_v38 = vadd.f32 %v15839_v39, %v15559_v1  ;;  %v2242_v1 = vadd.f32 %v15850_v60, %v15569_v12 }
 0x199   :  { %v16024_v48 = vpop.f32.mrf.mxu1  ;;  %v3129_v53 = vmax.f32 %v16019_v63, 0.0  ;;  %v3019_v56 = vmul.f32 %v15945_v34, %v2448_v46  ;;  %v2450_v9 = vadd.f32 %v2449_v2, %v2337_v43  ;;  %3423 = vmatmul.mubr.bf16.vlgmr.msra.gmra.mxu1 %v3285_v36  ;;  %v3082_v5 = vadd.f32 %v15961_v27, %v3017_v55  ;;  %v13596_v50 = vld [vmem:[%s20168_s4 + $0x154] ss:$8 sps:$4 sm:$0xff]  }
 0x19a   :  { %v16038_v16 = vpack.c.bf16 %v3127_v8, %v3124_v45  ;;  %3616 = vmatmul.mubr.bf16.vlgmr.msra.gmra.mxu0 %v3245_v6  ;;  %v2453_v40 = vpop.f32.mrf.mxu0  ;;  %3818 = vmatpush1.bf16.msra.mxu1 %v13588_v24  ;;  %v13606_v24 = vld [vmem:[%s20168_s4 + $0x1e0] ss:$8 sps:$4 sm:$0xff]   ;;  %v2345_v43 = vadd.f32 %v15830_v20, %v2232_v62  ;;  %v13614_v10 = vld [vmem:[%s20168_s4 + $0x1d4] ss:$8 sps:$4 sm:$0xff]   ;;  %v2347_v20 = vadd.f32 %v15834_v19, %v15837_v3  ;;  %v13594_v8 = vld [vmem:[%s20168_s4 + $0x150] ss:$8 sps:$4 sm:$0xff]  }
 0x19b   :  { %v12849_v25 = vpop.f32.mrf.mxu1  ;;  %3217 = vst [vmem:[#allocation2 + $0x68] sm:$0xff] %v3129_v53  ;;  %v3084_v32 = vadd.f32 %v15948_v23, %v3019_v56  ;;  %v3020_v61 = vmul.f32 %v15951_v42, %v2450_v9  ;;  %v2454_v58 = vadd.f32 %v2453_v40, %v2341_v49  ;;  %3432 = vmatprep.mubr.bf16.mxu1 %v20229_v52  ;;  %v3271_v12 = vld [vmem:[#allocation2 + $0x36] sm:$0xff]  ;;  %v13599_v6 = vld [vmem:[%s20168_s4 + $0x144] ss:$8 sps:$4 sm:$0xff]  }
 0x19c   :  { %20238 = vst [vmem:[#allocation35_spill] sm:$0xff] %v16038_v16  ;;  %3625 = vmatprep.mubr.bf16.mxu0 %v20229_v52  ;;  %v2455_v11 = vpop.f32.mrf.mxu0  ;;  %3819 = vmatprep.subr.bf16.mxu1 %v13593_v33  ;;  %v3231_v60 = vld [vmem:[#allocation2 + $0x35] sm:$0xff] }
 0x19d   :  { %v12850_v41 = vpop.f32.mrf.mxu1  ;;  %4084 = vmatpush1.bf16.msra.mxu0 %v13603_v7  ;;  %v3132_v18 = vmax.f32 %v3084_v32, 0.0  ;;  %v3085_v63 = vadd.f32 %v15961_v27, %v3020_v61  ;;  %v3022_v55 = vmul.f32 %v15945_v34, %v2454_v58  ;;  %v2456_v46 = vadd.f32 %v2455_v11, %v15832_v17  ;;  %v13602_v11 = vld [vmem:[%s20168_s4 + $0x134] ss:$8 sps:$4 sm:$0xff]  }
 0x19e   :  { %4085 = vmatprep.subr.bf16.mxu0 %v13608_v30  ;;  %v2457_v39 = vpop.f32.mrf.mxu0  ;;  %v16067_v36 = vadd.f32 %v12850_v41, %v12849_v25  ;;  %v3272_v62 = vld [vmem:[#allocation2 + $0x4e] sm:$0xff]  ;;  %3820 = vmatpush1.bf16.msra.mxu1 %v13591_v14  ;;  %v3130_v17 = vmax.f32 %v3082_v5, 0.0  ;;  %v2351_v25 = vadd.f32 %v15844_v44, %v2238_v38  ;;  %v13615_v41 = vld [vmem:[%s20168_s4 + $0x1c0] ss:$8 sps:$4 sm:$0xff]  }
 0x19f   :  { %v16069_v47 = vpop.f32.mrf.mxu1  ;;  %v3232_v45 = vld [vmem:[#allocation2 + $0x4d] sm:$0xff]  ;;  %3218 = vst [vmem:[#allocation2 + $0x80] sm:$0xff] %v3132_v18  ;;  %v3133_v2 = vmax.f32 %v3085_v63, 0.0  ;;  %v16075_v3 = vadd.f32 %v15948_v23, %v3022_v55  ;;  %v2458_v19 = vadd.f32 %v2457_v39, %v2345_v43  ;;  %3821 = vmatprep.subr.bf16.mxu1 %v13596_v50  ;;  %v3023_v33 = vmul.f32 %v15951_v42, %v2456_v46  ;;  %v13597_v43 = vld [vmem:[%s20168_s4 + $0x140] ss:$8 sps:$4 sm:$0xff]  }
 0x1a0   :  { %v2459_v7 = vpop.f32.mrf.mxu0  ;;  %v3286_v49 = vpack.c.bf16 %v3272_v62, %v3271_v12  ;;  %v3246_v56 = vpack.c.bf16 %v3232_v45, %v3231_v60  ;;  %v13612_v30 = vld [vmem:[%s20168_s4 + $0x1d0] ss:$8 sps:$4 sm:$0xff]   ;;  %v13617_v5 = vld [vmem:[%s20168_s4 + $0x1c4] ss:$8 sps:$4 sm:$0xff]   ;;  %v16089_v40 = vpack.c.bf16 %v3132_v18, %v3129_v53  ;;  %v2355_v53 = vadd.f32 %v15852_v54, %v2242_v1  ;;  %v13623_v54 = vld [vmem:[%s20168_s4 + $0x1b4] ss:$8 sps:$4 sm:$0xff]  }
 0x1a1   :  { %v16081_v9 = vpop.f32.mrf.mxu1  ;;  %4086 = vmatpush1.bf16.msra.mxu0 %v13606_v24  ;;  %v16092_v14 = vpack.c.bf16 %v3133_v2, %v3130_v17  ;;  %v3135_v32 = vmax.f32 %v16075_v3, 0.0  ;;  %v3025_v61 = vmul.f32 %v15945_v34, %v2458_v19  ;;  %v2460_v58 = vadd.f32 %v2459_v7, %v2347_v20  ;;  %v13621_v60 = vld [vmem:[%s20168_s4 + $0x1b0] ss:$8 sps:$4 sm:$0xff]   ;;  %v13611_v7 = vld [vmem:[%s20168_s4 + $0x124] ss:$8 sps:$4 sm:$0xff]  }
 0x1a2   :  { %4087 = vmatprep.subr.bf16.mxu0 %v13614_v10  ;;  %3433 = vmatmul.mubr.bf16.gmra.mxu1 %v3286_v49  ;;  %v2463_v50 = vpop.f32.mrf.mxu0  ;;  %v2248_v10 = vadd.f32 %v15861_v51, %v15579_v21  ;;  %v3088_v18 = vadd.f32 %v15961_v27, %v3023_v33  ;;  %v2357_v21 = vadd.f32 %v15856_v26, %v15859_v28  ;;  %v20240_v51 = vld [vmem:[#allocation7_spill] sm:$0xff] }
 0x1a3   :  { %20239 = vst [vmem:[#allocation36_spill] sm:$0xff] %v16092_v14  ;;  %3626 = vmatmul.mubr.bf16.gmra.mxu0 %v3246_v56  ;;  %v12855_v24 = vpop.f32.mrf.mxu1  ;;  %3219 = vst [vmem:[#allocation2 + $0x98] sm:$0xff] %v3135_v32  ;;  %v3090_v44 = vadd.f32 %v15948_v23, %v3025_v61  ;;  %v2464_v38 = vadd.f32 %v2463_v50, %v2351_v25  ;;  %3442 = vmatprep.mubr.bf16.mxu1 %v20229_v52  ;;  %v3273_v3 = vld [vmem:[#allocation2 + $0x66] sm:$0xff] }
 0x1a4   :  { %3635 = vmatprep.mubr.bf16.mxu0 %v20229_v52  ;;  %v3026_v63 = vmul.f32 %v15951_v42, %v2460_v58  ;;  %v2465_v55 = vpop.f32.mrf.mxu0  ;;  %3822 = vmatpush1.bf16.msra.mxu1 %v13594_v8  ;;  %v2252_v45 = vadd.f32 %v15872_v15, %v20240_v51  ;;  %v3233_v33 = vld [vmem:[#allocation2 + $0x65] sm:$0xff]  ;;  %v3136_v56 = vmax.f32 %v3088_v18, 0.0 }
 0x1a5   :  { %v12856_v46 = vpop.f32.mrf.mxu1  ;;  %4088 = vmatpush1.bf16.msra.mxu0 %v13612_v30  ;;  %v3138_v20 = vmax.f32 %v3090_v44, 0.0  ;;  %v3028_v1 = vmul.f32 %v15945_v34, %v2464_v38  ;;  %v2466_v39 = vadd.f32 %v2465_v55, %v15854_v22  ;;  %3823 = vmatprep.subr.bf16.mxu1 %v13599_v6  ;;  %v13600_v22 = vld [vmem:[%s20168_s4 + $0x130] ss:$8 sps:$4 sm:$0xff]   ;;  %v13626_v49 = vld [vmem:[%s20168_s4 + $0x1a4] ss:$8 sps:$4 sm:$0xff]  }
 0x1a6   :  { %v16118_v62 = vadd.f32 %v12856_v46, %v12855_v24  ;;  %4089 = vmatprep.subr.bf16.mxu0 %v13617_v5  ;;  %v3091_v17 = vadd.f32 %v15961_v27, %v3026_v63  ;;  %v2467_v2 = vpop.f32.mrf.mxu0  ;;  %v3274_v19 = vld [vmem:[#allocation2 + $0x7e] sm:$0xff]  ;;  %v20241_v50 = vld [vmem:[#allocation12_spill] sm:$0xff]  ;;  %v20243_v46 = vld [vmem:[#allocation13_spill] sm:$0xff] }
 0x1a7   :  { %v16125_v8 = vpop.f32.mrf.mxu1  ;;  %v3234_v12 = vld [vmem:[#allocation2 + $0x7d] sm:$0xff]  ;;  %3220 = vst [vmem:[#allocation2 + $0xb0] sm:$0xff] %v3138_v20  ;;  %v16134_v26 = vadd.f32 %v15948_v23, %v3028_v1  ;;  %v3029_v28 = vmul.f32 %v15951_v42, %v2466_v39  ;;  %v2468_v15 = vadd.f32 %v2467_v2, %v2355_v53  ;;  %v3287_v6 = vpack.c.bf16 %v3274_v19, %v3273_v3  ;;  %v20244_v1 = vld [vmem:[#allocation8_spill] sm:$0xff]  ;;  %v20245_v39 = vld [vmem:[#allocation17_spill] sm:$0xff] }
 0x1a8   :  { %v3139_v30 = vmax.f32 %v3091_v17, 0.0  ;;  %v2469_v5 = vpop.f32.mrf.mxu0  ;;  %v3247_v25 = vpack.c.bf16 %v3234_v12, %v3233_v33  ;;  %3824 = vmatpush1.bf16.msra.mxu1 %v13597_v43  ;;  %v16145_v58 = vpack.c.bf16 %v3138_v20, %v3135_v32  ;;  %v2361_v24 = vadd.f32 %v20241_v50, %v2248_v10  ;;  %v13624_v2 = vld [vmem:[%s20168_s4 + $0x1a0] ss:$8 sps:$4 sm:$0xff]   ;;  %v13632_v3 = vld [vmem:[%s20168_s4 + $0x194] ss:$8 sps:$4 sm:$0xff]  }
 0x1a9   :  { %v16143_v61 = vpop.f32.mrf.mxu1  ;;  %4090 = vmatpush1.bf16.msra.mxu0 %v13615_v41  ;;  %v3141_v53 = vmax.f32 %v16134_v26, 0.0  ;;  %v3031_v44 = vmul.f32 %v15945_v34, %v2468_v15  ;;  %v2470_v38 = vadd.f32 %v2469_v5, %v2357_v21  ;;  %3825 = vmatprep.subr.bf16.mxu1 %v13602_v11  ;;  %v3094_v18 = vadd.f32 %v15961_v27, %v3029_v28  ;;  %v13609_v11 = vld [vmem:[%s20168_s4 + $0x120] ss:$8 sps:$4 sm:$0xff]   ;;  %v20246_v28 = vld [vmem:[#allocation14_spill] sm:$0xff]  ;;  %v20249_v33 = vld [vmem:[#allocation9_spill] sm:$0xff] }
 0x1aa   :  { %4091 = vmatprep.subr.bf16.mxu0 %v13623_v54  ;;  %v16150_v63 = vpack.c.bf16 %v3139_v30, %v3136_v56  ;;  %3443 = vmatmul.mubr.bf16.gmra.mxu1 %v3287_v6  ;;  %v2473_v55 = vpop.f32.mrf.mxu0  ;;  %v13620_v54 = vld [vmem:[%s20168_s4 + $0x114] ss:$8 sps:$4 sm:$0xff]   ;;  %v2365_v20 = vadd.f32 %v20243_v46, %v2252_v45  ;;  %v2258_v21 = vadd.f32 %v20245_v39, %v20244_v1  ;;  %v20247_v6 = vld [vmem:[#allocation16_spill] sm:$0xff]  ;;  %v20250_v56 = vld [vmem:[#allocation19_spill] sm:$0xff] }
 0x1ab   :  { %3636 = vmatmul.mubr.bf16.gmra.mxu0 %v3247_v25  ;;  %v12861_v43 = vpop.f32.mrf.mxu1  ;;  %3221 = vst [vmem:[#allocation2 + $0xc8] sm:$0xff] %v3141_v53  ;;  %v3096_v32 = vadd.f32 %v15948_v23, %v3031_v44  ;;  %v3032_v41 = vmul.f32 %v15951_v42, %v2470_v38  ;;  %v2474_v10 = vadd.f32 %v2473_v55, %v2361_v24  ;;  %v13618_v38 = vld [vmem:[%s20168_s4 + $0x110] ss:$8 sps:$4 sm:$0xff]   ;;  %v3142_v55 = vmax.f32 %v3094_v18, 0.0  ;;  %v13629_v18 = vld [vmem:[%s20168_s4 + $0x104] ss:$8 sps:$4 sm:$0xff]  }
 0x1ac   :  { %20242 = vst [vmem:[#allocation7_spill] sm:$0xff] %v16150_v63  ;;  %3452 = vmatprep.mubr.bf16.mxu1 %v20229_v52  ;;  %3645 = vmatprep.mubr.bf16.mxu0 %v20229_v52  ;;  %v2475_v51 = vpop.f32.mrf.mxu0  ;;  %v2262_v30 = vadd.f32 %v20250_v56, %v20249_v33  ;;  %v13627_v33 = vld [vmem:[%s20168_s4 + $0x100] ss:$8 sps:$4 sm:$0xff]   ;;  %v13638_v26 = vld [vmem:[%s20168_s4 + $0x274] ss:$8 sps:$4 sm:$0xff]  }
 0x1ad   :  { %v12862_v17 = vpop.f32.mrf.mxu1  ;;  %3826 = vmatpush1.bf16.msra.mxu1 %v13600_v22  ;;  %4092 = vmatpush1.bf16.msra.mxu0 %v13621_v60  ;;  %v3144_v19 = vmax.f32 %v3096_v32, 0.0  ;;  %v3097_v12 = vadd.f32 %v15961_v27, %v3032_v41  ;;  %v3034_v45 = vmul.f32 %v15945_v34, %v2474_v10  ;;  %v2476_v15 = vadd.f32 %v2475_v51, %v20246_v28  ;;  %v20248_v22 = vld [vmem:[#allocation15_spill] sm:$0xff]  ;;  %v3275_v41 = vld [vmem:[#allocation2 + $0x96] sm:$0xff]  ;;  %v20253_v56 = vld [vmem:[#allocation20_spill] sm:$0xff] }
 0x1ae   :  { %3827 = vmatprep.subr.bf16.mxu1 %v13611_v7  ;;  %4093 = vmatprep.subr.bf16.mxu0 %v13626_v49  ;;  %v2367_v60 = vadd.f32 %v20248_v22, %v20247_v6  ;;  %v2477_v5 = vpop.f32.mrf.mxu0  ;;  %v16181_v25 = vadd.f32 %v12862_v17, %v12861_v43  ;;  %v3276_v24 = vld [vmem:[#allocation2 + $0xae] sm:$0xff] }
 0x1af   :  { %v16183_v50 = vpop.f32.mrf.mxu1  ;;  %v3236_v44 = vld [vmem:[#allocation2 + $0xad] sm:$0xff]  ;;  %3222 = vst [vmem:[#allocation2 + $0xe0] sm:$0xff] %v3144_v19  ;;  %v3145_v7 = vmax.f32 %v3097_v12, 0.0  ;;  %v16189_v49 = vadd.f32 %v15948_v23, %v3034_v45  ;;  %v2478_v32 = vadd.f32 %v2477_v5, %v2365_v20  ;;  %v3235_v10 = vld [vmem:[#allocation2 + $0x95] sm:$0xff]  ;;  %v3035_v46 = vmul.f32 %v15951_v42, %v2476_v15 }
 0x1b0   :  { %v13630_v43 = vld [vmem:[%s20168_s4 + $0x190] ss:$8 sps:$4 sm:$0xff]   ;;  %v2479_v1 = vpop.f32.mrf.mxu0  ;;  %v3288_v39 = vpack.c.bf16 %v3276_v24, %v3275_v41  ;;  %v3248_v51 = vpack.c.bf16 %v3236_v44, %v3235_v10  ;;  %v13635_v20 = vld [vmem:[%s20168_s4 + $0x184] ss:$8 sps:$4 sm:$0xff]   ;;  %v2375_v5 = vadd.f32 %v20253_v56, %v2262_v30 }
 0x1b1   :  { %v16195_v17 = vpop.f32.mrf.mxu1  ;;  %3828 = vmatpush1.bf16.msra.mxu1 %v13609_v11  ;;  %4094 = vmatpush1.bf16.msra.mxu0 %v13624_v2  ;;  %v20251_v12 = vld [vmem:[#allocation18_spill] sm:$0xff]  ;;  %v16204_v28 = vpack.c.bf16 %v3145_v7, %v3142_v55  ;;  %v3147_v15 = vmax.f32 %v16189_v49, 0.0  ;;  %v3037_v6 = vmul.f32 %v15945_v34, %v2478_v32  ;;  %v2480_v11 = vadd.f32 %v2479_v1, %v2367_v60  ;;  %v20255_v60 = vld [vmem:[#allocation25_spill] sm:$0xff] }
 0x1b2   :  { %v2371_v45 = vadd.f32 %v20251_v12, %v2258_v21  ;;  %3829 = vmatprep.subr.bf16.mxu1 %v13620_v54  ;;  %4095 = vmatprep.subr.bf16.mxu0 %v13632_v3  ;;  %v2483_v2 = vpop.f32.mrf.mxu0  ;;  %v16213_v21 = vpack.c.bf16 %v3144_v19, %v3141_v53  ;;  %v13633_v3 = vld [vmem:[%s20168_s4 + $0x180] ss:$8 sps:$4 sm:$0xff]   ;;  %v13653_v53 = vld [vmem:[%s20168_s4 + $0x2f4] ss:$8 sps:$4 sm:$0xff]   ;;  %v3100_v44 = vadd.f32 %v15961_v27, %v3035_v46 }
 0x1b3   :  { %20252 = vst [vmem:[#allocation12_spill] sm:$0xff] %v16204_v28  ;;  %3453 = vmatmul.mubr.bf16.gmra.mxu1 %v3288_v39  ;;  %3646 = vmatmul.mubr.bf16.gmra.mxu0 %v3248_v51  ;;  %v12867_v22 = vpop.f32.mrf.mxu1  ;;  %3223 = vst [vmem:[#allocation2 + $0xf8] sm:$0xff] %v3147_v15  ;;  %v3102_v24 = vadd.f32 %v15948_v23, %v3037_v6  ;;  %v20254_v19 = vld [vmem:[#allocation10_spill] sm:$0xff]  ;;  %v3038_v55 = vmul.f32 %v15951_v42, %v2480_v11  ;;  %v20256_v10 = vld [vmem:[#allocation21_spill] sm:$0xff] }
 0x1b4   :  { %v2484_v54 = vadd.f32 %v2483_v2, %v2371_v45  ;;  %3462 = vmatprep.mubr.bf16.mxu1 %v20229_v52  ;;  %3655 = vmatprep.mubr.bf16.mxu0 %v20229_v52  ;;  %v2268_v30 = vadd.f32 %v20255_v60, %v20254_v19  ;;  %v2485_v7 = vpop.f32.mrf.mxu0  ;;  %v20257_v51 = vld [vmem:[#allocation23_spill] sm:$0xff]  ;;  %v20258_v12 = vld [vmem:[#allocation22_spill] sm:$0xff]  ;;  %v20260_v46 = vld [vmem:[#allocation28_spill] sm:$0xff] }
 0x1b5   :  { %v12868_v49 = vpop.f32.mrf.mxu1  ;;  %3830 = vmatpush1.bf16.msra.mxu1 %v13618_v38  ;;  %4096 = vmatpush1.bf16.msra.mxu0 %v13630_v43  ;;  %v3150_v32 = vmax.f32 %v3102_v24, 0.0  ;;  %v2486_v1 = vadd.f32 %v2485_v7, %v20256_v10  ;;  %v2377_v45 = vadd.f32 %v20258_v12, %v20257_v51  ;;  %v20259_v6 = vld [vmem:[#allocation11_spill] sm:$0xff]  ;;  %v3103_v11 = vadd.f32 %v15961_v27, %v3038_v55 }
 0x1b6   :  { %v3040_v41 = vmul.f32 %v15945_v34, %v2484_v54  ;;  %v16234_v39 = vadd.f32 %v12868_v49, %v12867_v22  ;;  %3831 = vmatprep.subr.bf16.mxu1 %v13629_v18  ;;  %4097 = vmatprep.subr.bf16.mxu0 %v13635_v20  ;;  %v2272_v2 = vadd.f32 %v20260_v46, %v20259_v6  ;;  %v2487_v56 = vpop.f32.mrf.mxu0  ;;  %v3277_v43 = vld [vmem:[#allocation2 + $0xc6] sm:$0xff]  ;;  %v3278_v24 = vld [vmem:[#allocation2 + $0xde] sm:$0xff]  ;;  %v3148_v7 = vmax.f32 %v3100_v44, 0.0 }
 0x1b7   :  { %v16241_v38 = vpop.f32.mrf.mxu1  ;;  %v3238_v54 = vld [vmem:[#allocation2 + $0xdd] sm:$0xff]  ;;  %3224 = vst [vmem:[#allocation2 + $0x110] sm:$0xff] %v3150_v32  ;;  %v3041_v18 = vmul.f32 %v15951_v42, %v2486_v1  ;;  %v2488_v20 = vadd.f32 %v2487_v56, %v2375_v5  ;;  %v3289_v19 = vpack.c.bf16 %v3278_v24, %v3277_v43  ;;  %v3237_v60 = vld [vmem:[#allocation2 + $0xc5] sm:$0xff]  ;;  %v3151_v49 = vmax.f32 %v3103_v11, 0.0 }
 0x1b8   :  { %v3105_v22 = vadd.f32 %v15948_v23, %v3040_v41  ;;  %v2489_v10 = vpop.f32.mrf.mxu0  ;;  %v3249_v51 = vpack.c.bf16 %v3238_v54, %v3237_v60  ;;  %v16247_v55 = vpack.c.bf16 %v3150_v32, %v3147_v15  ;;  %v20261_v6 = vld [vmem:[#allocation26_spill] sm:$0xff] }
 0x1b9   :  { %v16245_v12 = vpop.f32.mrf.mxu1  ;;  %3832 = vmatpush1.bf16.msra.mxu1 %v13627_v33  ;;  %4098 = vmatpush1.bf16.msra.mxu0 %v13633_v3  ;;  %v2381_v46 = vadd.f32 %v20261_v6, %v2268_v30  ;;  %v3043_v41 = vmul.f32 %v15945_v34, %v2488_v20  ;;  %v2490_v63 = vadd.f32 %v2489_v10, %v2377_v45  ;;  %v20264_v24 = vld [vmem:[#allocation30_spill] sm:$0xff] }
 0x1ba   :  { %v3153_v28 = vmax.f32 %v3105_v22, 0.0  ;;  %4349 = vmatprep.subr.bf16.mxu1 %v13638_v26  ;;  %4615 = vmatprep.subr.bf16.mxu0 %v13653_v53  ;;  %v16251_v5 = vpack.c.bf16 %v3151_v49, %v3148_v7  ;;  %v3106_v44 = vadd.f32 %v15961_v27, %v3041_v18  ;;  %v2493_v1 = vpop.f32.mrf.mxu0  ;;  %v20263_v26 = vld [vmem:[#allocation29_spill] sm:$0xff]  ;;  %v20265_v22 = vld [vmem:[#allocation32_spill] sm:$0xff] }
 0x1bb   :  { %3463 = vmatmul.mubr.bf16.gmra.mxu1 %v3289_v19  ;;  %3656 = vmatmul.mubr.bf16.gmra.mxu0 %v3249_v51  ;;  %v12873_v11 = vpop.f32.mrf.mxu1  ;;  %v3108_v15 = vadd.f32 %v15948_v23, %v3043_v41  ;;  %v3044_v33 = vmul.f32 %v15951_v42, %v2490_v63  ;;  %v2494_v3 = vadd.f32 %v2493_v1, %v2381_v46  ;;  %v3279_v6 = vld [vmem:[#allocation2 + $0xf6] sm:$0xff] }
 0x1bc   :  { %20262 = vst [vmem:[#allocation13_spill] sm:$0xff] %v16251_v5  ;;  %3225 = vst [vmem:[#allocation2 + $0x128] sm:$0xff] %v3153_v28  ;;  %3472 = vmatprep.mubr.bf16.mxu1 %v20229_v52  ;;  %3665 = vmatprep.mubr.bf16.mxu0 %v20229_v52  ;;  %v2385_v53 = vadd.f32 %v20263_v26, %v2272_v2  ;;  %v2495_v30 = vpop.f32.mrf.mxu0  ;;  %v2387_v18 = vadd.f32 %v20265_v22, %v15942_v35  ;;  %v3154_v2 = vmax.f32 %v3106_v44, 0.0  ;;  %v3239_v46 = vld [vmem:[#allocation2 + $0xf5] sm:$0xff] }
 0x1bd   :  { %v12874_v32 = vpop.f32.mrf.mxu1  ;;  %v3156_v45 = vmax.f32 %v3108_v15, 0.0  ;;  %v3109_v56 = vadd.f32 %v15961_v27, %v3044_v33  ;;  %v3046_v43 = vmul.f32 %v15945_v34, %v2494_v3  ;;  %v2496_v54 = vadd.f32 %v2495_v30, %v20264_v24 }
 0x1be   :  { %v2497_v63 = vpop.f32.mrf.mxu0  ;;  %v16264_v20 = vadd.f32 %v12874_v32, %v12873_v11  ;;  %v3280_v60 = vld [vmem:[#allocation2 + $0x10e] sm:$0xff] }
 0x1bf   :  { %v16266_v19 = vpop.f32.mrf.mxu1  ;;  %v3240_v7 = vld [vmem:[#allocation2 + $0x10d] sm:$0xff]  ;;  %3226 = vst [vmem:[#allocation2 + $0x140] sm:$0xff] %v3156_v45  ;;  %v3157_v49 = vmax.f32 %v3109_v56, 0.0  ;;  %v3111_v10 = vadd.f32 %v15948_v23, %v3046_v43  ;;  %v2498_v51 = vadd.f32 %v2497_v63, %v2385_v53  ;;  %v3047_v41 = vmul.f32 %v15951_v42, %v2496_v54 }
 0x1c0   :  { %v2499_v1 = vpop.f32.mrf.mxu0  ;;  %v3290_v15 = vpack.c.bf16 %v3280_v60, %v3279_v6  ;;  %v3250_v35 = vpack.c.bf16 %v3240_v7, %v3239_v46  ;;  %v16272_v11 = vpack.c.bf16 %v3156_v45, %v3153_v28 }
 0x1c1   :  { %v16270_v33 = vpop.f32.mrf.mxu1  ;;  %v16274_v3 = vpack.c.bf16 %v3157_v49, %v3154_v2  ;;  %v3159_v26 = vmax.f32 %v3111_v10, 0.0  ;;  %v3049_v44 = vmul.f32 %v15945_v34, %v2498_v51  ;;  %v2500_v30 = vadd.f32 %v2499_v1, %v2387_v18 }
 0x1c2   :  { %v12895_v53 = vpop.f32.mrf.mxu0  ;;  %v3112_v28 = vadd.f32 %v15961_v27, %v3047_v41 }
 0x1c3   :  { %20266 = vst [vmem:[#allocation8_spill] sm:$0xff] %v16274_v3  ;;  %3473 = vmatmul.mubr.bf16.gmra.mxu1 %v3290_v15  ;;  %3666 = vmatmul.mubr.bf16.gmra.mxu0 %v3250_v35  ;;  %v12959_v32 = vpop.f32.mrf.mxu1  ;;  %3227 = vst [vmem:[#allocation2 + $0x158] sm:$0xff] %v3159_v26  ;;  %v3114_v56 = vadd.f32 %v15948_v23, %v3049_v44  ;;  %v3050_v45 = vmul.f32 %v15951_v42, %v2500_v30  ;;  %v3281_v54 = vld [vmem:[#allocation2 + $0x126] sm:$0xff]  ;;  %v20267_v35 = vld [vmem:[#allocation33_spill] sm:$0xff] }
 0x1c4   :  { %3482 = vmatprep.mubr.bf16.mxu1 %v20229_v52  ;;  %3675 = vmatprep.mubr.bf16.mxu0 %v20229_v52  ;;  %v12896_v43 = vpop.f32.mrf.mxu0  ;;  %v3241_v23 = vld [vmem:[#allocation2 + $0x125] sm:$0xff]  ;;  %v3160_v46 = vmax.f32 %v3112_v28, 0.0  ;;  %v12836_v44 = vadd.f32 %v15971_v4, %v20267_v35 }
 0x1c5   :  { %v12960_v24 = vpop.f32.mrf.mxu1  ;;  %v3162_v34 = vmax.f32 %v3114_v56, 0.0  ;;  %v12897_v22 = vadd.f32 %v12896_v43, %v12895_v53  ;;  %v3115_v63 = vadd.f32 %v15961_v27, %v3050_v45 }
 0x1c6   :  { %v12961_v18 = vadd.f32 %v12960_v24, %v12959_v32  ;;  %v12898_v60 = vpop.f32.mrf.mxu0  ;;  %v3282_v2 = vld [vmem:[#allocation2 + $0x13e] sm:$0xff] }
 0x1c7   :  { %v12962_v7 = vpop.f32.mrf.mxu1  ;;  %v3242_v49 = vld [vmem:[#allocation2 + $0x13d] sm:$0xff]  ;;  %3228 = vst [vmem:[#allocation2 + $0x170] sm:$0xff] %v3162_v34  ;;  %v2634_v10 = vadd.f32 %v12897_v22, %v15958_v29  ;;  %v3291_v51 = vpack.c.bf16 %v3282_v2, %v3281_v54  ;;  %v3163_v42 = vmax.f32 %v3115_v63, 0.0  ;;  %v16284_v15 = vpack.c.bf16 %v3162_v34, %v3159_v26 }
 0x1c8   :  { %v3251_v6 = vpack.c.bf16 %v3242_v49, %v3241_v23  ;;  %v12899_v41 = vpop.f32.mrf.mxu0 }
 0x1c9   :  { %v12963_v1 = vpop.f32.mrf.mxu1  ;;  %v16288_v27 = vadd.f32 %v12961_v18, %v2634_v10  ;;  %v12900_v30 = vadd.f32 %v12899_v41, %v12898_v60  ;;  %v16290_v32 = vpack.c.bf16 %v3163_v42, %v3160_v46 }
 0x1ca   :  { %v12964_v53 = vadd.f32 %v12963_v1, %v12962_v7  ;;  %v12901_v29 = vpop.f32.mrf.mxu0  ;;  %v3283_v54 = vld [vmem:[#allocation2 + $0x156] sm:$0xff] }
 0x1cb   :  { %20268 = vst [vmem:[#allocation17_spill] sm:$0xff] %v16290_v32  ;;  %3483 = vmatmul.mubr.bf16.gmra.mxu1 %v3291_v51  ;;  %3676 = vmatmul.mubr.bf16.gmra.mxu0 %v3251_v6  ;;  %v12965_v56 = vpop.f32.mrf.mxu1  ;;  %v2637_v45 = vadd.f32 %v12900_v30, %v12836_v44  ;;  %v3243_v63 = vld [vmem:[#allocation2 + $0x155] sm:$0xff]  ;;  %v12842_v51 = vadd.f32 %v15994_v31, %v15986_v0  ;;  %v3963_v44 = vld [vmem:[#allocation2 + $0x20] sm:$0xff] }
 0x1cc   :  { %3492 = vmatprep.mubr.bf16.mxu1 %v20229_v52  ;;  %3685 = vmatprep.mubr.bf16.mxu0 %v20229_v52  ;;  %v12902_v26 = vpop.f32.mrf.mxu0 }
 0x1cd   :  { %v12966_v28 = vpop.f32.mrf.mxu1  ;;  %v16294_v43 = vadd.f32 %v12964_v53, %v2637_v45  ;;  %v12903_v4 = vadd.f32 %v12902_v26, %v12901_v29  ;;  %v3962_v45 = vld [vmem:[#allocation2 + $0x8] sm:$0xff]  ;;  %v13636_v26 = vld [vmem:[%s20168_s4 + $0x270] ss:$8 sps:$4 sm:$0xff]  }
 0x1ce   :  { %v12967_v24 = vadd.f32 %v12966_v28, %v12965_v56  ;;  %v12904_v34 = vpop.f32.mrf.mxu0  ;;  %v3284_v18 = vld [vmem:[#allocation2 + $0x16e] sm:$0xff] }
 0x1cf   :  { %v12968_v22 = vpop.f32.mrf.mxu1  ;;  %v3244_v60 = vld [vmem:[#allocation2 + $0x16d] sm:$0xff]  ;;  %v2642_v7 = vadd.f32 %v12903_v4, %v15984_v59  ;;  %v3292_v2 = vpack.c.bf16 %v3284_v18, %v3283_v54  ;;  %v3697_v59 = vld [vmem:[#allocation2 + $0x1f] sm:$0xff] }
 0x1d0   :  { %v3252_v23 = vpack.c.bf16 %v3244_v60, %v3243_v63  ;;  %v12905_v49 = vpop.f32.mrf.mxu0  ;;  %v3696_v56 = vld [vmem:[#allocation2 + $0x7] sm:$0xff]  ;;  %v3978_v63 = vpack.c.bf16 %v3963_v44, %v3962_v45  ;;  %v13642_v45 = vld [vmem:[%s20168_s4 + $0x250] ss:$8 sps:$4 sm:$0xff]  }
 0x1d1   :  { %v12969_v10 = vpop.f32.mrf.mxu1  ;;  %v16299_v6 = vadd.f32 %v12967_v24, %v2642_v7  ;;  %v12906_v46 = vadd.f32 %v12905_v49, %v12904_v34  ;;  %v13641_v24 = vld [vmem:[%s20168_s4 + $0x264] ss:$8 sps:$4 sm:$0xff]   ;;  %v13651_v34 = vld [vmem:[%s20168_s4 + $0x2f0] ss:$8 sps:$4 sm:$0xff]   ;;  %v3712_v18 = vpack.c.bf16 %v3697_v59, %v3696_v56 }
 0x1d2   :  { %v12970_v42 = vadd.f32 %v12969_v10, %v12968_v22  ;;  %v12907_v41 = vpop.f32.mrf.mxu0  ;;  %v13656_v7 = vld [vmem:[%s20168_s4 + $0x2e4] ss:$8 sps:$4 sm:$0xff]  }
 0x1d3   :  { %3493 = vmatmul.mubr.bf16.gmra.mxu1 %v3292_v2  ;;  %3686 = vmatmul.mubr.bf16.gmra.mxu0 %v3252_v23  ;;  %v12971_v1 = vpop.f32.mrf.mxu1  ;;  %v2645_v35 = vadd.f32 %v12906_v46, %v12842_v51  ;;  %v12848_v2 = vadd.f32 %v16024_v48, %v16016_v37  ;;  %v3699_v37 = vld [vmem:[#allocation2 + $0x4f] sm:$0xff]  ;;  %v3964_v48 = vld [vmem:[#allocation2 + $0x38] sm:$0xff] }
 0x1d4   :  { %3849 = vmatprep.mubr.bf16.mxu1 %v20229_v52  ;;  %4115 = vmatprep.mubr.bf16.mxu0 %v20229_v52  ;;  %v12908_v30 = vpop.f32.mrf.mxu0 }
 0x1d5   :  { %v12972_v53 = vpop.f32.mrf.mxu1  ;;  %v16303_v29 = vadd.f32 %v12970_v42, %v2645_v35  ;;  %v12909_v0 = vadd.f32 %v12908_v30, %v12907_v41  ;;  %v13644_v42 = vld [vmem:[%s20168_s4 + $0x254] ss:$8 sps:$4 sm:$0xff]  }
 0x1d6   :  { %v12973_v31 = vadd.f32 %v12972_v53, %v12971_v1  ;;  %v12910_v28 = vpop.f32.mrf.mxu0  ;;  %v13654_v1 = vld [vmem:[%s20168_s4 + $0x2e0] ss:$8 sps:$4 sm:$0xff]  }
 0x1d7   :  { %v12974_v4 = vpop.f32.mrf.mxu1  ;;  %v2650_v54 = vadd.f32 %v12909_v0, %v16011_v13  ;;  %v13639_v13 = vld [vmem:[%s20168_s4 + $0x260] ss:$8 sps:$4 sm:$0xff]   ;;  %v3698_v0 = vld [vmem:[#allocation2 + $0x37] sm:$0xff] }
 0x1d8   :  { %v12911_v22 = vpop.f32.mrf.mxu0 }
 0x1d9   :  { %v12975_v60 = vpop.f32.mrf.mxu1  ;;  %v16320_v23 = vadd.f32 %v12973_v31, %v2650_v54  ;;  %v12912_v49 = vadd.f32 %v12911_v22, %v12910_v28  ;;  %v14428_v54 = vld [vmem:[#allocation2 + $0x50] sm:$0xff] }
 0x1da   :  { %v12976_v10 = vadd.f32 %v12975_v60, %v12974_v4  ;;  %v12913_v51 = vpop.f32.mrf.mxu0  ;;  %v3979_v22 = vpack.c.bf16 %v14428_v54, %v3964_v48 }
 0x1db   :  { %3850 = vmatmul.mubr.bf16.vlgmr.msra.gmra.mxu1 %v3712_v18  ;;  %4116 = vmatmul.mubr.bf16.vlgmr.msra.gmra.mxu0 %v3978_v63  ;;  %v12977_v46 = vpop.f32.mrf.mxu1  ;;  %v2653_v41 = vadd.f32 %v12912_v49, %v12848_v2 }
 0x1dc   :  { %4350 = vmatpush1.bf16.msra.mxu1 %v13636_v26  ;;  %3859 = vmatprep.mubr.bf16.mxu1 %v20229_v52  ;;  %v12914_v35 = vpop.f32.mrf.mxu0  ;;  %v13662_v26 = vld [vmem:[%s20168_s4 + $0x2d4] ss:$8 sps:$4 sm:$0xff]  }
 0x1dd   :  { %v12978_v59 = vpop.f32.mrf.mxu1  ;;  %4125 = vmatprep.mubr.bf16.mxu0 %v20229_v52  ;;  %4351 = vmatprep.subr.bf16.mxu1 %v13641_v24  ;;  %v16333_v44 = vadd.f32 %v12976_v10, %v2653_v41  ;;  %v12915_v30 = vadd.f32 %v12914_v35, %v12913_v51  ;;  %v3713_v24 = vpack.c.bf16 %v3699_v37, %v3698_v0 }
 0x1de   :  { %v12979_v53 = vadd.f32 %v12978_v59, %v12977_v46  ;;  %4616 = vmatpush1.bf16.msra.mxu0 %v13651_v34  ;;  %v12916_v31 = vpop.f32.mrf.mxu0 }
 0x1df   :  { %v12980_v56 = vpop.f32.mrf.mxu1  ;;  %4617 = vmatprep.subr.bf16.mxu0 %v13656_v7  ;;  %v2658_v28 = vadd.f32 %v12915_v30, %v16067_v36 }
 0x1e0   :  { %4352 = vmatpush1.bf16.msra.mxu1 %v13639_v13  ;;  %v12917_v4 = vpop.f32.mrf.mxu0 }
 0x1e1   :  { %v12981_v18 = vpop.f32.mrf.mxu1  ;;  %4353 = vmatprep.subr.bf16.mxu1 %v13644_v42 }
 0x1e2   :  { %19 = vsyncpa [#allocation5], 0  ;;  %v12854_v34 = vadd.f32 %v16081_v9, %v16069_v47  ;;  %v16344_v63 = vadd.f32 %v12979_v53, %v2658_v28  ;;  %v12918_v60 = vadd.f32 %v12917_v4, %v12916_v31  ;;  %v12982_v7 = vadd.f32 %v12981_v18, %v12980_v56  ;;  %v13647_v2 = vld [vmem:[%s20168_s4 + $0x244] ss:$8 sps:$4 sm:$0xff]   ;;  %4618 = vmatpush1.bf16.msra.mxu0 %v13654_v1  ;;  %v13660_v36 = vld [vmem:[%s20168_s4 + $0x2d0] ss:$8 sps:$4 sm:$0xff]   ;;  %v12919_v49 = vpop.f32.mrf.mxu0 }
 0x1e3   :  { %3860 = vmatmul.mubr.bf16.gmra.mxu1 %v3713_v24  ;;  %4126 = vmatmul.mubr.bf16.gmra.mxu0 %v3979_v22  ;;  %v12983_v10 = vpop.f32.mrf.mxu1  ;;  %v13665_v47 = vld [vmem:[%s20168_s4 + $0x2c4] ss:$8 sps:$4 sm:$0xff]   ;;  %v13645_v46 = vld [vmem:[%s20168_s4 + $0x240] ss:$8 sps:$4 sm:$0xff]   ;;  %v13650_v1 = vld [vmem:[%s20168_s4 + $0x234] ss:$8 sps:$4 sm:$0xff]   ;;  %v12860_v31 = vadd.f32 %v16143_v61, %v16125_v8 }
 0x1e4   :  { %v2661_v9 = vadd.f32 %v12918_v60, %v12854_v34  ;;  %3869 = vmatprep.mubr.bf16.mxu1 %v20229_v52  ;;  %4135 = vmatprep.mubr.bf16.mxu0 %v20229_v52  ;;  %v12920_v13 = vpop.f32.mrf.mxu0  ;;  %v3701_v48 = vld [vmem:[#allocation2 + $0x7f] sm:$0xff]  ;;  %v3700_v0 = vld [vmem:[#allocation2 + $0x67] sm:$0xff]  ;;  %v13648_v28 = vld [vmem:[%s20168_s4 + $0x230] ss:$8 sps:$4 sm:$0xff]   ;;  %vm9181_vm0 = vcmask 523264  }
 0x1e5   :  { %v12984_v51 = vpop.f32.mrf.mxu1  ;;  %4354 = vmatpush1.bf16.msra.mxu1 %v13642_v45  ;;  %4619 = vmatprep.subr.bf16.mxu0 %v13662_v26  ;;  %v12921_v41 = vadd.f32 %v12920_v13, %v12919_v49  ;;  %v13663_v35 = vld [vmem:[%s20168_s4 + $0x2c0] ss:$8 sps:$4 sm:$0xff]   ;;  %v3714_v45 = vpack.c.bf16 %v3701_v48, %v3700_v0  ;;  %v13671_v4 = vld [vmem:[%s20168_s4 + $0x2b4] ss:$8 sps:$4 sm:$0xff]   ;;  %v13659_v8 = vld [vmem:[%s20168_s4 + $0x224] ss:$8 sps:$4 sm:$0xff]   ;;  %v12866_v48 = vadd.f32 %v16195_v17, %v16183_v50 }
 0x1e6   :  { %v16360_v42 = vadd.f32 %v12982_v7, %v2661_v9  ;;  %v12985_v37 = vadd.f32 %v12984_v51, %v12983_v10  ;;  %4355 = vmatprep.subr.bf16.mxu1 %v13647_v2  ;;  %4620 = vmatpush1.bf16.msra.mxu0 %v13660_v36  ;;  %v12922_v59 = vpop.f32.mrf.mxu0  ;;  %v13669_v61 = vld [vmem:[%s20168_s4 + $0x2b0] ss:$8 sps:$4 sm:$0xff]   ;;  %v13674_v34 = vld [vmem:[%s20168_s4 + $0x2a4] ss:$8 sps:$4 sm:$0xff]   ;;  %v13657_v36 = vld [vmem:[%s20168_s4 + $0x220] ss:$8 sps:$4 sm:$0xff]  }
 0x1e7   :  { %v12986_v30 = vpop.f32.mrf.mxu1  ;;  %4621 = vmatprep.subr.bf16.mxu0 %v13665_v47  ;;  %v2666_v53 = vadd.f32 %v12921_v41, %v16118_v62  ;;  %v3703_v47 = vld [vmem:[#allocation2 + $0xaf] sm:$0xff]  ;;  %v13672_v13 = vld [vmem:[%s20168_s4 + $0x2a0] ss:$8 sps:$4 sm:$0xff]  }
 0x1e8   :  { %v12923_v56 = vpop.f32.mrf.mxu0  ;;  %v13668_v9 = vld [vmem:[%s20168_s4 + $0x214] ss:$8 sps:$4 sm:$0xff]   ;;  %v13677_v50 = vld [vmem:[%s20168_s4 + $0x204] ss:$8 sps:$4 sm:$0xff]   ;;  %v13678_v17 = vld [vmem:[%s20168_s4 + $0x290] ss:$8 sps:$4 sm:$0xff]  }
 0x1e9   :  { %v12987_v26 = vpop.f32.mrf.mxu1  ;;  %4356 = vmatpush1.bf16.msra.mxu1 %v13645_v46  ;;  %v16377_v24 = vadd.f32 %v12985_v37, %v2666_v53  ;;  %v12924_v54 = vadd.f32 %v12923_v56, %v12922_v59  ;;  %v3702_v37 = vld [vmem:[#allocation2 + $0x97] sm:$0xff]  ;;  %v13800_v32 = vld [vmem:[%s20171_s7 + $0x184] ss:$8 sps:$4 sm:$0xff]  }
 0x1ea   :  { %v12988_v62 = vadd.f32 %v12987_v26, %v12986_v30  ;;  %4357 = vmatprep.subr.bf16.mxu1 %v13650_v1  ;;  %4622 = vmatpush1.bf16.msra.mxu0 %v13663_v35  ;;  %v12925_v22 = vpop.f32.mrf.mxu0  ;;  %v3715_v35 = vpack.c.bf16 %v3703_v47, %v3702_v37  ;;  %v13666_v30 = vld [vmem:[%s20168_s4 + $0x210] ss:$8 sps:$4 sm:$0xff]   ;;  %v13680_v53 = vld [vmem:[%s20168_s4 + $0x294] ss:$8 sps:$4 sm:$0xff]   ;;  %v13683_v26 = vld [vmem:[%s20168_s4 + $0x284] ss:$8 sps:$4 sm:$0xff]  }
 0x1eb   :  { %3870 = vmatmul.mubr.bf16.gmra.mxu1 %v3714_v45  ;;  %4136 = vmatmul.mubr.bf16.gmra.mxu0 %v16089_v40  ;;  %v12989_v18 = vpop.f32.mrf.mxu1  ;;  %v2669_v60 = vadd.f32 %v12924_v54, %v12860_v31  ;;  %v13818_v14 = vld [vmem:[%s20171_s7 + $0x354] ss:$8 sps:$4 sm:$0xff]  }
 0x1ec   :  { %3879 = vmatprep.mubr.bf16.mxu1 %v20229_v52  ;;  %4145 = vmatprep.mubr.bf16.mxu0 %v20229_v52  ;;  %v12926_v7 = vpop.f32.mrf.mxu0 }
 0x1ed   :  { %v12990_v2 = vpop.f32.mrf.mxu1  ;;  %4358 = vmatpush1.bf16.msra.mxu1 %v13648_v28  ;;  %4623 = vmatprep.subr.bf16.mxu0 %v13671_v4  ;;  %v16394_v40 = vadd.f32 %v12988_v62, %v2669_v60  ;;  %v12927_v49 = vadd.f32 %v12926_v7, %v12925_v22  ;;  %v13675_v62 = vld [vmem:[%s20168_s4 + $0x200] ss:$8 sps:$4 sm:$0xff]  }
 0x1ee   :  { %v12991_v10 = vadd.f32 %v12990_v2, %v12989_v18  ;;  %4359 = vmatprep.subr.bf16.mxu1 %v13659_v8  ;;  %4624 = vmatpush1.bf16.msra.mxu0 %v13669_v61  ;;  %v12928_v51 = vpop.f32.mrf.mxu0  ;;  %v3705_v22 = vld [vmem:[#allocation2 + $0xdf] sm:$0xff] }
 0x1ef   :  { %v12992_v46 = vpop.f32.mrf.mxu1  ;;  %4625 = vmatprep.subr.bf16.mxu0 %v13674_v34  ;;  %v2674_v41 = vadd.f32 %v12927_v49, %v16181_v25  ;;  %v13681_v18 = vld [vmem:[%s20168_s4 + $0x280] ss:$8 sps:$4 sm:$0xff]   ;;  %v13686_v34 = vld [vmem:[%s20168_s4 + $0x374] ss:$8 sps:$4 sm:$0xff]   ;;  %v12872_v49 = vadd.f32 %v16245_v12, %v16241_v38 }
 0x1f0   :  { %v12929_v1 = vpop.f32.mrf.mxu0 }
 0x1f1   :  { %v12993_v59 = vpop.f32.mrf.mxu1  ;;  %4360 = vmatpush1.bf16.msra.mxu1 %v13657_v36  ;;  %v16411_v0 = vadd.f32 %v12991_v10, %v2674_v41  ;;  %v12930_v31 = vadd.f32 %v12929_v1, %v12928_v51  ;;  %v3704_v36 = vld [vmem:[#allocation2 + $0xc7] sm:$0xff] }
 0x1f2   :  { %v12994_v25 = vadd.f32 %v12993_v59, %v12992_v46  ;;  %4361 = vmatprep.subr.bf16.mxu1 %v13668_v9  ;;  %4626 = vmatpush1.bf16.msra.mxu0 %v13672_v13  ;;  %v12931_v56 = vpop.f32.mrf.mxu0  ;;  %v3716_v47 = vpack.c.bf16 %v3705_v22, %v3704_v36  ;;  %v3707_v59 = vld [vmem:[#allocation2 + $0x10f] sm:$0xff]  ;;  %v3708_v36 = vld [vmem:[#allocation2 + $0x127] sm:$0xff] }
 0x1f3   :  { %3880 = vmatmul.mubr.bf16.gmra.mxu1 %v3715_v35  ;;  %4146 = vmatmul.mubr.bf16.gmra.mxu0 %v16145_v58  ;;  %v12995_v45 = vpop.f32.mrf.mxu1  ;;  %v2677_v28 = vadd.f32 %v12930_v31, %v12866_v48 }
 0x1f4   :  { %3889 = vmatprep.mubr.bf16.mxu1 %v20229_v52  ;;  %4155 = vmatprep.mubr.bf16.mxu0 %v20229_v52  ;;  %v12932_v4 = vpop.f32.mrf.mxu0 }
 0x1f5   :  { %v12996_v54 = vpop.f32.mrf.mxu1  ;;  %4362 = vmatpush1.bf16.msra.mxu1 %v13666_v30  ;;  %4627 = vmatprep.subr.bf16.mxu0 %v13680_v53  ;;  %v16428_v58 = vadd.f32 %v12994_v25, %v2677_v28  ;;  %v12933_v8 = vadd.f32 %v12932_v4, %v12931_v56  ;;  %v3706_v25 = vld [vmem:[#allocation2 + $0xf7] sm:$0xff]  ;;  %v12878_v56 = vadd.f32 %v16270_v33, %v16266_v19 }
 0x1f6   :  { %v12997_v61 = vadd.f32 %v12996_v54, %v12995_v45  ;;  %4363 = vmatprep.subr.bf16.mxu1 %v13677_v50  ;;  %4628 = vmatpush1.bf16.msra.mxu0 %v13678_v17  ;;  %v12934_v60 = vpop.f32.mrf.mxu0  ;;  %v3717_v50 = vpack.c.bf16 %v3707_v59, %v3706_v25  ;;  %v3710_v25 = vld [vmem:[#allocation2 + $0x157] sm:$0xff] }
 0x1f7   :  { %v12998_v7 = vpop.f32.mrf.mxu1  ;;  %4629 = vmatprep.subr.bf16.mxu0 %v13683_v26  ;;  %v2682_v2 = vadd.f32 %v12933_v8, %v16234_v39  ;;  %v20269_v8 = vld [vmem:[#allocation24_spill] sm:$0xff] }
 0x1f8   :  { %v12935_v10 = vpop.f32.mrf.mxu0 }
 0x1f9   :  { %v12999_v9 = vpop.f32.mrf.mxu1  ;;  %4364 = vmatpush1.bf16.msra.mxu1 %v13675_v62  ;;  %v16439_v13 = vadd.f32 %v12997_v61, %v2682_v2  ;;  %v12936_v51 = vadd.f32 %v12935_v10, %v12934_v60  ;;  %v16453_v61 = vsub.s32 2, %v20269_v8 }
 0x1fa   :  { %v13000_v46 = vadd.f32 %v12999_v9, %v12998_v7  ;;  %4630 = vmatpush1.bf16.msra.mxu0 %v13681_v18  ;;  %4881 = vmatprep.subr.bf16.mxu1 %v13686_v34  ;;  %v12937_v41 = vpop.f32.mrf.mxu0  ;;  %v3709_v18 = vld [vmem:[#allocation2 + $0x13f] sm:$0xff] }
 0x1fb   :  { %3890 = vmatmul.mubr.bf16.gmra.mxu1 %v3716_v47  ;;  %4156 = vmatmul.mubr.bf16.gmra.mxu0 %v16213_v21  ;;  %v13001_v37 = vpop.f32.mrf.mxu1  ;;  %v2685_v39 = vadd.f32 %v12936_v51, %v12872_v49  ;;  %20270 = vst [vmem:[#allocation14_spill] sm:$0xff] %v16453_v61  ;;  %v14429_v7 = vld [vmem:[%s20166_s2] sm:$0x7]  ;;  %v3718_v10 = vpack.c.bf16 %v3709_v18, %v3708_v36 }
 0x1fc   :  { %3899 = vmatprep.mubr.bf16.mxu1 %v20229_v52  ;;  %4165 = vmatprep.mubr.bf16.mxu0 %v20229_v52  ;;  %v12938_v38 = vpop.f32.mrf.mxu0  ;;  %v16464_v2 = vrot.slane %v14429_v7, %v16453_v61 }
 0x1fd   :  { %v13002_v12 = vpop.f32.mrf.mxu1  ;;  %v16444_v48 = vadd.f32 %v13000_v46, %v2685_v39  ;;  %v12939_v1 = vadd.f32 %v12938_v38, %v12937_v41 }
 0x1fe   :  { %v13003_v35 = vadd.f32 %v13002_v12, %v13001_v37  ;;  %v12940_v30 = vpop.f32.mrf.mxu0 }
 0x1ff   :  { %v13004_v53 = vpop.f32.mrf.mxu1  ;;  %v2690_v31 = vadd.f32 %v12939_v1, %v16264_v20  ;;  %v3711_v1 = vld [vmem:[#allocation2 + $0x16f] sm:$0xff] }
 0x200   :  { %v12941_v21 = vpop.f32.mrf.mxu0 }
 0x201   :  { %v13005_v17 = vpop.f32.mrf.mxu1  ;;  %v16449_v45 = vadd.f32 %v13003_v35, %v2690_v31  ;;  %v12942_v26 = vadd.f32 %v12941_v21, %v12940_v30 }
 0x202   :  { %v13006_v28 = vadd.f32 %v13005_v17, %v13004_v53  ;;  %v13023_v4 = vpop.f32.mrf.mxu0 }
 0x203   :  { %3900 = vmatmul.mubr.bf16.gmra.mxu1 %v3717_v50  ;;  %4166 = vmatmul.mubr.bf16.gmra.mxu0 %v16247_v55  ;;  %v13105_v54 = vpop.f32.mrf.mxu1  ;;  %v2693_v62 = vadd.f32 %v12942_v26, %v12878_v56 }
 0x204   :  { %3909 = vmatprep.mubr.bf16.mxu1 %v20229_v52  ;;  %4175 = vmatprep.mubr.bf16.mxu0 %v20229_v52  ;;  %v13024_v20 = vpop.f32.mrf.mxu0 }
 0x205   :  { %v2924_v22 = vpop.f32.mrf.mxu1  ;;  %v16457_v19 = vadd.f32 %v13006_v28, %v2693_v62  ;;  %v13025_v33 = vadd.f32 %v13024_v20, %v13023_v4 }
 0x206   :  { %v13026_v34 = vpop.f32.mrf.mxu0 }
 0x207   :  { %v13106_v60 = vpop.f32.mrf.mxu1  ;;  %v2828_v55 = vadd.f32 %v13025_v33, %v16288_v27  ;;  %v14430_v27 = vld [vmem:[%s20167_s3] sm:$0x7] }
 0x208   :  { %v13027_v49 = vpop.f32.mrf.mxu0  ;;  %v16472_v37 = vrot.slane %v14430_v27, %v16453_v61 }
 0x209   :  { %v13028_v47 = vadd.f32 %v13027_v49, %v13026_v34  ;;  %v2925_v9 = vadd.f32 %v2924_v22, %v2828_v55  ;;  %v2927_v46 = vpop.f32.mrf.mxu1  ;;  %v4229_v34 = vld [vmem:[#allocation2 + $0x21] sm:$0xff] }
 0x20a   :  { %v13029_v51 = vpop.f32.mrf.mxu0  ;;  %v4495_v55 = vld [vmem:[#allocation2 + $0x22] sm:$0xff] }
 0x20b   :  { %3910 = vmatmul.mubr.bf16.gmra.mxu1 %v3718_v10  ;;  %4176 = vmatmul.mubr.bf16.gmra.mxu0 %v16272_v11  ;;  %v3006_v41 = vmul.f32 %v16464_v2, %v2925_v9  ;;  %v2831_v39 = vadd.f32 %v13028_v47, %v16294_v43  ;;  %v16477_v59 = vpop.f32.mrf.mxu1  ;;  %v3719_v43 = vpack.c.bf16 %v3711_v1, %v3710_v25  ;;  %v4228_v10 = vld [vmem:[#allocation2 + $0x9] sm:$0xff]  ;;  %v13692_v25 = vld [vmem:[%s20168_s4 + $0x354] ss:$8 sps:$4 sm:$0xff]  }
 0x20c   :  { %3919 = vmatprep.mubr.bf16.mxu1 %v20229_v52  ;;  %4185 = vmatprep.mubr.bf16.mxu0 %v20229_v52  ;;  %v13030_v38 = vpop.f32.mrf.mxu0  ;;  %v4494_v47 = vld [vmem:[#allocation2 + $0xa] sm:$0xff] }
 0x20d   :  { %v13031_v12 = vadd.f32 %v13030_v38, %v13029_v51  ;;  %v2928_v11 = vadd.f32 %v2927_v46, %v2831_v39  ;;  %v3071_v30 = vadd.f32 %v16472_v37, %v3006_v41  ;;  %v2940_v28 = vpop.f32.mrf.mxu1  ;;  %v13684_v9 = vld [vmem:[%s20168_s4 + $0x370] ss:$8 sps:$4 sm:$0xff]   ;;  %v4510_v46 = vpack.c.bf16 %v4495_v55, %v4494_v47  ;;  %v13689_v41 = vld [vmem:[%s20168_s4 + $0x364] ss:$8 sps:$4 sm:$0xff]  }
 0x20e   :  { %v13032_v35 = vpop.f32.mrf.mxu0 }
 0x20f   :  { %v2836_v53 = vadd.f32 %v13031_v12, %v16299_v6  ;;  %v3009_v31 = vmul.f32 %v16464_v2, %v2928_v11  ;;  %v3119_v4 = vmax.f32 %v3071_v30, 0.0  ;;  %v16490_v7 = vpop.f32.mrf.mxu1 }
 0x210   :  { %v13033_v21 = vpop.f32.mrf.mxu0 }
 0x211   :  { %v2933_v50 = vadd.f32 %v13105_v54, %v2836_v53  ;;  %v3074_v17 = vadd.f32 %v16472_v37, %v3009_v31  ;;  %v13034_v56 = vadd.f32 %v13033_v21, %v13032_v35  ;;  %v2943_v12 = vpop.f32.mrf.mxu1  ;;  %v13687_v53 = vld [vmem:[%s20168_s4 + $0x360] ss:$8 sps:$4 sm:$0xff]  }
 0x212   :  { %v13035_v26 = vpop.f32.mrf.mxu0 }
 0x213   :  { %3920 = vmatmul.mubr.bf16.gmra.mxu1 %v3719_v43  ;;  %4186 = vmatmul.mubr.bf16.gmra.mxu0 %v16284_v15  ;;  %v3012_v62 = vmul.f32 %v16464_v2, %v2933_v50  ;;  %v3122_v20 = vmax.f32 %v3074_v17, 0.0  ;;  %v2839_v6 = vadd.f32 %v13034_v56, %v16303_v29  ;;  %v4231_v50 = vld [vmem:[#allocation2 + $0x51] sm:$0xff] }
 0x214   :  { %4381 = vmatprep.mubr.bf16.mxu1 %v20229_v52  ;;  %4647 = vmatprep.mubr.bf16.mxu0 %v20229_v52  ;;  %v13036_v22 = vpop.f32.mrf.mxu0  ;;  %v4497_v17 = vld [vmem:[#allocation2 + $0x52] sm:$0xff] }
 0x215   :  { %v16488_v54 = vpack.c.bf16 %v3122_v20, %v3119_v4  ;;  %v2936_v33 = vadd.f32 %v13106_v60, %v2839_v6  ;;  %v13037_v18 = vadd.f32 %v13036_v22, %v13035_v26  ;;  %v3077_v36 = vadd.f32 %v16472_v37, %v3012_v62  ;;  %v16514_v26 = vpop.f32.mrf.mxu1  ;;  %v4230_v20 = vld [vmem:[#allocation2 + $0x39] sm:$0xff] }
 0x216   :  { %v13038_v15 = vpop.f32.mrf.mxu0  ;;  %v4244_v60 = vpack.c.bf16 %v4229_v34, %v4228_v10  ;;  %v4496_v6 = vld [vmem:[#allocation2 + $0x3a] sm:$0xff] }
 0x217   :  { %20271 = vst [vmem:[#allocation16_spill] sm:$0xff] %v16488_v54  ;;  %v3015_v49 = vmul.f32 %v16464_v2, %v2936_v33  ;;  %v2844_v29 = vadd.f32 %v13037_v18, %v16320_v23  ;;  %v3125_v11 = vmax.f32 %v3077_v36, 0.0  ;;  %v4245_v33 = vpack.c.bf16 %v4231_v50, %v4230_v20  ;;  %v13690_v34 = vld [vmem:[%s20168_s4 + $0x350] ss:$8 sps:$4 sm:$0xff]  }
 0x218   :  { %v13039_v51 = vpop.f32.mrf.mxu0  ;;  %v4511_v18 = vpack.c.bf16 %v4497_v17, %v4496_v6 }
 0x219   :  { %v3080_v27 = vadd.f32 %v16472_v37, %v3015_v49  ;;  %v13040_v39 = vadd.f32 %v13039_v51, %v13038_v15  ;;  %v2941_v38 = vadd.f32 %v2940_v28, %v2844_v29  ;;  %v2956_v29 = vpop.f32.mrf.mxu1 }
 0x21a   :  { %v13041_v23 = vpop.f32.mrf.mxu0 }
 0x21b   :  { %4382 = vmatmul.mubr.bf16.vlgmr.msra.gmra.mxu1 %v4244_v60  ;;  %4648 = vmatmul.mubr.bf16.vlgmr.msra.gmra.mxu0 %v4510_v46  ;;  %v3128_v1 = vmax.f32 %v3080_v27, 0.0  ;;  %v3018_v35 = vmul.f32 %v16464_v2, %v2941_v38  ;;  %v2847_v30 = vadd.f32 %v13040_v39, %v16333_v44  ;;  %v13693_v60 = vld [vmem:[%s20168_s4 + $0x340] ss:$8 sps:$4 sm:$0xff]  }
 0x21c   :  { %4882 = vmatpush1.bf16.msra.mxu1 %v13684_v9  ;;  %4391 = vmatprep.mubr.bf16.mxu1 %v20229_v52  ;;  %v13042_v31 = vpop.f32.mrf.mxu0  ;;  %v4233_v39 = vld [vmem:[#allocation2 + $0x81] sm:$0xff] }
 0x21d   :  { %4657 = vmatprep.mubr.bf16.mxu0 %v20229_v52  ;;  %4883 = vmatprep.subr.bf16.mxu1 %v13689_v41  ;;  %v13043_v21 = vadd.f32 %v13042_v31, %v13041_v23  ;;  %v2944_v43 = vadd.f32 %v2943_v12, %v2847_v30  ;;  %v16512_v56 = vpack.c.bf16 %v3128_v1, %v3125_v11  ;;  %v4499_v38 = vld [vmem:[#allocation2 + $0x82] sm:$0xff]  ;;  %v16540_v12 = vpop.f32.mrf.mxu1 }
 0x21e   :  { %v13044_v44 = vpop.f32.mrf.mxu0  ;;  %v3083_v28 = vadd.f32 %v16472_v37, %v3018_v35  ;;  %v4232_v30 = vld [vmem:[#allocation2 + $0x69] sm:$0xff] }
 0x21f   :  { %20272 = vst [vmem:[#allocation15_spill] sm:$0xff] %v16512_v56  ;;  %v2852_v4 = vadd.f32 %v13043_v21, %v16344_v63  ;;  %v3021_v62 = vmul.f32 %v16464_v2, %v2944_v43  ;;  %v13695_v63 = vld [vmem:[%s20168_s4 + $0x344] ss:$8 sps:$4 sm:$0xff]   ;;  %v4246_v31 = vpack.c.bf16 %v4233_v39, %v4232_v30  ;;  %v13696_v21 = vld [vmem:[%s20168_s4 + $0x330] ss:$8 sps:$4 sm:$0xff]  }
 0x220   :  { %4884 = vmatpush1.bf16.msra.mxu1 %v13687_v53  ;;  %v13045_v22 = vpop.f32.mrf.mxu0  ;;  %v3131_v10 = vmax.f32 %v3083_v28, 0.0  ;;  %v4498_v53 = vld [vmem:[#allocation2 + $0x6a] sm:$0xff]  ;;  %v2959_v28 = vpop.f32.mrf.mxu1  ;;  %v13830_v56 = vld [vmem:[%s20171_s7 + $0x334] ss:$8 sps:$4 sm:$0xff]  }
 0x221   :  { %4885 = vmatprep.subr.bf16.mxu1 %v13692_v25  ;;  %v2949_v55 = vadd.f32 %v16477_v59, %v2852_v4  ;;  %v3086_v15 = vadd.f32 %v16472_v37, %v3021_v62  ;;  %v13046_v36 = vadd.f32 %v13045_v22, %v13044_v44  ;;  %v4512_v25 = vpack.c.bf16 %v4499_v38, %v4498_v53  ;;  %v13701_v44 = vld [vmem:[%s20168_s4 + $0x324] ss:$8 sps:$4 sm:$0xff]  }
 0x222   :  { %v13047_v49 = vpop.f32.mrf.mxu0 }
 0x223   :  { %4392 = vmatmul.mubr.bf16.gmra.mxu1 %v4245_v33  ;;  %4658 = vmatmul.mubr.bf16.gmra.mxu0 %v4511_v18  ;;  %v3024_v47 = vmul.f32 %v16464_v2, %v2949_v55  ;;  %v3134_v9 = vmax.f32 %v3086_v15, 0.0  ;;  %v2855_v51 = vadd.f32 %v13046_v36, %v16360_v42  ;;  %v13698_v42 = vld [vmem:[%s20168_s4 + $0x334] ss:$8 sps:$4 sm:$0xff]   ;;  %v13699_v33 = vld [vmem:[%s20168_s4 + $0x320] ss:$8 sps:$4 sm:$0xff]  }
 0x224   :  { %4401 = vmatprep.mubr.bf16.mxu1 %v20229_v52  ;;  %4667 = vmatprep.mubr.bf16.mxu0 %v20229_v52  ;;  %v13048_v59 = vpop.f32.mrf.mxu0  ;;  %v4235_v55 = vld [vmem:[#allocation2 + $0xb1] sm:$0xff] }
 0x225   :  { %4886 = vmatpush1.bf16.msra.mxu1 %v13690_v34  ;;  %v16534_v46 = vpack.c.bf16 %v3134_v9, %v3131_v10  ;;  %v2952_v41 = vadd.f32 %v16490_v7, %v2855_v51  ;;  %v13049_v27 = vadd.f32 %v13048_v59, %v13047_v49  ;;  %v3089_v11 = vadd.f32 %v16472_v37, %v3024_v47  ;;  %v4501_v15 = vld [vmem:[#allocation2 + $0xb2] sm:$0xff]  ;;  %v16564_v49 = vpop.f32.mrf.mxu1  ;;  %v4500_v51 = vld [vmem:[#allocation2 + $0x9a] sm:$0xff] }
 0x226   :  { %4887 = vmatprep.subr.bf16.mxu1 %v13695_v63  ;;  %v13050_v23 = vpop.f32.mrf.mxu0  ;;  %v13704_v36 = vld [vmem:[%s20168_s4 + $0x314] ss:$8 sps:$4 sm:$0xff]  }
 0x227   :  { %20273 = vst [vmem:[#allocation9_spill] sm:$0xff] %v16534_v46  ;;  %v3027_v1 = vmul.f32 %v16464_v2, %v2952_v41  ;;  %v2860_v35 = vadd.f32 %v13049_v27, %v16377_v24  ;;  %v3137_v4 = vmax.f32 %v3089_v11, 0.0  ;;  %v4234_v9 = vld [vmem:[#allocation2 + $0x99] sm:$0xff]  ;;  %v4513_v41 = vpack.c.bf16 %v4501_v15, %v4500_v51  ;;  %v2972_v11 = vpop.f32.mrf.mxu1 }
 0x228   :  { %v13051_v7 = vpop.f32.mrf.mxu0  ;;  %v13702_v27 = vld [vmem:[%s20168_s4 + $0x310] ss:$8 sps:$4 sm:$0xff]  }
 0x229   :  { %4888 = vmatpush1.bf16.msra.mxu1 %v13693_v60  ;;  %v3092_v43 = vadd.f32 %v16472_v37, %v3027_v1  ;;  %v13052_v50 = vadd.f32 %v13051_v7, %v13050_v23  ;;  %v2957_v17 = vadd.f32 %v2956_v29, %v2860_v35  ;;  %v4247_v60 = vpack.c.bf16 %v4235_v55, %v4234_v9  ;;  %v13705_v7 = vld [vmem:[%s20168_s4 + $0x300] ss:$8 sps:$4 sm:$0xff]   ;;  %v4239_v9 = vld [vmem:[#allocation2 + $0x111] sm:$0xff] }
 0x22a   :  { %4889 = vmatprep.subr.bf16.mxu1 %v13698_v42  ;;  %v13053_v24 = vpop.f32.mrf.mxu0  ;;  %v4505_v51 = vld [vmem:[#allocation2 + $0x112] sm:$0xff] }
 0x22b   :  { %4402 = vmatmul.mubr.bf16.gmra.mxu1 %v4246_v31  ;;  %4668 = vmatmul.mubr.bf16.gmra.mxu0 %v4512_v25  ;;  %v3140_v62 = vmax.f32 %v3092_v43, 0.0  ;;  %v3030_v20 = vmul.f32 %v16464_v2, %v2957_v17  ;;  %v2863_v6 = vadd.f32 %v13052_v50, %v16394_v40  ;;  %v4237_v43 = vld [vmem:[#allocation2 + $0xe1] sm:$0xff] }
 0x22c   :  { %4411 = vmatprep.mubr.bf16.mxu1 %v20229_v52  ;;  %4677 = vmatprep.mubr.bf16.mxu0 %v20229_v52  ;;  %v13054_v22 = vpop.f32.mrf.mxu0  ;;  %v4503_v50 = vld [vmem:[#allocation2 + $0xe2] sm:$0xff] }
 0x22d   :  { %4890 = vmatpush1.bf16.msra.mxu1 %v13696_v21  ;;  %v13055_v18 = vadd.f32 %v13054_v22, %v13053_v24  ;;  %v2960_v34 = vadd.f32 %v2959_v28, %v2863_v6  ;;  %v16562_v40 = vpack.c.bf16 %v3140_v62, %v3137_v4  ;;  %v3095_v29 = vadd.f32 %v16472_v37, %v3030_v20  ;;  %v4236_v4 = vld [vmem:[#allocation2 + $0xc9] sm:$0xff] }
 0x22e   :  { %4891 = vmatprep.subr.bf16.mxu1 %v13701_v44  ;;  %v13056_v63 = vpop.f32.mrf.mxu0  ;;  %v4502_v62 = vld [vmem:[#allocation2 + $0xca] sm:$0xff]  ;;  %v4248_v6 = vpack.c.bf16 %v4237_v43, %v4236_v4 }
 0x22f   :  { %20274 = vst [vmem:[#allocation19_spill] sm:$0xff] %v16562_v40  ;;  %v2868_v10 = vadd.f32 %v13055_v18, %v16411_v0  ;;  %v3033_v47 = vmul.f32 %v16464_v2, %v2960_v34  ;;  %v13707_v0 = vld [vmem:[%s20168_s4 + $0x304] ss:$8 sps:$4 sm:$0xff]   ;;  %v3143_v1 = vmax.f32 %v3095_v29, 0.0  ;;  %v4514_v22 = vpack.c.bf16 %v4503_v50, %v4502_v62 }
 0x230   :  { %v13057_v59 = vpop.f32.mrf.mxu0  ;;  %v13815_v40 = vld [vmem:[%s20171_s7 + $0x264] ss:$8 sps:$4 sm:$0xff]  }
 0x231   :  { %4892 = vmatpush1.bf16.msra.mxu1 %v13699_v33  ;;  %v2965_v39 = vadd.f32 %v16514_v26, %v2868_v10  ;;  %v3098_v38 = vadd.f32 %v16472_v37, %v3033_v47  ;;  %v13058_v42 = vadd.f32 %v13057_v59, %v13056_v63 }
 0x232   :  { %4893 = vmatprep.subr.bf16.mxu1 %v13704_v36  ;;  %v13059_v23 = vpop.f32.mrf.mxu0 }
 0x233   :  { %4412 = vmatmul.mubr.bf16.gmra.mxu1 %v4247_v60  ;;  %4678 = vmatmul.mubr.bf16.gmra.mxu0 %v4513_v41  ;;  %v3036_v35 = vmul.f32 %v16464_v2, %v2965_v39  ;;  %v3146_v30 = vmax.f32 %v3098_v38, 0.0  ;;  %v2871_v53 = vadd.f32 %v13058_v42, %v16428_v58  ;;  %v13118_v58 = vpop.f32.mrf.mxu1  ;;  %v4238_v38 = vld [vmem:[#allocation2 + $0xf9] sm:$0xff] }
 0x234   :  { %4421 = vmatprep.mubr.bf16.mxu1 %v20229_v52  ;;  %4687 = vmatprep.mubr.bf16.mxu0 %v20229_v52  ;;  %v13060_v26 = vpop.f32.mrf.mxu0 }
 0x235   :  { %4894 = vmatpush1.bf16.msra.mxu1 %v13702_v27  ;;  %v16584_v31 = vpack.c.bf16 %v3146_v30, %v3143_v1  ;;  %v2968_v25 = vadd.f32 %v16540_v12, %v2871_v53  ;;  %v13061_v21 = vadd.f32 %v13060_v26, %v13059_v23  ;;  %v3101_v44 = vadd.f32 %v16472_v37, %v3036_v35  ;;  %v2975_v55 = vpop.f32.mrf.mxu1 }
 0x236   :  { %4895 = vmatprep.subr.bf16.mxu1 %v13707_v0  ;;  %v13062_v17 = vpop.f32.mrf.mxu0  ;;  %v4249_v0 = vpack.c.bf16 %v4239_v9, %v4238_v38  ;;  %v13710_v38 = vld [vmem:[%s20171_s7 + $0x174] ss:$8 sps:$4 sm:$0xff]  }
 0x237   :  { %20275 = vst [vmem:[#allocation18_spill] sm:$0xff] %v16584_v31  ;;  %v3039_v24 = vmul.f32 %v16464_v2, %v2968_v25  ;;  %v2876_v28 = vadd.f32 %v13061_v21, %v16439_v13  ;;  %v3149_v15 = vmax.f32 %v3101_v44, 0.0  ;;  %v4241_v21 = vld [vmem:[#allocation2 + $0x141] sm:$0xff]  ;;  %v4506_v44 = vld [vmem:[#allocation2 + $0x12a] sm:$0xff]  ;;  %5612 = vmatprep.subr.bf16.mxu0 %v13710_v38 }
 0x238   :  { %v13063_v20 = vpop.f32.mrf.mxu0 }
 0x239   :  { %4896 = vmatpush1.bf16.msra.mxu1 %v13705_v7  ;;  %v3104_v12 = vadd.f32 %v16472_v37, %v3039_v24  ;;  %v13064_v33 = vadd.f32 %v13063_v20, %v13062_v17  ;;  %v2973_v18 = vadd.f32 %v2972_v11, %v2876_v28  ;;  %v4240_v17 = vld [vmem:[#allocation2 + $0x129] sm:$0xff]  ;;  %v4509_v20 = vld [vmem:[#allocation2 + $0x172] sm:$0xff] }
 0x23a   :  { %v13065_v34 = vpop.f32.mrf.mxu0  ;;  %v4250_v24 = vpack.c.bf16 %v4241_v21, %v4240_v17  ;;  %v13714_v21 = vld [vmem:[%s20171_s7 + $0x160] ss:$8 sps:$4 sm:$0xff]  }
 0x23b   :  { %4422 = vmatmul.mubr.bf16.gmra.mxu1 %v4248_v6  ;;  %4688 = vmatmul.mubr.bf16.gmra.mxu0 %v4514_v22  ;;  %v3152_v36 = vmax.f32 %v3104_v12, 0.0  ;;  %v3042_v63 = vmul.f32 %v16464_v2, %v2973_v18  ;;  %v2879_v13 = vadd.f32 %v13064_v33, %v16444_v48  ;;  %v4504_v48 = vld [vmem:[#allocation2 + $0xfa] sm:$0xff]  ;;  %v4760_v18 = vld [vmem:[#allocation2 + $0xb] sm:$0xff] }
 0x23c   :  { %4431 = vmatprep.mubr.bf16.mxu1 %v20229_v52  ;;  %4697 = vmatprep.mubr.bf16.mxu0 %v20229_v52  ;;  %v13066_v29 = vpop.f32.mrf.mxu0  ;;  %v4515_v23 = vpack.c.bf16 %v4505_v51, %v4504_v48  ;;  %v4242_v22 = vld [vmem:[#allocation2 + $0x159] sm:$0xff] }
 0x23d   :  { %v13067_v10 = vadd.f32 %v13066_v29, %v13065_v34  ;;  %v2976_v47 = vadd.f32 %v2975_v55, %v2879_v13  ;;  %v16595_v59 = vpack.c.bf16 %v3152_v36, %v3149_v15  ;;  %v3107_v41 = vadd.f32 %v16472_v37, %v3042_v63  ;;  %v13713_v48 = vld [vmem:[%s20171_s7 + $0x74] ss:$8 sps:$4 sm:$0xff]  }
 0x23e   :  { %v13068_v60 = vpop.f32.mrf.mxu0  ;;  %5965 = vmatprep.subr.bf16.mxu1 %v13713_v48 }
 0x23f   :  { %20276 = vst [vmem:[#allocation20_spill] sm:$0xff] %v16595_v59  ;;  %v2884_v27 = vadd.f32 %v13067_v10, %v16449_v45  ;;  %v3045_v39 = vmul.f32 %v16464_v2, %v2976_v47  ;;  %v3155_v30 = vmax.f32 %v3107_v41, 0.0  ;;  %v4763_v47 = vld [vmem:[#allocation2 + $0x53] sm:$0xff]  ;;  %v4762_v41 = vld [vmem:[#allocation2 + $0x3b] sm:$0xff] }
 0x240   :  { %v13069_v42 = vpop.f32.mrf.mxu0 }
 0x241   :  { %v2981_v11 = vadd.f32 %v16564_v49, %v2884_v27  ;;  %v3110_v1 = vadd.f32 %v16472_v37, %v3045_v39  ;;  %v13070_v35 = vadd.f32 %v13069_v42, %v13068_v60  ;;  %v4507_v49 = vld [vmem:[#allocation2 + $0x142] sm:$0xff]  ;;  %v4777_v39 = vpack.c.bf16 %v4763_v47, %v4762_v41  ;;  %v13708_v42 = vld [vmem:[%s20171_s7 + $0x170] ss:$8 sps:$4 sm:$0xff]  }
 0x242   :  { %v4516_v28 = vpack.c.bf16 %v4507_v49, %v4506_v44  ;;  %5613 = vmatpush1.bf16.msra.mxu0 %v13708_v42  ;;  %v13717_v49 = vld [vmem:[%s20171_s7 + $0x60] ss:$8 sps:$4 sm:$0xff]   ;;  %v13734_v42 = vld [vmem:[%s20171_s7 + $0x134] ss:$8 sps:$4 sm:$0xff]  }
 0x243   :  { %4432 = vmatmul.mubr.bf16.gmra.mxu1 %v4249_v0  ;;  %4698 = vmatmul.mubr.bf16.gmra.mxu0 %v4515_v23  ;;  %v3048_v53 = vmul.f32 %v16464_v2, %v2981_v11  ;;  %v3158_v26 = vmax.f32 %v3110_v1, 0.0  ;;  %v2887_v45 = vadd.f32 %v13070_v35, %v16457_v19  ;;  %v13711_v0 = vld [vmem:[%s20171_s7 + $0x70] ss:$8 sps:$4 sm:$0xff]  }
 0x244   :  { %4441 = vmatprep.mubr.bf16.mxu1 %v20229_v52  ;;  %4707 = vmatprep.mubr.bf16.mxu0 %v20229_v52  ;;  %v4764_v44 = vld [vmem:[#allocation2 + $0x6b] sm:$0xff]  ;;  %v4766_v41 = vld [vmem:[#allocation2 + $0x9b] sm:$0xff] }
 0x245   :  { %v16606_v7 = vpack.c.bf16 %v3158_v26, %v3155_v30  ;;  %v2984_v25 = vadd.f32 %v13118_v58, %v2887_v45  ;;  %v3113_v43 = vadd.f32 %v16472_v37, %v3048_v53  ;;  %v4243_v58 = vld [vmem:[#allocation2 + $0x171] sm:$0xff]  ;;  %v13716_v53 = vld [vmem:[%s20171_s7 + $0x164] ss:$8 sps:$4 sm:$0xff]  }
 0x246   :  { %v4251_v12 = vpack.c.bf16 %v4243_v58, %v4242_v22  ;;  %v13719_v26 = vld [vmem:[%s20171_s7 + $0x64] ss:$8 sps:$4 sm:$0xff]   ;;  %5614 = vmatprep.subr.bf16.mxu0 %v13716_v53  ;;  %v13720_v58 = vld [vmem:[%s20171_s7 + $0x150] ss:$8 sps:$4 sm:$0xff]  }
 0x247   :  { %20277 = vst [vmem:[#allocation10_spill] sm:$0xff] %v16606_v7  ;;  %v3051_v50 = vmul.f32 %v16464_v2, %v2984_v25  ;;  %v3161_v19 = vmax.f32 %v3113_v43, 0.0  ;;  %v4508_v2 = vld [vmem:[#allocation2 + $0x15a] sm:$0xff]  ;;  %v4765_v25 = vld [vmem:[#allocation2 + $0x83] sm:$0xff]  ;;  %5615 = vmatpush1.bf16.msra.mxu0 %v13714_v21 }
 0x248   :  { %v4517_v33 = vpack.c.bf16 %v4509_v20, %v4508_v2  ;;  %v13723_v20 = vld [vmem:[%s20171_s7 + $0x50] ss:$8 sps:$4 sm:$0xff]   ;;  %v13740_v21 = vld [vmem:[%s20171_s7 + $0x124] ss:$8 sps:$4 sm:$0xff]  }
 0x249   :  { %v3116_v4 = vadd.f32 %v16472_v37, %v3051_v50  ;;  %v4761_v37 = vld [vmem:[#allocation2 + $0x23] sm:$0xff] }
 0x24a   :  { %v4776_v34 = vpack.c.bf16 %v4761_v37, %v4760_v18  ;;  %v13728_v18 = vld [vmem:[%s20171_s7 + $0x144] ss:$8 sps:$4 sm:$0xff]  }
 0x24b   :  { %4442 = vmatmul.mubr.bf16.gmra.mxu1 %v4250_v24  ;;  %4708 = vmatmul.mubr.bf16.gmra.mxu0 %v4516_v28  ;;  %v3164_v62 = vmax.f32 %v3116_v4, 0.0  ;;  %v4778_v4 = vpack.c.bf16 %v4765_v25, %v4764_v44  ;;  %v13738_v44 = vld [vmem:[%s20171_s7 + $0x120] ss:$8 sps:$4 sm:$0xff]  }
 0x24c   :  { %4451 = vmatprep.mubr.bf16.mxu1 %v20229_v52  ;;  %4717 = vmatprep.mubr.bf16.mxu0 %v20229_v52 }
 0x24d   :  { %v16613_v6 = vpack.c.bf16 %v3164_v62, %v3161_v19  ;;  %v13722_v19 = vld [vmem:[%s20171_s7 + $0x154] ss:$8 sps:$4 sm:$0xff]  }
 0x24e   :  { %v13725_v62 = vld [vmem:[%s20171_s7 + $0x54] ss:$8 sps:$4 sm:$0xff]   ;;  %5616 = vmatprep.subr.bf16.mxu0 %v13722_v19 }
 0x24f   :  { %20278 = vst [vmem:[#allocation25_spill] sm:$0xff] %v16613_v6  ;;  %5617 = vmatpush1.bf16.msra.mxu0 %v13720_v58  ;;  %v13803_v6 = vld [vmem:[%s20171_s7 + $0x84] ss:$8 sps:$4 sm:$0xff]  }
 0x250   :  { %5618 = vmatprep.subr.bf16.mxu0 %v13728_v18  ;;  %v13749_v18 = vld [vmem:[%s20171_s7 + $0x14] ss:$8 sps:$4 sm:$0xff]  }
 0x253   :  { %4452 = vmatmul.mubr.bf16.gmra.mxu1 %v4251_v12  ;;  %4718 = vmatmul.mubr.bf16.gmra.mxu0 %v4517_v33 }
 0x254   :  { %4913 = vmatprep.mubr.bf16.mxu1 %v20229_v52 }
 0x259   :  { %v3424_v55 = vpop.f32.mrf.mxu1 }
 0x25a   :  { %v3617_v15 = vpop.f32.mrf.mxu0 }
 0x25b   :  { %4914 = vmatmul.mubr.bf16.vlgmr.msra.gmra.mxu1 %v4776_v34  ;;  %v16616_v36 = vadd.f32 %v3617_v15, %v3424_v55  ;;  %v3426_v63 = vpop.f32.mrf.mxu1  ;;  %v13731_v34 = vld [vmem:[%s20171_s7 + $0x44] ss:$8 sps:$4 sm:$0xff]   ;;  %v4767_v15 = vld [vmem:[#allocation2 + $0xb3] sm:$0xff] }
 0x25c   :  { %4923 = vmatprep.mubr.bf16.mxu1 %v20229_v52  ;;  %v3619_v13 = vpop.f32.mrf.mxu0  ;;  %5966 = vmatpush1.bf16.msra.mxu1 %v13711_v0  ;;  %v4779_v48 = vpack.c.bf16 %v4767_v15, %v4766_v41  ;;  %v13737_v0 = vld [vmem:[%s20171_s7 + $0x34] ss:$8 sps:$4 sm:$0xff]   ;;  %v13747_v15 = vld [vmem:[%s20171_s7 + $0x10] ss:$8 sps:$4 sm:$0xff]  }
 0x25d   :  { %v16619_v29 = vadd.f32 %v3619_v13, %v3426_v63  ;;  %v3428_v10 = vpop.f32.mrf.mxu1  ;;  %5967 = vmatprep.subr.bf16.mxu1 %v13719_v26  ;;  %v13726_v63 = vld [vmem:[%s20171_s7 + $0x140] ss:$8 sps:$4 sm:$0xff]  }
 0x25e   :  { %v3621_v9 = vpop.f32.mrf.mxu0  ;;  %v13729_v13 = vld [vmem:[%s20171_s7 + $0x40] ss:$8 sps:$4 sm:$0xff]   ;;  %5619 = vmatpush1.bf16.msra.mxu0 %v13726_v63 }
 0x25f   :  { %v16621_v51 = vadd.f32 %v3621_v9, %v3428_v10  ;;  %v16623_v60 = vpop.f32.mrf.mxu1  ;;  %5620 = vmatprep.subr.bf16.mxu0 %v13734_v42  ;;  %v13755_v42 = vld [vmem:[%s20171_s7 + $0x4] ss:$8 sps:$4 sm:$0xff]  }
 0x260   :  { %v16625_v27 = vpop.f32.mrf.mxu0  ;;  %5968 = vmatpush1.bf16.msra.mxu1 %v13717_v49  ;;  %v13743_v49 = vld [vmem:[%s20171_s7 + $0x24] ss:$8 sps:$4 sm:$0xff]  }
 0x261   :  { %5969 = vmatprep.subr.bf16.mxu1 %v13725_v62 }
 0x262   :  { %v3434_v23 = vpop.f32.mrf.mxu1 }
 0x263   :  { %v3627_v11 = vpop.f32.mrf.mxu0  ;;  %4924 = vmatmul.mubr.bf16.gmra.mxu1 %v4777_v39 }
 0x264   :  { %v16639_v1 = vadd.f32 %v3627_v11, %v3434_v23  ;;  %4933 = vmatprep.mubr.bf16.mxu1 %v20229_v52  ;;  %v3436_v35 = vpop.f32.mrf.mxu1  ;;  %5970 = vmatpush1.bf16.msra.mxu1 %v13723_v20  ;;  %v13732_v23 = vld [vmem:[%s20171_s7 + $0x130] ss:$8 sps:$4 sm:$0xff]  }
 0x265   :  { %v3629_v30 = vpop.f32.mrf.mxu0  ;;  %5971 = vmatprep.subr.bf16.mxu1 %v13731_v34  ;;  %v13735_v11 = vld [vmem:[%s20171_s7 + $0x30] ss:$8 sps:$4 sm:$0xff]   ;;  %5621 = vmatpush1.bf16.msra.mxu0 %v13732_v23 }
 0x266   :  { %v16648_v45 = vadd.f32 %v3629_v30, %v3436_v35  ;;  %v3438_v43 = vpop.f32.mrf.mxu1  ;;  %5622 = vmatprep.subr.bf16.mxu0 %v13740_v21  ;;  %v4768_v20 = vld [vmem:[#allocation2 + $0xcb] sm:$0xff]  ;;  %v4771_v23 = vld [vmem:[#allocation2 + $0x113] sm:$0xff]  ;;  %v4770_v21 = vld [vmem:[#allocation2 + $0xfb] sm:$0xff] }
 0x267   :  { %v3631_v50 = vpop.f32.mrf.mxu0  ;;  %v13744_v34 = vld [vmem:[%s20171_s7 + $0x110] ss:$8 sps:$4 sm:$0xff]  }
 0x268   :  { %v16656_v17 = vadd.f32 %v3631_v50, %v3438_v43  ;;  %v16658_v24 = vpop.f32.mrf.mxu1  ;;  %5972 = vmatpush1.bf16.msra.mxu1 %v13729_v13  ;;  %v4769_v50 = vld [vmem:[#allocation2 + $0xe3] sm:$0xff] }
 0x269   :  { %v16660_v28 = vpop.f32.mrf.mxu0  ;;  %5973 = vmatprep.subr.bf16.mxu1 %v13737_v0  ;;  %5623 = vmatpush1.bf16.msra.mxu0 %v13738_v44  ;;  %v4781_v44 = vpack.c.bf16 %v4771_v23, %v4770_v21 }
 0x26a   :  { %v3444_v22 = vpop.f32.mrf.mxu1 }
 0x26b   :  { %v3637_v2 = vpop.f32.mrf.mxu0  ;;  %4934 = vmatmul.mubr.bf16.gmra.mxu1 %v4778_v4  ;;  %v13741_v4 = vld [vmem:[%s20171_s7 + $0x20] ss:$8 sps:$4 sm:$0xff]  }
 0x26c   :  { %v16674_v12 = vadd.f32 %v3637_v2, %v3444_v22  ;;  %4943 = vmatprep.mubr.bf16.mxu1 %v20229_v52  ;;  %v3446_v33 = vpop.f32.mrf.mxu1  ;;  %5974 = vmatpush1.bf16.msra.mxu1 %v13735_v11  ;;  %v13750_v11 = vld [vmem:[%s20171_s7 + $0x100] ss:$8 sps:$4 sm:$0xff]  }
 0x26d   :  { %v3639_v37 = vpop.f32.mrf.mxu0  ;;  %5975 = vmatprep.subr.bf16.mxu1 %v13743_v49 }
 0x26e   :  { %v16683_v55 = vadd.f32 %v3639_v37, %v3446_v33  ;;  %v3448_v10 = vpop.f32.mrf.mxu1  ;;  %v4780_v33 = vpack.c.bf16 %v4769_v50, %v4768_v20  ;;  %v13746_v37 = vld [vmem:[%s20171_s7 + $0x114] ss:$8 sps:$4 sm:$0xff]   ;;  %v13759_v20 = vld [vmem:[%s20171_s7 + $0xf0] ss:$8 sps:$4 sm:$0xff]  }
 0x26f   :  { %v3641_v47 = vpop.f32.mrf.mxu0  ;;  %5624 = vmatprep.subr.bf16.mxu0 %v13746_v37 }
 0x270   :  { %v16691_v9 = vadd.f32 %v3641_v47, %v3448_v10  ;;  %v16693_v39 = vpop.f32.mrf.mxu1  ;;  %5976 = vmatpush1.bf16.msra.mxu1 %v13741_v4  ;;  %5625 = vmatpush1.bf16.msra.mxu0 %v13744_v34  ;;  %v13758_v4 = vld [vmem:[%s20171_s7 + $0x1f4] ss:$8 sps:$4 sm:$0xff]  }
 0x271   :  { %v16695_v38 = vpop.f32.mrf.mxu0  ;;  %5977 = vmatprep.subr.bf16.mxu1 %v13749_v18 }
 0x273   :  { %v3454_v35 = vpop.f32.mrf.mxu1  ;;  %v3647_v30 = vpop.f32.mrf.mxu0  ;;  %4944 = vmatmul.mubr.bf16.gmra.mxu1 %v4779_v48  ;;  %v13752_v48 = vld [vmem:[%s20171_s7 + $0x104] ss:$8 sps:$4 sm:$0xff]  }
 0x274   :  { %v16709_v53 = vadd.f32 %v3647_v30, %v3454_v35  ;;  %4953 = vmatprep.mubr.bf16.mxu1 %v20229_v52  ;;  %5978 = vmatpush1.bf16.msra.mxu1 %v13747_v15  ;;  %v13753_v35 = vld [vmem:[%s20171_s7] ss:$8 sps:$4 sm:$0xff]  }
 0x275   :  { %v3456_v26 = vpop.f32.mrf.mxu1  ;;  %v3649_v25 = vpop.f32.mrf.mxu0  ;;  %5626 = vmatprep.subr.bf16.mxu0 %v13752_v48  ;;  %5979 = vmatprep.subr.bf16.mxu1 %v13755_v42  ;;  %v13762_v48 = vld [vmem:[%s20171_s7 + $0x1e0] ss:$8 sps:$4 sm:$0xff]  }
 0x276   :  { %v16718_v43 = vadd.f32 %v3649_v25, %v3456_v26  ;;  %5627 = vmatpush1.bf16.msra.mxu0 %v13750_v11  ;;  %v13765_v42 = vld [vmem:[%s20171_s7 + $0xe0] ss:$8 sps:$4 sm:$0xff]  }
 0x277   :  { %v3458_v19 = vpop.f32.mrf.mxu1  ;;  %v3651_v62 = vpop.f32.mrf.mxu0  ;;  %5628 = vmatprep.subr.bf16.mxu0 %v13758_v4  ;;  %v13770_v4 = vld [vmem:[%s20171_s7 + $0x1d4] ss:$8 sps:$4 sm:$0xff]  }
 0x278   :  { %v16726_v58 = vadd.f32 %v3651_v62, %v3458_v19  ;;  %5980 = vmatpush1.bf16.msra.mxu1 %v13753_v35  ;;  %v13761_v19 = vld [vmem:[%s20171_s7 + $0xf4] ss:$8 sps:$4 sm:$0xff]   ;;  %v13756_v62 = vld [vmem:[%s20171_s7 + $0x1f0] ss:$8 sps:$4 sm:$0xff]  }
 0x279   :  { %v16728_v22 = vpop.f32.mrf.mxu1  ;;  %v16730_v2 = vpop.f32.mrf.mxu0  ;;  %5981 = vmatprep.subr.bf16.mxu1 %v13761_v19  ;;  %v13773_v19 = vld [vmem:[%s20171_s7 + $0xd4] ss:$8 sps:$4 sm:$0xff]  }
 0x27a   :  { %5629 = vmatpush2.bf16.msra.mxu0 %v13756_v62  ;;  %v13768_v62 = vld [vmem:[%s20171_s7 + $0x1d0] ss:$8 sps:$4 sm:$0xff]  }
 0x27b   :  { %v3464_v63 = vpop.f32.mrf.mxu1  ;;  %v3657_v13 = vpop.f32.mrf.mxu0  ;;  %4954 = vmatmul.mubr.bf16.gmra.mxu1 %v4780_v33 }
 0x27c   :  { %v16744_v10 = vadd.f32 %v3657_v13, %v3464_v63  ;;  %4963 = vmatprep.mubr.bf16.mxu1 %v20229_v52  ;;  %5982 = vmatpush2.bf16.msra.mxu1 %v13759_v20  ;;  %v13764_v63 = vld [vmem:[%s20171_s7 + $0x1e4] ss:$8 sps:$4 sm:$0xff]   ;;  %v13771_v20 = vld [vmem:[%s20171_s7 + $0xd0] ss:$8 sps:$4 sm:$0xff]  }
 0x27d   :  { %v3466_v47 = vpop.f32.mrf.mxu1  ;;  %v3659_v41 = vpop.f32.mrf.mxu0  ;;  %v13767_v13 = vld [vmem:[%s20171_s7 + $0xe4] ss:$8 sps:$4 sm:$0xff]   ;;  %5630 = vmatprep.subr.bf16.mxu0 %v13764_v63 }
 0x27e   :  { %v16753_v0 = vadd.f32 %v3659_v41, %v3466_v47  ;;  %v4773_v41 = vld [vmem:[#allocation2 + $0x143] sm:$0xff]  ;;  %5983 = vmatprep.subr.bf16.mxu1 %v13767_v13  ;;  %5631 = vmatpush2.bf16.msra.mxu0 %v13762_v48 }
 0x27f   :  { %v3468_v30 = vpop.f32.mrf.mxu1  ;;  %v3661_v26 = vpop.f32.mrf.mxu0  ;;  %5632 = vmatprep.subr.bf16.mxu0 %v13770_v4  ;;  %v13776_v13 = vld [vmem:[%s20171_s7 + $0x1c4] ss:$8 sps:$4 sm:$0xff]  }
 0x280   :  { %v16761_v25 = vadd.f32 %v3661_v26, %v3468_v30  ;;  %v4772_v30 = vld [vmem:[#allocation2 + $0x12b] sm:$0xff]  ;;  %5984 = vmatpush2.bf16.msra.mxu1 %v13765_v42  ;;  %v4775_v42 = vld [vmem:[#allocation2 + $0x173] sm:$0xff] }
 0x281   :  { %v16763_v49 = vpop.f32.mrf.mxu1  ;;  %v16765_v50 = vpop.f32.mrf.mxu0  ;;  %5985 = vmatprep.subr.bf16.mxu1 %v13773_v19  ;;  %v4774_v19 = vld [vmem:[#allocation2 + $0x15b] sm:$0xff] }
 0x282   :  { %20279 = vst [vmem:[#allocation21_spill] sm:$0xff] %v16763_v49  ;;  %20280 = vst [vmem:[#allocation23_spill] sm:$0xff] %v16765_v50  ;;  %5633 = vmatpush2.bf16.msra.mxu0 %v13768_v62 }
 0x283   :  { %v3474_v33 = vpop.f32.mrf.mxu1  ;;  %v3667_v37 = vpop.f32.mrf.mxu0  ;;  %4964 = vmatmul.mubr.bf16.gmra.mxu1 %v4781_v44  ;;  %v4782_v44 = vpack.c.bf16 %v4773_v41, %v4772_v30  ;;  %v13779_v41 = vld [vmem:[%s20171_s7 + $0xc4] ss:$8 sps:$4 sm:$0xff]   ;;  %5634 = vmatprep.subr.bf16.mxu0 %v13776_v13  ;;  %v13783_v13 = vld [vmem:[%s20171_s7 + $0xb0] ss:$8 sps:$4 sm:$0xff]  }
 0x284   :  { %v16779_v18 = vadd.f32 %v3667_v37, %v3474_v33  ;;  %4973 = vmatprep.mubr.bf16.mxu1 %v20229_v52  ;;  %5986 = vmatpush2.bf16.msra.mxu1 %v13771_v20 }
 0x285   :  { %v3476_v34 = vpop.f32.mrf.mxu1  ;;  %v3669_v15 = vpop.f32.mrf.mxu0  ;;  %5987 = vmatprep.subr.bf16.mxu1 %v13779_v41 }
 0x286   :  { %v16788_v47 = vadd.f32 %v3669_v15, %v3476_v34 }
 0x287   :  { %v3478_v23 = vpop.f32.mrf.mxu1  ;;  %v3671_v11 = vpop.f32.mrf.mxu0 }
 0x288   :  { %v16796_v35 = vadd.f32 %v3671_v11, %v3478_v23  ;;  %v13774_v23 = vld [vmem:[%s20171_s7 + $0x1c0] ss:$8 sps:$4 sm:$0xff]  }
 0x289   :  { %v16798_v26 = vpop.f32.mrf.mxu1  ;;  %v16800_v21 = vpop.f32.mrf.mxu0  ;;  %v13777_v11 = vld [vmem:[%s20171_s7 + $0xc0] ss:$8 sps:$4 sm:$0xff]   ;;  %5635 = vmatpush2.bf16.msra.mxu0 %v13774_v23 }
 0x28a   :  { %20281 = vst [vmem:[#allocation22_spill] sm:$0xff] %v16798_v26  ;;  %20282 = vst [vmem:[#allocation11_spill] sm:$0xff] %v16800_v21  ;;  %5988 = vmatpush2.bf16.msra.mxu1 %v13777_v11 }
 0x28b   :  { %v3484_v33 = vpop.f32.mrf.mxu1  ;;  %v3677_v37 = vpop.f32.mrf.mxu0  ;;  %4974 = vmatmul.mubr.bf16.gmra.mxu1 %v4782_v44 }
 0x28c   :  { %v16814_v34 = vadd.f32 %v3677_v37, %v3484_v33  ;;  %4983 = vmatprep.mubr.bf16.mxu1 %v20229_v52  ;;  %v4783_v33 = vpack.c.bf16 %v4775_v42, %v4774_v19  ;;  %v13782_v37 = vld [vmem:[%s20171_s7 + $0x1b4] ss:$8 sps:$4 sm:$0xff]   ;;  %v13791_v19 = vld [vmem:[%s20171_s7 + $0xa4] ss:$8 sps:$4 sm:$0xff]  }
 0x28d   :  { %v3486_v15 = vpop.f32.mrf.mxu1  ;;  %v3679_v63 = vpop.f32.mrf.mxu0  ;;  %5636 = vmatprep.subr.bf16.mxu0 %v13782_v37  ;;  %v13789_v37 = vld [vmem:[%s20171_s7 + $0xa0] ss:$8 sps:$4 sm:$0xff]  }
 0x28e   :  { %v16823_v48 = vadd.f32 %v3679_v63, %v3486_v15  ;;  %v13785_v15 = vld [vmem:[%s20171_s7 + $0xb4] ss:$8 sps:$4 sm:$0xff]   ;;  %v13780_v63 = vld [vmem:[%s20171_s7 + $0x1b0] ss:$8 sps:$4 sm:$0xff]  }
 0x28f   :  { %v3488_v30 = vpop.f32.mrf.mxu1  ;;  %v3681_v44 = vpop.f32.mrf.mxu0  ;;  %5989 = vmatprep.subr.bf16.mxu1 %v13785_v15  ;;  %5637 = vmatpush2.bf16.msra.mxu0 %v13780_v63 }
 0x290   :  { %v16831_v4 = vadd.f32 %v3681_v44, %v3488_v30  ;;  %5990 = vmatpush2.bf16.msra.mxu1 %v13783_v13  ;;  %v13788_v44 = vld [vmem:[%s20171_s7 + $0x1a4] ss:$8 sps:$4 sm:$0xff]  }
 0x291   :  { %v16833_v62 = vpop.f32.mrf.mxu1  ;;  %v16835_v20 = vpop.f32.mrf.mxu0  ;;  %5638 = vmatprep.subr.bf16.mxu0 %v13788_v44  ;;  %5991 = vmatprep.subr.bf16.mxu1 %v13791_v19  ;;  %v13792_v44 = vld [vmem:[%s20171_s7 + $0x190] ss:$8 sps:$4 sm:$0xff]  }
 0x292   :  { %20283 = vst [vmem:[#allocation28_spill] sm:$0xff] %v16833_v62  ;;  %20284 = vst [vmem:[#allocation26_spill] sm:$0xff] %v16835_v20  ;;  %v13795_v19 = vld [vmem:[%s20171_s7 + $0x90] ss:$8 sps:$4 sm:$0xff]   ;;  %v13851_v20 = vld [vmem:[%s20171_s7 + $0x204] ss:$8 sps:$4 sm:$0xff]  }
 0x293   :  { %v3494_v41 = vpop.f32.mrf.mxu1  ;;  %v3687_v42 = vpop.f32.mrf.mxu0  ;;  %4984 = vmatmul.mubr.bf16.gmra.mxu1 %v4783_v33  ;;  %v13786_v33 = vld [vmem:[%s20171_s7 + $0x1a0] ss:$8 sps:$4 sm:$0xff]   ;;  %v13854_v62 = vld [vmem:[%s20171_s7 + $0x3f4] ss:$8 sps:$4 sm:$0xff]  }
 0x294   :  { %v16849_v23 = vadd.f32 %v3687_v42, %v3494_v41  ;;  %5639 = vmatpush2.bf16.msra.mxu0 %v13786_v33  ;;  %5992 = vmatpush2.bf16.msra.mxu1 %v13789_v37 }
 0x295   :  { %v3496_v11 = vpop.f32.mrf.mxu1  ;;  %v3689_v30 = vpop.f32.mrf.mxu0 }
 0x296   :  { %v16857_v61 = vadd.f32 %v3689_v30, %v3496_v11  ;;  %v13794_v11 = vld [vmem:[%s20171_s7 + $0x194] ss:$8 sps:$4 sm:$0xff]  }
 0x297   :  { %v3498_v15 = vpop.f32.mrf.mxu1  ;;  %v3691_v63 = vpop.f32.mrf.mxu0  ;;  %v13797_v30 = vld [vmem:[%s20171_s7 + $0x94] ss:$8 sps:$4 sm:$0xff]   ;;  %5640 = vmatprep.subr.bf16.mxu0 %v13794_v11  ;;  %v13801_v11 = vld [vmem:[%s20171_s7 + $0x80] ss:$8 sps:$4 sm:$0xff]  }
 0x298   :  { %v16865_v13 = vadd.f32 %v3691_v63, %v3498_v15  ;;  %5993 = vmatprep.subr.bf16.mxu1 %v13797_v30  ;;  %5641 = vmatpush2.bf16.msra.mxu0 %v13792_v44 }
 0x299   :  { %v16867_v41 = vpop.f32.mrf.mxu1  ;;  %v16869_v42 = vpop.f32.mrf.mxu0  ;;  %5994 = vmatpush2.bf16.msra.mxu1 %v13795_v19  ;;  %5642 = vmatprep.subr.bf16.mxu0 %v13800_v32 }
 0x29a   :  { %20285 = vst [vmem:[#allocation29_spill] sm:$0xff] %v16867_v41  ;;  %20286 = vst [vmem:[#allocation30_spill] sm:$0xff] %v16869_v42  ;;  %5995 = vmatprep.subr.bf16.mxu1 %v13803_v6 }
 0x29b   :  { %v3851_v15 = vpop.f32.mrf.mxu1  ;;  %v16883_v63 = vpop.f32.mrf.mxu0 }
 0x29c   :  { %v16886_v33 = vadd.f32 %v3851_v15, %v16616_v36  ;;  %v13798_v36 = vld [vmem:[%s20171_s7 + $0x180] ss:$8 sps:$4 sm:$0xff]   ;;  %v16908_v15 = vcombine.low %v20229_v52, %v20229_v52 }
 0x29d   :  { %v3853_v37 = vpop.f32.mrf.mxu1  ;;  %v16888_v8 = vpop.f32.mrf.mxu0  ;;  %5643 = vmatpush2.bf16.msra.mxu0 %v13798_v36  ;;  %5996 = vmatpush2.bf16.msra.mxu1 %v13801_v11  ;;  %v13806_v36 = vld [vmem:[%s20171_s7 + $0x374] ss:$8 sps:$4 sm:$0xff]  }
 0x29e   :  { %v16897_v3 = vadd.f32 %v3853_v37, %v16619_v29  ;;  %5644 = vmatprep.mubr.bf16.mxu0 %v16908_v15  ;;  %5997 = vmatprep.mubr.bf16.mxu1 %v16908_v15 }
 0x29f   :  { %v3855_v30 = vpop.f32.mrf.mxu1  ;;  %v4121_v44 = vpop.f32.mrf.mxu0  ;;  %6803 = vmatprep.subr.bf16.mxu1 %v13806_v36 }
 0x2a0   :  { %v3932_v19 = vadd.f32 %v3855_v30, %v16621_v51  ;;  %5645 = vmatmul.mubr.bf16.vlgmr.msra.gmra.mxu0 %v16908_v15  ;;  %5998 = vmatmul.mubr.bf16.vlgmr.msra.gmra.mxu1 %v16908_v15 }
 0x2a1   :  { %v16910_v29 = vpop.f32.mrf.mxu1  ;;  %v16912_v37 = vpop.f32.mrf.mxu0 }
 0x2a2   :  { %v16914_v7 = vadd.f32 %v4121_v44, %v3932_v19  ;;  %v13809_v19 = vld [vmem:[%s20171_s7 + $0x274] ss:$8 sps:$4 sm:$0xff]  }
 0x2a3   :  { %v3861_v5 = vpop.f32.mrf.mxu1  ;;  %v4127_v59 = vpop.f32.mrf.mxu0  ;;  %6368 = vmatprep.subr.bf16.mxu0 %v13809_v19 }
 0x2a4   :  { %v3934_v32 = vadd.f32 %v3861_v5, %v16639_v1  ;;  %v13804_v5 = vld [vmem:[%s20171_s7 + $0x370] ss:$8 sps:$4 sm:$0xff]  }
 0x2a5   :  { %v3863_v6 = vpop.f32.mrf.mxu1  ;;  %v16921_v51 = vpop.f32.mrf.mxu0  ;;  %6804 = vmatpush1.bf16.msra.mxu1 %v13804_v5 }
 0x2a6   :  { %v16926_v11 = vadd.f32 %v4127_v59, %v3934_v32  ;;  %v16929_v30 = vadd.f32 %v3863_v6, %v16648_v45  ;;  %v13807_v59 = vld [vmem:[%s20171_s7 + $0x270] ss:$8 sps:$4 sm:$0xff]   ;;  %v13812_v6 = vld [vmem:[%s20171_s7 + $0x364] ss:$8 sps:$4 sm:$0xff]  }
 0x2a7   :  { %v3865_v1 = vpop.f32.mrf.mxu1  ;;  %v4131_v44 = vpop.f32.mrf.mxu0  ;;  %6369 = vmatpush1.bf16.msra.mxu0 %v13807_v59  ;;  %6805 = vmatprep.subr.bf16.mxu1 %v13812_v6 }
 0x2a8   :  { %v3936_v31 = vadd.f32 %v3865_v1, %v16656_v17  ;;  %v13810_v17 = vld [vmem:[%s20171_s7 + $0x360] ss:$8 sps:$4 sm:$0xff]   ;;  %6370 = vmatprep.subr.bf16.mxu0 %v13815_v40  ;;  %v13821_v40 = vld [vmem:[%s20171_s7 + $0x254] ss:$8 sps:$4 sm:$0xff]  }
 0x2a9   :  { %v16941_v45 = vpop.f32.mrf.mxu1  ;;  %v16943_v32 = vpop.f32.mrf.mxu0  ;;  %6806 = vmatpush1.bf16.msra.mxu1 %v13810_v17 }
 0x2aa   :  { %v16948_v36 = vadd.f32 %v4131_v44, %v3936_v31  ;;  %v13813_v31 = vld [vmem:[%s20171_s7 + $0x260] ss:$8 sps:$4 sm:$0xff]   ;;  %6807 = vmatprep.subr.bf16.mxu1 %v13818_v14  ;;  %v13824_v14 = vld [vmem:[%s20171_s7 + $0x344] ss:$8 sps:$4 sm:$0xff]  }
 0x2ab   :  { %v3871_v5 = vpop.f32.mrf.mxu1  ;;  %v4137_v1 = vpop.f32.mrf.mxu0  ;;  %6371 = vmatpush1.bf16.msra.mxu0 %v13813_v31 }
 0x2ac   :  { %v3938_v19 = vadd.f32 %v3871_v5, %v16674_v12  ;;  %v13816_v12 = vld [vmem:[%s20171_s7 + $0x350] ss:$8 sps:$4 sm:$0xff]   ;;  %6372 = vmatprep.subr.bf16.mxu0 %v13821_v40 }
 0x2ad   :  { %v3873_v44 = vpop.f32.mrf.mxu1  ;;  %v16960_v59 = vpop.f32.mrf.mxu0  ;;  %6808 = vmatpush1.bf16.msra.mxu1 %v13816_v12 }
 0x2ae   :  { %v16965_v6 = vadd.f32 %v4137_v1, %v3938_v19  ;;  %v16968_v46 = vadd.f32 %v3873_v44, %v16683_v55  ;;  %v13819_v55 = vld [vmem:[%s20171_s7 + $0x250] ss:$8 sps:$4 sm:$0xff]   ;;  %6809 = vmatprep.subr.bf16.mxu1 %v13824_v14 }
 0x2af   :  { %v3875_v17 = vpop.f32.mrf.mxu1  ;;  %v4141_v5 = vpop.f32.mrf.mxu0  ;;  %6373 = vmatpush1.bf16.msra.mxu0 %v13819_v55 }
 0x2b0   :  { %v3940_v16 = vadd.f32 %v3875_v17, %v16691_v9  ;;  %v13822_v9 = vld [vmem:[%s20171_s7 + $0x340] ss:$8 sps:$4 sm:$0xff]   ;;  %v13827_v17 = vld [vmem:[%s20171_s7 + $0x244] ss:$8 sps:$4 sm:$0xff]  }
 0x2b1   :  { %v16980_v1 = vpop.f32.mrf.mxu1  ;;  %v16982_v19 = vpop.f32.mrf.mxu0  ;;  %6810 = vmatpush1.bf16.msra.mxu1 %v13822_v9  ;;  %6374 = vmatprep.subr.bf16.mxu0 %v13827_v17  ;;  %v13833_v17 = vld [vmem:[%s20171_s7 + $0x234] ss:$8 sps:$4 sm:$0xff]  }
 0x2b2   :  { %v16987_v31 = vadd.f32 %v4141_v5, %v3940_v16  ;;  %v13825_v16 = vld [vmem:[%s20171_s7 + $0x240] ss:$8 sps:$4 sm:$0xff]   ;;  %6811 = vmatprep.subr.bf16.mxu1 %v13830_v56  ;;  %v13836_v56 = vld [vmem:[%s20171_s7 + $0x324] ss:$8 sps:$4 sm:$0xff]  }
 0x2b3   :  { %v3881_v44 = vpop.f32.mrf.mxu1  ;;  %v4147_v12 = vpop.f32.mrf.mxu0  ;;  %6375 = vmatpush1.bf16.msra.mxu0 %v13825_v16 }
 0x2b4   :  { %v3942_v40 = vadd.f32 %v3881_v44, %v16709_v53  ;;  %v13828_v53 = vld [vmem:[%s20171_s7 + $0x330] ss:$8 sps:$4 sm:$0xff]   ;;  %6376 = vmatprep.subr.bf16.mxu0 %v13833_v17  ;;  %v13842_v17 = vld [vmem:[%s20171_s7 + $0x314] ss:$8 sps:$4 sm:$0xff]  }
 0x2b5   :  { %v3883_v5 = vpop.f32.mrf.mxu1  ;;  %v4149_v55 = vpop.f32.mrf.mxu0  ;;  %6812 = vmatpush1.bf16.msra.mxu1 %v13828_v53 }
 0x2b6   :  { %v17002_v57 = vadd.f32 %v4147_v12, %v3942_v40  ;;  %v3943_v14 = vadd.f32 %v3883_v5, %v16718_v43  ;;  %v13831_v43 = vld [vmem:[%s20171_s7 + $0x230] ss:$8 sps:$4 sm:$0xff]   ;;  %6813 = vmatprep.subr.bf16.mxu1 %v13836_v56 }
 0x2b7   :  { %v3885_v9 = vpop.f32.mrf.mxu1  ;;  %v4151_v44 = vpop.f32.mrf.mxu0  ;;  %6377 = vmatpush1.bf16.msra.mxu0 %v13831_v43 }
 0x2b8   :  { %v17011_v54 = vadd.f32 %v4149_v55, %v3943_v14  ;;  %v3944_v42 = vadd.f32 %v3885_v9, %v16726_v58  ;;  %v13834_v58 = vld [vmem:[%s20171_s7 + $0x320] ss:$8 sps:$4 sm:$0xff]   ;;  %v13839_v14 = vld [vmem:[%s20171_s7 + $0x224] ss:$8 sps:$4 sm:$0xff]  }
 0x2b9   :  { %v17017_v12 = vpop.f32.mrf.mxu1  ;;  %v17019_v40 = vpop.f32.mrf.mxu0  ;;  %6814 = vmatpush1.bf16.msra.mxu1 %v13834_v58  ;;  %6378 = vmatprep.subr.bf16.mxu0 %v13839_v14 }
 0x2ba   :  { %20287 = vst [vmem:[#allocation32_spill] sm:$0xff] %v17017_v12  ;;  %20288 = vst [vmem:[#allocation33_spill] sm:$0xff] %v17019_v40  ;;  %v17024_v16 = vadd.f32 %v4151_v44, %v3944_v42  ;;  %v13837_v42 = vld [vmem:[%s20171_s7 + $0x220] ss:$8 sps:$4 sm:$0xff]   ;;  %6815 = vmatprep.subr.bf16.mxu1 %v13842_v17  ;;  %v13848_v17 = vld [vmem:[%s20171_s7 + $0x304] ss:$8 sps:$4 sm:$0xff]  }
 0x2bb   :  { %v3891_v5 = vpop.f32.mrf.mxu1  ;;  %v17029_v55 = vpop.f32.mrf.mxu0  ;;  %6379 = vmatpush1.bf16.msra.mxu0 %v13837_v42 }
 0x2bc   :  { %20289 = vst [vmem:[#allocation37_spill] sm:$0xff] %v17029_v55  ;;  %v17035_v53 = vadd.f32 %v3891_v5, %v16744_v10  ;;  %v13840_v10 = vld [vmem:[%s20171_s7 + $0x310] ss:$8 sps:$4 sm:$0xff]   ;;  %v13845_v5 = vld [vmem:[%s20171_s7 + $0x214] ss:$8 sps:$4 sm:$0xff]  }
 0x2bd   :  { %v3893_v9 = vpop.f32.mrf.mxu1  ;;  %v17040_v44 = vpop.f32.mrf.mxu0  ;;  %6816 = vmatpush1.bf16.msra.mxu1 %v13840_v10  ;;  %6380 = vmatprep.subr.bf16.mxu0 %v13845_v5 }
 0x2be   :  { %20290 = vst [vmem:[#allocation38_spill] sm:$0xff] %v17035_v53  ;;  %20291 = vst [vmem:[#allocation39_spill] sm:$0xff] %v17040_v44  ;;  %v17046_v43 = vadd.f32 %v3893_v9, %v16753_v0  ;;  %v13843_v0 = vld [vmem:[%s20171_s7 + $0x210] ss:$8 sps:$4 sm:$0xff]   ;;  %6817 = vmatprep.subr.bf16.mxu1 %v13848_v17 }
 0x2bf   :  { %v3895_v56 = vpop.f32.mrf.mxu1  ;;  %v4161_v58 = vpop.f32.mrf.mxu0  ;;  %6381 = vmatpush1.bf16.msra.mxu0 %v13843_v0 }
 0x2c0   :  { %20292 = vst [vmem:[#allocation40_spill] sm:$0xff] %v17046_v43  ;;  %v3948_v14 = vadd.f32 %v3895_v56, %v16761_v25  ;;  %v13846_v25 = vld [vmem:[%s20171_s7 + $0x300] ss:$8 sps:$4 sm:$0xff]   ;;  %6382 = vmatprep.subr.bf16.mxu0 %v13851_v20  ;;  %v13857_v20 = vld [vmem:[%s20171_s7 + $0x2f4] ss:$8 sps:$4 sm:$0xff]  }
 0x2c1   :  { %v17058_v9 = vpop.f32.mrf.mxu1  ;;  %v17060_v42 = vpop.f32.mrf.mxu0  ;;  %6818 = vmatpush1.bf16.msra.mxu1 %v13846_v25 }
 0x2c2   :  { %20293 = vst [vmem:[#allocation41_spill] sm:$0xff] %v17058_v9  ;;  %20294 = vst [vmem:[#allocation42_spill] sm:$0xff] %v17060_v42  ;;  %v17065_v41 = vadd.f32 %v4161_v58, %v3948_v14  ;;  %v13849_v58 = vld [vmem:[%s20171_s7 + $0x200] ss:$8 sps:$4 sm:$0xff]   ;;  %6819 = vmatprep.subr.bf16.mxu1 %v13854_v62  ;;  %v13860_v62 = vld [vmem:[%s20171_s7 + $0x3e4] ss:$8 sps:$4 sm:$0xff]  }
 0x2c3   :  { %v3901_v10 = vpop.f32.mrf.mxu1  ;;  %v4167_v56 = vpop.f32.mrf.mxu0  ;;  %6383 = vmatpush1.bf16.msra.mxu0 %v13849_v58 }
 0x2c4   :  { %v3950_v5 = vadd.f32 %v3901_v10, %v16779_v18  ;;  %v13852_v18 = vld [vmem:[%s20171_s7 + $0x3f0] ss:$8 sps:$4 sm:$0xff]   ;;  %6384 = vmatprep.subr.bf16.mxu0 %v13857_v20 }
 0x2c5   :  { %v3903_v14 = vpop.f32.mrf.mxu1  ;;  %v17077_v0 = vpop.f32.mrf.mxu0  ;;  %6820 = vmatpush2.bf16.msra.mxu1 %v13852_v18 }
 0x2c6   :  { %20295 = vst [vmem:[#allocation43_spill] sm:$0xff] %v17077_v0  ;;  %v17082_v17 = vadd.f32 %v4167_v56, %v3950_v5  ;;  %v17085_v42 = vadd.f32 %v3903_v14, %v16788_v47  ;;  %v13855_v47 = vld [vmem:[%s20171_s7 + $0x2f0] ss:$8 sps:$4 sm:$0xff]   ;;  %6821 = vmatprep.subr.bf16.mxu1 %v13860_v62 }
 0x2c7   :  { %v3905_v25 = vpop.f32.mrf.mxu1  ;;  %v4171_v10 = vpop.f32.mrf.mxu0  ;;  %6385 = vmatpush2.bf16.msra.mxu0 %v13855_v47 }
 0x2c8   :  { %20296 = vst [vmem:[#allocation44_spill] sm:$0xff] %v17085_v42  ;;  %v3952_v0 = vadd.f32 %v3905_v25, %v16796_v35  ;;  %v13858_v35 = vld [vmem:[%s20171_s7 + $0x3e0] ss:$8 sps:$4 sm:$0xff]   ;;  %v13863_v25 = vld [vmem:[%s20171_s7 + $0x2e4] ss:$8 sps:$4 sm:$0xff]  }
 0x2c9   :  { %v17097_v56 = vpop.f32.mrf.mxu1  ;;  %v17099_v5 = vpop.f32.mrf.mxu0  ;;  %6822 = vmatpush2.bf16.msra.mxu1 %v13858_v35  ;;  %6386 = vmatprep.subr.bf16.mxu0 %v13863_v25  ;;  %v13869_v25 = vld [vmem:[%s20171_s7 + $0x2d4] ss:$8 sps:$4 sm:$0xff]  }
 0x2ca   :  { %20297 = vst [vmem:[#allocation45_spill] sm:$0xff] %v17097_v56  ;;  %20298 = vst [vmem:[#allocation46_spill] sm:$0xff] %v17099_v5  ;;  %v17104_v58 = vadd.f32 %v4171_v10, %v3952_v0  ;;  %v13861_v0 = vld [vmem:[%s20171_s7 + $0x2e0] ss:$8 sps:$4 sm:$0xff]   ;;  %v13866_v5 = vld [vmem:[%s20171_s7 + $0x3d4] ss:$8 sps:$4 sm:$0xff]  }
 0x2cb   :  { %v3911_v14 = vpop.f32.mrf.mxu1  ;;  %v4177_v18 = vpop.f32.mrf.mxu0  ;;  %6387 = vmatpush2.bf16.msra.mxu0 %v13861_v0  ;;  %6823 = vmatprep.subr.bf16.mxu1 %v13866_v5  ;;  %v13872_v5 = vld [vmem:[%s20171_s7 + $0x3c4] ss:$8 sps:$4 sm:$0xff]  }
 0x2cc   :  { %v3954_v20 = vadd.f32 %v3911_v14, %v16814_v34  ;;  %v13864_v34 = vld [vmem:[%s20171_s7 + $0x3d0] ss:$8 sps:$4 sm:$0xff]   ;;  %6388 = vmatprep.subr.bf16.mxu0 %v13869_v25 }
 0x2cd   :  { %v3913_v10 = vpop.f32.mrf.mxu1  ;;  %v17116_v47 = vpop.f32.mrf.mxu0  ;;  %6824 = vmatpush2.bf16.msra.mxu1 %v13864_v34 }
 0x2ce   :  { %20299 = vst [vmem:[#allocation47_spill] sm:$0xff] %v17116_v47  ;;  %v17121_v62 = vadd.f32 %v4177_v18, %v3954_v20  ;;  %v17124_v56 = vadd.f32 %v3913_v10, %v16823_v48  ;;  %v13867_v48 = vld [vmem:[%s20171_s7 + $0x2d0] ss:$8 sps:$4 sm:$0xff]   ;;  %6825 = vmatprep.subr.bf16.mxu1 %v13872_v5 }
 0x2cf   :  { %v3915_v35 = vpop.f32.mrf.mxu1  ;;  %v4181_v14 = vpop.f32.mrf.mxu0  ;;  %6389 = vmatpush2.bf16.msra.mxu0 %v13867_v48 }
 0x2d0   :  { %20300 = vst [vmem:[#allocation48_spill] sm:$0xff] %v17124_v56  ;;  %v3956_v47 = vadd.f32 %v3915_v35, %v16831_v4  ;;  %v13870_v4 = vld [vmem:[%s20171_s7 + $0x3c0] ss:$8 sps:$4 sm:$0xff]   ;;  %v13875_v35 = vld [vmem:[%s20171_s7 + $0x2c4] ss:$8 sps:$4 sm:$0xff]  }
 0x2d1   :  { %v17136_v18 = vpop.f32.mrf.mxu1  ;;  %v17138_v20 = vpop.f32.mrf.mxu0  ;;  %6826 = vmatpush2.bf16.msra.mxu1 %v13870_v4  ;;  %6390 = vmatprep.subr.bf16.mxu0 %v13875_v35  ;;  %v13881_v35 = vld [vmem:[%s20171_s7 + $0x2b4] ss:$8 sps:$4 sm:$0xff]  }
 0x2d2   :  { %20301 = vst [vmem:[#allocation49_spill] sm:$0xff] %v17136_v18  ;;  %20302 = vst [vmem:[#allocation50_spill] sm:$0xff] %v17138_v20  ;;  %v17143_v0 = vadd.f32 %v4181_v14, %v3956_v47  ;;  %v13873_v47 = vld [vmem:[%s20171_s7 + $0x2c0] ss:$8 sps:$4 sm:$0xff]   ;;  %v13878_v20 = vld [vmem:[%s20171_s7 + $0x3b4] ss:$8 sps:$4 sm:$0xff]  }
 0x2d3   :  { %v3921_v10 = vpop.f32.mrf.mxu1  ;;  %v4187_v34 = vpop.f32.mrf.mxu0  ;;  %6391 = vmatpush2.bf16.msra.mxu0 %v13873_v47  ;;  %6827 = vmatprep.subr.bf16.mxu1 %v13878_v20  ;;  %v13884_v20 = vld [vmem:[%s20171_s7 + $0x3a4] ss:$8 sps:$4 sm:$0xff]  }
 0x2d4   :  { %v3958_v25 = vadd.f32 %v3921_v10, %v16849_v23  ;;  %v13876_v23 = vld [vmem:[%s20171_s7 + $0x3b0] ss:$8 sps:$4 sm:$0xff]   ;;  %6392 = vmatprep.subr.bf16.mxu0 %v13881_v35 }
 0x2d5   :  { %v3923_v14 = vpop.f32.mrf.mxu1  ;;  %v4189_v48 = vpop.f32.mrf.mxu0  ;;  %6828 = vmatpush2.bf16.msra.mxu1 %v13876_v23  ;;  %v13888_v35 = vld [vmem:[%s20171_s7 + $0x390] ss:$8 sps:$4 sm:$0xff]  }
 0x2d6   :  { %v17158_v18 = vadd.f32 %v4187_v34, %v3958_v25  ;;  %v3959_v5 = vadd.f32 %v3923_v14, %v16857_v61  ;;  %v13879_v61 = vld [vmem:[%s20171_s7 + $0x2b0] ss:$8 sps:$4 sm:$0xff]   ;;  %6829 = vmatprep.subr.bf16.mxu1 %v13884_v20  ;;  %v13893_v20 = vld [vmem:[%s20171_s7 + $0x294] ss:$8 sps:$4 sm:$0xff]  }
 0x2d7   :  { %v3925_v4 = vpop.f32.mrf.mxu1  ;;  %v4191_v10 = vpop.f32.mrf.mxu0  ;;  %6393 = vmatpush2.bf16.msra.mxu0 %v13879_v61 }
 0x2d8   :  { %v17167_v56 = vadd.f32 %v4189_v48, %v3959_v5  ;;  %v3960_v42 = vadd.f32 %v3925_v4, %v16865_v13  ;;  %v13882_v13 = vld [vmem:[%s20171_s7 + $0x3a0] ss:$8 sps:$4 sm:$0xff]   ;;  %v13887_v5 = vld [vmem:[%s20171_s7 + $0x2a4] ss:$8 sps:$4 sm:$0xff]   ;;  %v13890_v4 = vld [vmem:[%s20171_s7 + $0x394] ss:$8 sps:$4 sm:$0xff]  }
 0x2d9   :  { %v17173_v34 = vpop.f32.mrf.mxu1  ;;  %v17175_v25 = vpop.f32.mrf.mxu0  ;;  %6830 = vmatpush2.bf16.msra.mxu1 %v13882_v13  ;;  %6394 = vmatprep.subr.bf16.mxu0 %v13887_v5  ;;  %v13891_v5 = vld [vmem:[%s20171_s7 + $0x290] ss:$8 sps:$4 sm:$0xff]  }
 0x2da   :  { %20303 = vst [vmem:[#allocation51_spill] sm:$0xff] %v17173_v34  ;;  %20304 = vst [vmem:[#allocation52_spill] sm:$0xff] %v17175_v25  ;;  %v17180_v47 = vadd.f32 %v4191_v10, %v3960_v42  ;;  %v13885_v42 = vld [vmem:[%s20171_s7 + $0x2a0] ss:$8 sps:$4 sm:$0xff]   ;;  %6831 = vmatprep.subr.bf16.mxu1 %v13890_v4  ;;  %v13896_v4 = vld [vmem:[%s20171_s7 + $0x384] ss:$8 sps:$4 sm:$0xff]  }
 0x2db   :  { %v17185_v14 = vpop.f32.mrf.mxu1  ;;  %v17187_v48 = vpop.f32.mrf.mxu0  ;;  %6395 = vmatpush2.bf16.msra.mxu0 %v13885_v42  ;;  %v13894_v42 = vld [vmem:[%s20171_s7 + $0x380] ss:$8 sps:$4 sm:$0xff]  }
 0x2dc   :  { %6396 = vmatprep.subr.bf16.mxu0 %v13893_v20  ;;  %v13902_v20 = vld [vmem:[%s20171_s7 + $0x574] ss:$8 sps:$4 sm:$0xff]  }
 0x2dd   :  { %v17195_v23 = vpop.f32.mrf.mxu1  ;;  %v17200_v10 = vpop.f32.mrf.mxu0  ;;  %6832 = vmatpush2.bf16.msra.mxu1 %v13888_v35 }
 0x2de   :  { %6833 = vmatprep.subr.bf16.mxu1 %v13896_v4 }
 0x2df   :  { %v4387_v61 = vpop.f32.mrf.mxu1  ;;  %v17225_v35 = vpop.f32.mrf.mxu0  ;;  %6397 = vmatpush2.bf16.msra.mxu0 %v13891_v5  ;;  %v13905_v5 = vld [vmem:[%s20171_s7 + $0x474] ss:$8 sps:$4 sm:$0xff]  }
 0x2e0   :  { %v17209_v13 = vadd.f32 %v4387_v61, %v16914_v7  ;;  %v13899_v7 = vld [vmem:[%s20171_s7 + $0x284] ss:$8 sps:$4 sm:$0xff]   ;;  %v13897_v61 = vld [vmem:[%s20171_s7 + $0x280] ss:$8 sps:$4 sm:$0xff]  }
 0x2e1   :  { %v17220_v25 = vpop.f32.mrf.mxu1  ;;  %6398 = vmatprep.subr.bf16.mxu0 %v13899_v7  ;;  %6834 = vmatpush2.bf16.msra.mxu1 %v13894_v42  ;;  %v17238_v9 = vpop.f32.mrf.mxu0 }
 0x2e2   :  { %7673 = vmatprep.subr.bf16.mxu1 %v13902_v20 }
 0x2e3   :  { %v4393_v34 = vpop.f32.mrf.mxu1  ;;  %6399 = vmatpush2.bf16.msra.mxu0 %v13897_v61 }
 0x2e4   :  { %v17231_v21 = vadd.f32 %v4393_v34, %v16926_v11  ;;  %7238 = vmatprep.subr.bf16.mxu0 %v13905_v5  ;;  %v17248_v34 = vpop.f32.mrf.mxu0 }
 0x2e5   :  { %v17236_v26 = vpop.f32.mrf.mxu1 }
 0x2e6   :  { %v17255_v61 = vpop.f32.mrf.mxu0 }
 0x2e7   :  { %v4397_v4 = vpop.f32.mrf.mxu1 }
 0x2e8   :  { %v17244_v7 = vadd.f32 %v4397_v4, %v16948_v36  ;;  %v17262_v36 = vpop.f32.mrf.mxu0 }
 0x2e9   :  { %v17246_v11 = vpop.f32.mrf.mxu1 }
 0x2ea   :  { %v17267_v50 = vpop.f32.mrf.mxu0 }
 0x2eb   :  { %v4403_v42 = vpop.f32.mrf.mxu1 }
 0x2ec   :  { %v17251_v44 = vadd.f32 %v4403_v42, %v16965_v6 }
 0x2ed   :  { %v17253_v43 = vpop.f32.mrf.mxu1 }
 0x2ef   :  { %v4407_v20 = vpop.f32.mrf.mxu1 }
 0x2f0   :  { %v17258_v55 = vadd.f32 %v4407_v20, %v16987_v31  ;;  %v17277_v20 = vpop.f32.mrf.mxu0 }
 0x2f1   :  { %v17260_v53 = vpop.f32.mrf.mxu1 }
 0x2f2   :  { %20305 = vst [vmem:[#allocation53_spill] sm:$0xff] %v17258_v55 }
 0x2f3   :  { %v4413_v5 = vpop.f32.mrf.mxu1 }
 0x2f4   :  { %v17265_v4 = vadd.f32 %v4413_v5, %v17002_v57  ;;  %v17283_v57 = vpop.f32.mrf.mxu0 }
 0x2f5   :  { %v4415_v40 = vpop.f32.mrf.mxu1 }
 0x2f6   :  { %20306 = vst [vmem:[#allocation54_spill] sm:$0xff] %v17265_v4  ;;  %v17270_v6 = vadd.f32 %v4415_v40, %v17011_v54  ;;  %v17290_v40 = vpop.f32.mrf.mxu0 }
 0x2f7   :  { %v4417_v42 = vpop.f32.mrf.mxu1 }
 0x2f8   :  { %20307 = vst [vmem:[#allocation55_spill] sm:$0xff] %v17270_v6  ;;  %v17273_v49 = vadd.f32 %v4417_v42, %v17024_v16 }
 0x2f9   :  { %v17275_v31 = vpop.f32.mrf.mxu1 }
 0x2fa   :  { %20308 = vst [vmem:[#allocation56_spill] sm:$0xff] %v17273_v49  ;;  %20309 = vst [vmem:[#allocation57_spill] sm:$0xff] %v17275_v31  ;;  %v17297_v31 = vpop.f32.mrf.mxu0 }
 0x2fb   :  { %v17279_v55 = vpop.f32.mrf.mxu1 }
 0x2fc   :  { %20310 = vst [vmem:[#allocation58_spill] sm:$0xff] %v17279_v55 }
 0x2fd   :  { %v17281_v12 = vpop.f32.mrf.mxu1 }
 0x2fe   :  { %20311 = vst [vmem:[#allocation59_spill] sm:$0xff] %v17281_v12 }
 0x2ff   :  { %v4427_v5 = vpop.f32.mrf.mxu1 }
 0x300   :  { %v17286_v4 = vadd.f32 %v4427_v5, %v17065_v41  ;;  %v17304_v41 = vpop.f32.mrf.mxu0 }
 0x301   :  { %v17288_v54 = vpop.f32.mrf.mxu1 }
 0x302   :  { %20312 = vst [vmem:[#allocation60_spill] sm:$0xff] %v17286_v4  ;;  %20313 = vst [vmem:[#allocation61_spill] sm:$0xff] %v17288_v54 }
 0x303   :  { %v4433_v16 = vpop.f32.mrf.mxu1 }
 0x304   :  { %v17293_v42 = vadd.f32 %v4433_v16, %v17082_v17  ;;  %v17311_v17 = vpop.f32.mrf.mxu0 }
 0x305   :  { %v17295_v49 = vpop.f32.mrf.mxu1 }
 0x306   :  { %20314 = vst [vmem:[#allocation62_spill] sm:$0xff] %v17293_v42  ;;  %20315 = vst [vmem:[#allocation63_spill] sm:$0xff] %v17295_v49 }
 0x307   :  { %v4437_v55 = vpop.f32.mrf.mxu1 }
 0x308   :  { %v17300_v12 = vadd.f32 %v4437_v55, %v17104_v58  ;;  %v17318_v55 = vpop.f32.mrf.mxu0 }
 0x309   :  { %v17302_v6 = vpop.f32.mrf.mxu1 }
 0x30a   :  { %20316 = vst [vmem:[#allocation64_spill] sm:$0xff] %v17300_v12  ;;  %v3624_v12 = vadd.f32 %v16625_v27, %v16623_v60  ;;  %v5026_v27 = vld [vmem:[%s20169_s5] sm:$0x3] }
 0x30b   :  { %v4443_v5 = vpop.f32.mrf.mxu1 }
 0x30c   :  { %v17307_v4 = vadd.f32 %v4443_v5, %v17121_v62  ;;  %v4196_v62 = vadd.f32 %v16883_v63, %v16886_v33 }
 0x30d   :  { %v17309_v54 = vpop.f32.mrf.mxu1 }
 0x30e   :  { %20317 = vst [vmem:[#allocation65_spill] sm:$0xff] %v17307_v4  ;;  %20318 = vst [vmem:[#allocation66_spill] sm:$0xff] %v17309_v54  ;;  %v4197_v54 = vadd.f32 %v16888_v8, %v16897_v3 }
 0x30f   :  { %v4447_v16 = vpop.f32.mrf.mxu1 }
 0x310   :  { %v17314_v42 = vadd.f32 %v4447_v16, %v17143_v0  ;;  %v3933_v0 = vadd.f32 %v16910_v29, %v3624_v12  ;;  %v4462_v16 = vadd.f32 %v17185_v14, %v4196_v62  ;;  %v4463_v63 = vadd.f32 %v17195_v23, %v4197_v54  ;;  %v5070_v14 = vld [vmem:[%s20170_s6] sm:$0x3] }
 0x311   :  { %v17316_v49 = vpop.f32.mrf.mxu1  ;;  %v3634_v23 = vadd.f32 %v16660_v28, %v16658_v24  ;;  %v4201_v62 = vadd.f32 %v16921_v51, %v16929_v30  ;;  %v4730_v24 = vadd.f32 %v17225_v35, %v17209_v13 }
 0x312   :  { %20319 = vst [vmem:[#allocation67_spill] sm:$0xff] %v17314_v42  ;;  %20320 = vst [vmem:[#allocation68_spill] sm:$0xff] %v17316_v49  ;;  %v17331_v42 = vpop.f32.mrf.mxu0  ;;  %v4199_v8 = vadd.f32 %v16912_v37, %v3933_v0  ;;  %v4728_v29 = vadd.f32 %v17187_v48, %v4462_v16 }
 0x313   :  { %v4453_v58 = vpop.f32.mrf.mxu1  ;;  %v3937_v0 = vadd.f32 %v16941_v45, %v3634_v23  ;;  %v4732_v23 = vadd.f32 %v17248_v34, %v17231_v21 }
 0x314   :  { %v17325_v5 = vadd.f32 %v4453_v58, %v17158_v18  ;;  %v17347_v12 = vpop.f32.mrf.mxu0  ;;  %v4465_v54 = vadd.f32 %v17220_v25, %v4199_v8  ;;  %v20322_v58 = vld [vmem:[#allocation31_spill] sm:$0xff] }
 0x315   :  { %v4455_v4 = vpop.f32.mrf.mxu1  ;;  %v17360_v48 = vrot.slane %v5026_v27, %v20322_v58 }
 0x316   :  { %v17334_v49 = vadd.f32 %v4455_v4, %v17167_v56  ;;  %v20321_v56 = vld [vmem:[#allocation27_spill] sm:$0xff]  ;;  %v4729_v4 = vadd.f32 %v17200_v10, %v4463_v63  ;;  %v17370_v28 = vpop.f32.mrf.mxu0  ;;  %v4467_v63 = vadd.f32 %v17236_v26, %v4201_v62  ;;  %v4731_v30 = vadd.f32 %v17238_v9, %v4465_v54 }
 0x317   :  { %v4457_v60 = vpop.f32.mrf.mxu1  ;;  %v17350_v18 = vrot.slane %v5026_v27, %v20321_v56  ;;  %v17366_v16 = vrot.slane %v5070_v14, %v20321_v56  ;;  %v17374_v27 = vrot.slane %v5070_v14, %v20322_v58  ;;  %v3644_v9 = vadd.f32 %v16695_v38, %v16693_v39 }
 0x318   :  { %v17341_v33 = vadd.f32 %v4457_v60, %v17180_v47  ;;  %v4733_v54 = vadd.f32 %v17255_v61, %v4467_v63 }
 0x319   :  { %v17343_v3 = vpop.f32.mrf.mxu1 }
 0x31b   :  { %v4915_v47 = vpop.f32.mrf.mxu1 }
 0x31c   :  { %v4994_v37 = vadd.f32 %v4915_v47, %v4728_v29  ;;  %v4203_v29 = vadd.f32 %v16943_v32, %v3937_v0  ;;  %v17383_v47 = vpop.f32.mrf.mxu0 }
 0x31d   :  { %v4917_v60 = vpop.f32.mrf.mxu1 }
 0x31e   :  { %v5038_v25 = vmul.f32 %v17350_v18, %v4994_v37  ;;  %v4995_v10 = vadd.f32 %v4917_v60, %v4729_v4  ;;  %v4469_v32 = vadd.f32 %v17246_v11, %v4203_v29  ;;  %v4205_v60 = vadd.f32 %v16960_v59, %v16968_v46  ;;  %v17398_v61 = vpop.f32.mrf.mxu0 }
 0x31f   :  { %v4919_v51 = vpop.f32.mrf.mxu1 }
 0x320   :  { %v5039_v45 = vmul.f32 %v17360_v48, %v4995_v10  ;;  %v4996_v8 = vadd.f32 %v4919_v51, %v4730_v24  ;;  %v5082_v13 = vadd.f32 %v17366_v16, %v5038_v25  ;;  %v3941_v24 = vadd.f32 %v16980_v1, %v3644_v9 }
 0x321   :  { %v4921_v35 = vpop.f32.mrf.mxu1  ;;  %v4734_v25 = vadd.f32 %v17262_v36, %v17244_v7  ;;  %v4735_v46 = vadd.f32 %v17267_v50, %v4469_v32  ;;  %v4471_v59 = vadd.f32 %v17253_v43, %v4205_v60  ;;  %v17417_v50 = vpop.f32.mrf.mxu0  ;;  %v4736_v9 = vadd.f32 %v17277_v20, %v17251_v44  ;;  %v20324_v20 = vld [vmem:[#allocation53_spill] sm:$0xff] }
 0x322   :  { %v5083_v14 = vadd.f32 %v17374_v27, %v5039_v45  ;;  %v5040_v26 = vmul.f32 %v17350_v18, %v4996_v8  ;;  %v4997_v4 = vadd.f32 %v4921_v35, %v4731_v30  ;;  %v5114_v39 = vmax.f32 %v5082_v13, 0.0 }
 0x323   :  { %v4925_v37 = vpop.f32.mrf.mxu1  ;;  %v3654_v30 = vadd.f32 %v16730_v2, %v16728_v22  ;;  %v4207_v13 = vadd.f32 %v16982_v19, %v3941_v24  ;;  %v4737_v19 = vadd.f32 %v17283_v57, %v4471_v59  ;;  %v20323_v24 = vld [vmem:[#allocation32_spill] sm:$0xff]  ;;  %v4738_v57 = vadd.f32 %v17290_v40, %v20324_v20 }
 0x324   :  { %v5115_v62 = vmax.f32 %v5083_v14, 0.0  ;;  %v5084_v0 = vadd.f32 %v17366_v16, %v5040_v26  ;;  %v5041_v21 = vmul.f32 %v17360_v48, %v4997_v4  ;;  %v4998_v34 = vadd.f32 %v4925_v37, %v4732_v23 }
 0x325   :  { %v4927_v38 = vpop.f32.mrf.mxu1  ;;  %v3945_v44 = vadd.f32 %v20323_v24, %v3654_v30 }
 0x326   :  { %v5116_v11 = vmax.f32 %v5084_v0, 0.0  ;;  %v5085_v10 = vadd.f32 %v17374_v27, %v5041_v21  ;;  %v5042_v63 = vmul.f32 %v17350_v18, %v4998_v34  ;;  %v4999_v51 = vadd.f32 %v4927_v38, %v4733_v54 }
 0x327   :  { %v4929_v1 = vpop.f32.mrf.mxu1  ;;  %v12765_v45 = vpack.c.bf16 %v5115_v62, %v5114_v39  ;;  %v4473_v54 = vadd.f32 %v17260_v53, %v4207_v13 }
 0x328   :  { %v17406_v7 = vpack.c.bf16 %v5116_v11, %v5114_v39  ;;  %v5086_v36 = vadd.f32 %v17366_v16, %v5042_v63  ;;  %v5043_v8 = vmul.f32 %v17360_v48, %v4999_v51  ;;  %v5000_v29 = vadd.f32 %v4929_v1, %v4734_v25 }
 0x329   :  { %v4931_v35 = vpop.f32.mrf.mxu1  ;;  %v17412_v23 = vcombine.high %v16908_v15, %v12765_v45  ;;  %v17415_v22 = vcombine.low %v20229_v52, %v12765_v45  ;;  %v5117_v2 = vmax.f32 %v5085_v10, 0.0  ;;  %v4739_v63 = vadd.f32 %v17297_v31, %v4473_v54  ;;  %v20325_v45 = vld [vmem:[#allocation21_spill] sm:$0xff]  ;;  %v20329_v54 = vld [vmem:[#allocation38_spill] sm:$0xff] }
 0x32a   :  { %v5118_v43 = vmax.f32 %v5086_v36, 0.0  ;;  %v5087_v14 = vadd.f32 %v17374_v27, %v5043_v8  ;;  %v5044_v26 = vmul.f32 %v17350_v18, %v5000_v29  ;;  %v5001_v4 = vadd.f32 %v4931_v35, %v4735_v46  ;;  %v20326_v36 = vld [vmem:[#allocation23_spill] sm:$0xff]  ;;  %v20327_v29 = vld [vmem:[#allocation33_spill] sm:$0xff]  ;;  %v20328_v35 = vld [vmem:[#allocation54_spill] sm:$0xff] }
 0x32b   :  { %6007 = vmatprep.mubr.bf16.mxu1 %v17412_v23  ;;  %v4935_v32 = vpop.f32.mrf.mxu1  ;;  %v17426_v37 = vpack.c.bf16 %v5117_v2, %v5115_v62  ;;  %v17437_v62 = vpop.f32.mrf.mxu0  ;;  %v3664_v8 = vadd.f32 %v20326_v36, %v20325_v45  ;;  %v4211_v13 = vadd.f32 %v20327_v29, %v3945_v44  ;;  %v20332_v44 = vld [vmem:[#allocation57_spill] sm:$0xff] }
 0x32c   :  { %v17428_v0 = vpack.c.bf16 %v5118_v43, %v5116_v11  ;;  %v5119_v21 = vmax.f32 %v5087_v14, 0.0  ;;  %v5088_v34 = vadd.f32 %v17366_v16, %v5044_v26  ;;  %v5045_v60 = vmul.f32 %v17360_v48, %v5001_v4  ;;  %6008 = vmatmul.mubr.bf16.gmra.mxu1 %v17415_v22 }
 0x32d   :  { %v5002_v53 = vadd.f32 %v4935_v32, %v4736_v9  ;;  %5654 = vmatprep.mubr.bf16.mxu0 %v17426_v37  ;;  %v4937_v25 = vpop.f32.mrf.mxu1  ;;  %v17455_v26 = vpop.f32.mrf.mxu0  ;;  %v20330_v32 = vld [vmem:[#allocation37_spill] sm:$0xff] }
 0x32e   :  { %v5120_v39 = vmax.f32 %v5088_v34, 0.0  ;;  %v5089_v38 = vadd.f32 %v17374_v27, %v5045_v60  ;;  %v5003_v11 = vadd.f32 %v4937_v25, %v4737_v19  ;;  %5655 = vmatmul.mubr.bf16.gmra.mxu0 %v17406_v7  ;;  %v17441_v10 = vpack.c.bf16 %v5119_v21, %v5117_v2  ;;  %v20331_v60 = vld [vmem:[#allocation55_spill] sm:$0xff] }
 0x32f   :  { %v5046_v51 = vmul.f32 %v17350_v18, %v5002_v53  ;;  %v4939_v30 = vpop.f32.mrf.mxu1  ;;  %v4740_v2 = vadd.f32 %v17304_v41, %v20328_v35  ;;  %v4212_v34 = vadd.f32 %v20330_v32, %v20329_v54  ;;  %v4741_v24 = vadd.f32 %v17311_v17, %v20331_v60  ;;  %v20336_v17 = vld [vmem:[#allocation56_spill] sm:$0xff]  ;;  %v17477_v29 = vpop.f32.mrf.mxu0 }
 0x330   :  { %v17445_v40 = vpack.c.bf16 %v5120_v39, %v5118_v43  ;;  %v5047_v46 = vmul.f32 %v17360_v48, %v5003_v11  ;;  %v5004_v59 = vadd.f32 %v4939_v30, %v4738_v57  ;;  %6017 = vmatprep.mubr.bf16.mxu1 %v17441_v10  ;;  %v5121_v1 = vmax.f32 %v5089_v38, 0.0  ;;  %v20335_v30 = vld [vmem:[#allocation41_spill] sm:$0xff] }
 0x331   :  { %v5090_v31 = vadd.f32 %v17366_v16, %v5046_v51  ;;  %v4941_v14 = vpop.f32.mrf.mxu1  ;;  %v4477_v41 = vadd.f32 %v20332_v44, %v4211_v13 }
 0x332   :  { %v5091_v43 = vadd.f32 %v17374_v27, %v5047_v46  ;;  %v5048_v4 = vmul.f32 %v17350_v18, %v5004_v59  ;;  %v5005_v9 = vadd.f32 %v4941_v14, %v4739_v63  ;;  %v17459_v19 = vpack.c.bf16 %v5121_v1, %v5119_v21  ;;  %v20333_v21 = vld [vmem:[#allocation40_spill] sm:$0xff]  ;;  %v20334_v63 = vld [vmem:[#allocation39_spill] sm:$0xff] }
 0x333   :  { %v5122_v20 = vmax.f32 %v5090_v31, 0.0  ;;  %v4945_v57 = vpop.f32.mrf.mxu1  ;;  %v4213_v51 = vadd.f32 %v20334_v63, %v20333_v21  ;;  %v3949_v46 = vadd.f32 %v20335_v30, %v3664_v8  ;;  %v4742_v59 = vadd.f32 %v17318_v55, %v20336_v17  ;;  %v17497_v63 = vpop.f32.mrf.mxu0 }
 0x334   :  { %v5123_v53 = vmax.f32 %v5091_v43, 0.0  ;;  %v5092_v25 = vadd.f32 %v17366_v16, %v5048_v4  ;;  %v5049_v38 = vmul.f32 %v17360_v48, %v5005_v9  ;;  %v5006_v11 = vadd.f32 %v4945_v57, %v4740_v2  ;;  %6018 = vmatmul.mubr.bf16.gmra.mxu1 %v17428_v0  ;;  %5664 = vmatprep.mubr.bf16.mxu0 %v17459_v19  ;;  %v20337_v43 = vld [vmem:[#allocation58_spill] sm:$0xff]  ;;  %v20338_v4 = vld [vmem:[#allocation59_spill] sm:$0xff] }
 0x335   :  { %v17475_v45 = vpack.c.bf16 %v5122_v20, %v5120_v39  ;;  %v4947_v36 = vpop.f32.mrf.mxu1  ;;  %v4743_v14 = vadd.f32 %v17331_v42, %v4477_v41  ;;  %v4478_v8 = vadd.f32 %v20337_v43, %v4212_v34  ;;  %v4479_v9 = vadd.f32 %v20338_v4, %v4213_v51  ;;  %v20339_v57 = vld [vmem:[#allocation22_spill] sm:$0xff]  ;;  %v20342_v42 = vld [vmem:[#allocation44_spill] sm:$0xff]  ;;  %v20343_v41 = vld [vmem:[#allocation43_spill] sm:$0xff] }
 0x336   :  { %v5124_v13 = vmax.f32 %v5092_v25, 0.0  ;;  %v5093_v35 = vadd.f32 %v17374_v27, %v5049_v38  ;;  %v5050_v2 = vmul.f32 %v17350_v18, %v5006_v11  ;;  %v5007_v31 = vadd.f32 %v4947_v36, %v4741_v24  ;;  %5665 = vmatmul.mubr.bf16.gmra.mxu0 %v17445_v40  ;;  %v20340_v24 = vld [vmem:[#allocation11_spill] sm:$0xff]  ;;  %v20341_v38 = vld [vmem:[#allocation42_spill] sm:$0xff] }
 0x337   :  { %v4949_v55 = vpop.f32.mrf.mxu1  ;;  %v17485_v39 = vpack.c.bf16 %v5123_v53, %v5121_v1  ;;  %v3674_v25 = vadd.f32 %v20340_v24, %v20339_v57  ;;  %v4215_v11 = vadd.f32 %v20341_v38, %v3949_v46  ;;  %v4217_v34 = vadd.f32 %v20343_v41, %v20342_v42  ;;  %v20344_v46 = vld [vmem:[#allocation61_spill] sm:$0xff]  ;;  %v20347_v38 = vld [vmem:[#allocation63_spill] sm:$0xff] }
 0x338   :  { %v17487_v54 = vpack.c.bf16 %v5124_v13, %v5122_v20  ;;  %v5094_v32 = vadd.f32 %v17366_v16, %v5050_v2  ;;  %v5051_v60 = vmul.f32 %v17360_v48, %v5007_v31  ;;  %v5008_v44 = vadd.f32 %v4949_v55, %v4742_v59 }
 0x339   :  { %6027 = vmatprep.mubr.bf16.mxu1 %v17485_v39  ;;  %v4951_v21 = vpop.f32.mrf.mxu1  ;;  %v5125_v1 = vmax.f32 %v5093_v35, 0.0  ;;  %v4744_v59 = vadd.f32 %v17347_v12, %v4478_v8  ;;  %v4745_v36 = vadd.f32 %v17370_v28, %v4479_v9  ;;  %v4481_v2 = vadd.f32 %v20344_v46, %v4215_v11 }
 0x33a   :  { %v5126_v20 = vmax.f32 %v5094_v32, 0.0  ;;  %v5095_v51 = vadd.f32 %v17374_v27, %v5051_v60  ;;  %v5052_v30 = vmul.f32 %v17350_v18, %v5008_v44  ;;  %v5009_v17 = vadd.f32 %v4951_v21, %v4743_v14  ;;  %v20345_v60 = vld [vmem:[#allocation45_spill] sm:$0xff]  ;;  %v20346_v44 = vld [vmem:[#allocation60_spill] sm:$0xff] }
 0x33b   :  { %v4955_v31 = vpop.f32.mrf.mxu1  ;;  %v17504_v43 = vpack.c.bf16 %v5125_v1, %v5123_v53  ;;  %v3953_v14 = vadd.f32 %v20345_v60, %v3674_v25  ;;  %v4746_v12 = vadd.f32 %v17383_v47, %v20346_v44  ;;  %v17516_v53 = vpop.f32.mrf.mxu0  ;;  %v4747_v25 = vadd.f32 %v17398_v61, %v4481_v2  ;;  %v20351_v60 = vld [vmem:[#allocation26_spill] sm:$0xff] }
 0x33c   :  { %v17506_v4 = vpack.c.bf16 %v5126_v20, %v5124_v13  ;;  %v5127_v35 = vmax.f32 %v5095_v51, 0.0  ;;  %v5096_v55 = vadd.f32 %v17366_v16, %v5052_v30  ;;  %v5053_v32 = vmul.f32 %v17360_v48, %v5009_v17  ;;  %6028 = vmatmul.mubr.bf16.gmra.mxu1 %v17475_v45  ;;  %v20348_v17 = vld [vmem:[#allocation46_spill] sm:$0xff] }
 0x33d   :  { %v5010_v28 = vadd.f32 %v4955_v31, %v4744_v59  ;;  %5674 = vmatprep.mubr.bf16.mxu0 %v17504_v43  ;;  %v4957_v8 = vpop.f32.mrf.mxu1  ;;  %6037 = vmatprep.mubr.bf16.mxu1 %v16908_v15  ;;  %v4483_v47 = vadd.f32 %v20347_v38, %v4217_v34  ;;  %v4219_v59 = vadd.f32 %v20348_v17, %v3953_v14  ;;  %v4713_v34 = vpop.f32.mrf.mxu0 }
 0x33e   :  { %v5128_v13 = vmax.f32 %v5096_v55, 0.0  ;;  %v5097_v9 = vadd.f32 %v17374_v27, %v5053_v32  ;;  %v5011_v57 = vadd.f32 %v4957_v8, %v4745_v36  ;;  %5675 = vmatmul.mubr.bf16.gmra.mxu0 %v17487_v54  ;;  %v17520_v24 = vpack.c.bf16 %v5127_v35, %v5125_v1  ;;  %v20349_v36 = vld [vmem:[#allocation62_spill] sm:$0xff]  ;;  %v20350_v32 = vld [vmem:[#allocation28_spill] sm:$0xff] }
 0x33f   :  { %v5054_v11 = vmul.f32 %v17350_v18, %v5010_v28  ;;  %v4959_v42 = vpop.f32.mrf.mxu1  ;;  %5684 = vmatprep.mubr.bf16.mxu0 %v16908_v15  ;;  %v4748_v1 = vadd.f32 %v17417_v50, %v20349_v36  ;;  %v3684_v44 = vadd.f32 %v20351_v60, %v20350_v32  ;;  %v4485_v14 = vadd.f32 %v17302_v6, %v4219_v59 }
 0x340   :  { %v17526_v41 = vpack.c.bf16 %v5128_v13, %v5126_v20  ;;  %v5055_v21 = vmul.f32 %v17360_v48, %v5011_v57  ;;  %v5012_v51 = vadd.f32 %v4959_v42, %v4746_v12  ;;  %v5129_v30 = vmax.f32 %v5097_v9, 0.0  ;;  %v20354_v42 = vld [vmem:[#allocation49_spill] sm:$0xff] }
 0x341   :  { %v5098_v61 = vadd.f32 %v17366_v16, %v5054_v11  ;;  %v4961_v46 = vpop.f32.mrf.mxu1  ;;  %v4749_v12 = vadd.f32 %v17437_v62, %v4483_v47 }
 0x342   :  { %v5099_v2 = vadd.f32 %v17374_v27, %v5055_v21  ;;  %v5056_v31 = vmul.f32 %v17350_v18, %v5012_v51  ;;  %v5013_v55 = vadd.f32 %v4961_v46, %v4747_v25  ;;  %v17535_v20 = vpack.c.bf16 %v5129_v30, %v5127_v35  ;;  %v20352_v35 = vld [vmem:[#allocation48_spill] sm:$0xff]  ;;  %v20353_v25 = vld [vmem:[#allocation47_spill] sm:$0xff]  ;;  %v20357_v46 = vld [vmem:[#allocation30_spill] sm:$0xff] }
 0x343   :  { %v4965_v28 = vpop.f32.mrf.mxu1  ;;  %v17541_v50 = vpack.c.bf16 %v5129_v30, %v5128_v13  ;;  %v4221_v11 = vadd.f32 %v20353_v25, %v20352_v35  ;;  %v3957_v21 = vadd.f32 %v20354_v42, %v3684_v44  ;;  %v20355_v51 = vld [vmem:[#allocation64_spill] sm:$0xff]  ;;  %v5130_v6 = vmax.f32 %v5098_v61, 0.0  ;;  %v4715_v13 = vpop.f32.mrf.mxu0 }
 0x344   :  { %v5131_v8 = vmax.f32 %v5099_v2, 0.0  ;;  %v5100_v9 = vadd.f32 %v17366_v16, %v5056_v31  ;;  %v5057_v57 = vmul.f32 %v17360_v48, %v5013_v55  ;;  %v5014_v38 = vadd.f32 %v4965_v28, %v4748_v1  ;;  %6038 = vmatmul.mubr.bf16.gmra.mxu1 %v16908_v15  ;;  %v20356_v1 = vld [vmem:[#allocation29_spill] sm:$0xff]  ;;  %v20358_v55 = vld [vmem:[#allocation66_spill] sm:$0xff] }
 0x345   :  { %v4750_v62 = vadd.f32 %v17455_v26, %v20355_v51  ;;  %v4967_v47 = vpop.f32.mrf.mxu1  ;;  %v3694_v2 = vadd.f32 %v20357_v46, %v20356_v1  ;;  %v4751_v31 = vadd.f32 %v17477_v29, %v4485_v14  ;;  %v4487_v32 = vadd.f32 %v20358_v55, %v4221_v11  ;;  %v4719_v14 = vpop.f32.mrf.mxu0 }
 0x346   :  { %v5132_v30 = vmax.f32 %v5100_v9, 0.0  ;;  %v5101_v17 = vadd.f32 %v17374_v27, %v5057_v57  ;;  %v5058_v59 = vmul.f32 %v17350_v18, %v5014_v38  ;;  %v5015_v36 = vadd.f32 %v4967_v47, %v4749_v12  ;;  %5685 = vmatmul.mubr.bf16.gmra.mxu0 %v16908_v15  ;;  %v20359_v57 = vld [vmem:[#allocation50_spill] sm:$0xff]  ;;  %v20360_v47 = vld [vmem:[#allocation65_spill] sm:$0xff] }
 0x347   :  { %v4969_v60 = vpop.f32.mrf.mxu1  ;;  %v12773_v26 = vpack.c.bf16 %v5131_v8, %v5130_v6  ;;  %v4223_v12 = vadd.f32 %v20359_v57, %v3957_v21  ;;  %v4753_v21 = vadd.f32 %v17516_v53, %v4487_v32 }
 0x348   :  { %v17558_v61 = vpack.c.bf16 %v5132_v30, %v5130_v6  ;;  %v5102_v44 = vadd.f32 %v17366_v16, %v5058_v59  ;;  %v5059_v28 = vmul.f32 %v17360_v48, %v5015_v36  ;;  %v5016_v9 = vadd.f32 %v4969_v60, %v4750_v62  ;;  %v20361_v59 = vld [vmem:[#allocation68_spill] sm:$0xff] }
 0x349   :  { %v4971_v38 = vpop.f32.mrf.mxu1  ;;  %v17564_v35 = vcombine.high %v16908_v15, %v12773_v26  ;;  %v17567_v25 = vcombine.low %v20229_v52, %v12773_v26  ;;  %v5133_v29 = vmax.f32 %v5101_v17, 0.0  ;;  %v4752_v62 = vadd.f32 %v17497_v63, %v20360_v47 }
 0x34a   :  { %v5134_v11 = vmax.f32 %v5102_v44, 0.0  ;;  %v5103_v42 = vadd.f32 %v17374_v27, %v5059_v28  ;;  %v5060_v51 = vmul.f32 %v17350_v18, %v5016_v9  ;;  %v5017_v6 = vadd.f32 %v4971_v38, %v4751_v31  ;;  %v20362_v31 = vld [vmem:[#allocation51_spill] sm:$0xff]  ;;  %v4721_v9 = vpop.f32.mrf.mxu0 }
 0x34b   :  { %v4489_v36 = vadd.f32 %v20361_v59, %v4223_v12  ;;  %6047 = vmatprep.mubr.bf16.mxu1 %v17564_v35  ;;  %v4975_v1 = vpop.f32.mrf.mxu1  ;;  %v17576_v46 = vpack.c.bf16 %v5133_v29, %v5131_v8  ;;  %v3961_v63 = vadd.f32 %v20362_v31, %v3694_v2  ;;  %v20363_v44 = vld [vmem:[#allocation67_spill] sm:$0xff]  ;;  %v4757_v31 = vadd.f32 %v4721_v9, %v17334_v49 }
 0x34c   :  { %v17578_v17 = vpack.c.bf16 %v5134_v11, %v5132_v30  ;;  %v5135_v55 = vmax.f32 %v5103_v42, 0.0  ;;  %v5104_v60 = vadd.f32 %v17366_v16, %v5060_v51  ;;  %v5061_v26 = vmul.f32 %v17360_v48, %v5017_v6  ;;  %6048 = vmatmul.mubr.bf16.gmra.mxu1 %v17567_v25 }
 0x34d   :  { %v4754_v53 = vadd.f32 %v4713_v34, %v20363_v44  ;;  %v5018_v32 = vadd.f32 %v4975_v1, %v4752_v62  ;;  %5694 = vmatprep.mubr.bf16.mxu0 %v17576_v46  ;;  %v4977_v28 = vpop.f32.mrf.mxu1  ;;  %v4755_v38 = vadd.f32 %v4715_v13, %v4489_v36  ;;  %v20364_v62 = vld [vmem:[#allocation52_spill] sm:$0xff] }
 0x34e   :  { %v5136_v8 = vmax.f32 %v5104_v60, 0.0  ;;  %v5105_v30 = vadd.f32 %v17374_v27, %v5061_v26  ;;  %v5019_v57 = vadd.f32 %v4977_v28, %v4753_v21  ;;  %5695 = vmatmul.mubr.bf16.gmra.mxu0 %v17558_v61  ;;  %v17588_v12 = vpack.c.bf16 %v5135_v55, %v5133_v29  ;;  %v4723_v60 = vpop.f32.mrf.mxu0 }
 0x34f   :  { %v5062_v42 = vmul.f32 %v17350_v18, %v5018_v32  ;;  %v4979_v51 = vpop.f32.mrf.mxu1  ;;  %v4227_v59 = vadd.f32 %v20364_v62, %v3961_v63  ;;  %v4756_v21 = vadd.f32 %v4719_v14, %v17325_v5 }
 0x350   :  { %v17591_v2 = vpack.c.bf16 %v5136_v8, %v5134_v11  ;;  %v5063_v34 = vmul.f32 %v17360_v48, %v5019_v57  ;;  %v5020_v6 = vadd.f32 %v4979_v51, %v4754_v53  ;;  %6057 = vmatprep.mubr.bf16.mxu1 %v17588_v12  ;;  %v5137_v47 = vmax.f32 %v5105_v30, 0.0  ;;  %v4725_v49 = vpop.f32.mrf.mxu0 }
 0x351   :  { %v5106_v1 = vadd.f32 %v17366_v16, %v5062_v42  ;;  %v4981_v29 = vpop.f32.mrf.mxu1  ;;  %v4493_v44 = vadd.f32 %v17343_v3, %v4227_v59  ;;  %v4758_v30 = vadd.f32 %v4723_v60, %v17341_v33 }
 0x352   :  { %v5107_v13 = vadd.f32 %v17374_v27, %v5063_v34  ;;  %v5064_v36 = vmul.f32 %v17350_v18, %v5020_v6  ;;  %v5021_v11 = vadd.f32 %v4981_v29, %v4755_v38  ;;  %v17600_v26 = vpack.c.bf16 %v5137_v47, %v5135_v55 }
 0x353   :  { %v5138_v53 = vmax.f32 %v5106_v1, 0.0  ;;  %v4985_v32 = vpop.f32.mrf.mxu1  ;;  %v4759_v51 = vadd.f32 %v4725_v49, %v4493_v44 }
 0x354   :  { %v5139_v63 = vmax.f32 %v5107_v13, 0.0  ;;  %v5108_v5 = vadd.f32 %v17366_v16, %v5064_v36  ;;  %v5065_v14 = vmul.f32 %v17360_v48, %v5021_v11  ;;  %v5022_v28 = vadd.f32 %v4985_v32, %v4756_v21  ;;  %6058 = vmatmul.mubr.bf16.gmra.mxu1 %v17578_v17  ;;  %5704 = vmatprep.mubr.bf16.mxu0 %v17600_v26 }
 0x355   :  { %v17609_v55 = vpack.c.bf16 %v5138_v53, %v5136_v8  ;;  %v4987_v57 = vpop.f32.mrf.mxu1 }
 0x356   :  { %v5140_v9 = vmax.f32 %v5108_v5, 0.0  ;;  %v17612_v3 = vadd.f32 %v17374_v27, %v5065_v14  ;;  %v5066_v38 = vmul.f32 %v17350_v18, %v5022_v28  ;;  %v5023_v42 = vadd.f32 %v4987_v57, %v4757_v31  ;;  %5705 = vmatmul.mubr.bf16.gmra.mxu0 %v17591_v2  ;;  %v13911_v14 = vld [vmem:[%s20171_s7 + $0x464] ss:$8 sps:$4 sm:$0xff]   ;;  %v13906_v57 = vld [vmem:[%s20171_s7 + $0x560] ss:$8 sps:$4 sm:$0xff]  }
 0x357   :  { %v4989_v34 = vpop.f32.mrf.mxu1  ;;  %v17616_v6 = vpack.c.bf16 %v5139_v63, %v5137_v47 }
 0x358   :  { %v17618_v62 = vpack.c.bf16 %v5140_v9, %v5138_v53  ;;  %v5110_v33 = vadd.f32 %v17366_v16, %v5066_v38  ;;  %v5067_v8 = vmul.f32 %v17360_v48, %v5023_v42  ;;  %v5024_v59 = vadd.f32 %v4989_v34, %v4758_v30  ;;  %v13909_v42 = vld [vmem:[%s20171_s7 + $0x460] ss:$8 sps:$4 sm:$0xff]  }
 0x359   :  { %6067 = vmatprep.mubr.bf16.mxu1 %v17616_v6  ;;  %v4991_v21 = vpop.f32.mrf.mxu1  ;;  %v5141_v1 = vmax.f32 %v17612_v3, 0.0  ;;  %v13981_v3 = vld [vmem:[%s20171_s7 + $0x4a0] ss:$8 sps:$4 sm:$0xff]  }
 0x35a   :  { %v5142_v29 = vmax.f32 %v5110_v33, 0.0  ;;  %v17625_v60 = vadd.f32 %v17374_v27, %v5067_v8  ;;  %v5068_v13 = vmul.f32 %v17350_v18, %v5024_v59  ;;  %v5025_v47 = vadd.f32 %v4991_v21, %v4759_v51  ;;  %v13912_v8 = vld [vmem:[%s20171_s7 + $0x550] ss:$8 sps:$4 sm:$0xff]   ;;  %v13920_v21 = vld [vmem:[%s20171_s7 + $0x544] ss:$8 sps:$4 sm:$0xff]  }
 0x35b   :  { %v17630_v36 = vpack.c.bf16 %v5141_v1, %v5139_v63 }
 0x35c   :  { %v17632_v11 = vpack.c.bf16 %v5142_v29, %v5140_v9  ;;  %v5112_v31 = vadd.f32 %v17366_v16, %v5068_v13  ;;  %v5069_v44 = vmul.f32 %v17360_v48, %v5025_v47  ;;  %6068 = vmatmul.mubr.bf16.gmra.mxu1 %v17609_v55  ;;  %v5143_v32 = vmax.f32 %v17625_v60, 0.0  ;;  %v13900_v48 = vld [vmem:[%s20171_s7 + $0x570] ss:$8 sps:$4 sm:$0xff]   ;;  %v13923_v13 = vld [vmem:[%s20171_s7 + $0x444] ss:$8 sps:$4 sm:$0xff]  }
 0x35d   :  { %5714 = vmatprep.mubr.bf16.mxu0 %v17630_v36  ;;  %6835 = vmatprep.mubr.bf16.mxu1 %v17426_v37  ;;  %v13908_v37 = vld [vmem:[%s20171_s7 + $0x564] ss:$8 sps:$4 sm:$0xff]   ;;  %v13918_v47 = vld [vmem:[%s20171_s7 + $0x540] ss:$8 sps:$4 sm:$0xff]   ;;  %v13984_v60 = vld [vmem:[%s20171_s7 + $0x590] ss:$8 sps:$4 sm:$0xff]  }
 0x35e   :  { %v5144_v53 = vmax.f32 %v5112_v31, 0.0  ;;  %v5113_v18 = vadd.f32 %v17374_v27, %v5069_v44  ;;  %5715 = vmatmul.mubr.bf16.gmra.mxu0 %v17618_v62  ;;  %v13926_v31 = vld [vmem:[%s20171_s7 + $0x534] ss:$8 sps:$4 sm:$0xff]   ;;  %v13921_v44 = vld [vmem:[%s20171_s7 + $0x440] ss:$8 sps:$4 sm:$0xff]  }
 0x35f   :  { %6400 = vmatprep.mubr.bf16.mxu0 %v17412_v23  ;;  %v13903_v23 = vld [vmem:[%s20171_s7 + $0x470] ss:$8 sps:$4 sm:$0xff]  }
 0x360   :  { %v17643_v63 = vpack.c.bf16 %v5144_v53, %v5142_v29  ;;  %v5145_v16 = vmax.f32 %v5113_v18, 0.0  ;;  %v5646_v28 = vpop.f32.mrf.mxu0  ;;  %v5999_v30 = vpop.f32.mrf.mxu1  ;;  %v13915_v29 = vld [vmem:[%s20171_s7 + $0x450] ss:$8 sps:$4 sm:$0xff]  }
 0x361   :  { %v17668_v49 = vadd.f32 %v5999_v30, %v5646_v28  ;;  %v13924_v18 = vld [vmem:[%s20171_s7 + $0x530] ss:$8 sps:$4 sm:$0xff]   ;;  %v13933_v28 = vld [vmem:[%s20171_s7 + $0x420] ss:$8 sps:$4 sm:$0xff]   ;;  %v13941_v30 = vld [vmem:[%s20171_s7 + $0x414] ss:$8 sps:$4 sm:$0xff]  }
 0x362   :  { %v17653_v27 = vpack.c.bf16 %v5145_v16, %v5143_v32  ;;  %v17655_v5 = vpack.c.bf16 %v5145_v16, %v5144_v53  ;;  %v5648_v9 = vpop.f32.mrf.mxu0  ;;  %v6001_v38 = vpop.f32.mrf.mxu1  ;;  %v13929_v53 = vld [vmem:[%s20171_s7 + $0x434] ss:$8 sps:$4 sm:$0xff]   ;;  %v13932_v16 = vld [vmem:[%s20171_s7 + $0x524] ss:$8 sps:$4 sm:$0xff]  }
 0x363   :  { %v17678_v51 = vadd.f32 %v6001_v38, %v5648_v9  ;;  %v13939_v9 = vld [vmem:[%s20171_s7 + $0x410] ss:$8 sps:$4 sm:$0xff]   ;;  %v13947_v38 = vld [vmem:[%s20171_s7 + $0x404] ss:$8 sps:$4 sm:$0xff]  }
 0x364   :  { %6836 = vmatmul.mubr.bf16.vlgmr.msra.gmra.mxu1 %v17406_v7  ;;  %v13914_v7 = vld [vmem:[%s20171_s7 + $0x554] ss:$8 sps:$4 sm:$0xff]   ;;  %v5650_v34 = vpop.f32.mrf.mxu0  ;;  %v6003_v33 = vpop.f32.mrf.mxu1 }
 0x365   :  { %6845 = vmatprep.mubr.bf16.mxu1 %v17459_v19  ;;  %7674 = vmatpush1.bf16.msra.mxu1 %v13900_v48  ;;  %v17686_v59 = vadd.f32 %v6003_v33, %v5650_v34  ;;  %v13927_v48 = vld [vmem:[%s20171_s7 + $0x430] ss:$8 sps:$4 sm:$0xff]   ;;  %v13945_v34 = vld [vmem:[%s20171_s7 + $0x400] ss:$8 sps:$4 sm:$0xff]  }
 0x366   :  { %6401 = vmatmul.mubr.bf16.vlgmr.msra.gmra.mxu0 %v17415_v22  ;;  %7675 = vmatprep.subr.bf16.mxu1 %v13908_v37  ;;  %v13917_v22 = vld [vmem:[%s20171_s7 + $0x454] ss:$8 sps:$4 sm:$0xff]   ;;  %v13935_v37 = vld [vmem:[%s20171_s7 + $0x424] ss:$8 sps:$4 sm:$0xff]   ;;  %v13948_v33 = vld [vmem:[%s20171_s7 + $0x5f0] ss:$8 sps:$4 sm:$0xff]  }
 0x367   :  { %6410 = vmatprep.mubr.bf16.mxu0 %v17441_v10  ;;  %7239 = vmatpush1.bf16.msra.mxu0 %v13903_v23  ;;  %v13930_v23 = vld [vmem:[%s20171_s7 + $0x520] ss:$8 sps:$4 sm:$0xff]  }
 0x368   :  { %7240 = vmatprep.subr.bf16.mxu0 %v13911_v14  ;;  %v13938_v14 = vld [vmem:[%s20171_s7 + $0x514] ss:$8 sps:$4 sm:$0xff]  }
 0x369   :  { %7676 = vmatpush1.bf16.msra.mxu1 %v13906_v57  ;;  %v13936_v57 = vld [vmem:[%s20171_s7 + $0x510] ss:$8 sps:$4 sm:$0xff]  }
 0x36a   :  { %7677 = vmatprep.subr.bf16.mxu1 %v13914_v7  ;;  %v13944_v7 = vld [vmem:[%s20171_s7 + $0x504] ss:$8 sps:$4 sm:$0xff]  }
 0x36b   :  { %7241 = vmatpush1.bf16.msra.mxu0 %v13909_v42  ;;  %v13942_v42 = vld [vmem:[%s20171_s7 + $0x500] ss:$8 sps:$4 sm:$0xff]  }
 0x36c   :  { %6846 = vmatmul.mubr.bf16.gmra.mxu1 %v17445_v40  ;;  %7242 = vmatprep.subr.bf16.mxu0 %v13917_v22  ;;  %v13950_v22 = vld [vmem:[%s20171_s7 + $0x5f4] ss:$8 sps:$4 sm:$0xff]  }
 0x36d   :  { %6855 = vmatprep.mubr.bf16.mxu1 %v17504_v43  ;;  %7678 = vmatpush1.bf16.msra.mxu1 %v13912_v8  ;;  %v13951_v8 = vld [vmem:[%s20171_s7 + $0x4f0] ss:$8 sps:$4 sm:$0xff]  }
 0x36e   :  { %6411 = vmatmul.mubr.bf16.gmra.mxu0 %v17428_v0  ;;  %7679 = vmatprep.subr.bf16.mxu1 %v13920_v21  ;;  %v13959_v21 = vld [vmem:[%s20171_s7 + $0x4e4] ss:$8 sps:$4 sm:$0xff]  }
 0x36f   :  { %6420 = vmatprep.mubr.bf16.mxu0 %v17485_v39  ;;  %7243 = vmatpush1.bf16.msra.mxu0 %v13915_v29  ;;  %v13954_v29 = vld [vmem:[%s20171_s7 + $0x5e0] ss:$8 sps:$4 sm:$0xff]  }
 0x370   :  { %7244 = vmatprep.subr.bf16.mxu0 %v13923_v13  ;;  %v13962_v13 = vld [vmem:[%s20171_s7 + $0x5d4] ss:$8 sps:$4 sm:$0xff]  }
 0x371   :  { %7680 = vmatpush1.bf16.msra.mxu1 %v13918_v47  ;;  %v13965_v47 = vld [vmem:[%s20171_s7 + $0x4d4] ss:$8 sps:$4 sm:$0xff]  }
 0x372   :  { %7681 = vmatprep.subr.bf16.mxu1 %v13926_v31  ;;  %v13968_v31 = vld [vmem:[%s20171_s7 + $0x5c4] ss:$8 sps:$4 sm:$0xff]  }
 0x373   :  { %7245 = vmatpush1.bf16.msra.mxu0 %v13921_v44  ;;  %v13963_v44 = vld [vmem:[%s20171_s7 + $0x4d0] ss:$8 sps:$4 sm:$0xff]  }
 0x374   :  { %6856 = vmatmul.mubr.bf16.gmra.mxu1 %v17487_v54  ;;  %7246 = vmatprep.subr.bf16.mxu0 %v13929_v53  ;;  %v13971_v53 = vld [vmem:[%s20171_s7 + $0x4c4] ss:$8 sps:$4 sm:$0xff]  }
 0x375   :  { %6865 = vmatprep.mubr.bf16.mxu1 %v17535_v20  ;;  %7682 = vmatpush1.bf16.msra.mxu1 %v13924_v18  ;;  %v13966_v18 = vld [vmem:[%s20171_s7 + $0x5c0] ss:$8 sps:$4 sm:$0xff]  }
 0x376   :  { %6421 = vmatmul.mubr.bf16.gmra.mxu0 %v17475_v45  ;;  %7683 = vmatprep.subr.bf16.mxu1 %v13932_v16  ;;  %v13974_v16 = vld [vmem:[%s20171_s7 + $0x5b4] ss:$8 sps:$4 sm:$0xff]  }
 0x377   :  { %6430 = vmatprep.mubr.bf16.mxu0 %v17520_v24  ;;  %7247 = vmatpush1.bf16.msra.mxu0 %v13927_v48  ;;  %v13969_v48 = vld [vmem:[%s20171_s7 + $0x4c0] ss:$8 sps:$4 sm:$0xff]  }
 0x378   :  { %7248 = vmatprep.subr.bf16.mxu0 %v13935_v37  ;;  %v13977_v37 = vld [vmem:[%s20171_s7 + $0x4b4] ss:$8 sps:$4 sm:$0xff]  }
 0x379   :  { %7684 = vmatpush1.bf16.msra.mxu1 %v13930_v23  ;;  %v13972_v23 = vld [vmem:[%s20171_s7 + $0x5b0] ss:$8 sps:$4 sm:$0xff]  }
 0x37a   :  { %7685 = vmatprep.subr.bf16.mxu1 %v13938_v14  ;;  %v13980_v14 = vld [vmem:[%s20171_s7 + $0x5a4] ss:$8 sps:$4 sm:$0xff]  }
 0x37b   :  { %7249 = vmatpush1.bf16.msra.mxu0 %v13933_v28  ;;  %v13975_v28 = vld [vmem:[%s20171_s7 + $0x4b0] ss:$8 sps:$4 sm:$0xff]  }
 0x37c   :  { %6866 = vmatmul.mubr.bf16.gmra.mxu1 %v17526_v41  ;;  %7250 = vmatprep.subr.bf16.mxu0 %v13941_v30  ;;  %v13983_v30 = vld [vmem:[%s20171_s7 + $0x4a4] ss:$8 sps:$4 sm:$0xff]  }
 0x37d   :  { %6875 = vmatprep.mubr.bf16.mxu1 %v17576_v46  ;;  %7686 = vmatpush1.bf16.msra.mxu1 %v13936_v57  ;;  %v13953_v46 = vld [vmem:[%s20171_s7 + $0x4f4] ss:$8 sps:$4 sm:$0xff]   ;;  %v17843_v57 = vpack.c.bf16 %v5143_v32, %v5141_v1  ;;  %v13992_v32 = vld [vmem:[%s20171_s7 + $0x584] ss:$8 sps:$4 sm:$0xff]  }
 0x37e   :  { %6431 = vmatmul.mubr.bf16.gmra.mxu0 %v17506_v4  ;;  %7687 = vmatprep.subr.bf16.mxu1 %v13944_v7  ;;  %v13978_v7 = vld [vmem:[%s20171_s7 + $0x5a0] ss:$8 sps:$4 sm:$0xff]   ;;  %v13989_v1 = vld [vmem:[%s20171_s7 + $0x494] ss:$8 sps:$4 sm:$0xff]  }
 0x37f   :  { %6440 = vmatprep.mubr.bf16.mxu0 %v17564_v35  ;;  %7251 = vmatpush1.bf16.msra.mxu0 %v13939_v9  ;;  %v13956_v35 = vld [vmem:[%s20171_s7 + $0x5e4] ss:$8 sps:$4 sm:$0xff]   ;;  %v13986_v9 = vld [vmem:[%s20171_s7 + $0x594] ss:$8 sps:$4 sm:$0xff]  }
 0x380   :  { %7252 = vmatprep.subr.bf16.mxu0 %v13947_v38  ;;  %v13987_v38 = vld [vmem:[%s20171_s7 + $0x490] ss:$8 sps:$4 sm:$0xff]  }
 0x381   :  { %7688 = vmatpush1.bf16.msra.mxu1 %v13942_v42  ;;  %v13995_v42 = vld [vmem:[%s20171_s7 + $0x484] ss:$8 sps:$4 sm:$0xff]  }
 0x382   :  { %7689 = vmatprep.subr.bf16.mxu1 %v13950_v22  ;;  %v13990_v22 = vld [vmem:[%s20171_s7 + $0x580] ss:$8 sps:$4 sm:$0xff]  }
 0x383   :  { %7253 = vmatpush1.bf16.msra.mxu0 %v13945_v34  ;;  %v14010_v34 = vld [vmem:[%s20175_s11 + $0x1fc] ss:$36 sps:$4 sm:$0xff]  }
 0x384   :  { %6876 = vmatmul.mubr.bf16.gmra.mxu1 %v17558_v61  ;;  %7254 = vmatprep.subr.bf16.mxu0 %v13953_v46  ;;  %v13957_v61 = vld [vmem:[%s20171_s7 + $0x4e0] ss:$8 sps:$4 sm:$0xff]  }
 0x385   :  { %6885 = vmatprep.mubr.bf16.mxu1 %v17600_v26  ;;  %7690 = vmatpush2.bf16.msra.mxu1 %v13948_v33  ;;  %v13993_v46 = vld [vmem:[%s20171_s7 + $0x480] ss:$8 sps:$4 sm:$0xff]   ;;  %v14008_v33 = vld [vmem:[%s20175_s11 + $0x1f8] ss:$36 sps:$4 sm:$0xff]  }
 0x386   :  { %6441 = vmatmul.mubr.bf16.gmra.mxu0 %v17567_v25  ;;  %7691 = vmatprep.subr.bf16.mxu1 %v13956_v35  ;;  %v13960_v25 = vld [vmem:[%s20171_s7 + $0x5d0] ss:$8 sps:$4 sm:$0xff]  }
 0x387   :  { %6450 = vmatprep.mubr.bf16.mxu0 %v17588_v12  ;;  %7255 = vmatpush2.bf16.msra.mxu0 %v13951_v8  ;;  %v14016_v35 = vld [vmem:[%s20175_s11 + $0x1b4] ss:$36 sps:$4 sm:$0xff]   ;;  %v14001_v8 = vld [vmem:[%s20171_s7 + $0x664] ss:$8 sps:$4 sm:$0xff]  }
 0x388   :  { %7256 = vmatprep.subr.bf16.mxu0 %v13959_v21  ;;  %v14014_v21 = vld [vmem:[%s20175_s11 + $0x1b0] ss:$36 sps:$4 sm:$0xff]  }
 0x389   :  { %7692 = vmatpush2.bf16.msra.mxu1 %v13954_v29  ;;  %v14022_v29 = vld [vmem:[%s20175_s11 + $0x16c] ss:$36 sps:$4 sm:$0xff]  }
 0x38a   :  { %7693 = vmatprep.subr.bf16.mxu1 %v13962_v13  ;;  %v14028_v13 = vld [vmem:[%s20175_s11 + $0x124] ss:$36 sps:$4 sm:$0xff]  }
 0x38b   :  { %7257 = vmatpush2.bf16.msra.mxu0 %v13957_v61  ;;  %v14002_v61 = vld [vmem:[%s20171_s7 + $0x650] ss:$8 sps:$4 sm:$0xff]  }
 0x38c   :  { %6886 = vmatmul.mubr.bf16.gmra.mxu1 %v17591_v2  ;;  %7258 = vmatprep.subr.bf16.mxu0 %v13965_v47  ;;  %v14007_v47 = vld [vmem:[%s20171_s7 + $0x644] ss:$8 sps:$4 sm:$0xff]  }
 0x38d   :  { %6895 = vmatprep.mubr.bf16.mxu1 %v17630_v36  ;;  %7694 = vmatpush2.bf16.msra.mxu1 %v13960_v25  ;;  %v14026_v25 = vld [vmem:[%s20175_s11 + $0x120] ss:$36 sps:$4 sm:$0xff]  }
 0x38e   :  { %6451 = vmatmul.mubr.bf16.gmra.mxu0 %v17578_v17  ;;  %7695 = vmatprep.subr.bf16.mxu1 %v13968_v31  ;;  %v14034_v31 = vld [vmem:[%s20175_s11 + $0xdc] ss:$36 sps:$4 sm:$0xff]  }
 0x38f   :  { %6460 = vmatprep.mubr.bf16.mxu0 %v17616_v6  ;;  %7259 = vmatpush2.bf16.msra.mxu0 %v13963_v44  ;;  %v14032_v44 = vld [vmem:[%s20175_s11 + $0xd8] ss:$36 sps:$4 sm:$0xff]  }
 0x390   :  { %7260 = vmatprep.subr.bf16.mxu0 %v13971_v53  ;;  %v14040_v53 = vld [vmem:[%s20175_s11 + $0x94] ss:$36 sps:$4 sm:$0xff]  }
 0x391   :  { %7696 = vmatpush2.bf16.msra.mxu1 %v13966_v18  ;;  %v14011_v18 = vld [vmem:[%s20171_s7 + $0x630] ss:$8 sps:$4 sm:$0xff]  }
 0x392   :  { %7697 = vmatprep.subr.bf16.mxu1 %v13974_v16  ;;  %v14019_v16 = vld [vmem:[%s20171_s7 + $0x624] ss:$8 sps:$4 sm:$0xff]  }
 0x393   :  { %7261 = vmatpush2.bf16.msra.mxu0 %v13969_v48  ;;  %v17958_v48 = vcombine.high %v17541_v50, %v16908_v15 }
 0x394   :  { %6896 = vmatmul.mubr.bf16.gmra.mxu1 %v17618_v62  ;;  %7262 = vmatprep.subr.bf16.mxu0 %v13977_v37  ;;  %v14038_v37 = vld [vmem:[%s20175_s11 + $0x90] ss:$36 sps:$4 sm:$0xff]  }
 0x395   :  { %6905 = vmatprep.mubr.bf16.mxu1 %v17653_v27  ;;  %7698 = vmatpush2.bf16.msra.mxu1 %v13972_v23  ;;  %v14017_v23 = vld [vmem:[%s20171_s7 + $0x620] ss:$8 sps:$4 sm:$0xff]  }
 0x396   :  { %6461 = vmatmul.mubr.bf16.gmra.mxu0 %v17609_v55  ;;  %7699 = vmatprep.subr.bf16.mxu1 %v13980_v14  ;;  %v14025_v14 = vld [vmem:[%s20171_s7 + $0x614] ss:$8 sps:$4 sm:$0xff]  }
 0x397   :  { %6470 = vmatprep.mubr.bf16.mxu0 %v17843_v57  ;;  %7263 = vmatpush2.bf16.msra.mxu0 %v13975_v28  ;;  %v14044_v28 = vld [vmem:[%s20175_s11 + $0x48] ss:$36 sps:$4 sm:$0xff]  }
 0x398   :  { %7264 = vmatprep.subr.bf16.mxu0 %v13983_v30  ;;  %v14052_v30 = vld [vmem:[%s20175_s11 + $0x4] ss:$36 sps:$4 sm:$0xff]  }
 0x399   :  { %7700 = vmatpush2.bf16.msra.mxu1 %v13978_v7  ;;  %v14023_v7 = vld [vmem:[%s20171_s7 + $0x610] ss:$8 sps:$4 sm:$0xff]  }
 0x39a   :  { %7701 = vmatprep.subr.bf16.mxu1 %v13986_v9  ;;  %v17987_v9 = vcombine.low %v17541_v50, %v20229_v52  ;;  %v14058_v50 = vld [vmem:[%s20175_s11 + $0x31c] ss:$36 sps:$4 sm:$0xff]  }
 0x39b   :  { %7265 = vmatpush2.bf16.msra.mxu0 %v13981_v3  ;;  %v14031_v3 = vld [vmem:[%s20171_s7 + $0x604] ss:$8 sps:$4 sm:$0xff]  }
 0x39c   :  { %6906 = vmatmul.mubr.bf16.gmra.mxu1 %v17643_v63  ;;  %7266 = vmatprep.subr.bf16.mxu0 %v13989_v1  ;;  %v14050_v1 = vld [vmem:[%s20175_s11] ss:$36 sps:$4 sm:$0xff]  }
 0x39d   :  { %7702 = vmatpush2.bf16.msra.mxu1 %v13984_v60  ;;  %7705 = vmatprep.mubr.bf16.mxu1 %v17459_v19  ;;  %v13998_v19 = vld [vmem:[%s20171_s7 + $0x674] ss:$8 sps:$4 sm:$0xff]   ;;  %v14029_v60 = vld [vmem:[%s20171_s7 + $0x600] ss:$8 sps:$4 sm:$0xff]  }
 0x39e   :  { %6471 = vmatmul.mubr.bf16.gmra.mxu0 %v17632_v11  ;;  %7703 = vmatprep.subr.bf16.mxu1 %v13992_v32  ;;  %v14056_v32 = vld [vmem:[%s20175_s11 + $0x318] ss:$36 sps:$4 sm:$0xff]  }
 0x39f   :  { %7267 = vmatpush2.bf16.msra.mxu0 %v13987_v38  ;;  %7270 = vmatprep.mubr.bf16.mxu0 %v17441_v10  ;;  %v13996_v10 = vld [vmem:[%s20171_s7 + $0x670] ss:$8 sps:$4 sm:$0xff]  }
 0x3a0   :  { %7268 = vmatprep.subr.bf16.mxu0 %v13995_v42  ;;  %v14035_v38 = vld [vmem:[%s20171_s7 + $0x6f0] ss:$8 sps:$4 sm:$0xff]   ;;  %v14043_v42 = vld [vmem:[%s20171_s7 + $0x6e4] ss:$8 sps:$4 sm:$0xff]  }
 0x3a1   :  { %7704 = vmatpush2.bf16.msra.mxu1 %v13990_v22  ;;  %v14062_v22 = vld [vmem:[%s20175_s11 + $0x2d0] ss:$36 sps:$4 sm:$0xff]  }
 0x3a2   :  { %9206 = vmatprep.subr.bf16.mxu1 %v14010_v34  ;;  %v14070_v34 = vld [vmem:[%s20175_s11 + $0x28c] ss:$36 sps:$4 sm:$0xff]  }
 0x3a3   :  { %7269 = vmatpush2.bf16.msra.mxu0 %v13993_v46  ;;  %v14076_v46 = vld [vmem:[%s20175_s11 + $0x244] ss:$36 sps:$4 sm:$0xff]  }
 0x3a4   :  { %7706 = vmatmul.mubr.bf16.vlgmr.msra.gmra.mxu1 %v17445_v40  ;;  %8108 = vmatprep.subr.bf16.mxu0 %v13998_v19  ;;  %v13999_v40 = vld [vmem:[%s20171_s7 + $0x660] ss:$8 sps:$4 sm:$0xff]   ;;  %v14047_v19 = vld [vmem:[%s20171_s7 + $0x6d0] ss:$8 sps:$4 sm:$0xff]  }
 0x3a5   :  { %7715 = vmatprep.mubr.bf16.mxu1 %v17504_v43  ;;  %9207 = vmatpush1.bf16.msra.mxu1 %v14008_v33  ;;  %v14004_v43 = vld [vmem:[%s20171_s7 + $0x654] ss:$8 sps:$4 sm:$0xff]   ;;  %v14055_v33 = vld [vmem:[%s20171_s7 + $0x6c4] ss:$8 sps:$4 sm:$0xff]  }
 0x3a6   :  { %7271 = vmatmul.mubr.bf16.vlgmr.msra.gmra.mxu0 %v17428_v0  ;;  %9208 = vmatprep.subr.bf16.mxu1 %v14016_v35  ;;  %v14020_v0 = vld [vmem:[%s20175_s11 + $0x168] ss:$36 sps:$4 sm:$0xff]   ;;  %v14074_v35 = vld [vmem:[%s20175_s11 + $0x240] ss:$36 sps:$4 sm:$0xff]  }
 0x3a7   :  { %7280 = vmatprep.mubr.bf16.mxu0 %v17485_v39  ;;  %8109 = vmatpush1.bf16.msra.mxu0 %v13996_v10  ;;  %v14082_v10 = vld [vmem:[%s20175_s11 + $0x20c] ss:$36 sps:$4 sm:$0xff]  }
 0x3a8   :  { %8110 = vmatprep.subr.bf16.mxu0 %v14001_v8  ;;  %v14059_v8 = vld [vmem:[%s20171_s7 + $0x6b0] ss:$8 sps:$4 sm:$0xff]  }
 0x3a9   :  { %9209 = vmatpush1.bf16.msra.mxu1 %v14014_v21  ;;  %v14067_v21 = vld [vmem:[%s20171_s7 + $0x6a4] ss:$8 sps:$4 sm:$0xff]  }
 0x3aa   :  { %9210 = vmatprep.subr.bf16.mxu1 %v14022_v29  ;;  %v18072_v29 = vcombine.high %v17655_v5, %v16908_v15 }
 0x3ab   :  { %8111 = vmatpush1.bf16.msra.mxu0 %v13999_v40  ;;  %v14073_v40 = vld [vmem:[%s20171_s7 + $0x694] ss:$8 sps:$4 sm:$0xff]  }
 0x3ac   :  { %7716 = vmatmul.mubr.bf16.gmra.mxu1 %v17487_v54  ;;  %8112 = vmatprep.subr.bf16.mxu0 %v14004_v43  ;;  %v14005_v54 = vld [vmem:[%s20171_s7 + $0x640] ss:$8 sps:$4 sm:$0xff]   ;;  %v14071_v43 = vld [vmem:[%s20171_s7 + $0x690] ss:$8 sps:$4 sm:$0xff]  }
 0x3ad   :  { %7725 = vmatprep.mubr.bf16.mxu1 %v17535_v20  ;;  %9211 = vmatpush1.bf16.msra.mxu1 %v14020_v0  ;;  %v14013_v20 = vld [vmem:[%s20171_s7 + $0x634] ss:$8 sps:$4 sm:$0xff]   ;;  %v18089_v0 = vcombine.low %v17655_v5, %v20229_v52  ;;  %v14085_v5 = vld [vmem:[%s20175_s11 + $0x204] ss:$36 sps:$4 sm:$0xff]  }
 0x3ae   :  { %7281 = vmatmul.mubr.bf16.gmra.mxu0 %v17475_v45  ;;  %9212 = vmatprep.subr.bf16.mxu1 %v14028_v13  ;;  %v14079_v13 = vld [vmem:[%s20171_s7 + $0x684] ss:$8 sps:$4 sm:$0xff]  }
 0x3af   :  { %7290 = vmatprep.mubr.bf16.mxu0 %v17520_v24  ;;  %8113 = vmatpush1.bf16.msra.mxu0 %v14002_v61  ;;  %v20365_v61 = vld [vmem:[#allocation16_spill] sm:$0xff] }
 0x3b0   :  { %8114 = vmatprep.subr.bf16.mxu0 %v14007_v47  ;;  %v14077_v47 = vld [vmem:[%s20171_s7 + $0x680] ss:$8 sps:$4 sm:$0xff]  }
 0x3b1   :  { %9213 = vmatpush1.bf16.msra.mxu1 %v14026_v25  ;;  %v14080_v25 = vld [vmem:[%s20175_s11 + $0x208] ss:$36 sps:$4 sm:$0xff]  }
 0x3b2   :  { %9214 = vmatprep.subr.bf16.mxu1 %v14034_v31  ;;  %v14088_v31 = vld [vmem:[%s20175_s11 + $0x1c4] ss:$36 sps:$4 sm:$0xff]  }
 0x3b3   :  { %8115 = vmatpush1.bf16.msra.mxu0 %v14005_v54  ;;  %v20366_v54 = vld [vmem:[#allocation34_spill] sm:$0xff] }
 0x3b4   :  { %7726 = vmatmul.mubr.bf16.gmra.mxu1 %v17526_v41  ;;  %8116 = vmatprep.subr.bf16.mxu0 %v14013_v20  ;;  %v14046_v41 = vld [vmem:[%s20175_s11 + $0x4c] ss:$36 sps:$4 sm:$0xff]   ;;  %v14091_v20 = vld [vmem:[%s20175_s11 + $0x1bc] ss:$36 sps:$4 sm:$0xff]  }
 0x3b5   :  { %7735 = vmatprep.mubr.bf16.mxu1 %v16908_v15  ;;  %9215 = vmatpush1.bf16.msra.mxu1 %v14032_v44  ;;  %v20367_v44 = vld [vmem:[#allocation15_spill] sm:$0xff] }
 0x3b6   :  { %7291 = vmatmul.mubr.bf16.gmra.mxu0 %v17506_v4  ;;  %9216 = vmatprep.subr.bf16.mxu1 %v14040_v53  ;;  %v14086_v53 = vld [vmem:[%s20175_s11 + $0x1c0] ss:$36 sps:$4 sm:$0xff]  }
 0x3b7   :  { %7300 = vmatprep.mubr.bf16.mxu0 %v17958_v48  ;;  %8117 = vmatpush1.bf16.msra.mxu0 %v14011_v18  ;;  %v14094_v18 = vld [vmem:[%s20175_s11 + $0x17c] ss:$36 sps:$4 sm:$0xff]  }
 0x3b8   :  { %8118 = vmatprep.subr.bf16.mxu0 %v14019_v16  ;;  %v14089_v16 = vld [vmem:[%s20175_s11 + $0x1b8] ss:$36 sps:$4 sm:$0xff]  }
 0x3b9   :  { %9217 = vmatpush1.bf16.msra.mxu1 %v14038_v37  ;;  %v14097_v37 = vld [vmem:[%s20175_s11 + $0x174] ss:$36 sps:$4 sm:$0xff]  }
 0x3ba   :  { %9218 = vmatprep.subr.bf16.mxu1 %v14046_v41  ;;  %v18136_v41 = vpop.f32.mrf.mxu1 }
 0x3bb   :  { %8119 = vmatpush1.bf16.msra.mxu0 %v14017_v23  ;;  %v14095_v23 = vld [vmem:[%s20175_s11 + $0x170] ss:$36 sps:$4 sm:$0xff]  }
 0x3bc   :  { %7736 = vmatmul.mubr.bf16.gmra.mxu1 %v16908_v15  ;;  %8120 = vmatprep.subr.bf16.mxu0 %v14025_v14  ;;  %v18144_v14 = vpop.f32.mrf.mxu0 }
 0x3bd   :  { %7745 = vmatprep.mubr.bf16.mxu1 %v17600_v26  ;;  %9219 = vmatpush1.bf16.msra.mxu1 %v14044_v28  ;;  %v14037_v26 = vld [vmem:[%s20171_s7 + $0x6f4] ss:$8 sps:$4 sm:$0xff]  }
 0x3be   :  { %7301 = vmatmul.mubr.bf16.gmra.mxu0 %v17987_v9  ;;  %9220 = vmatprep.subr.bf16.mxu1 %v14052_v30  ;;  %v20368_v30 = vld [vmem:[#allocation35_spill] sm:$0xff] }
 0x3bf   :  { %7310 = vmatprep.mubr.bf16.mxu0 %v17588_v12  ;;  %8121 = vmatpush1.bf16.msra.mxu0 %v14023_v7  ;;  %v14064_v12 = vld [vmem:[%s20175_s11 + $0x2d4] ss:$36 sps:$4 sm:$0xff]   ;;  %v14103_v7 = vld [vmem:[%s20175_s11 + $0x12c] ss:$36 sps:$4 sm:$0xff]  }
 0x3c0   :  { %8122 = vmatprep.subr.bf16.mxu0 %v14031_v3  ;;  %v20369_v3 = vld [vmem:[#allocation9_spill] sm:$0xff] }
 0x3c1   :  { %9221 = vmatpush1.bf16.msra.mxu1 %v14050_v1  ;;  %v14098_v1 = vld [vmem:[%s20175_s11 + $0x130] ss:$36 sps:$4 sm:$0xff]  }
 0x3c2   :  { %9230 = vmatprep.subr.bf16.mxu1 %v14058_v50 }
 0x3c3   :  { %8123 = vmatpush1.bf16.msra.mxu0 %v14029_v60 }
 0x3c4   :  { %7746 = vmatmul.mubr.bf16.gmra.mxu1 %v17591_v2  ;;  %8124 = vmatprep.subr.bf16.mxu0 %v14037_v26  ;;  %v14041_v2 = vld [vmem:[%s20171_s7 + $0x6e0] ss:$8 sps:$4 sm:$0xff]   ;;  %v14106_v26 = vld [vmem:[%s20175_s11 + $0xec] ss:$36 sps:$4 sm:$0xff]  }
 0x3c5   :  { %7755 = vmatprep.mubr.bf16.mxu1 %v17630_v36  ;;  %9231 = vmatpush2.bf16.msra.mxu1 %v14056_v32  ;;  %v14049_v36 = vld [vmem:[%s20171_s7 + $0x6d4] ss:$8 sps:$4 sm:$0xff]  }
 0x3c6   :  { %7311 = vmatmul.mubr.bf16.gmra.mxu0 %v17578_v17  ;;  %9232 = vmatprep.subr.bf16.mxu1 %v14064_v12  ;;  %v14068_v17 = vld [vmem:[%s20175_s11 + $0x288] ss:$36 sps:$4 sm:$0xff]  }
 0x3c7   :  { %7320 = vmatprep.mubr.bf16.mxu0 %v17616_v6  ;;  %8125 = vmatpush2.bf16.msra.mxu0 %v14035_v38  ;;  %v14101_v12 = vld [vmem:[%s20175_s11 + $0x128] ss:$36 sps:$4 sm:$0xff]  }
 0x3c8   :  { %8126 = vmatprep.subr.bf16.mxu0 %v14043_v42 }
 0x3c9   :  { %9233 = vmatpush2.bf16.msra.mxu1 %v14062_v22 }
 0x3ca   :  { %9234 = vmatprep.subr.bf16.mxu1 %v14070_v34  ;;  %v14104_v34 = vld [vmem:[%s20175_s11 + $0xe8] ss:$36 sps:$4 sm:$0xff]  }
 0x3cb   :  { %8127 = vmatpush2.bf16.msra.mxu0 %v14041_v2 }
 0x3cc   :  { %7756 = vmatmul.mubr.bf16.gmra.mxu1 %v17618_v62  ;;  %8128 = vmatprep.subr.bf16.mxu0 %v14049_v36  ;;  %v14053_v62 = vld [vmem:[%s20171_s7 + $0x6c0] ss:$8 sps:$4 sm:$0xff]  }
 0x3cd   :  { %7765 = vmatprep.mubr.bf16.mxu1 %v17653_v27  ;;  %9235 = vmatpush2.bf16.msra.mxu1 %v14068_v17  ;;  %v14061_v27 = vld [vmem:[%s20171_s7 + $0x6b4] ss:$8 sps:$4 sm:$0xff]   ;;  %v14112_v36 = vld [vmem:[%s20175_s11 + $0xa4] ss:$36 sps:$4 sm:$0xff]  }
 0x3ce   :  { %7321 = vmatmul.mubr.bf16.gmra.mxu0 %v17609_v55  ;;  %9236 = vmatprep.subr.bf16.mxu1 %v14076_v46  ;;  %v14107_v46 = vld [vmem:[%s20175_s11 + $0xe0] ss:$36 sps:$4 sm:$0xff]  }
 0x3cf   :  { %7330 = vmatprep.mubr.bf16.mxu0 %v17843_v57  ;;  %8129 = vmatpush2.bf16.msra.mxu0 %v14047_v19 }
 0x3d0   :  { %8130 = vmatprep.subr.bf16.mxu0 %v14055_v33 }
 0x3d1   :  { %9237 = vmatpush2.bf16.msra.mxu1 %v14074_v35  ;;  %v20370_v35 = vld [vmem:[#allocation36_spill] sm:$0xff] }
 0x3d2   :  { %9432 = vmatprep.subr.bf16.mxu1 %v14082_v10  ;;  %v14115_v10 = vld [vmem:[%s20175_s11 + $0x9c] ss:$36 sps:$4 sm:$0xff]  }
 0x3d3   :  { %8131 = vmatpush2.bf16.msra.mxu0 %v14053_v62 }
 0x3d4   :  { %7766 = vmatmul.mubr.bf16.gmra.mxu1 %v17643_v63  ;;  %8132 = vmatprep.subr.bf16.mxu0 %v14061_v27  ;;  %v14065_v63 = vld [vmem:[%s20171_s7 + $0x6a0] ss:$8 sps:$4 sm:$0xff]  }
 0x3d5   :  { %7775 = vmatprep.mubr.bf16.mxu1 %v16908_v15  ;;  %v20371_v27 = vld [vmem:[#allocation19_spill] sm:$0xff] }
 0x3d6   :  { %7331 = vmatmul.mubr.bf16.gmra.mxu0 %v17632_v11 }
 0x3d7   :  { %7340 = vmatprep.mubr.bf16.mxu0 %v18072_v29  ;;  %8133 = vmatpush2.bf16.msra.mxu0 %v14059_v8  ;;  %v14110_v8 = vld [vmem:[%s20175_s11 + $0xa0] ss:$36 sps:$4 sm:$0xff]  }
 0x3d8   :  { %8134 = vmatprep.subr.bf16.mxu0 %v14067_v21 }
 0x3db   :  { %8135 = vmatpush2.bf16.msra.mxu0 %v14065_v63 }
 0x3dc   :  { %7776 = vmatmul.mubr.bf16.gmra.mxu1 %v16908_v15  ;;  %8136 = vmatprep.subr.bf16.mxu0 %v14073_v40  ;;  %v14118_v40 = vld [vmem:[%s20175_s11 + $0x5c] ss:$36 sps:$4 sm:$0xff]  }
 0x3dd   :  { %12575 = vmatprep.mubr.msk.bf16.mxu1 %vm9181_vm0, %v20365_v61 }
 0x3de   :  { %7341 = vmatmul.mubr.bf16.gmra.mxu0 %v18089_v0 }
 0x3df   :  { %8137 = vmatpush2.bf16.msra.mxu0 %v14071_v43  ;;  %8140 = vmatprep.mubr.bf16.mxu0 %v17485_v39  ;;  %v14083_v39 = vld [vmem:[%s20175_s11 + $0x200] ss:$36 sps:$4 sm:$0xff]  }
 0x3e0   :  { %8138 = vmatprep.subr.bf16.mxu0 %v14079_v13  ;;  %v14113_v13 = vld [vmem:[%s20175_s11 + $0x98] ss:$36 sps:$4 sm:$0xff]  }
 0x3e3   :  { %8139 = vmatpush2.bf16.msra.mxu0 %v14077_v47 }
 0x3e4   :  { %9239 = vmatmul.mubr.bf16.vlgmr.msra.gmra.mxu1 %v20366_v54  ;;  %9319 = vmatprep.subr.bf16.mxu0 %v14085_v5 }
 0x3e5   :  { %12576 = vmatprep.mubr.msk.bf16.mxu1 %vm9181_vm0, %v20367_v44  ;;  %9433 = vmatpush1.bf16.msra.mxu1 %v14080_v25 }
 0x3e6   :  { %8141 = vmatmul.mubr.bf16.vlgmr.msra.gmra.mxu0 %v17475_v45  ;;  %9434 = vmatprep.subr.bf16.mxu1 %v14088_v31  ;;  %v14092_v45 = vld [vmem:[%s20175_s11 + $0x178] ss:$36 sps:$4 sm:$0xff]  }
 0x3e7   :  { %8150 = vmatprep.mubr.bf16.mxu0 %v17520_v24  ;;  %9320 = vmatpush1.bf16.msra.mxu0 %v14083_v39  ;;  %v14100_v24 = vld [vmem:[%s20175_s11 + $0x134] ss:$36 sps:$4 sm:$0xff]  }
 0x3e8   :  { %9321 = vmatprep.subr.bf16.mxu0 %v14091_v20  ;;  %v14116_v31 = vld [vmem:[%s20175_s11 + $0x58] ss:$36 sps:$4 sm:$0xff]  }
 0x3e9   :  { %9435 = vmatpush1.bf16.msra.mxu1 %v14086_v53  ;;  %v14124_v53 = vld [vmem:[%s20175_s11 + $0x14] ss:$36 sps:$4 sm:$0xff]  }
 0x3ea   :  { %9436 = vmatprep.subr.bf16.mxu1 %v14094_v18 }
 0x3eb   :  { %9322 = vmatpush1.bf16.msra.mxu0 %v14089_v16  ;;  %v14119_v16 = vld [vmem:[%s20175_s11 + $0x50] ss:$36 sps:$4 sm:$0xff]  }
 0x3ec   :  { %v6009_v28 = vpop.f32.mrf.mxu1  ;;  %9249 = vmatmul.mubr.bf16.gmra.mxu1 %v20368_v30  ;;  %9323 = vmatprep.subr.bf16.mxu0 %v14097_v37 }
 0x3ed   :  { %12577 = vmatprep.mubr.msk.bf16.mxu1 %vm9181_vm0, %v20369_v3  ;;  %9437 = vmatpush1.bf16.msra.mxu1 %v14092_v45 }
 0x3ee   :  { %v5656_v50 = vpop.f32.mrf.mxu0  ;;  %v6011_v60 = vpop.f32.mrf.mxu1  ;;  %8151 = vmatmul.mubr.bf16.gmra.mxu0 %v17506_v4  ;;  %9438 = vmatprep.subr.bf16.mxu1 %v14100_v24  ;;  %v14109_v4 = vld [vmem:[%s20175_s11 + $0xe4] ss:$36 sps:$4 sm:$0xff]  }
 0x3ef   :  { %v18159_v32 = vadd.f32 %v6009_v28, %v5656_v50  ;;  %8160 = vmatprep.mubr.bf16.mxu0 %v17958_v48  ;;  %9324 = vmatpush1.bf16.msra.mxu0 %v14095_v23  ;;  %v20372_v24 = vld [vmem:[#allocation7_spill] sm:$0xff]  ;;  %v14127_v23 = vld [vmem:[%s20175_s11 + $0xc] ss:$36 sps:$4 sm:$0xff]  }
 0x3f0   :  { %v5658_v38 = vpop.f32.mrf.mxu0  ;;  %v6013_v42 = vpop.f32.mrf.mxu1  ;;  %9325 = vmatprep.subr.bf16.mxu0 %v14103_v7  ;;  %v20373_v7 = vld [vmem:[#allocation18_spill] sm:$0xff] }
 0x3f1   :  { %v18168_v22 = vadd.f32 %v6011_v60, %v5658_v38  ;;  %9439 = vmatpush1.bf16.msra.mxu1 %v14098_v1  ;;  %v14122_v1 = vld [vmem:[%s20175_s11 + $0x10] ss:$36 sps:$4 sm:$0xff]   ;;  %v14125_v38 = vld [vmem:[%s20175_s11 + $0x8] ss:$36 sps:$4 sm:$0xff]  }
 0x3f2   :  { %v5660_v48 = vpop.f32.mrf.mxu0  ;;  %v6015_v2 = vpop.f32.mrf.mxu1  ;;  %9440 = vmatprep.subr.bf16.mxu1 %v14106_v26  ;;  %v14130_v26 = vld [vmem:[%s20175_s11 + $0x32c] ss:$36 sps:$4 sm:$0xff]  }
 0x3f3   :  { %v18176_v17 = vadd.f32 %v6013_v42, %v5660_v48  ;;  %9326 = vmatpush1.bf16.msra.mxu0 %v14101_v12 }
 0x3f4   :  { %v5662_v19 = vpop.f32.mrf.mxu0  ;;  %v6019_v33 = vpop.f32.mrf.mxu1  ;;  %9259 = vmatmul.mubr.bf16.gmra.mxu1 %v20370_v35  ;;  %9327 = vmatprep.subr.bf16.mxu0 %v14109_v4 }
 0x3f5   :  { %v18185_v62 = vadd.f32 %v6015_v2, %v5662_v19  ;;  %12578 = vmatprep.mubr.msk.bf16.mxu1 %vm9181_vm0, %v20371_v27  ;;  %9441 = vmatpush1.bf16.msra.mxu1 %v14104_v34  ;;  %v14133_v34 = vld [vmem:[%s20175_s11 + $0x324] ss:$36 sps:$4 sm:$0xff]  }
 0x3f6   :  { %v5666_v21 = vpop.f32.mrf.mxu0  ;;  %v6021_v63 = vpop.f32.mrf.mxu1  ;;  %8161 = vmatmul.mubr.bf16.gmra.mxu0 %v17987_v9  ;;  %9442 = vmatprep.subr.bf16.mxu1 %v14112_v36  ;;  %v14121_v9 = vld [vmem:[%s20175_s11 + $0x54] ss:$36 sps:$4 sm:$0xff]   ;;  %v14128_v2 = vld [vmem:[%s20175_s11 + $0x328] ss:$36 sps:$4 sm:$0xff]  }
 0x3f7   :  { %v18196_v43 = vadd.f32 %v6019_v33, %v5666_v21  ;;  %8170 = vmatprep.mubr.bf16.mxu0 %v16908_v15  ;;  %9328 = vmatpush1.bf16.msra.mxu0 %v14107_v46  ;;  %v14136_v46 = vld [vmem:[%s20175_s11 + $0x2e4] ss:$36 sps:$4 sm:$0xff]  }
 0x3f8   :  { %v5668_v47 = vpop.f32.mrf.mxu0  ;;  %v6023_v5 = vpop.f32.mrf.mxu1  ;;  %9329 = vmatprep.subr.bf16.mxu0 %v14115_v10  ;;  %v14131_v33 = vld [vmem:[%s20175_s11 + $0x320] ss:$36 sps:$4 sm:$0xff]   ;;  %v20374_v21 = vld [vmem:[#allocation12_spill] sm:$0xff] }
 0x3f9   :  { %v18205_v25 = vadd.f32 %v6021_v63, %v5668_v47  ;;  %9443 = vmatpush1.bf16.msra.mxu1 %v14110_v8  ;;  %v14139_v63 = vld [vmem:[%s20175_s11 + $0x2dc] ss:$36 sps:$4 sm:$0xff]  }
 0x3fa   :  { %v5670_v39 = vpop.f32.mrf.mxu0  ;;  %v6025_v20 = vpop.f32.mrf.mxu1  ;;  %9444 = vmatprep.subr.bf16.mxu1 %v14118_v40  ;;  %v14134_v47 = vld [vmem:[%s20175_s11 + $0x2e0] ss:$36 sps:$4 sm:$0xff]  }
 0x3fb   :  { %v18213_v18 = vadd.f32 %v6023_v5, %v5670_v39  ;;  %9330 = vmatpush1.bf16.msra.mxu0 %v14113_v13  ;;  %v20375_v13 = vld [vmem:[#allocation20_spill] sm:$0xff] }
 0x3fc   :  { %v5672_v37 = vpop.f32.mrf.mxu0  ;;  %v6029_v45 = vpop.f32.mrf.mxu1  ;;  %9269 = vmatmul.mubr.bf16.gmra.mxu1 %v20372_v24  ;;  %9331 = vmatprep.subr.bf16.mxu0 %v14121_v9 }
 0x3fd   :  { %v18222_v28 = vadd.f32 %v6025_v20, %v5672_v37  ;;  %12579 = vmatprep.mubr.msk.bf16.mxu1 %vm9181_vm0, %v20373_v7  ;;  %9445 = vmatpush1.bf16.msra.mxu1 %v14116_v31  ;;  %v14142_v31 = vld [vmem:[%s20175_s11 + $0x29c] ss:$36 sps:$4 sm:$0xff]  }
 0x3fe   :  { %v5676_v50 = vpop.f32.mrf.mxu0  ;;  %v6031_v60 = vpop.f32.mrf.mxu1  ;;  %8171 = vmatmul.mubr.bf16.gmra.mxu0 %v16908_v15  ;;  %9446 = vmatprep.subr.bf16.mxu1 %v14124_v53  ;;  %v14137_v20 = vld [vmem:[%s20175_s11 + $0x2d8] ss:$36 sps:$4 sm:$0xff]  }
 0x3ff   :  { %v18233_v12 = vadd.f32 %v6029_v45, %v5676_v50  ;;  %8180 = vmatprep.mubr.bf16.mxu0 %v17616_v6  ;;  %9332 = vmatpush1.bf16.msra.mxu0 %v14119_v16  ;;  %v14140_v45 = vld [vmem:[%s20175_s11 + $0x298] ss:$36 sps:$4 sm:$0xff]  }
 0x400   :  { %v5678_v42 = vpop.f32.mrf.mxu0  ;;  %v6033_v4 = vpop.f32.mrf.mxu1  ;;  %9333 = vmatprep.subr.bf16.mxu0 %v14127_v23 }
 0x401   :  { %v18242_v48 = vadd.f32 %v6031_v60, %v5678_v42  ;;  %9447 = vmatpush1.bf16.msra.mxu1 %v14122_v1  ;;  %v14148_v1 = vld [vmem:[%s20175_s11 + $0x254] ss:$36 sps:$4 sm:$0xff]  }
 0x402   :  { %v5680_v6 = vpop.f32.mrf.mxu0  ;;  %v6035_v36 = vpop.f32.mrf.mxu1  ;;  %9456 = vmatprep.subr.bf16.mxu1 %v14130_v26  ;;  %v14143_v60 = vld [vmem:[%s20175_s11 + $0x290] ss:$36 sps:$4 sm:$0xff]  }
 0x403   :  { %v18250_v19 = vadd.f32 %v6033_v4, %v5680_v6  ;;  %9334 = vmatpush1.bf16.msra.mxu0 %v14125_v38  ;;  %v20376_v42 = vld [vmem:[#allocation13_spill] sm:$0xff] }
 0x404   :  { %v5682_v10 = vpop.f32.mrf.mxu0  ;;  %v6039_v8 = vpop.f32.mrf.mxu1  ;;  %9279 = vmatmul.mubr.bf16.gmra.mxu1 %v20374_v21  ;;  %9343 = vmatprep.subr.bf16.mxu0 %v14133_v34  ;;  %v14151_v4 = vld [vmem:[%s20175_s11 + $0x24c] ss:$36 sps:$4 sm:$0xff]  }
 0x405   :  { %v18259_v40 = vadd.f32 %v6035_v36, %v5682_v10  ;;  %12580 = vmatprep.mubr.msk.bf16.mxu1 %vm9181_vm0, %v20375_v13  ;;  %9457 = vmatpush2.bf16.msra.mxu1 %v14128_v2  ;;  %v20377_v2 = vld [vmem:[#allocation10_spill] sm:$0xff]  ;;  %v14146_v6 = vld [vmem:[%s20175_s11 + $0x250] ss:$36 sps:$4 sm:$0xff]   ;;  %v14149_v10 = vld [vmem:[%s20175_s11 + $0x248] ss:$36 sps:$4 sm:$0xff]  }
 0x406   :  { %v5686_v5 = vpop.f32.mrf.mxu0  ;;  %v6041_v9 = vpop.f32.mrf.mxu1  ;;  %8181 = vmatmul.mubr.bf16.gmra.mxu0 %v17609_v55  ;;  %9458 = vmatprep.subr.bf16.mxu1 %v14136_v46  ;;  %v14145_v55 = vld [vmem:[%s20175_s11 + $0x294] ss:$36 sps:$4 sm:$0xff]  }
 0x407   :  { %v18270_v39 = vadd.f32 %v6039_v8, %v5686_v5  ;;  %8190 = vmatprep.mubr.bf16.mxu0 %v17843_v57  ;;  %9344 = vmatpush2.bf16.msra.mxu0 %v14131_v33 }
 0x408   :  { %v5688_v53 = vpop.f32.mrf.mxu0  ;;  %v6043_v16 = vpop.f32.mrf.mxu1  ;;  %9345 = vmatprep.subr.bf16.mxu0 %v14139_v63 }
 0x409   :  { %v18279_v37 = vadd.f32 %v6041_v9, %v5688_v53  ;;  %9459 = vmatpush2.bf16.msra.mxu1 %v14134_v47  ;;  %v14155_v47 = vld [vmem:[%s20175_s11 + $0x214] ss:$36 sps:$4 sm:$0xff]   ;;  %v20378_v53 = vld [vmem:[#allocation8_spill] sm:$0xff] }
 0x40a   :  { %v5690_v57 = vpop.f32.mrf.mxu0  ;;  %v6045_v23 = vpop.f32.mrf.mxu1  ;;  %9460 = vmatprep.subr.bf16.mxu1 %v14142_v31 }
 0x40b   :  { %v18287_v50 = vadd.f32 %v6043_v16, %v5690_v57  ;;  %9346 = vmatpush2.bf16.msra.mxu0 %v14137_v20 }
 0x40c   :  { %v5692_v26 = vpop.f32.mrf.mxu0  ;;  %v6049_v38 = vpop.f32.mrf.mxu1  ;;  %9289 = vmatmul.mubr.bf16.gmra.mxu1 %v20376_v42  ;;  %9347 = vmatprep.subr.bf16.mxu0 %v14145_v55  ;;  %v20379_v55 = vld [vmem:[#allocation25_spill] sm:$0xff] }
 0x40d   :  { %v18296_v34 = vadd.f32 %v6045_v23, %v5692_v26  ;;  %12581 = vmatprep.mubr.msk.bf16.mxu1 %vm9181_vm0, %v20377_v2  ;;  %9461 = vmatpush2.bf16.msra.mxu1 %v14140_v45 }
 0x40e   :  { %v5696_v36 = vpop.f32.mrf.mxu0  ;;  %v6051_v46 = vpop.f32.mrf.mxu1  ;;  %8191 = vmatmul.mubr.bf16.gmra.mxu0 %v17632_v11  ;;  %9462 = vmatprep.subr.bf16.mxu1 %v14148_v1 }
 0x40f   :  { %v18304_v33 = vadd.f32 %v6049_v38, %v5696_v36  ;;  %8200 = vmatprep.mubr.bf16.mxu0 %v18072_v29  ;;  %9348 = vmatpush2.bf16.msra.mxu0 %v14143_v60 }
 0x410   :  { %v5698_v8 = vpop.f32.mrf.mxu0  ;;  %v6053_v63 = vpop.f32.mrf.mxu1  ;;  %9349 = vmatprep.subr.bf16.mxu0 %v14151_v4 }
 0x411   :  { %v18313_v5 = vadd.f32 %v6051_v46, %v5698_v8  ;;  %9463 = vmatpush2.bf16.msra.mxu1 %v14146_v6 }
 0x412   :  { %v5700_v11 = vpop.f32.mrf.mxu0  ;;  %v6055_v9 = vpop.f32.mrf.mxu1  ;;  %9658 = vmatprep.subr.bf16.mxu1 %v20229_v52 }
 0x413   :  { %v18316_v29 = vadd.f32 %v6053_v63, %v5700_v11  ;;  %9350 = vmatpush2.bf16.msra.mxu0 %v14149_v10  ;;  %v20380_v10 = vld [vmem:[#allocation17_spill] sm:$0xff] }
 0x414   :  { %v5702_v31 = vpop.f32.mrf.mxu0  ;;  %v6059_v20 = vpop.f32.mrf.mxu1  ;;  %9299 = vmatmul.mubr.bf16.gmra.mxu1 %v20378_v53  ;;  %9545 = vmatprep.subr.bf16.mxu0 %v14155_v47 }
 0x415   :  { %v18319_v16 = vadd.f32 %v6055_v9, %v5702_v31  ;;  %12582 = vmatprep.mubr.msk.bf16.mxu1 %vm9181_vm0, %v20379_v55 }
 0x416   :  { %v5706_v45 = vpop.f32.mrf.mxu0  ;;  %v6061_v57 = vpop.f32.mrf.mxu1  ;;  %8201 = vmatmul.mubr.bf16.gmra.mxu0 %v18089_v0 }
 0x417   :  { %v18324_v23 = vadd.f32 %v6059_v20, %v5706_v45  ;;  %8210 = vmatprep.mubr.bf16.mxu0 %v16908_v15  ;;  %v14152_v20 = vld [vmem:[%s20175_s11 + $0x218] ss:$36 sps:$4 sm:$0xff]  }
 0x418   :  { %v5708_v1 = vpop.f32.mrf.mxu0  ;;  %v6063_v60 = vpop.f32.mrf.mxu1 }
 0x419   :  { %v18327_v26 = vadd.f32 %v6061_v57, %v5708_v1 }
 0x41a   :  { %v5710_v38 = vpop.f32.mrf.mxu0  ;;  %v6065_v4 = vpop.f32.mrf.mxu1 }
 0x41b   :  { %v18329_v6 = vadd.f32 %v6063_v60, %v5710_v38 }
 0x41c   :  { %v5712_v36 = vpop.f32.mrf.mxu0  ;;  %v6069_v46 = vpop.f32.mrf.mxu1  ;;  %9309 = vmatmul.mubr.bf16.gmra.mxu1 %v20380_v10 }
 0x41d   :  { %v18332_v8 = vadd.f32 %v6065_v4, %v5712_v36  ;;  %12591 = vmatprep.mubr.msk.bf16.mxu1 %vm9181_vm0, %v20365_v61  ;;  %v14159_v4 = vld [vmem:[%s20175_s11 + $0x1cc] ss:$36 sps:$4 sm:$0xff]  }
 0x41e   :  { %v5716_v0 = vpop.f32.mrf.mxu0  ;;  %v6071_v63 = vpop.f32.mrf.mxu1  ;;  %8211 = vmatmul.mubr.bf16.gmra.mxu0 %v16908_v15  ;;  %v14153_v15 = vld [vmem:[%s20175_s11 + $0x210] ss:$36 sps:$4 sm:$0xff]  }
 0x41f   :  { %v18337_v47 = vadd.f32 %v6069_v46, %v5716_v0  ;;  %12583 = vmatprep.mubr.msk.bf16.mxu0 %vm9181_vm0, %v20365_v61  ;;  %v14156_v46 = vld [vmem:[%s20175_s11 + $0x1d0] ss:$36 sps:$4 sm:$0xff]  }
 0x420   :  { %v5718_v11 = vpop.f32.mrf.mxu0  ;;  %v6073_v9 = vpop.f32.mrf.mxu1 }
 0x421   :  { %v18341_v31 = vadd.f32 %v6071_v63, %v5718_v11 }
 0x422   :  { %v5720_v45 = vpop.f32.mrf.mxu0  ;;  %v6075_v57 = vpop.f32.mrf.mxu1 }
 0x423   :  { %v18346_v1 = vadd.f32 %v6073_v9, %v5720_v45  ;;  %v14157_v9 = vld [vmem:[%s20175_s11 + $0x1c8] ss:$36 sps:$4 sm:$0xff]  }
 0x424   :  { %v5722_v60 = vpop.f32.mrf.mxu0  ;;  %v6837_v38 = vpop.f32.mrf.mxu1  ;;  %9465 = vmatmul.mubr.bf16.vlgmr.msra.gmra.mxu1 %v20366_v54 }
 0x425   :  { %v18355_v36 = vadd.f32 %v6075_v57, %v5722_v60  ;;  %12592 = vmatprep.mubr.msk.bf16.mxu1 %vm9181_vm0, %v20367_v44  ;;  %9659 = vmatpush1.bf16.msra.mxu1 %v14152_v20  ;;  %v14163_v57 = vld [vmem:[%s20175_s11 + $0x184] ss:$36 sps:$4 sm:$0xff]  }
 0x426   :  { %v6402_v0 = vpop.f32.mrf.mxu0  ;;  %v6839_v63 = vpop.f32.mrf.mxu1  ;;  %9352 = vmatmul.mubr.bf16.vlgmr.msra.gmra.mxu0 %v20366_v54  ;;  %9660 = vmatprep.subr.bf16.mxu1 %v20229_v52 }
 0x427   :  { %v6481_v11 = vadd.f32 %v6402_v0, %v17668_v49  ;;  %12584 = vmatprep.mubr.msk.bf16.mxu0 %vm9181_vm0, %v20367_v44  ;;  %9546 = vmatpush1.bf16.msra.mxu0 %v14153_v15  ;;  %v14160_v49 = vld [vmem:[%s20175_s11 + $0x188] ss:$36 sps:$4 sm:$0xff]  }
 0x428   :  { %v6404_v20 = vpop.f32.mrf.mxu0  ;;  %v6841_v45 = vpop.f32.mrf.mxu1  ;;  %9547 = vmatprep.subr.bf16.mxu0 %v14159_v4  ;;  %v6006_v4 = vadd.f32 %v18136_v41, %v18144_v14 }
 0x429   :  { %v6482_v60 = vadd.f32 %v6404_v20, %v17678_v51  ;;  %9661 = vmatpush1.bf16.msra.mxu1 %v14156_v46  ;;  %v18377_v0 = vadd.f32 %v6837_v38, %v6481_v11  ;;  %v14161_v51 = vld [vmem:[%s20175_s11 + $0x180] ss:$36 sps:$4 sm:$0xff]  }
 0x42a   :  { %v6406_v15 = vpop.f32.mrf.mxu0  ;;  %v6843_v58 = vpop.f32.mrf.mxu1  ;;  %9662 = vmatprep.subr.bf16.mxu1 %v20229_v52  ;;  %v14167_v38 = vld [vmem:[%s20175_s11 + $0x13c] ss:$36 sps:$4 sm:$0xff]  }
 0x42b   :  { %v6483_v56 = vadd.f32 %v6406_v15, %v17686_v59  ;;  %9548 = vmatpush1.bf16.msra.mxu0 %v14157_v9  ;;  %v18386_v46 = vadd.f32 %v6839_v63, %v6482_v60  ;;  %v14164_v59 = vld [vmem:[%s20175_s11 + $0x140] ss:$36 sps:$4 sm:$0xff]  }
 0x42c   :  { %v6408_v20 = vpop.f32.mrf.mxu0  ;;  %v6847_v44 = vpop.f32.mrf.mxu1  ;;  %9475 = vmatmul.mubr.bf16.gmra.mxu1 %v20368_v30  ;;  %9549 = vmatprep.subr.bf16.mxu0 %v14163_v57  ;;  %v14165_v57 = vld [vmem:[%s20175_s11 + $0x138] ss:$36 sps:$4 sm:$0xff]  }
 0x42d   :  { %v6484_v11 = vadd.f32 %v6408_v20, %v6006_v4  ;;  %12593 = vmatprep.mubr.msk.bf16.mxu1 %vm9181_vm0, %v20369_v3  ;;  %9663 = vmatpush1.bf16.msra.mxu1 %v14160_v49  ;;  %v18397_v41 = vadd.f32 %v6841_v45, %v6483_v56  ;;  %v14171_v49 = vld [vmem:[%s20175_s11 + $0xf4] ss:$36 sps:$4 sm:$0xff]  }
 0x42e   :  { %v6412_v14 = vpop.f32.mrf.mxu0  ;;  %v6849_v63 = vpop.f32.mrf.mxu1  ;;  %9362 = vmatmul.mubr.bf16.gmra.mxu0 %v20368_v30  ;;  %9664 = vmatprep.subr.bf16.mxu1 %v20229_v52 }
 0x42f   :  { %v6485_v9 = vadd.f32 %v6412_v14, %v18159_v32  ;;  %12585 = vmatprep.mubr.msk.bf16.mxu0 %vm9181_vm0, %v20369_v3  ;;  %9550 = vmatpush1.bf16.msra.mxu0 %v14161_v51  ;;  %v18407_v60 = vadd.f32 %v6843_v58, %v6484_v11  ;;  %v14168_v32 = vld [vmem:[%s20175_s11 + $0xf8] ss:$36 sps:$4 sm:$0xff]  }
 0x430   :  { %v6414_v56 = vpop.f32.mrf.mxu0  ;;  %v6851_v45 = vpop.f32.mrf.mxu1  ;;  %9551 = vmatprep.subr.bf16.mxu0 %v14167_v38  ;;  %v14169_v38 = vld [vmem:[%s20175_s11 + $0xf0] ss:$36 sps:$4 sm:$0xff]  }
 0x431   :  { %v6486_v15 = vadd.f32 %v6414_v56, %v18168_v22  ;;  %9665 = vmatpush1.bf16.msra.mxu1 %v14164_v59  ;;  %v18416_v4 = vadd.f32 %v6847_v44, %v6485_v9  ;;  %v14175_v44 = vld [vmem:[%s20175_s11 + $0xac] ss:$36 sps:$4 sm:$0xff]  }
 0x432   :  { %v6416_v51 = vpop.f32.mrf.mxu0  ;;  %v6853_v20 = vpop.f32.mrf.mxu1  ;;  %9666 = vmatprep.subr.bf16.mxu1 %v20229_v52 }
 0x433   :  { %v6487_v58 = vadd.f32 %v6416_v51, %v18176_v17  ;;  %9552 = vmatpush1.bf16.msra.mxu0 %v14165_v57  ;;  %v18423_v11 = vadd.f32 %v6849_v63, %v6486_v15  ;;  %v14172_v17 = vld [vmem:[%s20175_s11 + $0xb0] ss:$36 sps:$4 sm:$0xff]  }
 0x434   :  { %v6418_v22 = vpop.f32.mrf.mxu0  ;;  %v6857_v59 = vpop.f32.mrf.mxu1  ;;  %9485 = vmatmul.mubr.bf16.gmra.mxu1 %v20370_v35  ;;  %9553 = vmatprep.subr.bf16.mxu0 %v14171_v49 }
 0x435   :  { %v6488_v14 = vadd.f32 %v6418_v22, %v18185_v62  ;;  %12594 = vmatprep.mubr.msk.bf16.mxu1 %vm9181_vm0, %v20371_v27  ;;  %9667 = vmatpush1.bf16.msra.mxu1 %v14168_v32  ;;  %v18435_v63 = vadd.f32 %v6851_v45, %v6487_v58  ;;  %v14173_v62 = vld [vmem:[%s20175_s11 + $0xa8] ss:$36 sps:$4 sm:$0xff]  }
 0x436   :  { %v6422_v9 = vpop.f32.mrf.mxu0  ;;  %v6859_v57 = vpop.f32.mrf.mxu1  ;;  %9372 = vmatmul.mubr.bf16.gmra.mxu0 %v20370_v35  ;;  %9668 = vmatprep.subr.bf16.mxu1 %v20229_v52  ;;  %v14179_v32 = vld [vmem:[%s20175_s11 + $0x64] ss:$36 sps:$4 sm:$0xff]  }
 0x437   :  { %v6489_v56 = vadd.f32 %v6422_v9, %v18196_v43  ;;  %12586 = vmatprep.mubr.msk.bf16.mxu0 %vm9181_vm0, %v20371_v27  ;;  %9554 = vmatpush1.bf16.msra.mxu0 %v14169_v38  ;;  %v18445_v49 = vadd.f32 %v6853_v20, %v6488_v14  ;;  %v14176_v43 = vld [vmem:[%s20175_s11 + $0x68] ss:$36 sps:$4 sm:$0xff]  }
 0x438   :  { %v6424_v45 = vpop.f32.mrf.mxu0  ;;  %v6861_v15 = vpop.f32.mrf.mxu1  ;;  %9555 = vmatprep.subr.bf16.mxu0 %v14175_v44  ;;  %v14177_v44 = vld [vmem:[%s20175_s11 + $0x60] ss:$36 sps:$4 sm:$0xff]  }
 0x439   :  { %v6490_v51 = vadd.f32 %v6424_v45, %v18205_v25  ;;  %9669 = vmatpush1.bf16.msra.mxu1 %v14172_v17  ;;  %v18454_v58 = vadd.f32 %v6857_v59, %v6489_v56  ;;  %v14183_v59 = vld [vmem:[%s20175_s11 + $0x1c] ss:$36 sps:$4 sm:$0xff]  }
 0x43a   :  { %v6426_v38 = vpop.f32.mrf.mxu0  ;;  %v6863_v22 = vpop.f32.mrf.mxu1  ;;  %9670 = vmatprep.subr.bf16.mxu1 %v20229_v52 }
 0x43b   :  { %v6491_v20 = vadd.f32 %v6426_v38, %v18213_v18  ;;  %9556 = vmatpush1.bf16.msra.mxu0 %v14173_v62  ;;  %v18461_v14 = vadd.f32 %v6859_v57, %v6490_v51  ;;  %v14180_v18 = vld [vmem:[%s20175_s11 + $0x20] ss:$36 sps:$4 sm:$0xff]  }
 0x43c   :  { %v6428_v25 = vpop.f32.mrf.mxu0  ;;  %v6867_v17 = vpop.f32.mrf.mxu1  ;;  %9495 = vmatmul.mubr.bf16.gmra.mxu1 %v20372_v24  ;;  %9557 = vmatprep.subr.bf16.mxu0 %v14179_v32 }
 0x43d   :  { %v6492_v9 = vadd.f32 %v6428_v25, %v18222_v28  ;;  %12595 = vmatprep.mubr.msk.bf16.mxu1 %vm9181_vm0, %v20373_v7  ;;  %9671 = vmatpush1.bf16.msra.mxu1 %v14176_v43  ;;  %v18473_v57 = vadd.f32 %v6861_v15, %v6491_v20  ;;  %v14181_v28 = vld [vmem:[%s20175_s11 + $0x18] ss:$36 sps:$4 sm:$0xff]  }
 0x43e   :  { %v6432_v56 = vpop.f32.mrf.mxu0  ;;  %v6869_v62 = vpop.f32.mrf.mxu1  ;;  %9382 = vmatmul.mubr.bf16.gmra.mxu0 %v20372_v24  ;;  %9672 = vmatprep.subr.bf16.mxu1 %v20229_v52  ;;  %v14187_v43 = vld [vmem:[%s20175_s11 + $0x334] ss:$36 sps:$4 sm:$0xff]  }
 0x43f   :  { %v6493_v45 = vadd.f32 %v6432_v56, %v18233_v12  ;;  %12587 = vmatprep.mubr.msk.bf16.mxu0 %vm9181_vm0, %v20373_v7  ;;  %9558 = vmatpush1.bf16.msra.mxu0 %v14177_v44  ;;  %v18483_v32 = vadd.f32 %v6863_v22, %v6492_v9  ;;  %v14184_v12 = vld [vmem:[%s20175_s11 + $0x338] ss:$36 sps:$4 sm:$0xff]  }
 0x440   :  { %v6434_v15 = vpop.f32.mrf.mxu0  ;;  %v6871_v51 = vpop.f32.mrf.mxu1  ;;  %9559 = vmatprep.subr.bf16.mxu0 %v14183_v59  ;;  %v14185_v59 = vld [vmem:[%s20175_s11 + $0x330] ss:$36 sps:$4 sm:$0xff]  }
 0x441   :  { %v6494_v38 = vadd.f32 %v6434_v15, %v18242_v48  ;;  %9673 = vmatpush1.bf16.msra.mxu1 %v14180_v18  ;;  %v18492_v20 = vadd.f32 %v6867_v17, %v6493_v45  ;;  %v14191_v17 = vld [vmem:[%s20175_s11 + $0x2ec] ss:$36 sps:$4 sm:$0xff]  }
 0x442   :  { %v6436_v44 = vpop.f32.mrf.mxu0  ;;  %v6873_v25 = vpop.f32.mrf.mxu1  ;;  %9682 = vmatprep.subr.bf16.mxu1 %v20229_v52 }
 0x443   :  { %v6495_v22 = vadd.f32 %v6436_v44, %v18250_v19  ;;  %9560 = vmatpush1.bf16.msra.mxu0 %v14181_v28  ;;  %v18499_v9 = vadd.f32 %v6869_v62, %v6494_v38  ;;  %v14188_v19 = vld [vmem:[%s20175_s11 + $0x2f0] ss:$36 sps:$4 sm:$0xff]  }
 0x444   :  { %v6438_v48 = vpop.f32.mrf.mxu0  ;;  %v6877_v18 = vpop.f32.mrf.mxu1  ;;  %9505 = vmatmul.mubr.bf16.gmra.mxu1 %v20374_v21  ;;  %9569 = vmatprep.subr.bf16.mxu0 %v14187_v43 }
 0x445   :  { %v6496_v56 = vadd.f32 %v6438_v48, %v18259_v40  ;;  %12596 = vmatprep.mubr.msk.bf16.mxu1 %vm9181_vm0, %v20375_v13  ;;  %9683 = vmatpush2.bf16.msra.mxu1 %v14184_v12  ;;  %v18511_v62 = vadd.f32 %v6871_v51, %v6495_v22  ;;  %v14189_v40 = vld [vmem:[%s20175_s11 + $0x2e8] ss:$36 sps:$4 sm:$0xff]  }
 0x446   :  { %v6442_v45 = vpop.f32.mrf.mxu0  ;;  %v6879_v28 = vpop.f32.mrf.mxu1  ;;  %9392 = vmatmul.mubr.bf16.gmra.mxu0 %v20374_v21  ;;  %9684 = vmatprep.subr.bf16.mxu1 %v20229_v52  ;;  %v14195_v12 = vld [vmem:[%s20175_s11 + $0x2a4] ss:$36 sps:$4 sm:$0xff]  }
 0x447   :  { %v6497_v15 = vadd.f32 %v6442_v45, %v18270_v39  ;;  %12588 = vmatprep.mubr.msk.bf16.mxu0 %vm9181_vm0, %v20375_v13  ;;  %9570 = vmatpush2.bf16.msra.mxu0 %v14185_v59  ;;  %v18521_v43 = vadd.f32 %v6873_v25, %v6496_v56  ;;  %v14192_v39 = vld [vmem:[%s20175_s11 + $0x2a8] ss:$36 sps:$4 sm:$0xff]  }
 0x448   :  { %v6444_v51 = vpop.f32.mrf.mxu0  ;;  %v6881_v38 = vpop.f32.mrf.mxu1  ;;  %9571 = vmatprep.subr.bf16.mxu0 %v14191_v17  ;;  %v14193_v17 = vld [vmem:[%s20175_s11 + $0x2a0] ss:$36 sps:$4 sm:$0xff]  }
 0x449   :  { %v6498_v44 = vadd.f32 %v6444_v51, %v18279_v37  ;;  %9685 = vmatpush2.bf16.msra.mxu1 %v14188_v19  ;;  %v18530_v22 = vadd.f32 %v6877_v18, %v6497_v15  ;;  %v14199_v18 = vld [vmem:[%s20175_s11 + $0x25c] ss:$36 sps:$4 sm:$0xff]  }
 0x44a   :  { %v6446_v59 = vpop.f32.mrf.mxu0  ;;  %v6883_v48 = vpop.f32.mrf.mxu1  ;;  %9686 = vmatprep.subr.bf16.mxu1 %v20229_v52 }
 0x44b   :  { %v6499_v25 = vadd.f32 %v6446_v59, %v18287_v50  ;;  %9572 = vmatpush2.bf16.msra.mxu0 %v14189_v40  ;;  %v18537_v56 = vadd.f32 %v6879_v28, %v6498_v44  ;;  %v14196_v50 = vld [vmem:[%s20175_s11 + $0x260] ss:$36 sps:$4 sm:$0xff]  }
 0x44c   :  { %v6448_v37 = vpop.f32.mrf.mxu0  ;;  %v6887_v19 = vpop.f32.mrf.mxu1  ;;  %9515 = vmatmul.mubr.bf16.gmra.mxu1 %v20376_v42  ;;  %9573 = vmatprep.subr.bf16.mxu0 %v14195_v12  ;;  %v14202_v59 = vld [vmem:[%s20174_s10 + $0x1fc] ss:$36 sps:$4 sm:$0xff]  }
 0x44d   :  { %v6500_v45 = vadd.f32 %v6448_v37, %v18296_v34  ;;  %12597 = vmatprep.mubr.msk.bf16.mxu1 %vm9181_vm0, %v20377_v2  ;;  %9687 = vmatpush2.bf16.msra.mxu1 %v14192_v39  ;;  %v18549_v28 = vadd.f32 %v6881_v38, %v6499_v25  ;;  %v14214_v34 = vld [vmem:[%s20174_s10 + $0x204] ss:$36 sps:$4 sm:$0xff]   ;;  %v14197_v38 = vld [vmem:[%s20175_s11 + $0x258] ss:$36 sps:$4 sm:$0xff]  }
 0x44e   :  { %v6452_v15 = vpop.f32.mrf.mxu0  ;;  %v6889_v40 = vpop.f32.mrf.mxu1  ;;  %9402 = vmatmul.mubr.bf16.gmra.mxu0 %v20376_v42  ;;  %9688 = vmatprep.subr.bf16.mxu1 %v20229_v52 }
 0x44f   :  { %v6501_v51 = vadd.f32 %v6452_v15, %v18304_v33  ;;  %12589 = vmatprep.mubr.msk.bf16.mxu0 %vm9181_vm0, %v20377_v2  ;;  %9574 = vmatpush2.bf16.msra.mxu0 %v14193_v17  ;;  %v18562_v12 = vadd.f32 %v6883_v48, %v6500_v45 }
 0x450   :  { %v6454_v44 = vpop.f32.mrf.mxu0  ;;  %v6891_v39 = vpop.f32.mrf.mxu1  ;;  %9575 = vmatprep.subr.bf16.mxu0 %v14199_v18 }
 0x451   :  { %v6502_v25 = vadd.f32 %v6454_v44, %v18313_v5  ;;  %9689 = vmatpush2.bf16.msra.mxu1 %v14196_v50  ;;  %v18568_v33 = vadd.f32 %v6887_v19, %v6501_v51 }
 0x452   :  { %v6456_v37 = vpop.f32.mrf.mxu0  ;;  %v6893_v17 = vpop.f32.mrf.mxu1  ;;  %10444 = vmatprep.subr.bf16.mxu1 %v14214_v34 }
 0x453   :  { %v6503_v15 = vadd.f32 %v6456_v37, %v18316_v29  ;;  %9576 = vmatpush2.bf16.msra.mxu0 %v14197_v38  ;;  %v18571_v48 = vadd.f32 %v6889_v40, %v6502_v25 }
 0x454   :  { %v6458_v45 = vpop.f32.mrf.mxu0  ;;  %v6897_v52 = vpop.f32.mrf.mxu1  ;;  %9525 = vmatmul.mubr.bf16.gmra.mxu1 %v20378_v53  ;;  %10331 = vmatprep.subr.bf16.mxu0 %v14202_v59 }
 0x455   :  { %v6504_v18 = vadd.f32 %v6458_v45, %v18319_v16  ;;  %12598 = vmatprep.mubr.msk.bf16.mxu1 %vm9181_vm0, %v20379_v55  ;;  %v18577_v5 = vadd.f32 %v6891_v39, %v6503_v15 }
 0x456   :  { %v6462_v19 = vpop.f32.mrf.mxu0  ;;  %v6899_v50 = vpop.f32.mrf.mxu1  ;;  %9412 = vmatmul.mubr.bf16.gmra.mxu0 %v20378_v53 }
 0x457   :  { %v6505_v29 = vadd.f32 %v6462_v19, %v18324_v23  ;;  %12590 = vmatprep.mubr.msk.bf16.mxu0 %vm9181_vm0, %v20379_v55  ;;  %v18583_v40 = vadd.f32 %v6893_v17, %v6504_v18 }
 0x458   :  { %v6464_v34 = vpop.f32.mrf.mxu0  ;;  %v6901_v51 = vpop.f32.mrf.mxu1 }
 0x459   :  { %v6506_v16 = vadd.f32 %v6464_v34, %v18327_v26  ;;  %v18586_v38 = vadd.f32 %v6897_v52, %v6505_v29 }
 0x45a   :  { %v6466_v44 = vpop.f32.mrf.mxu0  ;;  %v6903_v39 = vpop.f32.mrf.mxu1 }
 0x45b   :  { %v6507_v59 = vadd.f32 %v6466_v44, %v18329_v6  ;;  %v18589_v25 = vadd.f32 %v6899_v50, %v6506_v16  ;;  %v14212_v50 = vld [vmem:[%s20174_s10 + $0x200] ss:$36 sps:$4 sm:$0xff]   ;;  %v14200_v16 = vld [vmem:[%s20174_s10 + $0x1f8] ss:$36 sps:$4 sm:$0xff]  }
 0x45c   :  { %v6468_v37 = vpop.f32.mrf.mxu0  ;;  %v6907_v15 = vpop.f32.mrf.mxu1  ;;  %9535 = vmatmul.mubr.bf16.gmra.mxu1 %v20380_v10 }
 0x45d   :  { %v6508_v23 = vadd.f32 %v6468_v37, %v18332_v8  ;;  %12607 = vmatprep.mubr.msk.bf16.mxu1 %vm9181_vm0, %v20365_v61  ;;  %v18595_v17 = vadd.f32 %v6901_v51, %v6507_v59  ;;  %v14205_v59 = vld [vmem:[%s20174_s10 + $0x1b4] ss:$36 sps:$4 sm:$0xff]  }
 0x45e   :  { %v6472_v26 = vpop.f32.mrf.mxu0  ;;  %v6909_v52 = vpop.f32.mrf.mxu1  ;;  %9422 = vmatmul.mubr.bf16.gmra.mxu0 %v20380_v10 }
 0x45f   :  { %v6509_v45 = vadd.f32 %v6472_v26, %v18337_v47  ;;  %12599 = vmatprep.mubr.msk.bf16.mxu0 %vm9181_vm0, %v20365_v61  ;;  %v18601_v6 = vadd.f32 %v6903_v39, %v6508_v23  ;;  %v14217_v47 = vld [vmem:[%s20174_s10 + $0x1bc] ss:$36 sps:$4 sm:$0xff]  }
 0x460   :  { %v6474_v18 = vpop.f32.mrf.mxu0  ;;  %v6911_v19 = vpop.f32.mrf.mxu1 }
 0x461   :  { %v6510_v8 = vadd.f32 %v6474_v18, %v18341_v31  ;;  %v18607_v29 = vadd.f32 %v6907_v15, %v6509_v45  ;;  %v20381_v15 = vld [vmem:[#allocation15_spill] sm:$0xff]  ;;  %v14223_v45 = vld [vmem:[%s20174_s10 + $0x174] ss:$36 sps:$4 sm:$0xff]  }
 0x462   :  { %v6476_v34 = vpop.f32.mrf.mxu0  ;;  %v6913_v51 = vpop.f32.mrf.mxu1  ;;  %v14203_v18 = vld [vmem:[%s20174_s10 + $0x1b0] ss:$36 sps:$4 sm:$0xff]  }
 0x463   :  { %v6511_v61 = vadd.f32 %v6476_v34, %v18346_v1  ;;  %v18616_v44 = vadd.f32 %v6909_v52, %v6510_v8  ;;  %v14215_v1 = vld [vmem:[%s20174_s10 + $0x1b8] ss:$36 sps:$4 sm:$0xff]  }
 0x464   :  { %v6478_v31 = vpop.f32.mrf.mxu0  ;;  %v7707_v39 = vpop.f32.mrf.mxu1  ;;  %9691 = vmatmul.mubr.bf16.vlgmr.msra.gmra.mxu1 %v20366_v54 }
 0x465   :  { %v6512_v37 = vadd.f32 %v6478_v31, %v18355_v36  ;;  %12608 = vmatprep.mubr.msk.bf16.mxu1 %vm9181_vm0, %v20381_v15  ;;  %10445 = vmatpush1.bf16.msra.mxu1 %v14212_v50  ;;  %v18628_v23 = vadd.f32 %v6911_v19, %v6511_v61 }
 0x466   :  { %v7272_v26 = vpop.f32.mrf.mxu0  ;;  %v7709_v52 = vpop.f32.mrf.mxu1  ;;  %9578 = vmatmul.mubr.bf16.vlgmr.msra.gmra.mxu0 %v20366_v54  ;;  %10446 = vmatprep.subr.bf16.mxu1 %v14217_v47  ;;  %v14208_v54 = vld [vmem:[%s20174_s10 + $0x16c] ss:$36 sps:$4 sm:$0xff]  }
 0x467   :  { %v7351_v36 = vadd.f32 %v7272_v26, %v18377_v0  ;;  %12600 = vmatprep.mubr.msk.bf16.mxu0 %vm9181_vm0, %v20381_v15  ;;  %10332 = vmatpush1.bf16.msra.mxu0 %v14200_v16  ;;  %v18640_v19 = vadd.f32 %v6913_v51, %v6512_v37  ;;  %v14221_v0 = vld [vmem:[%s20174_s10 + $0x170] ss:$36 sps:$4 sm:$0xff]  }
 0x468   :  { %v7274_v8 = vpop.f32.mrf.mxu0  ;;  %v7711_v50 = vpop.f32.mrf.mxu1  ;;  %10333 = vmatprep.subr.bf16.mxu0 %v14205_v59  ;;  %v14229_v51 = vld [vmem:[%s20174_s10 + $0x12c] ss:$36 sps:$4 sm:$0xff]  }
 0x469   :  { %v7352_v34 = vadd.f32 %v7274_v8, %v18386_v46  ;;  %10447 = vmatpush1.bf16.msra.mxu1 %v14215_v1  ;;  %v18649_v47 = vadd.f32 %v7707_v39, %v7351_v36  ;;  %v14206_v46 = vld [vmem:[%s20174_s10 + $0x168] ss:$36 sps:$4 sm:$0xff]  }
 0x46a   :  { %v7276_v61 = vpop.f32.mrf.mxu0  ;;  %v7713_v16 = vpop.f32.mrf.mxu1  ;;  %10448 = vmatprep.subr.bf16.mxu1 %v14223_v45  ;;  %v14211_v39 = vld [vmem:[%s20174_s10 + $0x124] ss:$36 sps:$4 sm:$0xff]  }
 0x46b   :  { %v7353_v31 = vadd.f32 %v7276_v61, %v18397_v41  ;;  %10334 = vmatpush1.bf16.msra.mxu0 %v14203_v18  ;;  %v18658_v59 = vadd.f32 %v7709_v52, %v7352_v34  ;;  %v14227_v41 = vld [vmem:[%s20174_s10 + $0x128] ss:$36 sps:$4 sm:$0xff]   ;;  %v14209_v18 = vld [vmem:[%s20174_s10 + $0x120] ss:$36 sps:$4 sm:$0xff]  }
 0x46c   :  { %v7278_v37 = vpop.f32.mrf.mxu0  ;;  %v7717_v15 = vpop.f32.mrf.mxu1  ;;  %9699 = vmatmul.mubr.bf16.gmra.mxu1 %v20368_v30  ;;  %10335 = vmatprep.subr.bf16.mxu0 %v14208_v54  ;;  %v14235_v36 = vld [vmem:[%s20174_s10 + $0xe4] ss:$36 sps:$4 sm:$0xff]  }
 0x46d   :  { %v7354_v1 = vadd.f32 %v7278_v37, %v18407_v60  ;;  %12609 = vmatprep.mubr.msk.bf16.mxu1 %vm9181_vm0, %v20369_v3  ;;  %10449 = vmatpush1.bf16.msra.mxu1 %v14221_v0  ;;  %v18670_v26 = vadd.f32 %v7711_v50, %v7353_v31 }
 0x46e   :  { %v7282_v52 = vpop.f32.mrf.mxu0  ;;  %v7719_v45 = vpop.f32.mrf.mxu1  ;;  %9588 = vmatmul.mubr.bf16.gmra.mxu0 %v20368_v30  ;;  %10450 = vmatprep.subr.bf16.mxu1 %v14229_v51  ;;  %v14220_v30 = vld [vmem:[%s20174_s10 + $0xdc] ss:$36 sps:$4 sm:$0xff]  }
 0x46f   :  { %v7355_v60 = vadd.f32 %v7282_v52, %v18416_v4  ;;  %12601 = vmatprep.mubr.msk.bf16.mxu0 %vm9181_vm0, %v20369_v3  ;;  %10336 = vmatpush1.bf16.msra.mxu0 %v14206_v46  ;;  %v18682_v8 = vadd.f32 %v7713_v16, %v7354_v1  ;;  %v14233_v3 = vld [vmem:[%s20174_s10 + $0xe0] ss:$36 sps:$4 sm:$0xff]  }
 0x470   :  { %v7284_v50 = vpop.f32.mrf.mxu0  ;;  %v7721_v54 = vpop.f32.mrf.mxu1  ;;  %10337 = vmatprep.subr.bf16.mxu0 %v14211_v39  ;;  %v14238_v16 = vld [vmem:[%s20174_s10 + $0x9c] ss:$36 sps:$4 sm:$0xff]  }
 0x471   :  { %v7356_v34 = vadd.f32 %v7284_v50, %v18423_v11  ;;  %10451 = vmatpush1.bf16.msra.mxu1 %v14227_v41  ;;  %v18691_v4 = vadd.f32 %v7717_v15, %v7355_v60  ;;  %v14218_v11 = vld [vmem:[%s20174_s10 + $0xd8] ss:$36 sps:$4 sm:$0xff]  }
 0x472   :  { %v7286_v0 = vpop.f32.mrf.mxu0  ;;  %v7723_v61 = vpop.f32.mrf.mxu1  ;;  %10452 = vmatprep.subr.bf16.mxu1 %v14235_v36  ;;  %v14226_v15 = vld [vmem:[%s20174_s10 + $0x94] ss:$36 sps:$4 sm:$0xff]  }
 0x473   :  { %v7357_v51 = vadd.f32 %v7286_v0, %v18435_v63  ;;  %10338 = vmatpush1.bf16.msra.mxu0 %v14209_v18  ;;  %v18700_v31 = vadd.f32 %v7719_v45, %v7356_v34  ;;  %v14236_v63 = vld [vmem:[%s20174_s10 + $0x98] ss:$36 sps:$4 sm:$0xff]   ;;  %v14224_v36 = vld [vmem:[%s20174_s10 + $0x90] ss:$36 sps:$4 sm:$0xff]  }
 0x474   :  { %v7288_v46 = vpop.f32.mrf.mxu0  ;;  %v7727_v37 = vpop.f32.mrf.mxu1  ;;  %9707 = vmatmul.mubr.bf16.gmra.mxu1 %v20370_v35  ;;  %10339 = vmatprep.subr.bf16.mxu0 %v14220_v30  ;;  %v14244_v45 = vld [vmem:[%s20174_s10 + $0x54] ss:$36 sps:$4 sm:$0xff]  }
 0x475   :  { %v7358_v39 = vadd.f32 %v7288_v46, %v18445_v49  ;;  %12610 = vmatprep.mubr.msk.bf16.mxu1 %vm9181_vm0, %v20371_v27  ;;  %10453 = vmatpush1.bf16.msra.mxu1 %v14233_v3  ;;  %v18712_v1 = vadd.f32 %v7721_v54, %v7357_v51  ;;  %v14250_v3 = vld [vmem:[%s20174_s10 + $0xc] ss:$36 sps:$4 sm:$0xff]  }
 0x476   :  { %v7292_v41 = vpop.f32.mrf.mxu0  ;;  %v7729_v52 = vpop.f32.mrf.mxu1  ;;  %9598 = vmatmul.mubr.bf16.gmra.mxu0 %v20370_v35  ;;  %10454 = vmatprep.subr.bf16.mxu1 %v14238_v16  ;;  %v14232_v35 = vld [vmem:[%s20174_s10 + $0x4c] ss:$36 sps:$4 sm:$0xff]  }
 0x477   :  { %v7359_v49 = vadd.f32 %v7292_v41, %v18454_v58  ;;  %12602 = vmatprep.mubr.msk.bf16.mxu0 %vm9181_vm0, %v20371_v27  ;;  %10340 = vmatpush1.bf16.msra.mxu0 %v14218_v11  ;;  %v18724_v60 = vadd.f32 %v7723_v61, %v7358_v39  ;;  %v14242_v27 = vld [vmem:[%s20174_s10 + $0x50] ss:$36 sps:$4 sm:$0xff]   ;;  %v14241_v11 = vld [vmem:[%s20174_s10 + $0x4] ss:$36 sps:$4 sm:$0xff]  }
 0x478   :  { %v7294_v18 = vpop.f32.mrf.mxu0  ;;  %v7731_v50 = vpop.f32.mrf.mxu1  ;;  %10341 = vmatprep.subr.bf16.mxu0 %v14226_v15  ;;  %v14239_v41 = vld [vmem:[%s20174_s10] ss:$36 sps:$4 sm:$0xff]  }
 0x479   :  { %v7360_v54 = vadd.f32 %v7294_v18, %v18461_v14  ;;  %10455 = vmatpush1.bf16.msra.mxu1 %v14236_v63  ;;  %v18733_v58 = vadd.f32 %v7727_v37, %v7359_v49  ;;  %v14230_v14 = vld [vmem:[%s20174_s10 + $0x48] ss:$36 sps:$4 sm:$0xff]  }
 0x47a   :  { %v7296_v30 = vpop.f32.mrf.mxu0  ;;  %v7733_v34 = vpop.f32.mrf.mxu1  ;;  %10456 = vmatprep.subr.bf16.mxu1 %v14244_v45  ;;  %v14256_v63 = vld [vmem:[%s20174_s10 + $0x324] ss:$36 sps:$4 sm:$0xff]  }
 0x47b   :  { %v7361_v0 = vadd.f32 %v7296_v30, %v18473_v57  ;;  %10342 = vmatpush1.bf16.msra.mxu0 %v14224_v36  ;;  %v18742_v61 = vadd.f32 %v7729_v52, %v7360_v54  ;;  %v14248_v57 = vld [vmem:[%s20174_s10 + $0x8] ss:$36 sps:$4 sm:$0xff]  }
 0x47c   :  { %v7298_v16 = vpop.f32.mrf.mxu0  ;;  %v7737_v51 = vpop.f32.mrf.mxu1  ;;  %9715 = vmatmul.mubr.bf16.gmra.mxu1 %v20372_v24  ;;  %10343 = vmatprep.subr.bf16.mxu0 %v14232_v35  ;;  %v14259_v35 = vld [vmem:[%s20174_s10 + $0x2dc] ss:$36 sps:$4 sm:$0xff]  }
 0x47d   :  { %v7362_v46 = vadd.f32 %v7298_v16, %v18483_v32  ;;  %12611 = vmatprep.mubr.msk.bf16.mxu1 %vm9181_vm0, %v20373_v7  ;;  %10457 = vmatpush1.bf16.msra.mxu1 %v14242_v27  ;;  %v18754_v37 = vadd.f32 %v7731_v50, %v7361_v0 }
 0x47e   :  { %v7302_v15 = vpop.f32.mrf.mxu0  ;;  %v7739_v39 = vpop.f32.mrf.mxu1  ;;  %9608 = vmatmul.mubr.bf16.gmra.mxu0 %v20372_v24  ;;  %10458 = vmatprep.subr.bf16.mxu1 %v14250_v3  ;;  %v14247_v24 = vld [vmem:[%s20174_s10 + $0x31c] ss:$36 sps:$4 sm:$0xff]   ;;  %v14253_v3 = vld [vmem:[%s20174_s10 + $0x2d4] ss:$36 sps:$4 sm:$0xff]  }
 0x47f   :  { %v7363_v32 = vadd.f32 %v7302_v15, %v18492_v20  ;;  %12603 = vmatprep.mubr.msk.bf16.mxu0 %vm9181_vm0, %v20373_v7  ;;  %10344 = vmatpush1.bf16.msra.mxu0 %v14230_v14  ;;  %v18766_v52 = vadd.f32 %v7733_v34, %v7362_v46  ;;  %v14254_v7 = vld [vmem:[%s20174_s10 + $0x320] ss:$36 sps:$4 sm:$0xff]   ;;  %v14251_v46 = vld [vmem:[%s20174_s10 + $0x2d0] ss:$36 sps:$4 sm:$0xff]  }
 0x480   :  { %v7304_v45 = vpop.f32.mrf.mxu0  ;;  %v7741_v49 = vpop.f32.mrf.mxu1  ;;  %10345 = vmatprep.subr.bf16.mxu0 %v14241_v11  ;;  %v14265_v11 = vld [vmem:[%s20174_s10 + $0x294] ss:$36 sps:$4 sm:$0xff]  }
 0x481   :  { %v7364_v36 = vadd.f32 %v7304_v45, %v18499_v9  ;;  %10459 = vmatpush1.bf16.msra.mxu1 %v14248_v57  ;;  %v18775_v20 = vadd.f32 %v7737_v51, %v7363_v32  ;;  %v14245_v9 = vld [vmem:[%s20174_s10 + $0x318] ss:$36 sps:$4 sm:$0xff]   ;;  %v14271_v45 = vld [vmem:[%s20174_s10 + $0x24c] ss:$36 sps:$4 sm:$0xff]  }
 0x482   :  { %v7306_v18 = vpop.f32.mrf.mxu0  ;;  %v7743_v50 = vpop.f32.mrf.mxu1  ;;  %10468 = vmatprep.subr.bf16.mxu1 %v14256_v63 }
 0x483   :  { %v7365_v54 = vadd.f32 %v7306_v18, %v18511_v62  ;;  %10346 = vmatpush1.bf16.msra.mxu0 %v14239_v41  ;;  %v18784_v27 = vadd.f32 %v7739_v39, %v7364_v36  ;;  %v14257_v62 = vld [vmem:[%s20174_s10 + $0x2d8] ss:$36 sps:$4 sm:$0xff]   ;;  %v14268_v18 = vld [vmem:[%s20174_s10 + $0x244] ss:$36 sps:$4 sm:$0xff]  }
 0x484   :  { %v7308_v30 = vpop.f32.mrf.mxu0  ;;  %v7747_v34 = vpop.f32.mrf.mxu1  ;;  %9723 = vmatmul.mubr.bf16.gmra.mxu1 %v20374_v21  ;;  %10355 = vmatprep.subr.bf16.mxu0 %v14247_v24 }
 0x485   :  { %v7366_v0 = vadd.f32 %v7308_v30, %v18521_v43  ;;  %12612 = vmatprep.mubr.msk.bf16.mxu1 %vm9181_vm0, %v20375_v13  ;;  %10469 = vmatpush2.bf16.msra.mxu1 %v14254_v7  ;;  %v18796_v14 = vadd.f32 %v7741_v49, %v7365_v54  ;;  %v14286_v30 = vld [vmem:[%s20174_s10 + $0x214] ss:$36 sps:$4 sm:$0xff]  }
 0x486   :  { %v7312_v16 = vpop.f32.mrf.mxu0  ;;  %v7749_v51 = vpop.f32.mrf.mxu1  ;;  %9618 = vmatmul.mubr.bf16.gmra.mxu0 %v20374_v21  ;;  %10470 = vmatprep.subr.bf16.mxu1 %v14259_v35  ;;  %v14262_v21 = vld [vmem:[%s20174_s10 + $0x28c] ss:$36 sps:$4 sm:$0xff]  }
 0x487   :  { %v7367_v43 = vadd.f32 %v7312_v16, %v18530_v22  ;;  %12604 = vmatprep.mubr.msk.bf16.mxu0 %vm9181_vm0, %v20375_v13  ;;  %10356 = vmatpush2.bf16.msra.mxu0 %v14245_v9  ;;  %v18808_v57 = vadd.f32 %v7743_v50, %v7366_v0  ;;  %v14263_v13 = vld [vmem:[%s20174_s10 + $0x290] ss:$36 sps:$4 sm:$0xff]  }
 0x488   :  { %v7314_v15 = vpop.f32.mrf.mxu0  ;;  %v7751_v39 = vpop.f32.mrf.mxu1  ;;  %10357 = vmatprep.subr.bf16.mxu0 %v14253_v3 }
 0x489   :  { %v7368_v63 = vadd.f32 %v7314_v15, %v18537_v56  ;;  %10471 = vmatpush2.bf16.msra.mxu1 %v14257_v62  ;;  %v18817_v22 = vadd.f32 %v7747_v34, %v7367_v43  ;;  %v14260_v56 = vld [vmem:[%s20174_s10 + $0x288] ss:$36 sps:$4 sm:$0xff]   ;;  %v14266_v34 = vld [vmem:[%s20174_s10 + $0x240] ss:$36 sps:$4 sm:$0xff]  }
 0x48a   :  { %v7316_v32 = vpop.f32.mrf.mxu0  ;;  %v7753_v41 = vpop.f32.mrf.mxu1  ;;  %10472 = vmatprep.subr.bf16.mxu1 %v14265_v11 }
 0x48b   :  { %v7369_v49 = vadd.f32 %v7316_v32, %v18549_v28  ;;  %10358 = vmatpush2.bf16.msra.mxu0 %v14251_v46  ;;  %v18826_v24 = vadd.f32 %v7749_v51, %v7368_v63  ;;  %v14269_v28 = vld [vmem:[%s20174_s10 + $0x248] ss:$36 sps:$4 sm:$0xff]  }
 0x48c   :  { %v7318_v36 = vpop.f32.mrf.mxu0  ;;  %v7757_v7 = vpop.f32.mrf.mxu1  ;;  %9731 = vmatmul.mubr.bf16.gmra.mxu1 %v20376_v42  ;;  %10359 = vmatprep.subr.bf16.mxu0 %v14262_v21 }
 0x48d   :  { %v7370_v50 = vadd.f32 %v7318_v36, %v18562_v12  ;;  %12613 = vmatprep.mubr.msk.bf16.mxu1 %vm9181_vm0, %v20377_v2  ;;  %10473 = vmatpush2.bf16.msra.mxu1 %v14263_v13  ;;  %v18838_v35 = vadd.f32 %v7751_v39, %v7369_v49 }
 0x48e   :  { %v7322_v54 = vpop.f32.mrf.mxu0  ;;  %v7759_v9 = vpop.f32.mrf.mxu1  ;;  %9628 = vmatmul.mubr.bf16.gmra.mxu0 %v20376_v42  ;;  %10474 = vmatprep.subr.bf16.mxu1 %v14271_v45  ;;  %v14274_v42 = vld [vmem:[%s20174_s10 + $0x20c] ss:$36 sps:$4 sm:$0xff]  }
 0x48f   :  { %v7371_v12 = vadd.f32 %v7322_v54, %v18568_v33  ;;  %12605 = vmatprep.mubr.msk.bf16.mxu0 %vm9181_vm0, %v20377_v2  ;;  %10360 = vmatpush2.bf16.msra.mxu0 %v14260_v56  ;;  %v18850_v3 = vadd.f32 %v7753_v41, %v7370_v50 }
 0x490   :  { %v7324_v0 = vpop.f32.mrf.mxu0  ;;  %v7761_v62 = vpop.f32.mrf.mxu1  ;;  %10361 = vmatprep.subr.bf16.mxu0 %v14268_v18 }
 0x491   :  { %v7372_v16 = vadd.f32 %v7324_v0, %v18571_v48  ;;  %10475 = vmatpush2.bf16.msra.mxu1 %v14269_v28  ;;  %v18856_v33 = vadd.f32 %v7757_v7, %v7371_v12 }
 0x492   :  { %v7326_v2 = vpop.f32.mrf.mxu0  ;;  %v7763_v51 = vpop.f32.mrf.mxu1  ;;  %10670 = vmatprep.subr.bf16.mxu1 %v14286_v30 }
 0x493   :  { %v7373_v11 = vadd.f32 %v7326_v2, %v18577_v5  ;;  %10362 = vmatpush2.bf16.msra.mxu0 %v14266_v34  ;;  %v18859_v43 = vadd.f32 %v7759_v9, %v7372_v16  ;;  %v20382_v2 = vld [vmem:[#allocation27_spill] sm:$0xff] }
 0x494   :  { %v7328_v46 = vpop.f32.mrf.mxu0  ;;  %v7767_v15 = vpop.f32.mrf.mxu1  ;;  %9739 = vmatmul.mubr.bf16.gmra.mxu1 %v20378_v53  ;;  %10557 = vmatprep.subr.bf16.mxu0 %v14274_v42 }
 0x495   :  { %v7374_v39 = vadd.f32 %v7328_v46, %v18583_v40  ;;  %12614 = vmatprep.mubr.msk.bf16.mxu1 %vm9181_vm0, %v20379_v55  ;;  %v18865_v48 = vadd.f32 %v7761_v62, %v7373_v11  ;;  %v8297_v46 = vld [vmem:[%s20173_s9] sm:$0x3] }
 0x496   :  { %v7332_v21 = vpop.f32.mrf.mxu0  ;;  %v7769_v63 = vpop.f32.mrf.mxu1  ;;  %9638 = vmatmul.mubr.bf16.gmra.mxu0 %v20378_v53 }
 0x497   :  { %v7375_v5 = vadd.f32 %v7332_v21, %v18586_v38  ;;  %12606 = vmatprep.mubr.msk.bf16.mxu0 %vm9181_vm0, %v20379_v55  ;;  %v18871_v13 = vadd.f32 %v7763_v51, %v7374_v39  ;;  %v20383_v39 = vld [vmem:[#allocation31_spill] sm:$0xff] }
 0x498   :  { %v7334_v32 = vpop.f32.mrf.mxu0  ;;  %v7771_v41 = vpop.f32.mrf.mxu1 }
 0x499   :  { %v7376_v40 = vadd.f32 %v7334_v32, %v18589_v25  ;;  %v18874_v45 = vadd.f32 %v7767_v15, %v7375_v5 }
 0x49a   :  { %v7336_v49 = vpop.f32.mrf.mxu0  ;;  %v7773_v56 = vpop.f32.mrf.mxu1 }
 0x49b   :  { %v7377_v36 = vadd.f32 %v7336_v49, %v18595_v17  ;;  %v18877_v7 = vadd.f32 %v7769_v63, %v7376_v40 }
 0x49c   :  { %v7338_v53 = vpop.f32.mrf.mxu0  ;;  %v7777_v18 = vpop.f32.mrf.mxu1  ;;  %9747 = vmatmul.mubr.bf16.gmra.mxu1 %v20380_v10 }
 0x49d   :  { %v7378_v55 = vadd.f32 %v7338_v53, %v18601_v6  ;;  %v18881_v38 = vadd.f32 %v7771_v41, %v7377_v36  ;;  %v8253_v6 = vld [vmem:[%s20172_s8] sm:$0x3]  ;;  %v18919_v41 = vrot.slane %v8297_v46, %v20382_v2  ;;  %v18926_v36 = vrot.slane %v8297_v46, %v20383_v39 }
 0x49e   :  { %v7342_v50 = vpop.f32.mrf.mxu0  ;;  %v7779_v28 = vpop.f32.mrf.mxu1  ;;  %9648 = vmatmul.mubr.bf16.gmra.mxu0 %v20380_v10  ;;  %v18900_v51 = vrot.slane %v8253_v6, %v20382_v2  ;;  %v18911_v21 = vrot.slane %v8253_v6, %v20383_v39 }
 0x49f   :  { %v7379_v25 = vadd.f32 %v7342_v50, %v18607_v29  ;;  %v18885_v54 = vadd.f32 %v7773_v56, %v7378_v55 }
 0x4a0   :  { %v7344_v9 = vpop.f32.mrf.mxu0  ;;  %v7781_v17 = vpop.f32.mrf.mxu1 }
 0x4a1   :  { %v7380_v30 = vadd.f32 %v7344_v9, %v18616_v44  ;;  %v18888_v12 = vadd.f32 %v7777_v18, %v7379_v25 }
 0x4a2   :  { %v7346_v34 = vpop.f32.mrf.mxu0  ;;  %v7783_v0 = vpop.f32.mrf.mxu1 }
 0x4a3   :  { %v7381_v62 = vadd.f32 %v7346_v34, %v18628_v23  ;;  %v18894_v42 = vadd.f32 %v7779_v28, %v7380_v30 }
 0x4a4   :  { %v7348_v10 = vpop.f32.mrf.mxu0  ;;  %v18896_v29 = vpop.f32.mrf.mxu1 }
 0x4a5   :  { %v7382_v16 = vadd.f32 %v7348_v10, %v18640_v19  ;;  %v18902_v44 = vadd.f32 %v7781_v17, %v7381_v62 }
 0x4a6   :  { %v8142_v11 = vpop.f32.mrf.mxu0  ;;  %v18907_v15 = vpop.f32.mrf.mxu1 }
 0x4a7   :  { %v8221_v23 = vadd.f32 %v8142_v11, %v18649_v47  ;;  %v18913_v63 = vadd.f32 %v7783_v0, %v7382_v16 }
 0x4a8   :  { %v8144_v19 = vpop.f32.mrf.mxu0  ;;  %v18915_v5 = vpop.f32.mrf.mxu1 }
 0x4a9   :  { %v8265_v32 = vmul.f32 %v18900_v51, %v8221_v23  ;;  %v8222_v40 = vadd.f32 %v8144_v19, %v18658_v59 }
 0x4aa   :  { %v8146_v49 = vpop.f32.mrf.mxu0  ;;  %v18922_v56 = vpop.f32.mrf.mxu1 }
 0x4ab   :  { %v8266_v47 = vmul.f32 %v18911_v21, %v8222_v40  ;;  %v8223_v53 = vadd.f32 %v8146_v49, %v18670_v26  ;;  %v8309_v50 = vadd.f32 %v18919_v41, %v8265_v32 }
 0x4ac   :  { %v8148_v18 = vpop.f32.mrf.mxu0  ;;  %v18929_v55 = vpop.f32.mrf.mxu1 }
 0x4ad   :  { %v8267_v28 = vmul.f32 %v18900_v51, %v8223_v53  ;;  %v8224_v25 = vadd.f32 %v8148_v18, %v18682_v8  ;;  %v8310_v17 = vadd.f32 %v18926_v36, %v8266_v47  ;;  %v8341_v62 = vmax.f32 %v8309_v50, 0.0  ;;  %v14272_v50 = vld [vmem:[%s20174_s10 + $0x208] ss:$36 sps:$4 sm:$0xff]  }
 0x4ae   :  { %v8152_v59 = vpop.f32.mrf.mxu0  ;;  %v18934_v9 = vpop.f32.mrf.mxu1 }
 0x4af   :  { %v8311_v30 = vadd.f32 %v18919_v41, %v8267_v28  ;;  %v8268_v34 = vmul.f32 %v18911_v21, %v8224_v25  ;;  %v8225_v26 = vadd.f32 %v8152_v59, %v18691_v4  ;;  %v8342_v19 = vmax.f32 %v8310_v17, 0.0  ;;  %v14284_v28 = vld [vmem:[%s20174_s10 + $0x210] ss:$36 sps:$4 sm:$0xff]  }
 0x4b0   :  { %v8154_v0 = vpop.f32.mrf.mxu0  ;;  %v18940_v6 = vpop.f32.mrf.mxu1 }
 0x4b1   :  { %v8343_v10 = vmax.f32 %v8311_v30, 0.0  ;;  %v8312_v16 = vadd.f32 %v18926_v36, %v8268_v34  ;;  %v8226_v8 = vadd.f32 %v8154_v0, %v18700_v31  ;;  %v8269_v11 = vmul.f32 %v18900_v51, %v8225_v26  ;;  %v14277_v30 = vld [vmem:[%s20174_s10 + $0x1c4] ss:$36 sps:$4 sm:$0xff]  }
 0x4b2   :  { %v8156_v46 = vpop.f32.mrf.mxu0  ;;  %v18945_v23 = vpop.f32.mrf.mxu1 }
 0x4b3   :  { %v18947_v32 = vpack.c.bf16 %v8343_v10, %v8341_v62  ;;  %v8344_v40 = vmax.f32 %v8312_v16, 0.0  ;;  %v8270_v4 = vmul.f32 %v18911_v21, %v8226_v8  ;;  %v8227_v49 = vadd.f32 %v8156_v46, %v18712_v1  ;;  %v14275_v46 = vld [vmem:[%s20174_s10 + $0x1c0] ss:$36 sps:$4 sm:$0xff]  }
 0x4b4   :  { %v8158_v47 = vpop.f32.mrf.mxu0  ;;  %v18951_v53 = vpop.f32.mrf.mxu1  ;;  %v8313_v25 = vadd.f32 %v18919_v41, %v8269_v11 }
 0x4b5   :  { %v18953_v18 = vpack.c.bf16 %v8344_v40, %v8342_v19  ;;  %v8228_v31 = vadd.f32 %v8158_v47, %v18724_v60  ;;  %v8271_v59 = vmul.f32 %v18900_v51, %v8227_v49  ;;  %v14289_v60 = vld [vmem:[%s20174_s10 + $0x1cc] ss:$36 sps:$4 sm:$0xff]   ;;  %v8314_v34 = vadd.f32 %v18926_v36, %v8270_v4 }
 0x4b6   :  { %v8162_v1 = vpop.f32.mrf.mxu0  ;;  %v18964_v17 = vpop.f32.mrf.mxu1  ;;  %v14287_v19 = vld [vmem:[%s20174_s10 + $0x1c8] ss:$36 sps:$4 sm:$0xff]   ;;  %v8345_v40 = vmax.f32 %v8313_v25, 0.0 }
 0x4b7   :  { %v8272_v26 = vmul.f32 %v18911_v21, %v8228_v31  ;;  %v8229_v0 = vadd.f32 %v8162_v1, %v18733_v58  ;;  %12723 = vmatprep.mubr.msk.bf16.mxu0 %vm9181_vm0, %v18953_v18  ;;  %12731 = vmatprep.mubr.msk.bf16.mxu1 %vm9181_vm0, %v18953_v18  ;;  %v8315_v62 = vadd.f32 %v18919_v41, %v8271_v59  ;;  %v14295_v31 = vld [vmem:[%s20174_s10 + $0x184] ss:$36 sps:$4 sm:$0xff]  }
 0x4b8   :  { %v8164_v10 = vpop.f32.mrf.mxu0  ;;  %v18980_v16 = vpop.f32.mrf.mxu1  ;;  %10364 = vmatmul.mubr.bf16.vlgmr.msra.gmra.mxu0 %v18947_v32  ;;  %10477 = vmatmul.mubr.bf16.vlgmr.msra.gmra.mxu1 %v18947_v32 }
 0x4b9   :  { %v8316_v8 = vadd.f32 %v18926_v36, %v8272_v26  ;;  %v8273_v11 = vmul.f32 %v18900_v51, %v8229_v0  ;;  %v8230_v58 = vadd.f32 %v8164_v10, %v18742_v61  ;;  %10558 = vmatpush1.bf16.msra.mxu0 %v14272_v50  ;;  %10671 = vmatpush1.bf16.msra.mxu1 %v14284_v28  ;;  %v8347_v4 = vmax.f32 %v8315_v62, 0.0  ;;  %v14280_v61 = vld [vmem:[%s20174_s10 + $0x17c] ss:$36 sps:$4 sm:$0xff]  }
 0x4ba   :  { %v8166_v49 = vpop.f32.mrf.mxu0  ;;  %v18993_v47 = vpop.f32.mrf.mxu1  ;;  %10559 = vmatprep.subr.bf16.mxu0 %v14277_v30  ;;  %10672 = vmatprep.subr.bf16.mxu1 %v14289_v60  ;;  %v8346_v50 = vmax.f32 %v8314_v34, 0.0  ;;  %v14278_v34 = vld [vmem:[%s20174_s10 + $0x178] ss:$36 sps:$4 sm:$0xff]  }
 0x4bb   :  { %v8348_v28 = vmax.f32 %v8316_v8, 0.0  ;;  %v8231_v59 = vadd.f32 %v8166_v49, %v18754_v37  ;;  %v19002_v1 = vpack.c.bf16 %v8347_v4, %v8345_v40  ;;  %v8274_v25 = vmul.f32 %v18911_v21, %v8230_v58  ;;  %v14293_v37 = vld [vmem:[%s20174_s10 + $0x180] ss:$36 sps:$4 sm:$0xff]  }
 0x4bc   :  { %v8168_v26 = vpop.f32.mrf.mxu0  ;;  %v19005_v0 = vpop.f32.mrf.mxu1  ;;  %v8317_v62 = vadd.f32 %v18919_v41, %v8273_v11  ;;  %v14283_v11 = vld [vmem:[%s20174_s10 + $0x134] ss:$36 sps:$4 sm:$0xff]  }
 0x4bd   :  { %v19007_v30 = vpack.c.bf16 %v8348_v28, %v8346_v50  ;;  %v8275_v60 = vmul.f32 %v18900_v51, %v8231_v59  ;;  %10560 = vmatpush1.bf16.msra.mxu0 %v14275_v46  ;;  %10673 = vmatpush1.bf16.msra.mxu1 %v14287_v19  ;;  %v8232_v10 = vadd.f32 %v8168_v26, %v18766_v52  ;;  %v14301_v46 = vld [vmem:[%s20174_s10 + $0x13c] ss:$36 sps:$4 sm:$0xff]   ;;  %v14281_v59 = vld [vmem:[%s20174_s10 + $0x130] ss:$36 sps:$4 sm:$0xff]  }
 0x4be   :  { %v8172_v8 = vpop.f32.mrf.mxu0  ;;  %v19018_v58 = vpop.f32.mrf.mxu1  ;;  %10561 = vmatprep.subr.bf16.mxu0 %v14280_v61  ;;  %10674 = vmatprep.subr.bf16.mxu1 %v14295_v31  ;;  %v8318_v52 = vadd.f32 %v18926_v36, %v8274_v25  ;;  %v8349_v31 = vmax.f32 %v8317_v62, 0.0  ;;  %v14299_v25 = vld [vmem:[%s20174_s10 + $0x138] ss:$36 sps:$4 sm:$0xff]  }
 0x4bf   :  { %v8319_v19 = vadd.f32 %v18919_v41, %v8275_v60  ;;  %v8233_v40 = vadd.f32 %v8172_v8, %v18775_v20  ;;  %12724 = vmatprep.mubr.msk.bf16.mxu0 %vm9181_vm0, %v19007_v30  ;;  %12732 = vmatprep.mubr.msk.bf16.mxu1 %vm9181_vm0, %v19007_v30  ;;  %v8276_v4 = vmul.f32 %v18911_v21, %v8232_v10  ;;  %v14307_v62 = vld [vmem:[%s20174_s10 + $0xf4] ss:$36 sps:$4 sm:$0xff]  }
 0x4c0   :  { %v8174_v49 = vpop.f32.mrf.mxu0  ;;  %v19034_v61 = vpop.f32.mrf.mxu1  ;;  %10374 = vmatmul.mubr.bf16.gmra.mxu0 %v19002_v1  ;;  %10487 = vmatmul.mubr.bf16.gmra.mxu1 %v19002_v1 }
 0x4c1   :  { %20384 = vst [vmem:[#allocation32_spill] sm:$0xff] %v19034_v61  ;;  %v8351_v50 = vmax.f32 %v8319_v19, 0.0  ;;  %v8277_v20 = vmul.f32 %v18900_v51, %v8233_v40  ;;  %v8234_v28 = vadd.f32 %v8174_v49, %v18784_v27  ;;  %10562 = vmatpush1.bf16.msra.mxu0 %v14278_v34  ;;  %10675 = vmatpush1.bf16.msra.mxu1 %v14293_v37  ;;  %v14292_v27 = vld [vmem:[%s20174_s10 + $0xec] ss:$36 sps:$4 sm:$0xff]   ;;  %v8350_v19 = vmax.f32 %v8318_v52, 0.0 }
 0x4c2   :  { %v8320_v26 = vadd.f32 %v18926_v36, %v8276_v4  ;;  %v8176_v60 = vpop.f32.mrf.mxu0  ;;  %v19047_v10 = vpop.f32.mrf.mxu1  ;;  %10563 = vmatprep.subr.bf16.mxu0 %v14283_v11  ;;  %10676 = vmatprep.subr.bf16.mxu1 %v14301_v46  ;;  %v14305_v52 = vld [vmem:[%s20174_s10 + $0xf0] ss:$36 sps:$4 sm:$0xff]  }
 0x4c3   :  { %20385 = vst [vmem:[#allocation53_spill] sm:$0xff] %v19047_v10  ;;  %v19055_v34 = vpack.c.bf16 %v8351_v50, %v8349_v31  ;;  %v8278_v37 = vmul.f32 %v18911_v21, %v8234_v28  ;;  %v8235_v8 = vadd.f32 %v8176_v60, %v18796_v14  ;;  %v8321_v11 = vadd.f32 %v18919_v41, %v8277_v20  ;;  %v14290_v14 = vld [vmem:[%s20174_s10 + $0xe8] ss:$36 sps:$4 sm:$0xff]  }
 0x4c4   :  { %v8352_v40 = vmax.f32 %v8320_v26, 0.0  ;;  %v8178_v4 = vpop.f32.mrf.mxu0  ;;  %v19059_v49 = vpop.f32.mrf.mxu1  ;;  %v14310_v26 = vld [vmem:[%s20174_s10 + $0xac] ss:$36 sps:$4 sm:$0xff]  }
 0x4c5   :  { %v8279_v10 = vmul.f32 %v18900_v51, %v8235_v8  ;;  %v8236_v46 = vadd.f32 %v8178_v4, %v18808_v57  ;;  %10564 = vmatpush1.bf16.msra.mxu0 %v14281_v59  ;;  %10677 = vmatpush1.bf16.msra.mxu1 %v14299_v25  ;;  %v8322_v20 = vadd.f32 %v18926_v36, %v8278_v37  ;;  %v14298_v25 = vld [vmem:[%s20174_s10 + $0xa4] ss:$36 sps:$4 sm:$0xff]  }
 0x4c6   :  { %v19064_v61 = vpack.c.bf16 %v8352_v40, %v8350_v19  ;;  %v8182_v31 = vpop.f32.mrf.mxu0  ;;  %v19066_v50 = vpop.f32.mrf.mxu1  ;;  %10565 = vmatprep.subr.bf16.mxu0 %v14292_v27  ;;  %10678 = vmatprep.subr.bf16.mxu1 %v14307_v62  ;;  %v8353_v27 = vmax.f32 %v8321_v11, 0.0  ;;  %v14296_v4 = vld [vmem:[%s20174_s10 + $0xa0] ss:$36 sps:$4 sm:$0xff]   ;;  %v14308_v11 = vld [vmem:[%s20174_s10 + $0xa8] ss:$36 sps:$4 sm:$0xff]  }
 0x4c7   :  { %v8323_v57 = vadd.f32 %v18919_v41, %v8279_v10  ;;  %v8280_v28 = vmul.f32 %v18911_v21, %v8236_v46  ;;  %v8237_v59 = vadd.f32 %v8182_v31, %v18817_v22 }
 0x4c8   :  { %12725 = vmatprep.mubr.msk.bf16.mxu0 %vm9181_vm0, %v19064_v61  ;;  %12733 = vmatprep.mubr.msk.bf16.mxu1 %vm9181_vm0, %v19064_v61  ;;  %v8184_v60 = vpop.f32.mrf.mxu0  ;;  %v19088_v10 = vpop.f32.mrf.mxu1 }
 0x4c9   :  { %v8355_v62 = vmax.f32 %v8323_v57, 0.0  ;;  %v8324_v22 = vadd.f32 %v18926_v36, %v8280_v28  ;;  %v8238_v37 = vadd.f32 %v8184_v60, %v18826_v24  ;;  %10384 = vmatmul.mubr.bf16.gmra.mxu0 %v19055_v34  ;;  %10497 = vmatmul.mubr.bf16.gmra.mxu1 %v19055_v34  ;;  %v8281_v8 = vmul.f32 %v18900_v51, %v8237_v59 }
 0x4ca   :  { %v8186_v19 = vpop.f32.mrf.mxu0  ;;  %v19095_v40 = vpop.f32.mrf.mxu1  ;;  %10566 = vmatpush1.bf16.msra.mxu0 %v14290_v14  ;;  %10679 = vmatpush1.bf16.msra.mxu1 %v14305_v52  ;;  %v8354_v24 = vmax.f32 %v8322_v20, 0.0  ;;  %v14304_v52 = vld [vmem:[%s20174_s10 + $0x5c] ss:$36 sps:$4 sm:$0xff]   ;;  %v14316_v20 = vld [vmem:[%s20174_s10 + $0x64] ss:$36 sps:$4 sm:$0xff]  }
 0x4cb   :  { %v19103_v46 = vpack.c.bf16 %v8355_v62, %v8353_v27  ;;  %v8356_v31 = vmax.f32 %v8324_v22, 0.0  ;;  %v8282_v57 = vmul.f32 %v18911_v21, %v8238_v37  ;;  %10567 = vmatprep.subr.bf16.mxu0 %v14298_v25  ;;  %10680 = vmatprep.subr.bf16.mxu1 %v14310_v26  ;;  %v8239_v28 = vadd.f32 %v8186_v19, %v18838_v35  ;;  %v14302_v22 = vld [vmem:[%s20174_s10 + $0x58] ss:$36 sps:$4 sm:$0xff]   ;;  %v14314_v37 = vld [vmem:[%s20174_s10 + $0x60] ss:$36 sps:$4 sm:$0xff]  }
 0x4cc   :  { %v8188_v14 = vpop.f32.mrf.mxu0  ;;  %v19107_v59 = vpop.f32.mrf.mxu1  ;;  %v8325_v25 = vadd.f32 %v18919_v41, %v8281_v8 }
 0x4cd   :  { %20386 = vst [vmem:[#allocation21_spill] sm:$0xff] %v19107_v59  ;;  %v19115_v60 = vpack.c.bf16 %v8356_v31, %v8354_v24  ;;  %v8240_v27 = vadd.f32 %v8188_v14, %v18850_v3  ;;  %v8283_v26 = vmul.f32 %v18900_v51, %v8239_v28  ;;  %v8326_v19 = vadd.f32 %v18926_v36, %v8282_v57 }
 0x4ce   :  { %v8192_v35 = vpop.f32.mrf.mxu0  ;;  %v19120_v62 = vpop.f32.mrf.mxu1  ;;  %10568 = vmatpush1.bf16.msra.mxu0 %v14296_v4  ;;  %10681 = vmatpush1.bf16.msra.mxu1 %v14308_v11  ;;  %v14313_v4 = vld [vmem:[%s20174_s10 + $0x14] ss:$36 sps:$4 sm:$0xff]   ;;  %v14322_v11 = vld [vmem:[%s20174_s10 + $0x1c] ss:$36 sps:$4 sm:$0xff]  }
 0x4cf   :  { %20387 = vst [vmem:[#allocation23_spill] sm:$0xff] %v19120_v62  ;;  %v8284_v3 = vmul.f32 %v18911_v21, %v8240_v27  ;;  %v8241_v8 = vadd.f32 %v8192_v35, %v18856_v33  ;;  %12726 = vmatprep.mubr.msk.bf16.mxu0 %vm9181_vm0, %v19115_v60  ;;  %12734 = vmatprep.mubr.msk.bf16.mxu1 %vm9181_vm0, %v19115_v60  ;;  %v8357_v27 = vmax.f32 %v8325_v25, 0.0 }
 0x4d0   :  { %v8327_v24 = vadd.f32 %v18919_v41, %v8283_v26  ;;  %v8194_v31 = vpop.f32.mrf.mxu0  ;;  %v19142_v57 = vpop.f32.mrf.mxu1  ;;  %10569 = vmatprep.subr.bf16.mxu0 %v14304_v52  ;;  %10682 = vmatprep.subr.bf16.mxu1 %v14316_v20  ;;  %v14311_v52 = vld [vmem:[%s20174_s10 + $0x10] ss:$36 sps:$4 sm:$0xff]   ;;  %v14320_v20 = vld [vmem:[%s20174_s10 + $0x18] ss:$36 sps:$4 sm:$0xff]  }
 0x4d1   :  { %20388 = vst [vmem:[#allocation33_spill] sm:$0xff] %v19142_v57  ;;  %v8328_v33 = vadd.f32 %v18926_v36, %v8284_v3  ;;  %v8285_v28 = vmul.f32 %v18900_v51, %v8241_v8  ;;  %v8242_v14 = vadd.f32 %v8194_v31, %v18859_v43  ;;  %10394 = vmatmul.mubr.bf16.gmra.mxu0 %v19103_v46  ;;  %v8358_v43 = vmax.f32 %v8326_v19, 0.0  ;;  %v14328_v19 = vld [vmem:[%s20174_s10 + $0x334] ss:$36 sps:$4 sm:$0xff]  }
 0x4d2   :  { %10507 = vmatmul.mubr.bf16.gmra.mxu1 %v19103_v46  ;;  %v8359_v35 = vmax.f32 %v8327_v24, 0.0  ;;  %v8196_v62 = vpop.f32.mrf.mxu0  ;;  %v19149_v59 = vpop.f32.mrf.mxu1  ;;  %10570 = vmatpush1.bf16.msra.mxu0 %v14302_v22 }
 0x4d3   :  { %20389 = vst [vmem:[#allocation54_spill] sm:$0xff] %v19149_v59  ;;  %10683 = vmatpush1.bf16.msra.mxu1 %v14314_v37  ;;  %v8360_v26 = vmax.f32 %v8328_v33, 0.0  ;;  %v8243_v3 = vadd.f32 %v8196_v62, %v18865_v48  ;;  %10571 = vmatprep.subr.bf16.mxu0 %v14313_v4  ;;  %v8286_v8 = vmul.f32 %v18911_v21, %v8242_v14  ;;  %v14319_v37 = vld [vmem:[%s20174_s10 + $0x32c] ss:$36 sps:$4 sm:$0xff]  }
 0x4d4   :  { %10684 = vmatprep.subr.bf16.mxu1 %v14322_v11  ;;  %v19158_v25 = vpack.c.bf16 %v8359_v35, %v8357_v27  ;;  %v8198_v22 = vpop.f32.mrf.mxu0  ;;  %v19161_v24 = vpop.f32.mrf.mxu1  ;;  %v8329_v48 = vadd.f32 %v18919_v41, %v8285_v28  ;;  %v14317_v14 = vld [vmem:[%s20174_s10 + $0x328] ss:$36 sps:$4 sm:$0xff]   ;;  %v14326_v27 = vld [vmem:[%s20174_s10 + $0x330] ss:$36 sps:$4 sm:$0xff]  }
 0x4d5   :  { %20390 = vst [vmem:[#allocation38_spill] sm:$0xff] %v19161_v24  ;;  %v19169_v31 = vpack.c.bf16 %v8360_v26, %v8358_v43  ;;  %v8287_v62 = vmul.f32 %v18900_v51, %v8243_v3  ;;  %v8244_v4 = vadd.f32 %v8198_v22, %v18871_v13  ;;  %v14325_v13 = vld [vmem:[%s20174_s10 + $0x2e4] ss:$36 sps:$4 sm:$0xff]  }
 0x4d6   :  { %v8202_v11 = vpop.f32.mrf.mxu0  ;;  %v19174_v33 = vpop.f32.mrf.mxu1  ;;  %10572 = vmatpush1.bf16.msra.mxu0 %v14311_v52  ;;  %v8330_v52 = vadd.f32 %v18926_v36, %v8286_v8  ;;  %v8361_v3 = vmax.f32 %v8329_v48, 0.0 }
 0x4d7   :  { %20391 = vst [vmem:[#allocation37_spill] sm:$0xff] %v19174_v33  ;;  %10685 = vmatpush1.bf16.msra.mxu1 %v14320_v20  ;;  %v8331_v35 = vadd.f32 %v18919_v41, %v8287_v62  ;;  %v8245_v28 = vadd.f32 %v8202_v11, %v18874_v45  ;;  %12727 = vmatprep.mubr.msk.bf16.mxu0 %vm9181_vm0, %v19169_v31  ;;  %v14331_v45 = vld [vmem:[%s20174_s10 + $0x2ec] ss:$36 sps:$4 sm:$0xff]  }
 0x4d8   :  { %12735 = vmatprep.mubr.msk.bf16.mxu1 %vm9181_vm0, %v19169_v31  ;;  %v8288_v20 = vmul.f32 %v18911_v21, %v8244_v4  ;;  %v8204_v43 = vpop.f32.mrf.mxu0  ;;  %v19193_v26 = vpop.f32.mrf.mxu1  ;;  %10581 = vmatprep.subr.bf16.mxu0 %v14319_v37  ;;  %v14323_v37 = vld [vmem:[%s20174_s10 + $0x2e0] ss:$36 sps:$4 sm:$0xff]  }
 0x4d9   :  { %20392 = vst [vmem:[#allocation55_spill] sm:$0xff] %v19193_v26  ;;  %10694 = vmatprep.subr.bf16.mxu1 %v14328_v19  ;;  %v8363_v22 = vmax.f32 %v8331_v35, 0.0  ;;  %v8289_v62 = vmul.f32 %v18900_v51, %v8245_v28  ;;  %v8246_v11 = vadd.f32 %v8204_v43, %v18877_v7  ;;  %10404 = vmatmul.mubr.bf16.gmra.mxu0 %v19158_v25  ;;  %v14329_v19 = vld [vmem:[%s20174_s10 + $0x2e8] ss:$36 sps:$4 sm:$0xff]  }
 0x4da   :  { %10517 = vmatmul.mubr.bf16.gmra.mxu1 %v19158_v25  ;;  %v8332_v8 = vadd.f32 %v18926_v36, %v8288_v20  ;;  %v8206_v4 = vpop.f32.mrf.mxu0  ;;  %v19203_v26 = vpop.f32.mrf.mxu1  ;;  %10582 = vmatpush2.bf16.msra.mxu0 %v14317_v14  ;;  %v14334_v14 = vld [vmem:[%s20174_s10 + $0x29c] ss:$36 sps:$4 sm:$0xff]   ;;  %v14337_v28 = vld [vmem:[%s20174_s10 + $0x2a4] ss:$36 sps:$4 sm:$0xff]  }
 0x4db   :  { %20393 = vst [vmem:[#allocation57_spill] sm:$0xff] %v19203_v26  ;;  %10695 = vmatpush2.bf16.msra.mxu1 %v14326_v27  ;;  %v19211_v7 = vpack.c.bf16 %v8363_v22, %v8361_v3  ;;  %v8290_v48 = vmul.f32 %v18911_v21, %v8246_v11  ;;  %v8247_v35 = vadd.f32 %v8206_v4, %v18881_v38  ;;  %v8362_v27 = vmax.f32 %v8330_v52, 0.0  ;;  %v14332_v52 = vld [vmem:[%s20174_s10 + $0x298] ss:$36 sps:$4 sm:$0xff]  }
 0x4dc   :  { %10583 = vmatprep.subr.bf16.mxu0 %v14325_v13  ;;  %v8364_v20 = vmax.f32 %v8332_v8, 0.0  ;;  %v8208_v43 = vpop.f32.mrf.mxu0  ;;  %v19221_v26 = vpop.f32.mrf.mxu1  ;;  %10696 = vmatprep.subr.bf16.mxu1 %v14331_v45  ;;  %v8333_v3 = vadd.f32 %v18919_v41, %v8289_v62  ;;  %v14335_v45 = vld [vmem:[%s20174_s10 + $0x2a0] ss:$36 sps:$4 sm:$0xff]  }
 0x4dd   :  { %20394 = vst [vmem:[#allocation40_spill] sm:$0xff] %v19221_v26  ;;  %v8291_v22 = vmul.f32 %v18900_v51, %v8247_v35  ;;  %v8248_v38 = vadd.f32 %v8208_v43, %v18885_v54  ;;  %v8334_v11 = vadd.f32 %v18926_v36, %v8290_v48 }
 0x4de   :  { %v19226_v13 = vpack.c.bf16 %v8364_v20, %v8362_v27  ;;  %v8212_v4 = vpop.f32.mrf.mxu0  ;;  %v19229_v33 = vpop.f32.mrf.mxu1  ;;  %10584 = vmatpush2.bf16.msra.mxu0 %v14323_v37  ;;  %v14340_v37 = vld [vmem:[%s20174_s10 + $0x254] ss:$36 sps:$4 sm:$0xff]  }
 0x4df   :  { %20395 = vst [vmem:[#allocation39_spill] sm:$0xff] %v19229_v33  ;;  %10697 = vmatpush2.bf16.msra.mxu1 %v14329_v19  ;;  %v8335_v62 = vadd.f32 %v18919_v41, %v8291_v22  ;;  %v8292_v54 = vmul.f32 %v18911_v21, %v8248_v38  ;;  %v8249_v8 = vadd.f32 %v8212_v4, %v18888_v12  ;;  %v14343_v19 = vld [vmem:[%s20174_s10 + $0x25c] ss:$36 sps:$4 sm:$0xff]   ;;  %v8365_v12 = vmax.f32 %v8333_v3, 0.0  ;;  %v14338_v3 = vld [vmem:[%s20174_s10 + $0x250] ss:$36 sps:$4 sm:$0xff]  }
 0x4e0   :  { %10585 = vmatprep.subr.bf16.mxu0 %v14334_v14  ;;  %10698 = vmatprep.subr.bf16.mxu1 %v14337_v28  ;;  %v8214_v48 = vpop.f32.mrf.mxu0  ;;  %v19250_v35 = vpop.f32.mrf.mxu1  ;;  %v14341_v38 = vld [vmem:[%s20174_s10 + $0x258] ss:$36 sps:$4 sm:$0xff]  }
 0x4e1   :  { %12728 = vmatprep.mubr.msk.bf16.mxu0 %vm9181_vm0, %v19226_v13  ;;  %12736 = vmatprep.mubr.msk.bf16.mxu1 %vm9181_vm0, %v19226_v13  ;;  %20396 = vst [vmem:[#allocation41_spill] sm:$0xff] %v19250_v35  ;;  %v8367_v14 = vmax.f32 %v8335_v62, 0.0  ;;  %v8336_v28 = vadd.f32 %v18926_v36, %v8292_v54  ;;  %v8250_v27 = vadd.f32 %v8214_v48, %v18894_v42  ;;  %v8366_v42 = vmax.f32 %v8334_v11, 0.0 }
 0x4e2   :  { %10414 = vmatmul.mubr.bf16.gmra.mxu0 %v19211_v7  ;;  %10527 = vmatmul.mubr.bf16.gmra.mxu1 %v19211_v7  ;;  %v8293_v20 = vmul.f32 %v18900_v51, %v8249_v8  ;;  %v8216_v43 = vpop.f32.mrf.mxu0  ;;  %v19257_v22 = vpop.f32.mrf.mxu1 }
 0x4e3   :  { %20397 = vst [vmem:[#allocation56_spill] sm:$0xff] %v19257_v22  ;;  %10586 = vmatpush2.bf16.msra.mxu0 %v14332_v52  ;;  %10699 = vmatpush2.bf16.msra.mxu1 %v14335_v45  ;;  %v19265_v4 = vpack.c.bf16 %v8367_v14, %v8365_v12  ;;  %v8368_v62 = vmax.f32 %v8336_v28, 0.0  ;;  %v8294_v54 = vmul.f32 %v18911_v21, %v8250_v27  ;;  %v20401_v28 = vmov 0  }
 0x4e4   :  { %10587 = vmatprep.subr.bf16.mxu0 %v14340_v37  ;;  %10700 = vmatprep.subr.bf16.mxu1 %v14343_v19  ;;  %v8251_v8 = vadd.f32 %v8216_v43, %v18902_v44  ;;  %v8218_v52 = vpop.f32.mrf.mxu0  ;;  %v19269_v45 = vpop.f32.mrf.mxu1  ;;  %v8337_v35 = vadd.f32 %v18919_v41, %v8293_v20 }
 0x4e5   :  { %20398 = vst [vmem:[#allocation58_spill] sm:$0xff] %v19269_v45  ;;  %v19271_v48 = vpack.c.bf16 %v8368_v62, %v8366_v42  ;;  %v8252_v22 = vadd.f32 %v8218_v52, %v18913_v63  ;;  %v8338_v37 = vadd.f32 %v18926_v36, %v8294_v54 }
 0x4e6   :  { %v8295_v11 = vmul.f32 %v18900_v51, %v8251_v8  ;;  %v19276_v12 = vpop.f32.mrf.mxu0  ;;  %v19278_v14 = vpop.f32.mrf.mxu1 }
 0x4e7   :  { %20399 = vst [vmem:[#allocation59_spill] sm:$0xff] %v19278_v14  ;;  %10588 = vmatpush2.bf16.msra.mxu0 %v14338_v3  ;;  %10701 = vmatpush2.bf16.msra.mxu1 %v14341_v38  ;;  %v8296_v44 = vmul.f32 %v18911_v21, %v8252_v22  ;;  %v8369_v21 = vmax.f32 %v8337_v35, 0.0 }
 0x4e8   :  { %12729 = vmatprep.mubr.msk.bf16.mxu0 %vm9181_vm0, %v19271_v48  ;;  %12737 = vmatprep.mubr.msk.bf16.mxu1 %vm9181_vm0, %v19271_v48  ;;  %v8339_v63 = vadd.f32 %v18919_v41, %v8295_v11  ;;  %v19287_v19 = vpop.f32.mrf.mxu0  ;;  %v19289_v51 = vpop.f32.mrf.mxu1  ;;  %v8370_v41 = vmax.f32 %v8338_v37, 0.0 }
 0x4e9   :  { %20400 = vst [vmem:[#allocation22_spill] sm:$0xff] %v19289_v51  ;;  %10783 = vmatprep.subr.bf16.mxu0 %v20401_v28  ;;  %13119 = vmatprep.subr.bf16.mxu1 %v20401_v28  ;;  %v8340_v27 = vadd.f32 %v18926_v36, %v8296_v44 }
 0x4ea   :  { %10424 = vmatmul.mubr.bf16.gmra.mxu0 %v19265_v4  ;;  %10537 = vmatmul.mubr.bf16.gmra.mxu1 %v19265_v4  ;;  %v8371_v20 = vmax.f32 %v8339_v63, 0.0  ;;  %v19296_v43 = vpop.f32.mrf.mxu0  ;;  %v19298_v22 = vpop.f32.mrf.mxu1 }
 0x4eb   :  { %20402 = vst [vmem:[#allocation11_spill] sm:$0xff] %v19298_v22  ;;  %v8372_v3 = vmax.f32 %v8340_v27, 0.0 }
 0x4ec   :  { %v19300_v38 = vpack.c.bf16 %v8371_v20, %v8369_v21  ;;  %v19302_v42 = vpop.f32.mrf.mxu0  ;;  %v19304_v62 = vpop.f32.mrf.mxu1  ;;  %v14344_v20 = vld [vmem:[%s20174_s10 + $0x218] ss:$36 sps:$4 sm:$0xff]  }
 0x4ed   :  { %20403 = vst [vmem:[#allocation42_spill] sm:$0xff] %v19304_v62  ;;  %v19306_v54 = vpack.c.bf16 %v8372_v3, %v8370_v41 }
 0x4ee   :  { %v19308_v36 = vpop.f32.mrf.mxu0  ;;  %v19310_v8 = vpop.f32.mrf.mxu1 }
 0x4ef   :  { %20404 = vst [vmem:[#allocation44_spill] sm:$0xff] %v19310_v8  ;;  %12730 = vmatprep.mubr.msk.bf16.mxu0 %vm9181_vm0, %v19306_v54  ;;  %12738 = vmatprep.mubr.msk.bf16.mxu1 %vm9181_vm0, %v19306_v54 }
 0x4f0   :  { %v19316_v35 = vpop.f32.mrf.mxu0  ;;  %v19318_v52 = vpop.f32.mrf.mxu1 }
 0x4f1   :  { %20405 = vst [vmem:[#allocation43_spill] sm:$0xff] %v19318_v52 }
 0x4f2   :  { %10434 = vmatmul.mubr.bf16.gmra.mxu0 %v19300_v38  ;;  %10547 = vmatmul.mubr.bf16.gmra.mxu1 %v19300_v38  ;;  %v19326_v11 = vpop.f32.mrf.mxu0  ;;  %v19328_v37 = vpop.f32.mrf.mxu1 }
 0x4f3   :  { %12739 = vmatprep.mubr.msk.bf16.mxu0 %vm9181_vm0, %v18953_v18  ;;  %12747 = vmatprep.mubr.msk.bf16.mxu1 %vm9181_vm0, %v18953_v18  ;;  %20406 = vst [vmem:[#allocation61_spill] sm:$0xff] %v19328_v37  ;;  %v14345_v37 = vld [vmem:[%s20174_s10 + $0x1d0] ss:$36 sps:$4 sm:$0xff]  }
 0x4f4   :  { %v19330_v44 = vpop.f32.mrf.mxu0  ;;  %v19332_v63 = vpop.f32.mrf.mxu1 }
 0x4f5   :  { %20407 = vst [vmem:[#allocation45_spill] sm:$0xff] %v19332_v63 }
 0x4f6   :  { %v19334_v27 = vpop.f32.mrf.mxu0  ;;  %v19336_v21 = vpop.f32.mrf.mxu1 }
 0x4f7   :  { %20408 = vst [vmem:[#allocation60_spill] sm:$0xff] %v19336_v21 }
 0x4f8   :  { %v19341_v41 = vpop.f32.mrf.mxu0  ;;  %v19343_v3 = vpop.f32.mrf.mxu1 }
 0x4f9   :  { %20409 = vst [vmem:[#allocation63_spill] sm:$0xff] %v19343_v3 }
 0x4fa   :  { %10590 = vmatmul.mubr.bf16.vlgmr.msra.gmra.mxu0 %v18947_v32  ;;  %10703 = vmatmul.mubr.bf16.vlgmr.msra.gmra.mxu1 %v18947_v32  ;;  %v19351_v63 = vpop.f32.mrf.mxu0  ;;  %v19353_v21 = vpop.f32.mrf.mxu1 }
 0x4fb   :  { %12740 = vmatprep.mubr.msk.bf16.mxu0 %vm9181_vm0, %v19007_v30  ;;  %12748 = vmatprep.mubr.msk.bf16.mxu1 %vm9181_vm0, %v19007_v30  ;;  %20410 = vst [vmem:[#allocation46_spill] sm:$0xff] %v19353_v21  ;;  %v14346_v21 = vld [vmem:[%s20174_s10 + $0x188] ss:$36 sps:$4 sm:$0xff]  }
 0x4fc   :  { %10784 = vmatpush1.bf16.msra.mxu0 %v14344_v20  ;;  %13131 = vmatpush1.bf16.msra.mxu1 %v14344_v20  ;;  %v19358_v3 = vpop.f32.mrf.mxu0  ;;  %v19360_v52 = vpop.f32.mrf.mxu1 }
 0x4fd   :  { %20411 = vst [vmem:[#allocation62_spill] sm:$0xff] %v19360_v52  ;;  %10785 = vmatprep.subr.bf16.mxu0 %v20401_v28  ;;  %13120 = vmatprep.subr.bf16.mxu1 %v20401_v28 }
 0x4fe   :  { %v19364_v8 = vpop.f32.mrf.mxu0  ;;  %v19366_v62 = vpop.f32.mrf.mxu1 }
 0x4ff   :  { %20412 = vst [vmem:[#allocation28_spill] sm:$0xff] %v19366_v62 }
 0x500   :  { %10786 = vmatpush1.bf16.msra.mxu0 %v14345_v37  ;;  %13132 = vmatpush1.bf16.msra.mxu1 %v14345_v37  ;;  %v19371_v22 = vpop.f32.mrf.mxu0  ;;  %v19373_v20 = vpop.f32.mrf.mxu1 }
 0x501   :  { %20413 = vst [vmem:[#allocation26_spill] sm:$0xff] %v19373_v20  ;;  %10787 = vmatprep.subr.bf16.mxu0 %v20401_v28  ;;  %13121 = vmatprep.subr.bf16.mxu1 %v20401_v28  ;;  %v14347_v20 = vld [vmem:[%s20174_s10 + $0x140] ss:$36 sps:$4 sm:$0xff]  }
 0x502   :  { %10600 = vmatmul.mubr.bf16.gmra.mxu0 %v19002_v1  ;;  %10713 = vmatmul.mubr.bf16.gmra.mxu1 %v19002_v1  ;;  %v19383_v62 = vpop.f32.mrf.mxu0  ;;  %v19385_v37 = vpop.f32.mrf.mxu1 }
 0x503   :  { %12741 = vmatprep.mubr.msk.bf16.mxu0 %vm9181_vm0, %v19064_v61  ;;  %12749 = vmatprep.mubr.msk.bf16.mxu1 %vm9181_vm0, %v19064_v61  ;;  %20414 = vst [vmem:[#allocation48_spill] sm:$0xff] %v19385_v37  ;;  %v14348_v37 = vld [vmem:[%s20174_s10 + $0xf8] ss:$36 sps:$4 sm:$0xff]  }
 0x504   :  { %10788 = vmatpush1.bf16.msra.mxu0 %v14346_v21  ;;  %13133 = vmatpush1.bf16.msra.mxu1 %v14346_v21  ;;  %v19390_v52 = vpop.f32.mrf.mxu0  ;;  %v19392_v51 = vpop.f32.mrf.mxu1 }
 0x505   :  { %20415 = vst [vmem:[#allocation47_spill] sm:$0xff] %v19392_v51  ;;  %10789 = vmatprep.subr.bf16.mxu0 %v20401_v28  ;;  %13122 = vmatprep.subr.bf16.mxu1 %v20401_v28 }
 0x506   :  { %v19396_v14 = vpop.f32.mrf.mxu0  ;;  %v19398_v45 = vpop.f32.mrf.mxu1 }
 0x507   :  { %20416 = vst [vmem:[#allocation49_spill] sm:$0xff] %v19398_v45 }
 0x508   :  { %10790 = vmatpush1.bf16.msra.mxu0 %v14347_v20  ;;  %13134 = vmatpush1.bf16.msra.mxu1 %v14347_v20  ;;  %v19403_v33 = vpop.f32.mrf.mxu0  ;;  %v19405_v21 = vpop.f32.mrf.mxu1 }
 0x509   :  { %20417 = vst [vmem:[#allocation64_spill] sm:$0xff] %v19405_v21  ;;  %10791 = vmatprep.subr.bf16.mxu0 %v20401_v28  ;;  %13123 = vmatprep.subr.bf16.mxu1 %v20401_v28  ;;  %v14349_v21 = vld [vmem:[%s20174_s10 + $0xb0] ss:$36 sps:$4 sm:$0xff]  }
 0x50a   :  { %10610 = vmatmul.mubr.bf16.gmra.mxu0 %v19055_v34  ;;  %10723 = vmatmul.mubr.bf16.gmra.mxu1 %v19055_v34  ;;  %v19415_v45 = vpop.f32.mrf.mxu0  ;;  %v19417_v20 = vpop.f32.mrf.mxu1 }
 0x50b   :  { %12742 = vmatprep.mubr.msk.bf16.mxu0 %vm9181_vm0, %v19115_v60  ;;  %12750 = vmatprep.mubr.msk.bf16.mxu1 %vm9181_vm0, %v19115_v60  ;;  %20418 = vst [vmem:[#allocation29_spill] sm:$0xff] %v19417_v20  ;;  %v14350_v20 = vld [vmem:[%s20174_s10 + $0x68] ss:$36 sps:$4 sm:$0xff]  }
 0x50c   :  { %10792 = vmatpush1.bf16.msra.mxu0 %v14348_v37  ;;  %13135 = vmatpush1.bf16.msra.mxu1 %v14348_v37  ;;  %v19422_v51 = vpop.f32.mrf.mxu0  ;;  %v19424_v26 = vpop.f32.mrf.mxu1 }
 0x50d   :  { %20419 = vst [vmem:[#allocation30_spill] sm:$0xff] %v19422_v51  ;;  %20420 = vst [vmem:[#allocation66_spill] sm:$0xff] %v19424_v26  ;;  %10793 = vmatprep.subr.bf16.mxu0 %v20401_v28  ;;  %13124 = vmatprep.subr.bf16.mxu1 %v20401_v28 }
 0x50e   :  { %v19428_v24 = vpop.f32.mrf.mxu0  ;;  %v19430_v59 = vpop.f32.mrf.mxu1 }
 0x50f   :  { %20421 = vst [vmem:[#allocation50_spill] sm:$0xff] %v19428_v24  ;;  %20422 = vst [vmem:[#allocation65_spill] sm:$0xff] %v19430_v59 }
 0x510   :  { %10794 = vmatpush1.bf16.msra.mxu0 %v14349_v21  ;;  %13136 = vmatpush1.bf16.msra.mxu1 %v14349_v21  ;;  %v19435_v57 = vpop.f32.mrf.mxu0  ;;  %v19437_v37 = vpop.f32.mrf.mxu1 }
 0x511   :  { %20423 = vst [vmem:[#allocation68_spill] sm:$0xff] %v19435_v57  ;;  %20424 = vst [vmem:[#allocation51_spill] sm:$0xff] %v19437_v37  ;;  %10795 = vmatprep.subr.bf16.mxu0 %v20401_v28  ;;  %13125 = vmatprep.subr.bf16.mxu1 %v20401_v28  ;;  %v14351_v37 = vld [vmem:[%s20174_s10 + $0x20] ss:$36 sps:$4 sm:$0xff]  }
 0x512   :  { %10620 = vmatmul.mubr.bf16.gmra.mxu0 %v19103_v46  ;;  %10733 = vmatmul.mubr.bf16.gmra.mxu1 %v19103_v46  ;;  %v19447_v59 = vpop.f32.mrf.mxu0  ;;  %v19449_v21 = vpop.f32.mrf.mxu1 }
 0x513   :  { %12743 = vmatprep.mubr.msk.bf16.mxu0 %vm9181_vm0, %v19169_v31  ;;  %12751 = vmatprep.mubr.msk.bf16.mxu1 %vm9181_vm0, %v19169_v31  ;;  %20425 = vst [vmem:[#allocation67_spill] sm:$0xff] %v19447_v59  ;;  %20426 = vst [vmem:[#allocation52_spill] sm:$0xff] %v19449_v21  ;;  %v14352_v21 = vld [vmem:[%s20174_s10 + $0x338] ss:$36 sps:$4 sm:$0xff]  }
 0x514   :  { %10796 = vmatpush1.bf16.msra.mxu0 %v14350_v20  ;;  %13137 = vmatpush1.bf16.msra.mxu1 %v14350_v20  ;;  %v19454_v26 = vpop.f32.mrf.mxu0  ;;  %v19456_v57 = vpop.f32.mrf.mxu1 }
 0x515   :  { %20427 = vst [vmem:[#allocation16_spill] sm:$0xff] %v19454_v26  ;;  %20428 = vst [vmem:[#allocation34_spill] sm:$0xff] %v19456_v57  ;;  %10797 = vmatprep.subr.bf16.mxu0 %v20401_v28  ;;  %13126 = vmatprep.subr.bf16.mxu1 %v20401_v28 }
 0x516   :  { %v19460_v24 = vpop.f32.mrf.mxu0  ;;  %v19462_v51 = vpop.f32.mrf.mxu1 }
 0x517   :  { %20429 = vst [vmem:[#allocation35_spill] sm:$0xff] %v19460_v24  ;;  %20430 = vst [vmem:[#allocation9_spill] sm:$0xff] %v19462_v51 }
 0x518   :  { %10798 = vmatpush1.bf16.msra.mxu0 %v14351_v37  ;;  %13138 = vmatpush1.bf16.msra.mxu1 %v14351_v37  ;;  %v19467_v59 = vpop.f32.mrf.mxu0  ;;  %v19469_v20 = vpop.f32.mrf.mxu1 }
 0x519   :  { %20431 = vst [vmem:[#allocation36_spill] sm:$0xff] %v19467_v59  ;;  %20432 = vst [vmem:[#allocation19_spill] sm:$0xff] %v19469_v20  ;;  %10807 = vmatprep.subr.bf16.mxu0 %v20401_v28  ;;  %13127 = vmatprep.subr.bf16.mxu1 %v20401_v28  ;;  %v14353_v20 = vld [vmem:[%s20174_s10 + $0x2f0] ss:$36 sps:$4 sm:$0xff]  }
 0x51a   :  { %10630 = vmatmul.mubr.bf16.gmra.mxu0 %v19158_v25  ;;  %10743 = vmatmul.mubr.bf16.gmra.mxu1 %v19158_v25  ;;  %v19479_v51 = vpop.f32.mrf.mxu0  ;;  %v19481_v37 = vpop.f32.mrf.mxu1 }
 0x51b   :  { %12744 = vmatprep.mubr.msk.bf16.mxu0 %vm9181_vm0, %v19226_v13  ;;  %12752 = vmatprep.mubr.msk.bf16.mxu1 %vm9181_vm0, %v19226_v13  ;;  %20433 = vst [vmem:[#allocation7_spill] sm:$0xff] %v19479_v51  ;;  %20434 = vst [vmem:[#allocation18_spill] sm:$0xff] %v19481_v37 }
 0x51c   :  { %10808 = vmatpush2.bf16.msra.mxu0 %v14352_v21  ;;  %13139 = vmatpush2.bf16.msra.mxu1 %v14352_v21  ;;  %v19486_v57 = vpop.f32.mrf.mxu0  ;;  %v19488_v59 = vpop.f32.mrf.mxu1  ;;  %v14354_v21 = vld [vmem:[%s20174_s10 + $0x2a8] ss:$36 sps:$4 sm:$0xff]  }
 0x51d   :  { %20435 = vst [vmem:[#allocation12_spill] sm:$0xff] %v19486_v57  ;;  %20436 = vst [vmem:[#allocation20_spill] sm:$0xff] %v19488_v59  ;;  %10809 = vmatprep.subr.bf16.mxu0 %v20401_v28  ;;  %13128 = vmatprep.subr.bf16.mxu1 %v20401_v28 }
 0x51e   :  { %v19492_v24 = vpop.f32.mrf.mxu0  ;;  %v19494_v26 = vpop.f32.mrf.mxu1 }
 0x51f   :  { %20437 = vst [vmem:[#allocation13_spill] sm:$0xff] %v19492_v24  ;;  %20438 = vst [vmem:[#allocation10_spill] sm:$0xff] %v19494_v26 }
 0x520   :  { %10810 = vmatpush2.bf16.msra.mxu0 %v14353_v20  ;;  %13140 = vmatpush2.bf16.msra.mxu1 %v14353_v20  ;;  %v19499_v37 = vpop.f32.mrf.mxu0  ;;  %v19501_v51 = vpop.f32.mrf.mxu1 }
 0x521   :  { %20439 = vst [vmem:[#allocation8_spill] sm:$0xff] %v19499_v37  ;;  %20440 = vst [vmem:[#allocation25_spill] sm:$0xff] %v19501_v51  ;;  %10811 = vmatprep.subr.bf16.mxu0 %v20401_v28  ;;  %13129 = vmatprep.subr.bf16.mxu1 %v20401_v28  ;;  %v14355_v51 = vld [vmem:[%s20174_s10 + $0x260] ss:$36 sps:$4 sm:$0xff]  }
 0x522   :  { %10640 = vmatmul.mubr.bf16.gmra.mxu0 %v19211_v7  ;;  %10753 = vmatmul.mubr.bf16.gmra.mxu1 %v19211_v7  ;;  %v19511_v20 = vpop.f32.mrf.mxu0  ;;  %v19513_v26 = vpop.f32.mrf.mxu1 }
 0x523   :  { %12745 = vmatprep.mubr.msk.bf16.mxu0 %vm9181_vm0, %v19271_v48  ;;  %12753 = vmatprep.mubr.msk.bf16.mxu1 %vm9181_vm0, %v19271_v48  ;;  %20441 = vst [vmem:[#allocation17_spill] sm:$0xff] %v19513_v26 }
 0x524   :  { %10812 = vmatpush2.bf16.msra.mxu0 %v14354_v21  ;;  %13141 = vmatpush2.bf16.msra.mxu1 %v14354_v21  ;;  %v19518_v59 = vpop.f32.mrf.mxu0  ;;  %v19520_v37 = vpop.f32.mrf.mxu1 }
 0x525   :  { %20442 = vst [vmem:[#allocation15_spill] sm:$0xff] %v19518_v59  ;;  %20443 = vst [vmem:[#allocation27_spill] sm:$0xff] %v19520_v37  ;;  %10813 = vmatprep.subr.bf16.mxu0 %v20401_v28  ;;  %13130 = vmatprep.subr.bf16.mxu1 %v20401_v28 }
 0x526   :  { %v19524_v24 = vpop.f32.mrf.mxu0  ;;  %v9694_v57 = vpop.f32.mrf.mxu1 }
 0x527   :  { %20444 = vst [vmem:[#allocation31_spill] sm:$0xff] %v19524_v24 }
 0x528   :  { %10814 = vmatpush2.bf16.msra.mxu0 %v14355_v51  ;;  %13142 = vmatpush2.bf16.msra.mxu1 %v14355_v51  ;;  %v19526_v26 = vpop.f32.mrf.mxu0  ;;  %v19528_v21 = vpop.f32.mrf.mxu1 }
 0x529   :  { %20445 = vst [vmem:[#allocation69_spill] sm:$0xff] %v19526_v26  ;;  %20446 = vst [vmem:[#allocation70_spill] sm:$0xff] %v19528_v21 }
 0x52a   :  { %10650 = vmatmul.mubr.bf16.gmra.mxu0 %v19265_v4  ;;  %10763 = vmatmul.mubr.bf16.gmra.mxu1 %v19265_v4  ;;  %v19536_v28 = vpop.f32.mrf.mxu0  ;;  %v9697_v37 = vpop.f32.mrf.mxu1 }
 0x52b   :  { %12746 = vmatprep.mubr.msk.bf16.mxu0 %vm9181_vm0, %v19306_v54  ;;  %12754 = vmatprep.mubr.msk.bf16.mxu1 %vm9181_vm0, %v19306_v54  ;;  %20447 = vst [vmem:[#allocation71_spill] sm:$0xff] %v19536_v28 }
 0x52c   :  { %v19538_v57 = vpop.f32.mrf.mxu0  ;;  %v19540_v51 = vpop.f32.mrf.mxu1 }
 0x52d   :  { %20448 = vst [vmem:[#allocation72_spill] sm:$0xff] %v19538_v57  ;;  %20449 = vst [vmem:[#allocation73_spill] sm:$0xff] %v19540_v51 }
 0x52e   :  { %v19542_v26 = vpop.f32.mrf.mxu0  ;;  %v9702_v21 = vpop.f32.mrf.mxu1 }
 0x52f   :  { %20450 = vst [vmem:[#allocation74_spill] sm:$0xff] %v19542_v26 }
 0x530   :  { %v19544_v24 = vpop.f32.mrf.mxu0  ;;  %v19546_v59 = vpop.f32.mrf.mxu1 }
 0x531   :  { %20451 = vst [vmem:[#allocation75_spill] sm:$0xff] %v19544_v24  ;;  %20452 = vst [vmem:[#allocation76_spill] sm:$0xff] %v19546_v59 }
 0x532   :  { %10660 = vmatmul.mubr.bf16.gmra.mxu0 %v19300_v38  ;;  %10773 = vmatmul.mubr.bf16.gmra.mxu1 %v19300_v38  ;;  %v19554_v37 = vpop.f32.mrf.mxu0  ;;  %v9705_v51 = vpop.f32.mrf.mxu1 }
 0x533   :  { %12755 = vmatprep.mubr.msk.bf16.mxu0 %vm9181_vm0, %v18953_v18  ;;  %12761 = vmatprep.mubr.msk.bf16.mxu1 %vm9181_vm0, %v19271_v48 }
 0x534   :  { %v19556_v57 = vpop.f32.mrf.mxu0  ;;  %v19558_v21 = vpop.f32.mrf.mxu1 }
 0x535   :  { %20453 = vst [vmem:[#allocation77_spill] sm:$0xff] %v19556_v57  ;;  %20454 = vst [vmem:[#allocation78_spill] sm:$0xff] %v19558_v21 }
 0x536   :  { %v19560_v24 = vpop.f32.mrf.mxu0  ;;  %v9710_v59 = vpop.f32.mrf.mxu1 }
 0x537   :  { %20455 = vst [vmem:[#allocation79_spill] sm:$0xff] %v19560_v24 }
 0x538   :  { %v19562_v26 = vpop.f32.mrf.mxu0  ;;  %v19564_v28 = vpop.f32.mrf.mxu1 }
 0x539   :  { %20456 = vst [vmem:[#allocation80_spill] sm:$0xff] %v19562_v26  ;;  %20457 = vst [vmem:[#allocation81_spill] sm:$0xff] %v19564_v28 }
 0x53a   :  { %10816 = vmatmul.mubr.bf16.vlgmr.msra.gmra.mxu0 %v18947_v32  ;;  %10864 = vmatmul.mubr.bf16.vlgmr.msra.gmra.mxu1 %v19265_v4  ;;  %v19572_v18 = vpop.f32.mrf.mxu0  ;;  %v9713_v48 = vpop.f32.mrf.mxu1 }
 0x53b   :  { %12756 = vmatprep.mubr.msk.bf16.mxu0 %vm9181_vm0, %v19007_v30  ;;  %12762 = vmatprep.mubr.msk.bf16.mxu1 %vm9181_vm0, %v19306_v54  ;;  %20458 = vst [vmem:[#allocation82_spill] sm:$0xff] %v19572_v18 }
 0x53c   :  { %v19574_v51 = vpop.f32.mrf.mxu0  ;;  %v19576_v59 = vpop.f32.mrf.mxu1 }
 0x53d   :  { %20459 = vst [vmem:[#allocation83_spill] sm:$0xff] %v19574_v51  ;;  %20460 = vst [vmem:[#allocation84_spill] sm:$0xff] %v19576_v59 }
 0x53e   :  { %v19578_v21 = vpop.f32.mrf.mxu0  ;;  %v9718_v28 = vpop.f32.mrf.mxu1 }
 0x53f   :  { %20461 = vst [vmem:[#allocation85_spill] sm:$0xff] %v19578_v21 }
 0x540   :  { %v19580_v26 = vpop.f32.mrf.mxu0  ;;  %v19582_v32 = vpop.f32.mrf.mxu1 }
 0x541   :  { %20462 = vst [vmem:[#allocation86_spill] sm:$0xff] %v19580_v26  ;;  %20463 = vst [vmem:[#allocation87_spill] sm:$0xff] %v19582_v32 }
 0x542   :  { %10824 = vmatmul.mubr.bf16.gmra.mxu0 %v19002_v1  ;;  %10872 = vmatmul.mubr.bf16.gmra.mxu1 %v19300_v38  ;;  %v19588_v30 = vpop.f32.mrf.mxu0  ;;  %v9721_v4 = vpop.f32.mrf.mxu1 }
 0x543   :  { %12757 = vmatprep.mubr.msk.bf16.mxu0 %vm9181_vm0, %v19064_v61  ;;  %20464 = vst [vmem:[#allocation88_spill] sm:$0xff] %v19588_v30 }
 0x544   :  { %v19590_v54 = vpop.f32.mrf.mxu0  ;;  %v19592_v48 = vpop.f32.mrf.mxu1 }
 0x545   :  { %20465 = vst [vmem:[#allocation89_spill] sm:$0xff] %v19590_v54  ;;  %20466 = vst [vmem:[#allocation90_spill] sm:$0xff] %v19592_v48 }
 0x546   :  { %v19594_v59 = vpop.f32.mrf.mxu0  ;;  %v9726_v28 = vpop.f32.mrf.mxu1 }
 0x547   :  { %20467 = vst [vmem:[#allocation91_spill] sm:$0xff] %v19594_v59 }
 0x548   :  { %v19596_v26 = vpop.f32.mrf.mxu0  ;;  %v19598_v32 = vpop.f32.mrf.mxu1 }
 0x549   :  { %20468 = vst [vmem:[#allocation92_spill] sm:$0xff] %v19596_v26  ;;  %20469 = vst [vmem:[#allocation93_spill] sm:$0xff] %v19598_v32 }
 0x54a   :  { %10832 = vmatmul.mubr.bf16.gmra.mxu0 %v19055_v34  ;;  %v19603_v1 = vpop.f32.mrf.mxu0  ;;  %v9729_v61 = vpop.f32.mrf.mxu1 }
 0x54b   :  { %12758 = vmatprep.mubr.msk.bf16.mxu0 %vm9181_vm0, %v19115_v60  ;;  %20470 = vst [vmem:[#allocation94_spill] sm:$0xff] %v19603_v1 }
 0x54c   :  { %v19605_v38 = vpop.f32.mrf.mxu0  ;;  %v19607_v4 = vpop.f32.mrf.mxu1 }
 0x54d   :  { %20471 = vst [vmem:[#allocation95_spill] sm:$0xff] %v19605_v38  ;;  %20472 = vst [vmem:[#allocation96_spill] sm:$0xff] %v19607_v4 }
 0x54e   :  { %v19609_v48 = vpop.f32.mrf.mxu0  ;;  %v9734_v59 = vpop.f32.mrf.mxu1 }
 0x54f   :  { %20473 = vst [vmem:[#allocation97_spill] sm:$0xff] %v19609_v48 }
 0x550   :  { %v19611_v28 = vpop.f32.mrf.mxu0  ;;  %v19613_v26 = vpop.f32.mrf.mxu1 }
 0x551   :  { %20474 = vst [vmem:[#allocation98_spill] sm:$0xff] %v19611_v28  ;;  %20475 = vst [vmem:[#allocation99_spill] sm:$0xff] %v19613_v26 }
 0x552   :  { %10840 = vmatmul.mubr.bf16.gmra.mxu0 %v19103_v46  ;;  %v19618_v34 = vpop.f32.mrf.mxu0  ;;  %v9737_v60 = vpop.f32.mrf.mxu1 }
 0x553   :  { %12759 = vmatprep.mubr.msk.bf16.mxu0 %vm9181_vm0, %v19169_v31  ;;  %20476 = vst [vmem:[#allocation100_spill] sm:$0xff] %v19618_v34 }
 0x554   :  { %v19620_v61 = vpop.f32.mrf.mxu1  ;;  %v19622_v32 = vpop.f32.mrf.mxu0 }
 0x555   :  { %20477 = vst [vmem:[#allocation101_spill] sm:$0xff] %v19620_v61  ;;  %20478 = vst [vmem:[#allocation102_spill] sm:$0xff] %v19622_v32 }
 0x556   :  { %v9742_v4 = vpop.f32.mrf.mxu1  ;;  %v19627_v59 = vpop.f32.mrf.mxu0 }
 0x557   :  { %20480 = vst [vmem:[#allocation104_spill] sm:$0xff] %v19627_v59 }
 0x558   :  { %v19624_v38 = vpop.f32.mrf.mxu1  ;;  %v19633_v31 = vpop.f32.mrf.mxu0 }
 0x559   :  { %20479 = vst [vmem:[#allocation103_spill] sm:$0xff] %v19624_v38  ;;  %20482 = vst [vmem:[#allocation106_spill] sm:$0xff] %v19633_v31 }
 0x55a   :  { %10848 = vmatmul.mubr.bf16.gmra.mxu0 %v19158_v25  ;;  %v9745_v46 = vpop.f32.mrf.mxu1  ;;  %v19638_v4 = vpop.f32.mrf.mxu0 }
 0x55b   :  { %12760 = vmatprep.mubr.msk.bf16.mxu0 %vm9181_vm0, %v19226_v13  ;;  %20484 = vst [vmem:[#allocation108_spill] sm:$0xff] %v19638_v4  ;;  %v19651_v46 = vld [vmem:[%s20176_s12] sm:$0xff] }
 0x55c   :  { %v19631_v26 = vpop.f32.mrf.mxu1  ;;  %v19640_v61 = vpop.f32.mrf.mxu0  ;;  %v19681_v28 = vrot.slane %v19651_v46, %v20383_v39 }
 0x55d   :  { %20481 = vst [vmem:[#allocation105_spill] sm:$0xff] %v19631_v26  ;;  %20485 = vst [vmem:[#allocation109_spill] sm:$0xff] %v19640_v61  ;;  %v19663_v26 = vrot.slane %v19651_v46, %v20382_v2 }
 0x55e   :  { %v9750_v60 = vpop.f32.mrf.mxu1  ;;  %v19642_v25 = vpop.f32.mrf.mxu0 }
 0x55f   :  { %20486 = vst [vmem:[#allocation110_spill] sm:$0xff] %v19642_v25  ;;  %v20489_v60 = vld [vmem:[#allocation24_spill] sm:$0xff] }
 0x560   :  { %v19635_v34 = vpop.f32.mrf.mxu1  ;;  %v19644_v59 = vpop.f32.mrf.mxu0 }
 0x561   :  { %20483 = vst [vmem:[#allocation107_spill] sm:$0xff] %v19635_v34  ;;  %20487 = vst [vmem:[#allocation111_spill] sm:$0xff] %v19644_v59  ;;  %v20491_v59 = vld [vmem:[#allocation14_spill] sm:$0xff] }
 0x562   :  { %10856 = vmatmul.mubr.bf16.gmra.mxu0 %v19211_v7  ;;  %v9753_v38 = vpop.f32.mrf.mxu1  ;;  %v19646_v13 = vpop.f32.mrf.mxu0  ;;  %v19656_v7 = vld [vmem:[%s20177_s13] sm:$0xff] }
 0x563   :  { %20488 = vst [vmem:[#allocation112_spill] sm:$0xff] %v19646_v13  ;;  %v10898_v38 = vsub.s32 3, %v20489_v60  ;;  %v19667_v13 = vrot.slane %v19651_v46, %v20491_v59  ;;  %v19671_v61 = vrot.slane %v19656_v7, %v20382_v2  ;;  %v19675_v31 = vrot.slane %v19656_v7, %v20491_v59 }
 0x564   :  { %v19659_v34 = vpop.f32.mrf.mxu0  ;;  %v19688_v2 = vrot.slane %v19656_v7, %v20383_v39 }
 0x565   :  { %20490 = vst [vmem:[#allocation24_spill] sm:$0xff] %v19659_v34  ;;  %v19684_v48 = vrot.slane %v19651_v46, %v10898_v38  ;;  %v19691_v59 = vrot.slane %v19656_v7, %v10898_v38 }
 0x578   :  { %v10365_v25 = vpop.f32.mrf.mxu0  ;;  %v10478_v4 = vpop.f32.mrf.mxu1 }
 0x579   :  { %v10366_v34 = vadd.f32 %v10365_v25, %v18896_v29  ;;  %v10479_v32 = vadd.f32 %v10478_v4, %v19276_v12 }
 0x57a   :  { %v10367_v1 = vpop.f32.mrf.mxu0  ;;  %v10480_v54 = vpop.f32.mrf.mxu1 }
 0x57b   :  { %v10929_v29 = vmul.f32 %v19663_v26, %v10366_v34  ;;  %v10931_v12 = vmul.f32 %v19667_v13, %v10479_v32  ;;  %v10368_v4 = vadd.f32 %v10367_v1, %v18907_v15  ;;  %v10481_v25 = vadd.f32 %v10480_v54, %v19287_v19 }
 0x57c   :  { %v10369_v30 = vpop.f32.mrf.mxu0  ;;  %v10482_v21 = vpop.f32.mrf.mxu1 }
 0x57d   :  { %v11122_v51 = vadd.f32 %v19671_v61, %v10929_v29  ;;  %v11124_v18 = vadd.f32 %v19675_v31, %v10931_v12  ;;  %v10930_v39 = vmul.f32 %v19681_v28, %v10368_v4  ;;  %v10932_v24 = vmul.f32 %v19684_v48, %v10481_v25 }
 0x57e   :  { %v10370_v38 = vadd.f32 %v10369_v30, %v18915_v5  ;;  %v10483_v34 = vadd.f32 %v10482_v21, %v19296_v43  ;;  %v10371_v57 = vpop.f32.mrf.mxu0  ;;  %v10484_v32 = vpop.f32.mrf.mxu1 }
 0x57f   :  { %11266 = vst [vmem:[#allocation4] sm:$0xff] %v11122_v51  ;;  %11268 = vst [vmem:[#allocation4 + $0x10] sm:$0xff] %v11124_v18  ;;  %v11123_v15 = vadd.f32 %v19688_v2, %v10930_v39  ;;  %v11125_v19 = vadd.f32 %v19691_v59, %v10932_v24  ;;  %v10372_v54 = vadd.f32 %v10371_v57, %v18922_v56 }
 0x580   :  { %v10485_v1 = vadd.f32 %v10484_v32, %v19302_v42  ;;  %v10938_v29 = vmul.f32 %v19663_v26, %v10370_v38  ;;  %v10940_v12 = vmul.f32 %v19667_v13, %v10483_v34  ;;  %v10375_v4 = vpop.f32.mrf.mxu0  ;;  %v10488_v5 = vpop.f32.mrf.mxu1 }
 0x581   :  { %11267 = vst [vmem:[#allocation4 + $0x8] sm:$0xff] %v11123_v15  ;;  %11269 = vst [vmem:[#allocation4 + $0x18] sm:$0xff] %v11125_v19  ;;  %v10939_v43 = vmul.f32 %v19681_v28, %v10372_v54  ;;  %v10376_v18 = vadd.f32 %v10375_v4, %v18929_v55  ;;  %v10489_v24 = vadd.f32 %v10488_v5, %v19308_v36 }
 0x582   :  { %v10941_v21 = vmul.f32 %v19684_v48, %v10485_v1  ;;  %v11131_v56 = vadd.f32 %v19671_v61, %v10938_v29  ;;  %v11133_v42 = vadd.f32 %v19675_v31, %v10940_v12  ;;  %v10377_v57 = vpop.f32.mrf.mxu0  ;;  %v10490_v51 = vpop.f32.mrf.mxu1 }
 0x583   :  { %v11132_v30 = vadd.f32 %v19688_v2, %v10939_v43  ;;  %v10947_v39 = vmul.f32 %v19663_v26, %v10376_v18  ;;  %v10949_v38 = vmul.f32 %v19667_v13, %v10489_v24  ;;  %v10378_v55 = vadd.f32 %v10377_v57, %v18934_v9 }
 0x584   :  { %v11134_v25 = vadd.f32 %v19691_v59, %v10941_v21  ;;  %11275 = vst [vmem:[#allocation4 + $0x48] sm:$0xff] %v11131_v56  ;;  %11277 = vst [vmem:[#allocation4 + $0x58] sm:$0xff] %v11133_v42  ;;  %v10491_v36 = vadd.f32 %v10490_v51, %v19316_v35  ;;  %v10379_v34 = vpop.f32.mrf.mxu0  ;;  %v10492_v32 = vpop.f32.mrf.mxu1 }
 0x585   :  { %11276 = vst [vmem:[#allocation4 + $0x50] sm:$0xff] %v11132_v30  ;;  %v11140_v15 = vadd.f32 %v19671_v61, %v10947_v39  ;;  %v11142_v19 = vadd.f32 %v19675_v31, %v10949_v38  ;;  %v10380_v54 = vadd.f32 %v10379_v34, %v18940_v6  ;;  %v10493_v1 = vadd.f32 %v10492_v32, %v19326_v11 }
 0x586   :  { %11278 = vst [vmem:[#allocation4 + $0x60] sm:$0xff] %v11134_v25  ;;  %v10948_v29 = vmul.f32 %v19681_v28, %v10378_v55  ;;  %v10950_v12 = vmul.f32 %v19684_v48, %v10491_v36  ;;  %v10381_v4 = vpop.f32.mrf.mxu0  ;;  %v10494_v9 = vpop.f32.mrf.mxu1 }
 0x587   :  { %11284 = vst [vmem:[#allocation4 + $0x90] sm:$0xff] %v11140_v15  ;;  %11286 = vst [vmem:[#allocation4 + $0xa0] sm:$0xff] %v11142_v19  ;;  %v10956_v35 = vmul.f32 %v19663_v26, %v10380_v54  ;;  %v10958_v5 = vmul.f32 %v19667_v13, %v10493_v1  ;;  %v10382_v43 = vadd.f32 %v10381_v4, %v18945_v23 }
 0x588   :  { %v10495_v21 = vadd.f32 %v10494_v9, %v19330_v44  ;;  %v11141_v6 = vadd.f32 %v19688_v2, %v10948_v29  ;;  %v11143_v11 = vadd.f32 %v19691_v59, %v10950_v12 }
 0x589   :  { %v11149_v18 = vadd.f32 %v19671_v61, %v10956_v35  ;;  %v11151_v24 = vadd.f32 %v19675_v31, %v10958_v5  ;;  %v10957_v56 = vmul.f32 %v19681_v28, %v10382_v43  ;;  %v10385_v57 = vpop.f32.mrf.mxu0  ;;  %v10498_v51 = vpop.f32.mrf.mxu1 }
 0x58a   :  { %v10959_v42 = vmul.f32 %v19684_v48, %v10495_v21  ;;  %11285 = vst [vmem:[#allocation4 + $0x98] sm:$0xff] %v11141_v6  ;;  %11287 = vst [vmem:[#allocation4 + $0xa8] sm:$0xff] %v11143_v11  ;;  %v10386_v23 = vadd.f32 %v10385_v57, %v18951_v53  ;;  %v10499_v44 = vadd.f32 %v10498_v51, %v19334_v27 }
 0x58b   :  { %11293 = vst [vmem:[#allocation4 + $0xd8] sm:$0xff] %v11149_v18  ;;  %11295 = vst [vmem:[#allocation4 + $0xe8] sm:$0xff] %v11151_v24  ;;  %v11150_v30 = vadd.f32 %v19688_v2, %v10957_v56  ;;  %v10387_v39 = vpop.f32.mrf.mxu0  ;;  %v10500_v38 = vpop.f32.mrf.mxu1 }
 0x58c   :  { %v11152_v25 = vadd.f32 %v19691_v59, %v10959_v42  ;;  %v10965_v55 = vmul.f32 %v19663_v26, %v10386_v23  ;;  %v10967_v36 = vmul.f32 %v19667_v13, %v10499_v44  ;;  %v10388_v34 = vadd.f32 %v10387_v39, %v18964_v17 }
 0x58d   :  { %v10501_v32 = vadd.f32 %v10500_v38, %v19341_v41  ;;  %11294 = vst [vmem:[#allocation4 + $0xe0] sm:$0xff] %v11150_v30  ;;  %v10389_v53 = vpop.f32.mrf.mxu0  ;;  %v10502_v27 = vpop.f32.mrf.mxu1 }
 0x58e   :  { %11296 = vst [vmem:[#allocation4 + $0xf0] sm:$0xff] %v11152_v25  ;;  %v11158_v15 = vadd.f32 %v19671_v61, %v10965_v55  ;;  %v11160_v19 = vadd.f32 %v19675_v31, %v10967_v36  ;;  %v10966_v54 = vmul.f32 %v19681_v28, %v10388_v34  ;;  %v10390_v29 = vadd.f32 %v10389_v53, %v18980_v16  ;;  %v20492_v55 = vld [vmem:[#allocation32_spill] sm:$0xff] }
 0x58f   :  { %v10968_v1 = vmul.f32 %v19684_v48, %v10501_v32  ;;  %v10503_v12 = vadd.f32 %v10502_v27, %v19351_v63  ;;  %v10391_v4 = vpop.f32.mrf.mxu0  ;;  %v10504_v17 = vpop.f32.mrf.mxu1 }
 0x590   :  { %11302 = vst [vmem:[#allocation4 + $0x120] sm:$0xff] %v11158_v15  ;;  %11304 = vst [vmem:[#allocation4 + $0x130] sm:$0xff] %v11160_v19  ;;  %v11159_v41 = vadd.f32 %v19688_v2, %v10966_v54  ;;  %v10392_v35 = vadd.f32 %v10391_v4, %v18993_v47  ;;  %v10505_v5 = vadd.f32 %v10504_v17, %v19358_v3  ;;  %v20493_v19 = vld [vmem:[#allocation53_spill] sm:$0xff] }
 0x591   :  { %v11161_v9 = vadd.f32 %v19691_v59, %v10968_v1  ;;  %v10974_v43 = vmul.f32 %v19663_v26, %v10390_v29  ;;  %v10976_v21 = vmul.f32 %v19667_v13, %v10503_v12  ;;  %v10395_v6 = vpop.f32.mrf.mxu0 }
 0x592   :  { %v10508_v16 = vpop.f32.mrf.mxu1  ;;  %11303 = vst [vmem:[#allocation4 + $0x128] sm:$0xff] %v11159_v41  ;;  %v10975_v63 = vmul.f32 %v19681_v28, %v10392_v35  ;;  %v10977_v11 = vmul.f32 %v19684_v48, %v10505_v5  ;;  %v10396_v18 = vadd.f32 %v10395_v6, %v19005_v0 }
 0x593   :  { %11305 = vst [vmem:[#allocation4 + $0x138] sm:$0xff] %v11161_v9  ;;  %v10509_v24 = vadd.f32 %v10508_v16, %v19364_v8  ;;  %v11167_v47 = vadd.f32 %v19671_v61, %v10974_v43  ;;  %v11169_v3 = vadd.f32 %v19675_v31, %v10976_v21  ;;  %v10397_v56 = vpop.f32.mrf.mxu0 }
 0x594   :  { %v10510_v42 = vpop.f32.mrf.mxu1  ;;  %v11168_v57 = vadd.f32 %v19688_v2, %v10975_v63  ;;  %v11170_v51 = vadd.f32 %v19691_v59, %v10977_v11  ;;  %v10983_v23 = vmul.f32 %v19663_v26, %v10396_v18  ;;  %v10398_v0 = vadd.f32 %v10397_v56, %v19018_v58 }
 0x595   :  { %v10985_v44 = vmul.f32 %v19667_v13, %v10509_v24  ;;  %11311 = vst [vmem:[#allocation4 + $0x168] sm:$0xff] %v11167_v47  ;;  %11313 = vst [vmem:[#allocation4 + $0x178] sm:$0xff] %v11169_v3  ;;  %v10511_v8 = vadd.f32 %v10510_v42, %v19371_v22  ;;  %v10399_v30 = vpop.f32.mrf.mxu0 }
 0x596   :  { %v10512_v25 = vpop.f32.mrf.mxu1  ;;  %11312 = vst [vmem:[#allocation4 + $0x170] sm:$0xff] %v11168_v57  ;;  %11314 = vst [vmem:[#allocation4 + $0x180] sm:$0xff] %v11170_v51  ;;  %v11176_v39 = vadd.f32 %v19671_v61, %v10983_v23  ;;  %v10400_v36 = vadd.f32 %v10399_v30, %v20492_v55  ;;  %v10984_v32 = vmul.f32 %v19681_v28, %v10398_v0  ;;  %v20494_v30 = vld [vmem:[#allocation30_spill] sm:$0xff] }
 0x597   :  { %v11178_v38 = vadd.f32 %v19675_v31, %v10985_v44  ;;  %v10513_v34 = vadd.f32 %v10512_v25, %v19383_v62  ;;  %v10986_v53 = vmul.f32 %v19684_v48, %v10511_v8  ;;  %v10401_v27 = vpop.f32.mrf.mxu0 }
 0x598   :  { %v10514_v58 = vpop.f32.mrf.mxu1  ;;  %11320 = vst [vmem:[#allocation4 + $0x1b0] sm:$0xff] %v11176_v39  ;;  %v10992_v22 = vmul.f32 %v19663_v26, %v10400_v36  ;;  %v10402_v54 = vadd.f32 %v10401_v27, %v20493_v19  ;;  %v11177_v29 = vadd.f32 %v19688_v2, %v10984_v32  ;;  %v20495_v36 = vld [vmem:[#allocation21_spill] sm:$0xff]  ;;  %v20496_v32 = vld [vmem:[#allocation50_spill] sm:$0xff] }
 0x599   :  { %11322 = vst [vmem:[#allocation4 + $0x1c0] sm:$0xff] %v11178_v38  ;;  %v10994_v15 = vmul.f32 %v19667_v13, %v10513_v34  ;;  %v10515_v1 = vadd.f32 %v10514_v58, %v19390_v52  ;;  %v11179_v62 = vadd.f32 %v19691_v59, %v10986_v53  ;;  %v10405_v12 = vpop.f32.mrf.mxu0 }
 0x59a   :  { %v10518_v4 = vpop.f32.mrf.mxu1  ;;  %v11185_v17 = vadd.f32 %v19671_v61, %v10992_v22  ;;  %v10993_v9 = vmul.f32 %v19681_v28, %v10402_v54  ;;  %11321 = vst [vmem:[#allocation4 + $0x1b8] sm:$0xff] %v11177_v29  ;;  %v10406_v5 = vadd.f32 %v10405_v12, %v19059_v49  ;;  %v20497_v54 = vld [vmem:[#allocation23_spill] sm:$0xff]  ;;  %v20498_v29 = vld [vmem:[#allocation68_spill] sm:$0xff] }
 0x59b   :  { %v11187_v41 = vadd.f32 %v19675_v31, %v10994_v15  ;;  %v10995_v35 = vmul.f32 %v19684_v48, %v10515_v1  ;;  %11323 = vst [vmem:[#allocation4 + $0x1c8] sm:$0xff] %v11179_v62  ;;  %v10519_v52 = vadd.f32 %v10518_v4, %v19396_v14  ;;  %v10407_v43 = vpop.f32.mrf.mxu0 }
 0x59c   :  { %v10520_v21 = vpop.f32.mrf.mxu1  ;;  %11329 = vst [vmem:[#allocation4 + $0x1f8] sm:$0xff] %v11185_v17  ;;  %v11186_v6 = vadd.f32 %v19688_v2, %v10993_v9  ;;  %v10408_v63 = vadd.f32 %v10407_v43, %v19066_v50  ;;  %v11001_v18 = vmul.f32 %v19663_v26, %v10406_v5  ;;  %v20499_v43 = vld [vmem:[#allocation33_spill] sm:$0xff] }
 0x59d   :  { %11331 = vst [vmem:[#allocation4 + $0x208] sm:$0xff] %v11187_v41  ;;  %v11188_v16 = vadd.f32 %v19691_v59, %v10995_v35  ;;  %v10521_v11 = vadd.f32 %v10520_v21, %v19403_v33  ;;  %v11003_v24 = vmul.f32 %v19667_v13, %v10519_v52  ;;  %v10409_v47 = vpop.f32.mrf.mxu0 }
 0x59e   :  { %v10522_v49 = vpop.f32.mrf.mxu1  ;;  %11330 = vst [vmem:[#allocation4 + $0x200] sm:$0xff] %v11186_v6  ;;  %v11002_v14 = vmul.f32 %v19681_v28, %v10408_v63  ;;  %v10410_v56 = vadd.f32 %v10409_v47, %v19088_v10  ;;  %v11194_v50 = vadd.f32 %v19671_v61, %v11001_v18  ;;  %v20500_v6 = vld [vmem:[#allocation67_spill] sm:$0xff]  ;;  %v20501_v47 = vld [vmem:[#allocation54_spill] sm:$0xff] }
 0x59f   :  { %11332 = vst [vmem:[#allocation4 + $0x210] sm:$0xff] %v11188_v16  ;;  %v11004_v3 = vmul.f32 %v19684_v48, %v10521_v11  ;;  %v10523_v42 = vadd.f32 %v10522_v49, %v19415_v45  ;;  %v11196_v33 = vadd.f32 %v19675_v31, %v11003_v24  ;;  %v10411_v57 = vpop.f32.mrf.mxu0 }
 0x5a0   :  { %v10524_v51 = vpop.f32.mrf.mxu1  ;;  %v11195_v23 = vadd.f32 %v19688_v2, %v11002_v14  ;;  %v11010_v0 = vmul.f32 %v19663_v26, %v10410_v56  ;;  %11338 = vst [vmem:[#allocation4 + $0x240] sm:$0xff] %v11194_v50  ;;  %v10412_v10 = vadd.f32 %v10411_v57, %v19095_v40  ;;  %v20502_v14 = vld [vmem:[#allocation16_spill] sm:$0xff] }
 0x5a1   :  { %v11197_v44 = vadd.f32 %v19691_v59, %v11004_v3  ;;  %v11012_v8 = vmul.f32 %v19667_v13, %v10523_v42  ;;  %11340 = vst [vmem:[#allocation4 + $0x250] sm:$0xff] %v11196_v33  ;;  %v10525_v45 = vadd.f32 %v10524_v51, %v20494_v30 }
 0x5a2   :  { %v10415_v25 = vpop.f32.mrf.mxu0  ;;  %v10528_v39 = vpop.f32.mrf.mxu1  ;;  %11339 = vst [vmem:[#allocation4 + $0x248] sm:$0xff] %v11195_v23  ;;  %v11203_v38 = vadd.f32 %v19671_v61, %v11010_v0  ;;  %v11011_v27 = vmul.f32 %v19681_v28, %v10412_v10  ;;  %v20503_v23 = vld [vmem:[#allocation38_spill] sm:$0xff]  ;;  %v20504_v0 = vld [vmem:[#allocation35_spill] sm:$0xff] }
 0x5a3   :  { %11341 = vst [vmem:[#allocation4 + $0x258] sm:$0xff] %v11197_v44  ;;  %v11205_v55 = vadd.f32 %v19675_v31, %v11012_v8  ;;  %v10416_v34 = vadd.f32 %v10415_v25, %v20495_v36  ;;  %v10529_v53 = vadd.f32 %v10528_v39, %v20496_v32  ;;  %v11013_v58 = vmul.f32 %v19684_v48, %v10525_v45 }
 0x5a4   :  { %v10417_v22 = vpop.f32.mrf.mxu0  ;;  %v10530_v40 = vpop.f32.mrf.mxu1  ;;  %11347 = vst [vmem:[#allocation4 + $0x288] sm:$0xff] %v11203_v38  ;;  %v11204_v12 = vadd.f32 %v19688_v2, %v11011_v27 }
 0x5a5   :  { %11349 = vst [vmem:[#allocation4 + $0x298] sm:$0xff] %v11205_v55  ;;  %v11019_v15 = vmul.f32 %v19663_v26, %v10416_v34  ;;  %v11021_v19 = vmul.f32 %v19667_v13, %v10529_v53  ;;  %v10418_v1 = vadd.f32 %v10417_v22, %v20497_v54  ;;  %v10531_v62 = vadd.f32 %v10530_v40, %v20498_v29  ;;  %v20505_v34 = vld [vmem:[#allocation37_spill] sm:$0xff]  ;;  %v20506_v53 = vld [vmem:[#allocation36_spill] sm:$0xff] }
 0x5a6   :  { %v11206_v4 = vadd.f32 %v19691_v59, %v11013_v58  ;;  %v10419_v17 = vpop.f32.mrf.mxu0  ;;  %v10532_v41 = vpop.f32.mrf.mxu1  ;;  %11348 = vst [vmem:[#allocation4 + $0x290] sm:$0xff] %v11204_v12 }
 0x5a7   :  { %v11212_v9 = vadd.f32 %v19671_v61, %v11019_v15  ;;  %v11214_v35 = vadd.f32 %v19675_v31, %v11021_v19  ;;  %v11020_v5 = vmul.f32 %v19681_v28, %v10418_v1  ;;  %v11022_v52 = vmul.f32 %v19684_v48, %v10531_v62  ;;  %v20507_v19 = vld [vmem:[#allocation55_spill] sm:$0xff] }
 0x5a8   :  { %11350 = vst [vmem:[#allocation4 + $0x2a0] sm:$0xff] %v11206_v4  ;;  %v10420_v21 = vadd.f32 %v10419_v17, %v20499_v43  ;;  %v10533_v16 = vadd.f32 %v10532_v41, %v20500_v6  ;;  %v10421_v63 = vpop.f32.mrf.mxu0  ;;  %v10534_v11 = vpop.f32.mrf.mxu1  ;;  %v20508_v1 = vld [vmem:[#allocation7_spill] sm:$0xff]  ;;  %v10902_v41 = vsub.s32 4, %v20489_v60 }
 0x5a9   :  { %11356 = vst [vmem:[#allocation4 + $0x2d0] sm:$0xff] %v11212_v9  ;;  %11358 = vst [vmem:[#allocation4 + $0x2e0] sm:$0xff] %v11214_v35  ;;  %v11213_v18 = vadd.f32 %v19688_v2, %v11020_v5  ;;  %v11215_v24 = vadd.f32 %v19691_v59, %v11022_v52  ;;  %v10422_v49 = vadd.f32 %v10421_v63, %v20501_v47  ;;  %v10910_v9 = vsub.s32 6, %v20489_v60  ;;  %v20509_v52 = vld [vmem:[#allocation57_spill] sm:$0xff] }
 0x5aa   :  { %v10535_v3 = vadd.f32 %v10534_v11, %v20502_v14  ;;  %v11028_v56 = vmul.f32 %v19663_v26, %v10420_v21  ;;  %v11030_v42 = vmul.f32 %v19667_v13, %v10533_v16  ;;  %v10425_v50 = vpop.f32.mrf.mxu0  ;;  %v10538_v33 = vpop.f32.mrf.mxu1  ;;  %v20510_v21 = vld [vmem:[#allocation12_spill] sm:$0xff] }
 0x5ab   :  { %11357 = vst [vmem:[#allocation4 + $0x2d8] sm:$0xff] %v11213_v18  ;;  %11359 = vst [vmem:[#allocation4 + $0x2e8] sm:$0xff] %v11215_v24  ;;  %v11029_v57 = vmul.f32 %v19681_v28, %v10422_v49  ;;  %v10426_v44 = vadd.f32 %v10425_v50, %v20503_v23  ;;  %v10539_v8 = vadd.f32 %v10538_v33, %v20504_v0 }
 0x5ac   :  { %v11031_v51 = vmul.f32 %v19684_v48, %v10535_v3  ;;  %v11221_v10 = vadd.f32 %v19671_v61, %v11028_v56  ;;  %v11223_v30 = vadd.f32 %v19675_v31, %v11030_v42  ;;  %v10427_v45 = vpop.f32.mrf.mxu0  ;;  %v10540_v25 = vpop.f32.mrf.mxu1  ;;  %v20511_v3 = vld [vmem:[#allocation40_spill] sm:$0xff]  ;;  %v20512_v42 = vld [vmem:[#allocation13_spill] sm:$0xff]  ;;  %v19865_v23 = vrot.slane %v19651_v46, %v10910_v9 }
 0x5ad   :  { %v11222_v39 = vadd.f32 %v19688_v2, %v11029_v57  ;;  %v11037_v55 = vmul.f32 %v19663_v26, %v10426_v44  ;;  %v11039_v36 = vmul.f32 %v19667_v13, %v10539_v8  ;;  %v10428_v32 = vadd.f32 %v10427_v45, %v20505_v34  ;;  %v20513_v8 = vld [vmem:[#allocation39_spill] sm:$0xff] }
 0x5ae   :  { %v11224_v38 = vadd.f32 %v19691_v59, %v11031_v51  ;;  %11365 = vst [vmem:[#allocation4 + $0x318] sm:$0xff] %v11221_v10  ;;  %11367 = vst [vmem:[#allocation4 + $0x328] sm:$0xff] %v11223_v30  ;;  %v10541_v27 = vadd.f32 %v10540_v25, %v20506_v53  ;;  %v10429_v58 = vpop.f32.mrf.mxu0  ;;  %v10542_v22 = vpop.f32.mrf.mxu1  ;;  %v19862_v51 = vrot.slane %v19651_v46, %v10902_v41  ;;  %v20514_v30 = vld [vmem:[#allocation8_spill] sm:$0xff]  ;;  %v10914_v34 = vsub.s32 7, %v20489_v60 }
 0x5af   :  { %11366 = vst [vmem:[#allocation4 + $0x320] sm:$0xff] %v11222_v39  ;;  %v11230_v40 = vadd.f32 %v19671_v61, %v11037_v55  ;;  %v11232_v15 = vadd.f32 %v19675_v31, %v11039_v36  ;;  %v10430_v54 = vadd.f32 %v10429_v58, %v20507_v19  ;;  %v10543_v29 = vadd.f32 %v10542_v22, %v20508_v1 }
 0x5b0   :  { %11368 = vst [vmem:[#allocation4 + $0x330] sm:$0xff] %v11224_v38  ;;  %v11038_v62 = vmul.f32 %v19681_v28, %v10428_v32  ;;  %v11040_v12 = vmul.f32 %v19684_v48, %v10541_v27  ;;  %v10431_v4 = vpop.f32.mrf.mxu0  ;;  %v10544_v17 = vpop.f32.mrf.mxu1  ;;  %v10906_v36 = vsub.s32 5, %v20489_v60  ;;  %v20515_v27 = vld [vmem:[#allocation41_spill] sm:$0xff]  ;;  %v19882_v1 = vrot.slane %v19656_v7, %v10902_v41 }
 0x5b1   :  { %11374 = vst [vmem:[#allocation4 + $0x360] sm:$0xff] %v11230_v40  ;;  %11376 = vst [vmem:[#allocation4 + $0x370] sm:$0xff] %v11232_v15  ;;  %v11046_v35 = vmul.f32 %v19663_v26, %v10430_v54  ;;  %v11048_v5 = vmul.f32 %v19667_v13, %v10543_v29  ;;  %v10432_v43 = vadd.f32 %v10431_v4, %v20509_v52  ;;  %v20516_v4 = vld [vmem:[#allocation56_spill] sm:$0xff] }
 0x5b2   :  { %v10545_v6 = vadd.f32 %v10544_v17, %v20510_v21  ;;  %v11231_v16 = vadd.f32 %v19688_v2, %v11038_v62  ;;  %v11233_v63 = vadd.f32 %v19691_v59, %v11040_v12  ;;  %v10435_v11 = vpop.f32.mrf.mxu0  ;;  %v10548_v18 = vpop.f32.mrf.mxu1  ;;  %v19885_v60 = vrot.slane %v19656_v7, %v10910_v9  ;;  %v20518_v21 = vld [vmem:[#allocation58_spill] sm:$0xff] }
 0x5b3   :  { %v11239_v24 = vadd.f32 %v19671_v61, %v11046_v35  ;;  %v11241_v47 = vadd.f32 %v19675_v31, %v11048_v5  ;;  %v11047_v49 = vmul.f32 %v19681_v28, %v10432_v43  ;;  %v10436_v56 = vadd.f32 %v10435_v11, %v20511_v3  ;;  %v20517_v35 = vld [vmem:[#allocation15_spill] sm:$0xff] }
 0x5b4   :  { %v11049_v14 = vmul.f32 %v19684_v48, %v10545_v6  ;;  %11375 = vst [vmem:[#allocation4 + $0x368] sm:$0xff] %v11231_v16  ;;  %11377 = vst [vmem:[#allocation4 + $0x378] sm:$0xff] %v11233_v63  ;;  %v10549_v50 = vadd.f32 %v10548_v18, %v20512_v42  ;;  %v10437_v33 = vpop.f32.mrf.mxu0  ;;  %v10550_v57 = vpop.f32.mrf.mxu1  ;;  %v19894_v43 = vrot.slane %v19651_v46, %v10906_v36  ;;  %v20519_v16 = vld [vmem:[#allocation31_spill] sm:$0xff] }
 0x5b5   :  { %11383 = vst [vmem:[#allocation4 + $0x3a8] sm:$0xff] %v11239_v24  ;;  %11385 = vst [vmem:[#allocation4 + $0x3b8] sm:$0xff] %v11241_v47  ;;  %v11240_v44 = vadd.f32 %v19688_v2, %v11047_v49  ;;  %v10438_v10 = vadd.f32 %v10437_v33, %v20513_v8  ;;  %v10551_v45 = vadd.f32 %v10550_v57, %v20514_v30  ;;  %v20522_v8 = vld [vmem:[#allocation22_spill] sm:$0xff]  ;;  %v20523_v30 = vld [vmem:[#allocation71_spill] sm:$0xff] }
 0x5b6   :  { %v11242_v0 = vadd.f32 %v19691_v59, %v11049_v14  ;;  %v11055_v25 = vmul.f32 %v19663_v26, %v10436_v56  ;;  %v11057_v39 = vmul.f32 %v19667_v13, %v10549_v50  ;;  %v10439_v38 = vpop.f32.mrf.mxu0  ;;  %v10552_v55 = vpop.f32.mrf.mxu1  ;;  %v19897_v9 = vrot.slane %v19651_v46, %v10914_v34  ;;  %v20520_v14 = vld [vmem:[#allocation59_spill] sm:$0xff]  ;;  %v20521_v56 = vld [vmem:[#allocation69_spill] sm:$0xff] }
 0x5b7   :  { %11384 = vst [vmem:[#allocation4 + $0x3b0] sm:$0xff] %v11240_v44  ;;  %v11056_v32 = vmul.f32 %v19681_v28, %v10438_v10  ;;  %v11058_v53 = vmul.f32 %v19684_v48, %v10551_v45  ;;  %v10440_v58 = vadd.f32 %v10439_v38, %v20515_v27  ;;  %v10553_v22 = vadd.f32 %v10552_v55, %v19511_v20  ;;  %v20524_v38 = vld [vmem:[#allocation11_spill] sm:$0xff] }
 0x5b8   :  { %11386 = vst [vmem:[#allocation4 + $0x3c0] sm:$0xff] %v11242_v0  ;;  %v11248_v40 = vadd.f32 %v19671_v61, %v11055_v25  ;;  %v11250_v15 = vadd.f32 %v19675_v31, %v11057_v39  ;;  %v10441_v19 = vpop.f32.mrf.mxu0  ;;  %v10554_v54 = vpop.f32.mrf.mxu1  ;;  %v19906_v47 = vrot.slane %v19656_v7, %v10906_v36  ;;  %v19909_v49 = vrot.slane %v19656_v7, %v10914_v34  ;;  %v20525_v36 = vld [vmem:[#allocation72_spill] sm:$0xff] }
 0x5b9   :  { %v11249_v29 = vadd.f32 %v19688_v2, %v11056_v32  ;;  %v11251_v62 = vadd.f32 %v19691_v59, %v11058_v53  ;;  %v11064_v12 = vmul.f32 %v19663_v26, %v10440_v58  ;;  %v11066_v20 = vmul.f32 %v19667_v13, %v10553_v22 }
 0x5ba   :  { %11392 = vst [vmem:[#allocation4 + $0x3f0] sm:$0xff] %v11248_v40  ;;  %11394 = vst [vmem:[#allocation4 + $0x400] sm:$0xff] %v11250_v15  ;;  %v10442_v17 = vadd.f32 %v10441_v19, %v20516_v4  ;;  %v10555_v5 = vadd.f32 %v10554_v54, %v20517_v35  ;;  %v10591_v52 = vpop.f32.mrf.mxu0  ;;  %v10704_v41 = vpop.f32.mrf.mxu1  ;;  %v20526_v15 = vld [vmem:[#allocation42_spill] sm:$0xff] }
 0x5bb   :  { %11393 = vst [vmem:[#allocation4 + $0x3f8] sm:$0xff] %v11249_v29  ;;  %11395 = vst [vmem:[#allocation4 + $0x408] sm:$0xff] %v11251_v62  ;;  %v11257_v26 = vadd.f32 %v19671_v61, %v11064_v12  ;;  %v11259_v13 = vadd.f32 %v19675_v31, %v11066_v20  ;;  %v10592_v6 = vadd.f32 %v10591_v52, %v20518_v21  ;;  %v20527_v54 = vld [vmem:[#allocation74_spill] sm:$0xff] }
 0x5bc   :  { %v10705_v63 = vadd.f32 %v10704_v41, %v20519_v16  ;;  %v11065_v11 = vmul.f32 %v19681_v28, %v10442_v17  ;;  %v11067_v18 = vmul.f32 %v19684_v48, %v10555_v5  ;;  %v10593_v24 = vpop.f32.mrf.mxu0  ;;  %v10706_v46 = vpop.f32.mrf.mxu1  ;;  %v20528_v41 = vld [vmem:[#allocation44_spill] sm:$0xff] }
 0x5bd   :  { %11401 = vst [vmem:[#allocation4 + $0x438] sm:$0xff] %v11257_v26  ;;  %11403 = vst [vmem:[#allocation4 + $0x448] sm:$0xff] %v11259_v13  ;;  %v10933_v61 = vmul.f32 %v19862_v51, %v10592_v6  ;;  %v10594_v3 = vadd.f32 %v10593_v24, %v20520_v14  ;;  %v10707_v28 = vadd.f32 %v10706_v46, %v20521_v56  ;;  %v20529_v13 = vld [vmem:[#allocation75_spill] sm:$0xff] }
 0x5be   :  { %v10935_v31 = vmul.f32 %v19865_v23, %v10705_v63  ;;  %v11258_v48 = vadd.f32 %v19688_v2, %v11065_v11  ;;  %v11260_v42 = vadd.f32 %v19691_v59, %v11067_v18  ;;  %v10595_v50 = vpop.f32.mrf.mxu0  ;;  %v10708_v33 = vpop.f32.mrf.mxu1  ;;  %v20530_v18 = vld [vmem:[#allocation43_spill] sm:$0xff] }
 0x5bf   :  { %v11126_v57 = vadd.f32 %v19882_v1, %v10933_v61  ;;  %v10934_v44 = vmul.f32 %v19894_v43, %v10594_v3  ;;  %v10936_v0 = vmul.f32 %v19897_v9, %v10707_v28  ;;  %v10596_v10 = vadd.f32 %v10595_v50, %v20522_v8  ;;  %v20532_v50 = vld [vmem:[#allocation77_spill] sm:$0xff] }
 0x5c0   :  { %v11128_v7 = vadd.f32 %v19885_v60, %v10935_v31  ;;  %11402 = vst [vmem:[#allocation4 + $0x440] sm:$0xff] %v11258_v48  ;;  %11404 = vst [vmem:[#allocation4 + $0x450] sm:$0xff] %v11260_v42  ;;  %v10709_v45 = vadd.f32 %v10708_v33, %v20523_v30  ;;  %v10597_v25 = vpop.f32.mrf.mxu0  ;;  %v10710_v2 = vpop.f32.mrf.mxu1  ;;  %v20531_v48 = vld [vmem:[#allocation61_spill] sm:$0xff] }
 0x5c1   :  { %11270 = vst [vmem:[#allocation4 + $0x20] sm:$0xff] %v11126_v57  ;;  %v11127_v59 = vadd.f32 %v19906_v47, %v10934_v44  ;;  %v11129_v39 = vadd.f32 %v19909_v49, %v10936_v0  ;;  %v10598_v55 = vadd.f32 %v10597_v25, %v20524_v38  ;;  %v10711_v34 = vadd.f32 %v10710_v2, %v20525_v36  ;;  %v20534_v2 = vld [vmem:[#allocation79_spill] sm:$0xff] }
 0x5c2   :  { %11272 = vst [vmem:[#allocation4 + $0x30] sm:$0xff] %v11128_v7  ;;  %v10942_v32 = vmul.f32 %v19862_v51, %v10596_v10  ;;  %v10944_v53 = vmul.f32 %v19865_v23, %v10709_v45  ;;  %v10601_v27 = vpop.f32.mrf.mxu0  ;;  %v10714_v58 = vpop.f32.mrf.mxu1  ;;  %v20533_v45 = vld [vmem:[#allocation45_spill] sm:$0xff] }
 0x5c3   :  { %11271 = vst [vmem:[#allocation4 + $0x28] sm:$0xff] %v11127_v59  ;;  %11273 = vst [vmem:[#allocation4 + $0x38] sm:$0xff] %v11129_v39  ;;  %v10943_v22 = vmul.f32 %v19894_v43, %v10598_v55  ;;  %v10945_v40 = vmul.f32 %v19897_v9, %v10711_v34  ;;  %v10602_v19 = vadd.f32 %v10601_v27, %v20526_v15  ;;  %v20535_v34 = vld [vmem:[#allocation60_spill] sm:$0xff] }
 0x5c4   :  { %v10715_v29 = vadd.f32 %v10714_v58, %v20527_v54  ;;  %v11135_v62 = vadd.f32 %v19882_v1, %v10942_v32  ;;  %v11137_v12 = vadd.f32 %v19885_v60, %v10944_v53  ;;  %v10603_v20 = vpop.f32.mrf.mxu0  ;;  %v10716_v4 = vpop.f32.mrf.mxu1  ;;  %v20536_v53 = vld [vmem:[#allocation80_spill] sm:$0xff] }
 0x5c5   :  { %v11136_v17 = vadd.f32 %v19906_v47, %v10943_v22  ;;  %v11138_v35 = vadd.f32 %v19909_v49, %v10945_v40  ;;  %v10951_v5 = vmul.f32 %v19862_v51, %v10602_v19  ;;  %v10604_v26 = vadd.f32 %v10603_v20, %v20528_v41 }
 0x5c6   :  { %v10953_v52 = vmul.f32 %v19865_v23, %v10715_v29  ;;  %11279 = vst [vmem:[#allocation4 + $0x68] sm:$0xff] %v11135_v62  ;;  %11281 = vst [vmem:[#allocation4 + $0x78] sm:$0xff] %v11137_v12  ;;  %v10717_v21 = vadd.f32 %v10716_v4, %v20529_v13  ;;  %v10605_v6 = vpop.f32.mrf.mxu0  ;;  %v10718_v16 = vpop.f32.mrf.mxu1  ;;  %v20537_v29 = vld [vmem:[#allocation63_spill] sm:$0xff]  ;;  %v20538_v12 = vld [vmem:[#allocation82_spill] sm:$0xff] }
 0x5c7   :  { %11280 = vst [vmem:[#allocation4 + $0x70] sm:$0xff] %v11136_v17  ;;  %11282 = vst [vmem:[#allocation4 + $0x80] sm:$0xff] %v11138_v35  ;;  %v11144_v63 = vadd.f32 %v19882_v1, %v10951_v5  ;;  %v10606_v24 = vadd.f32 %v10605_v6, %v20530_v18  ;;  %v10719_v46 = vadd.f32 %v10718_v16, %v19554_v37  ;;  %v20540_v16 = vld [vmem:[#allocation83_spill] sm:$0xff] }
 0x5c8   :  { %v11146_v11 = vadd.f32 %v19885_v60, %v10953_v52  ;;  %v10952_v61 = vmul.f32 %v19894_v43, %v10604_v26  ;;  %v10954_v31 = vmul.f32 %v19897_v9, %v10717_v21  ;;  %v10607_v14 = vpop.f32.mrf.mxu0  ;;  %v10720_v3 = vpop.f32.mrf.mxu1  ;;  %v20539_v21 = vld [vmem:[#allocation46_spill] sm:$0xff] }
 0x5c9   :  { %11288 = vst [vmem:[#allocation4 + $0xb0] sm:$0xff] %v11144_v63  ;;  %v10960_v56 = vmul.f32 %v19862_v51, %v10606_v24  ;;  %v10962_v28 = vmul.f32 %v19865_v23, %v10719_v46  ;;  %v10608_v42 = vadd.f32 %v10607_v14, %v20531_v48  ;;  %v10721_v33 = vadd.f32 %v10720_v3, %v20532_v50  ;;  %v20542_v14 = vld [vmem:[#allocation85_spill] sm:$0xff] }
 0x5ca   :  { %11290 = vst [vmem:[#allocation4 + $0xc0] sm:$0xff] %v11146_v11  ;;  %v11145_v57 = vadd.f32 %v19906_v47, %v10952_v61  ;;  %v11147_v37 = vadd.f32 %v19909_v49, %v10954_v31  ;;  %v10611_v7 = vpop.f32.mrf.mxu0  ;;  %v10724_v44 = vpop.f32.mrf.mxu1  ;;  %v20541_v61 = vld [vmem:[#allocation62_spill] sm:$0xff] }
 0x5cb   :  { %v11153_v0 = vadd.f32 %v19882_v1, %v10960_v56  ;;  %v11155_v8 = vadd.f32 %v19885_v60, %v10962_v28  ;;  %v10961_v10 = vmul.f32 %v19894_v43, %v10608_v42  ;;  %v10963_v30 = vmul.f32 %v19897_v9, %v10721_v33 }
 0x5cc   :  { %11289 = vst [vmem:[#allocation4 + $0xb8] sm:$0xff] %v11145_v57  ;;  %11291 = vst [vmem:[#allocation4 + $0xc8] sm:$0xff] %v11147_v37  ;;  %v10612_v25 = vadd.f32 %v10611_v7, %v20533_v45  ;;  %v10725_v59 = vadd.f32 %v10724_v44, %v20534_v2  ;;  %v10613_v39 = vpop.f32.mrf.mxu0  ;;  %v10726_v38 = vpop.f32.mrf.mxu1  ;;  %v20543_v57 = vld [vmem:[#allocation28_spill] sm:$0xff]  ;;  %v20544_v7 = vld [vmem:[#allocation86_spill] sm:$0xff] }
 0x5cd   :  { %11297 = vst [vmem:[#allocation4 + $0xf8] sm:$0xff] %v11153_v0  ;;  %11299 = vst [vmem:[#allocation4 + $0x108] sm:$0xff] %v11155_v8  ;;  %v11154_v55 = vadd.f32 %v19906_v47, %v10961_v10  ;;  %v11156_v36 = vadd.f32 %v19909_v49, %v10963_v30  ;;  %v10614_v32 = vadd.f32 %v10613_v39, %v20535_v34  ;;  %v20545_v39 = vld [vmem:[#allocation26_spill] sm:$0xff] }
 0x5ce   :  { %v10727_v27 = vadd.f32 %v10726_v38, %v20536_v53  ;;  %v10969_v58 = vmul.f32 %v19862_v51, %v10612_v25  ;;  %v10971_v22 = vmul.f32 %v19865_v23, %v10725_v59  ;;  %v10615_v40 = vpop.f32.mrf.mxu0  ;;  %v10728_v15 = vpop.f32.mrf.mxu1 }
 0x5cf   :  { %11298 = vst [vmem:[#allocation4 + $0x100] sm:$0xff] %v11154_v55  ;;  %11300 = vst [vmem:[#allocation4 + $0x110] sm:$0xff] %v11156_v36  ;;  %v10970_v19 = vmul.f32 %v19894_v43, %v10614_v32  ;;  %v10616_v62 = vadd.f32 %v10615_v40, %v20537_v29  ;;  %v10729_v20 = vadd.f32 %v10728_v15, %v20538_v12  ;;  %v20546_v55 = vld [vmem:[#allocation88_spill] sm:$0xff]  ;;  %v20548_v40 = vld [vmem:[#allocation89_spill] sm:$0xff] }
 0x5d0   :  { %v10972_v54 = vmul.f32 %v19897_v9, %v10727_v27  ;;  %v11162_v4 = vadd.f32 %v19882_v1, %v10969_v58  ;;  %v11164_v17 = vadd.f32 %v19885_v60, %v10971_v22  ;;  %v10617_v35 = vpop.f32.mrf.mxu0  ;;  %v10730_v5 = vpop.f32.mrf.mxu1  ;;  %v20547_v58 = vld [vmem:[#allocation48_spill] sm:$0xff] }
 0x5d1   :  { %v11163_v52 = vadd.f32 %v19906_v47, %v10970_v19  ;;  %v10978_v26 = vmul.f32 %v19862_v51, %v10616_v62  ;;  %v10980_v13 = vmul.f32 %v19865_v23, %v10729_v20  ;;  %v10618_v6 = vadd.f32 %v10617_v35, %v20539_v21  ;;  %v20550_v35 = vld [vmem:[#allocation91_spill] sm:$0xff] }
 0x5d2   :  { %v11165_v41 = vadd.f32 %v19909_v49, %v10972_v54  ;;  %11306 = vst [vmem:[#allocation4 + $0x140] sm:$0xff] %v11162_v4  ;;  %11308 = vst [vmem:[#allocation4 + $0x150] sm:$0xff] %v11164_v17  ;;  %v10731_v63 = vadd.f32 %v10730_v5, %v20540_v16  ;;  %v10621_v11 = vpop.f32.mrf.mxu0  ;;  %v10734_v18 = vpop.f32.mrf.mxu1  ;;  %v20549_v4 = vld [vmem:[#allocation47_spill] sm:$0xff] }
 0x5d3   :  { %11307 = vst [vmem:[#allocation4 + $0x148] sm:$0xff] %v11163_v52  ;;  %v11171_v24 = vadd.f32 %v19882_v1, %v10978_v26  ;;  %v11173_v46 = vadd.f32 %v19885_v60, %v10980_v13  ;;  %v10622_v31 = vadd.f32 %v10621_v11, %v20541_v61  ;;  %v10735_v3 = vadd.f32 %v10734_v18, %v20542_v14  ;;  %v20551_v11 = vld [vmem:[#allocation49_spill] sm:$0xff] }
 0x5d4   :  { %11309 = vst [vmem:[#allocation4 + $0x158] sm:$0xff] %v11165_v41  ;;  %v10979_v56 = vmul.f32 %v19894_v43, %v10618_v6  ;;  %v10981_v28 = vmul.f32 %v19897_v9, %v10731_v63  ;;  %v10623_v48 = vpop.f32.mrf.mxu0  ;;  %v10736_v42 = vpop.f32.mrf.mxu1 }
 0x5d5   :  { %11315 = vst [vmem:[#allocation4 + $0x188] sm:$0xff] %v11171_v24  ;;  %11317 = vst [vmem:[#allocation4 + $0x198] sm:$0xff] %v11173_v46  ;;  %v10987_v50 = vmul.f32 %v19862_v51, %v10622_v31  ;;  %v10989_v33 = vmul.f32 %v19865_v23, %v10735_v3  ;;  %v10624_v37 = vadd.f32 %v10623_v48, %v20543_v57  ;;  %v20552_v24 = vld [vmem:[#allocation92_spill] sm:$0xff]  ;;  %v20554_v48 = vld [vmem:[#allocation94_spill] sm:$0xff] }
 0x5d6   :  { %v10737_v44 = vadd.f32 %v10736_v42, %v20544_v7  ;;  %v11172_v0 = vadd.f32 %v19906_v47, %v10979_v56  ;;  %v11174_v8 = vadd.f32 %v19909_v49, %v10981_v28  ;;  %v10625_v10 = vpop.f32.mrf.mxu0  ;;  %v10738_v30 = vpop.f32.mrf.mxu1  ;;  %v20553_v56 = vld [vmem:[#allocation64_spill] sm:$0xff] }
 0x5d7   :  { %v11180_v45 = vadd.f32 %v19882_v1, %v10987_v50  ;;  %v11182_v25 = vadd.f32 %v19885_v60, %v10989_v33  ;;  %v10988_v2 = vmul.f32 %v19894_v43, %v10624_v37  ;;  %v10626_v38 = vadd.f32 %v10625_v10, %v20545_v39  ;;  %v20556_v10 = vld [vmem:[#allocation95_spill] sm:$0xff] }
 0x5d8   :  { %v10990_v59 = vmul.f32 %v19897_v9, %v10737_v44  ;;  %11316 = vst [vmem:[#allocation4 + $0x190] sm:$0xff] %v11172_v0  ;;  %11318 = vst [vmem:[#allocation4 + $0x1a0] sm:$0xff] %v11174_v8  ;;  %v10739_v36 = vadd.f32 %v10738_v30, %v20546_v55  ;;  %v10627_v34 = vpop.f32.mrf.mxu0  ;;  %v10740_v32 = vpop.f32.mrf.mxu1  ;;  %v20555_v0 = vld [vmem:[#allocation29_spill] sm:$0xff] }
 0x5d9   :  { %11324 = vst [vmem:[#allocation4 + $0x1d0] sm:$0xff] %v11180_v45  ;;  %11326 = vst [vmem:[#allocation4 + $0x1e0] sm:$0xff] %v11182_v25  ;;  %v11181_v53 = vadd.f32 %v19906_v47, %v10988_v2  ;;  %v10628_v22 = vadd.f32 %v10627_v34, %v20547_v58  ;;  %v10741_v15 = vadd.f32 %v10740_v32, %v20548_v40  ;;  %v20557_v34 = vld [vmem:[#allocation66_spill] sm:$0xff] }
 0x5da   :  { %v11183_v27 = vadd.f32 %v19909_v49, %v10990_v59  ;;  %v10996_v19 = vmul.f32 %v19862_v51, %v10626_v38  ;;  %v10998_v54 = vmul.f32 %v19865_v23, %v10739_v36  ;;  %v10631_v29 = vpop.f32.mrf.mxu0  ;;  %v10744_v62 = vpop.f32.mrf.mxu1 }
 0x5db   :  { %11325 = vst [vmem:[#allocation4 + $0x1d8] sm:$0xff] %v11181_v53  ;;  %v10997_v12 = vmul.f32 %v19894_v43, %v10628_v22  ;;  %v10999_v20 = vmul.f32 %v19897_v9, %v10741_v15  ;;  %v10632_v17 = vadd.f32 %v10631_v29, %v20549_v4  ;;  %v10745_v5 = vadd.f32 %v10744_v62, %v20550_v35  ;;  %v20558_v53 = vld [vmem:[#allocation97_spill] sm:$0xff]  ;;  %v20560_v29 = vld [vmem:[#allocation98_spill] sm:$0xff] }
 0x5dc   :  { %11327 = vst [vmem:[#allocation4 + $0x1e8] sm:$0xff] %v11183_v27  ;;  %v11189_v52 = vadd.f32 %v19882_v1, %v10996_v19  ;;  %v11191_v41 = vadd.f32 %v19885_v60, %v10998_v54  ;;  %v10633_v26 = vpop.f32.mrf.mxu0  ;;  %v10746_v13 = vpop.f32.mrf.mxu1  ;;  %v20559_v19 = vld [vmem:[#allocation65_spill] sm:$0xff] }
 0x5dd   :  { %v11190_v21 = vadd.f32 %v19906_v47, %v10997_v12  ;;  %v11192_v6 = vadd.f32 %v19909_v49, %v10999_v20  ;;  %v11005_v16 = vmul.f32 %v19862_v51, %v10632_v17  ;;  %v11007_v63 = vmul.f32 %v19865_v23, %v10745_v5 }
 0x5de   :  { %11333 = vst [vmem:[#allocation4 + $0x218] sm:$0xff] %v11189_v52  ;;  %11335 = vst [vmem:[#allocation4 + $0x228] sm:$0xff] %v11191_v41  ;;  %v10634_v18 = vadd.f32 %v10633_v26, %v20551_v11  ;;  %v10747_v46 = vadd.f32 %v10746_v13, %v20552_v24  ;;  %v10635_v61 = vpop.f32.mrf.mxu0  ;;  %v10748_v31 = vpop.f32.mrf.mxu1  ;;  %v20561_v52 = vld [vmem:[#allocation51_spill] sm:$0xff]  ;;  %v20562_v26 = vld [vmem:[#allocation100_spill] sm:$0xff] }
 0x5df   :  { %11334 = vst [vmem:[#allocation4 + $0x220] sm:$0xff] %v11190_v21  ;;  %11336 = vst [vmem:[#allocation4 + $0x230] sm:$0xff] %v11192_v6  ;;  %v11198_v14 = vadd.f32 %v19882_v1, %v11005_v16  ;;  %v11200_v3 = vadd.f32 %v19885_v60, %v11007_v63  ;;  %v10636_v28 = vadd.f32 %v10635_v61, %v20553_v56  ;;  %v20563_v61 = vld [vmem:[#allocation52_spill] sm:$0xff] }
 0x5e0   :  { %v10749_v42 = vadd.f32 %v10748_v31, %v20554_v48  ;;  %v11006_v50 = vmul.f32 %v19894_v43, %v10634_v18  ;;  %v11008_v33 = vmul.f32 %v19897_v9, %v10747_v46  ;;  %v10637_v57 = vpop.f32.mrf.mxu0  ;;  %v10750_v37 = vpop.f32.mrf.mxu1 }
 0x5e1   :  { %11342 = vst [vmem:[#allocation4 + $0x260] sm:$0xff] %v11198_v14  ;;  %11344 = vst [vmem:[#allocation4 + $0x270] sm:$0xff] %v11200_v3  ;;  %v11014_v7 = vmul.f32 %v19862_v51, %v10636_v28  ;;  %v10638_v8 = vadd.f32 %v10637_v57, %v20555_v0  ;;  %v10751_v30 = vadd.f32 %v10750_v37, %v20556_v10  ;;  %v20564_v14 = vld [vmem:[#allocation102_spill] sm:$0xff]  ;;  %v20566_v57 = vld [vmem:[#allocation104_spill] sm:$0xff] }
 0x5e2   :  { %v11016_v44 = vmul.f32 %v19865_v23, %v10749_v42  ;;  %v11199_v45 = vadd.f32 %v19906_v47, %v11006_v50  ;;  %v11201_v25 = vadd.f32 %v19909_v49, %v11008_v33  ;;  %v10641_v2 = vpop.f32.mrf.mxu0  ;;  %v10754_v59 = vpop.f32.mrf.mxu1  ;;  %v20565_v50 = vld [vmem:[#allocation34_spill] sm:$0xff] }
 0x5e3   :  { %v11207_v39 = vadd.f32 %v19882_v1, %v11014_v7  ;;  %v11015_v55 = vmul.f32 %v19894_v43, %v10638_v8  ;;  %v11017_v36 = vmul.f32 %v19897_v9, %v10751_v30  ;;  %v10642_v32 = vadd.f32 %v10641_v2, %v20557_v34  ;;  %v20568_v2 = vld [vmem:[#allocation106_spill] sm:$0xff] }
 0x5e4   :  { %v11209_v38 = vadd.f32 %v19885_v60, %v11016_v44  ;;  %11343 = vst [vmem:[#allocation4 + $0x268] sm:$0xff] %v11199_v45  ;;  %11345 = vst [vmem:[#allocation4 + $0x278] sm:$0xff] %v11201_v25  ;;  %v10755_v27 = vadd.f32 %v10754_v59, %v20558_v53  ;;  %v10643_v58 = vpop.f32.mrf.mxu0  ;;  %v10756_v22 = vpop.f32.mrf.mxu1  ;;  %v20567_v45 = vld [vmem:[#allocation9_spill] sm:$0xff] }
 0x5e5   :  { %11351 = vst [vmem:[#allocation4 + $0x2a8] sm:$0xff] %v11207_v39  ;;  %v11208_v40 = vadd.f32 %v19906_v47, %v11015_v55  ;;  %v11210_v15 = vadd.f32 %v19909_v49, %v11017_v36  ;;  %v10644_v54 = vadd.f32 %v10643_v58, %v20559_v19  ;;  %v10757_v62 = vadd.f32 %v10756_v22, %v20560_v29  ;;  %v20569_v58 = vld [vmem:[#allocation19_spill] sm:$0xff] }
 0x5e6   :  { %11353 = vst [vmem:[#allocation4 + $0x2b8] sm:$0xff] %v11209_v38  ;;  %v11023_v12 = vmul.f32 %v19862_v51, %v10642_v32  ;;  %v11025_v20 = vmul.f32 %v19865_v23, %v10755_v27  ;;  %v10645_v4 = vpop.f32.mrf.mxu0  ;;  %v10758_v17 = vpop.f32.mrf.mxu1 }
 0x5e7   :  { %11352 = vst [vmem:[#allocation4 + $0x2b0] sm:$0xff] %v11208_v40  ;;  %11354 = vst [vmem:[#allocation4 + $0x2c0] sm:$0xff] %v11210_v15  ;;  %v11024_v35 = vmul.f32 %v19894_v43, %v10644_v54  ;;  %v11026_v5 = vmul.f32 %v19897_v9, %v10757_v62  ;;  %v10646_v41 = vadd.f32 %v10645_v4, %v20561_v52  ;;  %v20570_v40 = vld [vmem:[#allocation108_spill] sm:$0xff]  ;;  %v20572_v4 = vld [vmem:[#allocation109_spill] sm:$0xff] }
 0x5e8   :  { %v10759_v13 = vadd.f32 %v10758_v17, %v20562_v26  ;;  %v11216_v21 = vadd.f32 %v19882_v1, %v11023_v12  ;;  %v11218_v6 = vadd.f32 %v19885_v60, %v11025_v20  ;;  %v10647_v16 = vpop.f32.mrf.mxu0  ;;  %v10760_v63 = vpop.f32.mrf.mxu1  ;;  %v20571_v12 = vld [vmem:[#allocation18_spill] sm:$0xff] }
 0x5e9   :  { %v11217_v11 = vadd.f32 %v19906_v47, %v11024_v35  ;;  %v11219_v18 = vadd.f32 %v19909_v49, %v11026_v5  ;;  %v11032_v24 = vmul.f32 %v19862_v51, %v10646_v41  ;;  %v10648_v31 = vadd.f32 %v10647_v16, %v20563_v61  ;;  %v20574_v16 = vld [vmem:[#allocation110_spill] sm:$0xff] }
 0x5ea   :  { %v11034_v46 = vmul.f32 %v19865_v23, %v10759_v13  ;;  %11360 = vst [vmem:[#allocation4 + $0x2f0] sm:$0xff] %v11216_v21  ;;  %11362 = vst [vmem:[#allocation4 + $0x300] sm:$0xff] %v11218_v6  ;;  %v10761_v3 = vadd.f32 %v10760_v63, %v20564_v14  ;;  %v10651_v56 = vpop.f32.mrf.mxu0  ;;  %v10764_v28 = vpop.f32.mrf.mxu1  ;;  %v20573_v21 = vld [vmem:[#allocation20_spill] sm:$0xff] }
 0x5eb   :  { %11361 = vst [vmem:[#allocation4 + $0x2f8] sm:$0xff] %v11217_v11  ;;  %11363 = vst [vmem:[#allocation4 + $0x308] sm:$0xff] %v11219_v18  ;;  %v11225_v48 = vadd.f32 %v19882_v1, %v11032_v24  ;;  %v10652_v33 = vadd.f32 %v10651_v56, %v20565_v50  ;;  %v10765_v37 = vadd.f32 %v10764_v28, %v20566_v57  ;;  %v20575_v56 = vld [vmem:[#allocation10_spill] sm:$0xff] }
 0x5ec   :  { %v11227_v42 = vadd.f32 %v19885_v60, %v11034_v46  ;;  %v11033_v7 = vmul.f32 %v19894_v43, %v10648_v31  ;;  %v11035_v44 = vmul.f32 %v19897_v9, %v10761_v3  ;;  %v10653_v0 = vpop.f32.mrf.mxu0  ;;  %v10766_v8 = vpop.f32.mrf.mxu1 }
 0x5ed   :  { %11369 = vst [vmem:[#allocation4 + $0x338] sm:$0xff] %v11225_v48  ;;  %v11041_v10 = vmul.f32 %v19862_v51, %v10652_v33  ;;  %v11043_v30 = vmul.f32 %v19865_v23, %v10765_v37  ;;  %v10654_v25 = vadd.f32 %v10653_v0, %v20567_v45  ;;  %v10767_v59 = vadd.f32 %v10766_v8, %v20568_v2  ;;  %v20576_v48 = vld [vmem:[#allocation111_spill] sm:$0xff]  ;;  %v20578_v0 = vld [vmem:[#allocation112_spill] sm:$0xff] }
 0x5ee   :  { %11371 = vst [vmem:[#allocation4 + $0x348] sm:$0xff] %v11227_v42  ;;  %v11226_v39 = vadd.f32 %v19906_v47, %v11033_v7  ;;  %v11228_v38 = vadd.f32 %v19909_v49, %v11035_v44  ;;  %v10655_v55 = vpop.f32.mrf.mxu0  ;;  %v10768_v36 = vpop.f32.mrf.mxu1  ;;  %v20577_v7 = vld [vmem:[#allocation25_spill] sm:$0xff] }
 0x5ef   :  { %v11234_v34 = vadd.f32 %v19882_v1, %v11041_v10  ;;  %v11236_v32 = vadd.f32 %v19885_v60, %v11043_v30  ;;  %v11042_v53 = vmul.f32 %v19894_v43, %v10654_v25  ;;  %v11044_v27 = vmul.f32 %v19897_v9, %v10767_v59 }
 0x5f0   :  { %11370 = vst [vmem:[#allocation4 + $0x340] sm:$0xff] %v11226_v39  ;;  %11372 = vst [vmem:[#allocation4 + $0x350] sm:$0xff] %v11228_v38  ;;  %v10656_v22 = vadd.f32 %v10655_v55, %v20569_v58  ;;  %v10769_v15 = vadd.f32 %v10768_v36, %v20570_v40  ;;  %v10657_v19 = vpop.f32.mrf.mxu0  ;;  %v10770_v54 = vpop.f32.mrf.mxu1  ;;  %v20579_v39 = vld [vmem:[#allocation17_spill] sm:$0xff]  ;;  %v20580_v55 = vld [vmem:[#allocation24_spill] sm:$0xff] }
 0x5f1   :  { %11378 = vst [vmem:[#allocation4 + $0x380] sm:$0xff] %v11234_v34  ;;  %11380 = vst [vmem:[#allocation4 + $0x390] sm:$0xff] %v11236_v32  ;;  %v11235_v29 = vadd.f32 %v19906_v47, %v11042_v53  ;;  %v11237_v62 = vadd.f32 %v19909_v49, %v11044_v27  ;;  %v10658_v20 = vadd.f32 %v10657_v19, %v20571_v12 }
 0x5f2   :  { %v10771_v17 = vadd.f32 %v10770_v54, %v20572_v4  ;;  %v11050_v35 = vmul.f32 %v19862_v51, %v10656_v22  ;;  %v11052_v5 = vmul.f32 %v19865_v23, %v10769_v15  ;;  %v10661_v52 = vpop.f32.mrf.mxu0  ;;  %v10774_v41 = vpop.f32.mrf.mxu1  ;;  %v20581_v15 = vld [vmem:[#allocation27_spill] sm:$0xff]  ;;  %v20582_v54 = vld [vmem:[#allocation101_spill] sm:$0xff] }
 0x5f3   :  { %11379 = vst [vmem:[#allocation4 + $0x388] sm:$0xff] %v11235_v29  ;;  %11381 = vst [vmem:[#allocation4 + $0x398] sm:$0xff] %v11237_v62  ;;  %v11051_v26 = vmul.f32 %v19894_v43, %v10658_v20  ;;  %v10662_v6 = vadd.f32 %v10661_v52, %v20573_v21  ;;  %v10775_v63 = vadd.f32 %v10774_v41, %v20574_v16  ;;  %v20584_v52 = vld [vmem:[#allocation103_spill] sm:$0xff] }
 0x5f4   :  { %v11053_v13 = vmul.f32 %v19897_v9, %v10771_v17  ;;  %v11243_v11 = vadd.f32 %v19882_v1, %v11050_v35  ;;  %v11245_v18 = vadd.f32 %v19885_v60, %v11052_v5  ;;  %v10663_v24 = vpop.f32.mrf.mxu0  ;;  %v10776_v46 = vpop.f32.mrf.mxu1  ;;  %v20583_v35 = vld [vmem:[#allocation70_spill] sm:$0xff] }
 0x5f5   :  { %v11244_v61 = vadd.f32 %v19906_v47, %v11051_v26  ;;  %v11059_v14 = vmul.f32 %v19862_v51, %v10662_v6  ;;  %v11061_v3 = vmul.f32 %v19865_v23, %v10775_v63  ;;  %v10664_v28 = vadd.f32 %v10663_v24, %v20575_v56  ;;  %v20585_v24 = vld [vmem:[#allocation73_spill] sm:$0xff] }
 0x5f6   :  { %v11246_v31 = vadd.f32 %v19909_v49, %v11053_v13  ;;  %11387 = vst [vmem:[#allocation4 + $0x3c8] sm:$0xff] %v11243_v11  ;;  %11389 = vst [vmem:[#allocation4 + $0x3d8] sm:$0xff] %v11245_v18  ;;  %v10777_v42 = vadd.f32 %v10776_v46, %v20576_v48  ;;  %v10665_v50 = vpop.f32.mrf.mxu0  ;;  %v10778_v33 = vpop.f32.mrf.mxu1 }
 0x5f7   :  { %11388 = vst [vmem:[#allocation4 + $0x3d0] sm:$0xff] %v11244_v61  ;;  %v11252_v57 = vadd.f32 %v19882_v1, %v11059_v14  ;;  %v11254_v37 = vadd.f32 %v19885_v60, %v11061_v3  ;;  %v10666_v44 = vadd.f32 %v10665_v50, %v20577_v7  ;;  %v10779_v8 = vadd.f32 %v10778_v33, %v20578_v0  ;;  %v20586_v61 = vld [vmem:[#allocation105_spill] sm:$0xff]  ;;  %v20588_v7 = vld [vmem:[#allocation107_spill] sm:$0xff] }
 0x5f8   :  { %11390 = vst [vmem:[#allocation4 + $0x3e0] sm:$0xff] %v11246_v31  ;;  %v11060_v10 = vmul.f32 %v19894_v43, %v10664_v28  ;;  %v11062_v30 = vmul.f32 %v19897_v9, %v10777_v42  ;;  %v10667_v45 = vpop.f32.mrf.mxu0  ;;  %v10780_v25 = vpop.f32.mrf.mxu1 }
 0x5f9   :  { %11396 = vst [vmem:[#allocation4 + $0x410] sm:$0xff] %v11252_v57  ;;  %11398 = vst [vmem:[#allocation4 + $0x420] sm:$0xff] %v11254_v37  ;;  %v11068_v2 = vmul.f32 %v19862_v51, %v10666_v44  ;;  %v11070_v59 = vmul.f32 %v19865_v23, %v10779_v8  ;;  %v10668_v38 = vadd.f32 %v10667_v45, %v20579_v39  ;;  %v20104_v23 = vld [vmem:[%s20176_s12 + $0x8] ss:$0 sm:$0xff]  ;;  %s14455_s12 = smov [#allocation4]  }
 0x5fa   :  { %v10781_v36 = vadd.f32 %v10780_v25, %v20580_v55  ;;  %v11253_v34 = vadd.f32 %v19906_v47, %v11060_v10  ;;  %v11255_v32 = vadd.f32 %v19909_v49, %v11062_v30  ;;  %v10817_v53 = vpop.f32.mrf.mxu0  ;;  %v10865_v27 = vpop.f32.mrf.mxu1  ;;  %v20587_v57 = vld [vmem:[#allocation76_spill] sm:$0xff] }
 0x5fb   :  { %v11261_v58 = vadd.f32 %v19882_v1, %v11068_v2  ;;  %v11263_v22 = vadd.f32 %v19885_v60, %v11070_v59  ;;  %v11069_v40 = vmul.f32 %v19894_v43, %v10668_v38  ;;  %v10818_v19 = vadd.f32 %v10817_v53, %v20581_v15  ;;  %v20113_v43 = vld [vmem:[%s20177_s13 + $0x8] ss:$0 sm:$0xff]  ;;  %v20589_v59 = vld [vmem:[#allocation78_spill] sm:$0xff]  ;;  %s11415_s13 = sshll.u32 %s14455_s12, 4  ;;  %s11416_s13 = int_to_ptr.vmem [resolvable:$true] %s11415_s13 }
 0x5fc   :  { %v11071_v51 = vmul.f32 %v19897_v9, %v10781_v36  ;;  %11397 = vst [vmem:[#allocation4 + $0x418] sm:$0xff] %v11253_v34  ;;  %11399 = vst [vmem:[#allocation4 + $0x428] sm:$0xff] %v11255_v32  ;;  %v10866_v29 = vadd.f32 %v10865_v27, %v20582_v54  ;;  %v10819_v62 = vpop.f32.mrf.mxu0  ;;  %v10867_v12 = vpop.f32.mrf.mxu1  ;;  %v20590_v32 = vld [vmem:[#allocation81_spill] sm:$0xff]  ;;  %s14431_s30 = scalar_lea.vmem %s11416_s13, 18432  ;;  %p14436_p1 = scmp.lt.s32.totalorder %s11416_s13, %s11416_s13 }
 0x5fd   :  { %11405 = vst [vmem:[#allocation4 + $0x458] sm:$0xff] %v11261_v58  ;;  %11407 = vst [vmem:[#allocation4 + $0x468] sm:$0xff] %v11263_v22  ;;  %v11262_v1 = vadd.f32 %v19906_v47, %v11069_v40  ;;  %v10937_v9 = vmul.f32 %v20104_v23, %v10818_v19  ;;  %v20592_v12 = vld [vmem:[#allocation87_spill] sm:$0xff]  ;;  %p14432_p0 = scmp.ne.s32.totalorder %s11416_s13, %s14431_s30  ;;  %p14437_p2 = scmp.lt.s32.totalorder %s14431_s30, %s14431_s30 }
 0x5fe   :  { %v11264_v60 = vadd.f32 %v19909_v49, %v11071_v51  ;;  %v11045_v20 = vmul.f32 %v20104_v23, %v10866_v29  ;;  %v10820_v4 = vpop.f32.mrf.mxu0  ;;  %v10868_v17 = vpop.f32.mrf.mxu1  ;;  %v20591_v51 = vld [vmem:[#allocation84_spill] sm:$0xff] }
 0x5ff   :  { %11406 = vst [vmem:[#allocation4 + $0x460] sm:$0xff] %v11262_v1  ;;  %v10821_v5 = vadd.f32 %v10820_v4, %v20583_v35  ;;  %v10869_v41 = vadd.f32 %v10868_v17, %v20584_v52  ;;  %v11130_v47 = vadd.f32 %v20113_v43, %v10937_v9  ;;  %v20593_v17 = vld [vmem:[#allocation90_spill] sm:$0xff]  ;;  %p14438_p3 = por %p14437_p2, %p14436_p1 }
 0x600   :  { %11408 = vst [vmem:[#allocation4 + $0x470] sm:$0xff] %v11264_v60  ;;  %v11238_v49 = vadd.f32 %v20113_v43, %v11045_v20  ;;  %v10822_v26 = vpop.f32.mrf.mxu0  ;;  %v10870_v13 = vpop.f32.mrf.mxu1 }
 0x601   :  { %v10946_v21 = vmul.f32 %v20104_v23, %v10821_v5  ;;  %v11054_v6 = vmul.f32 %v20104_v23, %v10869_v41  ;;  %11274 = vst [vmem:[#allocation4 + $0x40] sm:$0xff] %v11130_v47  ;;  %p14439_p4 = pnand %p14438_p3, %p14432_p0 }
 0x602   :  { %11382 = vst [vmem:[#allocation4 + $0x3a0] sm:$0xff] %v11238_v49  ;;  %v10825_v16 = vpop.f32.mrf.mxu0  ;;  %v10873_v63 = vpop.f32.mrf.mxu1  ;;  %v20594_v49 = vld [vmem:[#allocation93_spill] sm:$0xff] }
 0x603   :  { %v11139_v11 = vadd.f32 %v20113_v43, %v10946_v21  ;;  %v11247_v18 = vadd.f32 %v20113_v43, %v11054_v6  ;;  %v10826_v46 = vadd.f32 %v10825_v16, %v20585_v24  ;;  %v10874_v31 = vadd.f32 %v10873_v63, %v20586_v61  ;;  %v20595_v63 = vld [vmem:[#allocation96_spill] sm:$0xff] }
 0x604   :  { %v10827_v14 = vpop.f32.mrf.mxu0  ;;  %v10875_v3 = vpop.f32.mrf.mxu1 }
 0x605   :  { %11283 = vst [vmem:[#allocation4 + $0x88] sm:$0xff] %v11139_v11  ;;  %11391 = vst [vmem:[#allocation4 + $0x3e8] sm:$0xff] %v11247_v18  ;;  %v10955_v56 = vmul.f32 %v20104_v23, %v10826_v46  ;;  %v11063_v28 = vmul.f32 %v20104_v23, %v10874_v31  ;;  %v20596_v31 = vld [vmem:[#allocation99_spill] sm:$0xff] }
 0x606   :  { %v10828_v48 = vpop.f32.mrf.mxu0  ;;  %v10876_v42 = vpop.f32.mrf.mxu1 }
 0x607   :  { %v11148_v50 = vadd.f32 %v20113_v43, %v10955_v56  ;;  %v11256_v33 = vadd.f32 %v20113_v43, %v11063_v28  ;;  %v10829_v37 = vadd.f32 %v10828_v48, %v20587_v57  ;;  %v10877_v44 = vadd.f32 %v10876_v42, %v20588_v7 }
 0x608   :  { %v10830_v0 = vpop.f32.mrf.mxu0  ;;  %v10878_v8 = vpop.f32.mrf.mxu1 }
 0x609   :  { %11292 = vst [vmem:[#allocation4 + $0xd0] sm:$0xff] %v11148_v50  ;;  %11400 = vst [vmem:[#allocation4 + $0x430] sm:$0xff] %v11256_v33  ;;  %v10964_v10 = vmul.f32 %v20104_v23, %v10829_v37  ;;  %v11072_v30 = vmul.f32 %v20104_v23, %v10877_v44 }
 0x60a   :  { %v10833_v45 = vpop.f32.mrf.mxu0 }
 0x60b   :  { %v11157_v25 = vadd.f32 %v20113_v43, %v10964_v10  ;;  %v11265_v2 = vadd.f32 %v20113_v43, %v11072_v30  ;;  %v10834_v39 = vadd.f32 %v10833_v45, %v20589_v59 }
 0x60c   :  { %v10835_v38 = vpop.f32.mrf.mxu0 }
 0x60d   :  { %11301 = vst [vmem:[#allocation4 + $0x118] sm:$0xff] %v11157_v25  ;;  %11409 = vst [vmem:[#allocation4 + $0x478] sm:$0xff] %v11265_v2  ;;  %v10973_v55 = vmul.f32 %v20104_v23, %v10834_v39 }
 0x60e   :  { %v10836_v36 = vpop.f32.mrf.mxu0 }
 0x60f   :  { %v11166_v34 = vadd.f32 %v20113_v43, %v10973_v55  ;;  %v10837_v53 = vadd.f32 %v10836_v36, %v20590_v32 }
 0x610   :  { %v10838_v27 = vpop.f32.mrf.mxu0 }
 0x611   :  { %11310 = vst [vmem:[#allocation4 + $0x160] sm:$0xff] %v11166_v34  ;;  %v10982_v58 = vmul.f32 %v20104_v23, %v10837_v53 }
 0x612   :  { %v10841_v22 = vpop.f32.mrf.mxu0 }
 0x613   :  { %v11175_v40 = vadd.f32 %v20113_v43, %v10982_v58  ;;  %v10842_v15 = vadd.f32 %v10841_v22, %v20591_v51 }
 0x614   :  { %v10843_v19 = vpop.f32.mrf.mxu0 }
 0x615   :  { %11319 = vst [vmem:[#allocation4 + $0x1a8] sm:$0xff] %v11175_v40  ;;  %v10991_v54 = vmul.f32 %v20104_v23, %v10842_v15 }
 0x616   :  { %v10844_v29 = vpop.f32.mrf.mxu0 }
 0x617   :  { %v11184_v62 = vadd.f32 %v20113_v43, %v10991_v54  ;;  %v10845_v1 = vadd.f32 %v10844_v29, %v20592_v12 }
 0x618   :  { %v10846_v60 = vpop.f32.mrf.mxu0 }
 0x619   :  { %11328 = vst [vmem:[#allocation4 + $0x1f0] sm:$0xff] %v11184_v62  ;;  %v11000_v9 = vmul.f32 %v20104_v23, %v10845_v1 }
 0x61a   :  { %v10849_v20 = vpop.f32.mrf.mxu0 }
 0x61b   :  { %v11193_v4 = vadd.f32 %v20113_v43, %v11000_v9  ;;  %v10850_v35 = vadd.f32 %v10849_v20, %v20593_v17 }
 0x61c   :  { %v10851_v5 = vpop.f32.mrf.mxu0 }
 0x61d   :  { %11337 = vst [vmem:[#allocation4 + $0x238] sm:$0xff] %v11193_v4  ;;  %v11009_v52 = vmul.f32 %v20104_v23, %v10850_v35 }
 0x61e   :  { %v10852_v41 = vpop.f32.mrf.mxu0 }
 0x61f   :  { %v11202_v47 = vadd.f32 %v20113_v43, %v11009_v52  ;;  %v10853_v26 = vadd.f32 %v10852_v41, %v20594_v49 }
 0x620   :  { %v10854_v13 = vpop.f32.mrf.mxu0 }
 0x621   :  { %11346 = vst [vmem:[#allocation4 + $0x280] sm:$0xff] %v11202_v47  ;;  %v11018_v21 = vmul.f32 %v20104_v23, %v10853_v26 }
 0x622   :  { %v10857_v6 = vpop.f32.mrf.mxu0 }
 0x623   :  { %v11211_v16 = vadd.f32 %v20113_v43, %v11018_v21  ;;  %v10858_v11 = vadd.f32 %v10857_v6, %v20595_v63 }
 0x624   :  { %v10859_v18 = vpop.f32.mrf.mxu0 }
 0x625   :  { %11355 = vst [vmem:[#allocation4 + $0x2c8] sm:$0xff] %v11211_v16  ;;  %v11027_v24 = vmul.f32 %v20104_v23, %v10858_v11 }
 0x626   :  { %v10860_v46 = vpop.f32.mrf.mxu0 }
 0x627   :  { %v11220_v61 = vadd.f32 %v20113_v43, %v11027_v24  ;;  %v10861_v14 = vadd.f32 %v10860_v46, %v20596_v31 }
 0x628   :  { %v10862_v3 = vpop.f32.mrf.mxu0 }
 0x629   :  { %11364 = vst [vmem:[#allocation4 + $0x310] sm:$0xff] %v11220_v61  ;;  %v11036_v56 = vmul.f32 %v20104_v23, %v10861_v14 }
 0x62b   :  { %v11229_v28 = vadd.f32 %v20113_v43, %v11036_v56 }
 0x62d   :  { %11373 = vst [vmem:[#allocation4 + $0x358] sm:$0xff] %v11229_v28 }
 0x62e   :  { %14442 = shalt.err (!%p14439_p4)
}
 0x62f   :  { %s14456_s2 = smov 1152   ;;  %s14457_s5 = smov 72  }
 0x630   :  { %11421 = dma.vmem_to_hbm [thread:$0]  %s11416_s13, 18432, %s20178_s14, [#allocation5], %s14456_s2, %s14456_s2, %s14457_s5  }
 0x631   :  { %14451 = dma.done.wait [#allocation5], 18432  }
 0x632   :  { %14452 = vsyncadd [#allocation5], 4294948864 }
 0x633   :  { %11425 = vsyncpa [#allocation5], 1 }

</bundles_post_ra>
